<compile_context>
chip_gen: v7x
topology: tpu7x:2x2x1
jax: 0.10.0
libtpu: 0.0.40
codegen_flags: <defaults>
</compile_context>

<pallas_src>
import functools

import jax
import jax.numpy as jnp
from jax.experimental import pallas as pl
from jax.experimental.pallas import tpu as pltpu


# ------------------------------ Pallas kernel ------------------------------ #
def _bottleneck_kernel(x_ref, w1_ref, s1_ref, b1_ref,
                       w2_ref, s2_ref, b2_ref,
                       w3_ref, s3_ref, b3_ref,
                       o_ref, y1p_ref, col_ref, *, H, W):
    """Fused Bottleneck forward for one image.

    x_ref  : (1, H*W, Cin)          bf16  (channels-last, flattened spatial)
    w1_ref : (Cin, width)           bf16
    s1/b1  : (1, width)             f32   (inference-BN scale / bias)
    w2_ref : (9*width, width)       bf16  (3x3 taps flattened, (kh,kw,cin)-major)
    s2/b2  : (1, width)             f32
    w3_ref : (width, Cout)          bf16
    s3/b3  : (1, Cout)              f32
    o_ref  : (1, H*W, Cout)         bf16
    y1p_ref: (H+2, W+2, width)      bf16 VMEM scratch (zero-halo for 3x3 taps)
    col_ref: (H*W, 9*width)         bf16 VMEM scratch (im2col tile)
    """
    width = w1_ref.shape[1]
    x2d = x_ref[0]                                          # (H*W, Cin) bf16

    # ---- conv1 (1x1) + bn1 + relu --------------------------------------- #
    y1 = jnp.dot(x2d, w1_ref[...], preferred_element_type=jnp.float32)
    y1 = jnp.maximum(y1 * s1_ref[...] + b1_ref[...], 0.0).astype(jnp.bfloat16)

    # Zero only the halo RING; the interior is fully overwritten every step.
    y1p_ref[0:1, :, :] = jnp.zeros((1, W + 2, width), jnp.bfloat16)
    y1p_ref[H + 1:H + 2, :, :] = jnp.zeros((1, W + 2, width), jnp.bfloat16)
    y1p_ref[1:H + 1, 0:1, :] = jnp.zeros((H, 1, width), jnp.bfloat16)
    y1p_ref[1:H + 1, W + 1:W + 2, :] = jnp.zeros((H, 1, width), jnp.bfloat16)
    y1p_ref[1:H + 1, 1:W + 1, :] = y1.reshape(H, W, width)

    # Build the (H*W, 9*width) im2col tile in VMEM (no HBM traffic).
    for kh in range(3):
        for kw in range(3):
            t = kh * 3 + kw
            col_ref[:, t * width:(t + 1) * width] = (
                y1p_ref[kh:kh + H, kw:kw + W, :].reshape(H * W, width))

    # ---- conv2 (3x3, pad=1) + bn2 + relu : single wide-K matmul ---------- #
    y2 = jnp.dot(col_ref[...], w2_ref[...], preferred_element_type=jnp.float32)
    y2 = jnp.maximum(y2 * s2_ref[...] + b2_ref[...], 0.0).astype(jnp.bfloat16)

    # ---- conv3 (1x1) + bn3 + identity residual + relu -------------------- #
    y3 = jnp.dot(y2, w3_ref[...], preferred_element_type=jnp.float32)
    y3 = y3 * s3_ref[...] + b3_ref[...] + x2d.astype(jnp.float32)
    o_ref[0] = jnp.maximum(y3, 0.0).astype(o_ref.dtype)


# -------------------------------- wrappers ---------------------------------- #
def _bn_fold(gamma, beta, running_mean, running_var, eps=1e-5):
    """Inference-mode BatchNorm -> per-channel (scale, bias), kept in f32."""
    scale = gamma / jnp.sqrt(running_var + eps)
    bias = beta - running_mean * scale
    return scale, bias


def bottleneck_forward_nhwc(x_nhwc, params):
    """Bottleneck forward, NHWC in / NHWC bf16 out (no layout transposes)."""
    N, H, W, Cin = x_nhwc.shape
    width = params["w1"].shape[1]
    cout = params["w3"].shape[1]

    # BN stays a f32 post-matmul scale+bias (do NOT fold into bf16 weights).
    s1, b1 = _bn_fold(*params["bn1"])
    s2, b2 = _bn_fold(*params["bn2"])
    s3, b3 = _bn_fold(*params["bn3"])
    w1 = params["w1"].astype(jnp.bfloat16)                      # (Cin, width)
    w2 = params["w2"].reshape(9 * width, width).astype(jnp.bfloat16)
    w3 = params["w3"].astype(jnp.bfloat16)                      # (width, cout)
    s1 = s1.reshape(1, width).astype(jnp.float32)
    b1 = b1.reshape(1, width).astype(jnp.float32)
    s2 = s2.reshape(1, width).astype(jnp.float32)
    b2 = b2.reshape(1, width).astype(jnp.float32)
    s3 = s3.reshape(1, cout).astype(jnp.float32)
    b3 = b3.reshape(1, cout).astype(jnp.float32)

    x_flat = x_nhwc.reshape(N, H * W, Cin).astype(jnp.bfloat16)

    kernel = functools.partial(_bottleneck_kernel, H=H, W=W)

    flops = 2 * N * H * W * (Cin * width + 9 * width * width + width * cout)
    bytes_accessed = (N * H * W * (Cin + cout) * 2                  # x + out (bf16)
                      + (Cin * width + 9 * width * width + width * cout) * 2
                      + 4 * (4 * width + 2 * cout))                 # f32 scale/bias
    cost = pl.CostEstimate(flops=flops, transcendentals=0,
                           bytes_accessed=bytes_accessed)

    out_flat = pl.pallas_call(
        kernel,
        out_shape=jax.ShapeDtypeStruct((N, H * W, cout), jnp.bfloat16),
        grid=(N,),
        in_specs=[
            pl.BlockSpec((1, H * W, Cin), lambda b: (b, 0, 0)),       # x
            pl.BlockSpec((Cin, width), lambda b: (0, 0)),             # w1 (resident)
            pl.BlockSpec((1, width), lambda b: (0, 0)),               # s1
            pl.BlockSpec((1, width), lambda b: (0, 0)),               # b1
            pl.BlockSpec((9 * width, width), lambda b: (0, 0)),       # w2 (resident)
            pl.BlockSpec((1, width), lambda b: (0, 0)),               # s2
            pl.BlockSpec((1, width), lambda b: (0, 0)),               # b2
            pl.BlockSpec((width, cout), lambda b: (0, 0)),            # w3 (resident)
            pl.BlockSpec((1, cout), lambda b: (0, 0)),                # s3
            pl.BlockSpec((1, cout), lambda b: (0, 0)),                # b3
        ],
        out_specs=pl.BlockSpec((1, H * W, cout), lambda b: (b, 0, 0)),
        scratch_shapes=[
            pltpu.VMEM((H + 2, W + 2, width), jnp.bfloat16),   # zero-halo y1
            pltpu.VMEM((H * W, 9 * width), jnp.bfloat16),      # im2col tile
        ],
        compiler_params=pltpu.CompilerParams(
            dimension_semantics=("parallel",),       # split batch over TCs (v7x)
            vmem_limit_bytes=32 * 1024 * 1024,       # fits every generation
        ),
        cost_estimate=cost,
    )(x_flat, w1, s1, b1, w2, s2, b2, w3, s3, b3)

    return out_flat.reshape(N, H, W, cout)


def bottleneck_forward(x_nchw, params):
    """NCHW adapter matching the PyTorch module interface."""
    # TODO(synk): NHWC-native callers should use bottleneck_forward_nhwc and
    #             skip these two full-tensor HBM transposes.
    x_nhwc = jnp.transpose(x_nchw, (0, 2, 3, 1))
    out_nhwc = bottleneck_forward_nhwc(x_nhwc, params)
    return jnp.transpose(out_nhwc, (0, 3, 1, 2))


# --------------------------- parameter creation ----------------------------- #
def make_params(key, inplanes, planes, base_width=64, groups=1, expansion=4):
    width = int(planes * (base_width / 64.0)) * groups
    cout = planes * expansion
    ks = jax.random.split(key, 6)

    def bn_params(k, c):
        kg, kb, km, kv = jax.random.split(k, 4)
        gamma = jax.random.uniform(kg, (c,), jnp.float32, 0.5, 1.5)
        beta = 0.1 * jax.random.normal(kb, (c,), jnp.float32)
        rmean = 0.05 * jax.random.normal(km, (c,), jnp.float32)
        rvar = jax.random.uniform(kv, (c,), jnp.float32, 0.5, 1.5)
        return gamma, beta, rmean, rvar

    return {
        "w1": 0.1 * jax.random.normal(ks[0], (inplanes, width), jnp.float32),
        "w2": 0.1 * jax.random.normal(ks[1], (3, 3, width, width), jnp.float32),
        "w3": 0.1 * jax.random.normal(ks[2], (width, cout), jnp.float32),
        "bn1": bn_params(ks[3], width),
        "bn2": bn_params(ks[4], width),
        "bn3": bn_params(ks[5], cout),
    }


# ----------------------------- pure-JAX reference --------------------------- #
def _reference(x_nchw, params, eps=1e-5):
    """Module-faithful forward (inference BN).  Conv inputs/weights are cast
    to bf16 with f32 accumulation and BN applied in f32 afterwards -- the
    same precision recipe as the kernel."""
    def bn(y, p):
        g, b, m, v = p
        s = g / jnp.sqrt(v + eps)
        return y * s[None, :, None, None] + (b - m * s)[None, :, None, None]

    def conv(x, w_hwio, pad):
        return jax.lax.conv_general_dilated(
            x.astype(jnp.bfloat16), w_hwio.astype(jnp.bfloat16),
            window_strides=(1, 1), padding=pad,
            dimension_numbers=("NCHW", "HWIO", "NCHW"),
            preferred_element_type=jnp.float32)

    width = params["w1"].shape[1]
    cout = params["w3"].shape[1]
    w1 = params["w1"].reshape(1, 1, -1, width)
    w2 = params["w2"]                               # (3,3,Cin,Cout) = HWIO
    w3 = params["w3"].reshape(1, 1, width, cout)

    out = jax.nn.relu(bn(conv(x_nchw, w1, "VALID"), params["bn1"]))
    out = jax.nn.relu(bn(conv(out, w2, "SAME"), params["bn2"]))
    out = bn(conv(out, w3, "VALID"), params["bn3"])
    out = out + x_nchw.astype(jnp.bfloat16).astype(jnp.float32)   # identity
    return jax.nn.relu(out)


# ---------------------------------- main ------------------------------------ #
if __name__ == "__main__":
    key = jax.random.PRNGKey(0)
    k_x, k_p = jax.random.split(key)

    # Identity shortcut (downsample=None) requires inplanes == planes * 4.
    # width=128 / cout=512 keep all intermediates 128-lane dense.
    inplanes, planes = 512, 128         # width = 128, cout = 512
    N, H, W = 2, 16, 16

    x = jax.random.normal(k_x, (N, inplanes, H, W), jnp.float32)
    params = make_params(k_p, inplanes, planes)

    fwd = jax.jit(bottleneck_forward)
    out = jax.block_until_ready(fwd(x, params))

    ref = _reference(x, params)
    assert out.shape == (N, planes * 4, H, W)
    out_f32 = out.astype(jnp.float32)
    max_err = float(jnp.max(jnp.abs(out_f32 - ref)))
    assert jnp.allclose(out_f32, ref, rtol=2e-2, atol=2e-2), \
        f"mismatch vs reference (max abs err = {max_err})"

    print("KERNEL_OK")
</pallas_src>

<mosaic_0001>
module attributes {stable_mosaic.version = 11 : i64} {
  func.func @_bottleneck_kernel(%arg0: i32, %arg1: memref<1x256x512xbf16, #tpu.memory_space<vmem>>, %arg2: memref<512x128xbf16, #tpu.memory_space<vmem>>, %arg3: memref<1x128xf32, #tpu.memory_space<vmem>>, %arg4: memref<1x128xf32, #tpu.memory_space<vmem>>, %arg5: memref<1152x128xbf16, #tpu.memory_space<vmem>>, %arg6: memref<1x128xf32, #tpu.memory_space<vmem>>, %arg7: memref<1x128xf32, #tpu.memory_space<vmem>>, %arg8: memref<128x512xbf16, #tpu.memory_space<vmem>>, %arg9: memref<1x512xf32, #tpu.memory_space<vmem>>, %arg10: memref<1x512xf32, #tpu.memory_space<vmem>>, %arg11: memref<1x256x512xbf16, #tpu.memory_space<vmem>>, %arg12: memref<18x18x128xbf16, #tpu.memory_space<vmem>>, %arg13: memref<256x1152xbf16, #tpu.memory_space<vmem>>) attributes {dimension_semantics = [#tpu.dimension_semantics<parallel>], iteration_bounds = array<i64: 2>, scalar_prefetch = 0 : i64, scratch_operands = 2 : i64, tpu.core_type = #tpu.core_type<tc>, window_params = [{transform_indices = @transform_0, window_bounds = array<i64: 1, 256, 512>}, {pipeline_mode = #tpu.pipeline_mode<synchronous>, transform_indices = @transform_1, window_bounds = array<i64: 512, 128>}, {pipeline_mode = #tpu.pipeline_mode<synchronous>, transform_indices = @transform_2, window_bounds = array<i64: 1, 128>}, {pipeline_mode = #tpu.pipeline_mode<synchronous>, transform_indices = @transform_3, window_bounds = array<i64: 1, 128>}, {pipeline_mode = #tpu.pipeline_mode<synchronous>, transform_indices = @transform_4, window_bounds = array<i64: 1152, 128>}, {pipeline_mode = #tpu.pipeline_mode<synchronous>, transform_indices = @transform_5, window_bounds = array<i64: 1, 128>}, {pipeline_mode = #tpu.pipeline_mode<synchronous>, transform_indices = @transform_6, window_bounds = array<i64: 1, 128>}, {pipeline_mode = #tpu.pipeline_mode<synchronous>, transform_indices = @transform_7, window_bounds = array<i64: 128, 512>}, {pipeline_mode = #tpu.pipeline_mode<synchronous>, transform_indices = @transform_8, window_bounds = array<i64: 1, 512>}, {pipeline_mode = #tpu.pipeline_mode<synchronous>, transform_indices = @transform_9, window_bounds = array<i64: 1, 512>}, {transform_indices = @transform_10, window_bounds = array<i64: 1, 256, 512>}]} {
    %c0 = arith.constant 0 : index
    %c0_0 = arith.constant 0 : index
    %c0_1 = arith.constant 0 : index
    %0 = vector.load %arg1[%c0, %c0_0, %c0_1] : memref<1x256x512xbf16, #tpu.memory_space<vmem>>, vector<1x256x512xbf16>
    %1 = vector.shape_cast %0 : vector<1x256x512xbf16> to vector<256x512xbf16>
    %c0_2 = arith.constant 0 : index
    %c0_3 = arith.constant 0 : index
    %2 = vector.load %arg2[%c0_2, %c0_3] : memref<512x128xbf16, #tpu.memory_space<vmem>>, vector<512x128xbf16>
    %cst = arith.constant dense<0.000000e+00> : vector<256x128xf32>
    %3 = tpu.matmul %1, %2, %cst {dimension_numbers = #tpu.dot_dimension_numbers<[1], [0], [0], [1], [0, 0, 1, 1], [], []>} : vector<256x512xbf16>, vector<512x128xbf16>, vector<256x128xf32> -> vector<256x128xf32>
    %c0_4 = arith.constant 0 : index
    %c0_5 = arith.constant 0 : index
    %4 = vector.load %arg3[%c0_4, %c0_5] : memref<1x128xf32, #tpu.memory_space<vmem>>, vector<1x128xf32>
    %5 = vector.broadcast %4 : vector<1x128xf32> to vector<256x128xf32>
    %6 = arith.mulf %3, %5 : vector<256x128xf32>
    %c0_6 = arith.constant 0 : index
    %c0_7 = arith.constant 0 : index
    %7 = vector.load %arg4[%c0_6, %c0_7] : memref<1x128xf32, #tpu.memory_space<vmem>>, vector<1x128xf32>
    %8 = vector.broadcast %7 : vector<1x128xf32> to vector<256x128xf32>
    %9 = arith.addf %6, %8 : vector<256x128xf32>
    %cst_8 = arith.constant 0.000000e+00 : f32
    %10 = vector.broadcast %cst_8 : f32 to vector<256x128xf32>
    %11 = arith.maximumf %9, %10 : vector<256x128xf32>
    %12 = arith.truncf %11 : vector<256x128xf32> to vector<256x128xbf16>
    %cst_9 = arith.constant 0.000000e+00 : bf16
    %13 = vector.broadcast %cst_9 : bf16 to vector<1x18x128xbf16>
    %c0_10 = arith.constant 0 : index
    %c0_11 = arith.constant 0 : index
    %c0_12 = arith.constant 0 : index
    %14 = vector.load %arg12[%c0_10, %c0_11, %c0_12] : memref<18x18x128xbf16, #tpu.memory_space<vmem>>, vector<1x18x128xbf16>
    tpu.vector_store %arg12[%c0_10, %c0_11, %c0_12], %13 {strides = array<i32>} : memref<18x18x128xbf16, #tpu.memory_space<vmem>>, vector<1x18x128xbf16>,
    %cst_13 = arith.constant 0.000000e+00 : bf16
    %15 = vector.broadcast %cst_13 : bf16 to vector<1x18x128xbf16>
    %c17 = arith.constant 17 : index
    %c0_14 = arith.constant 0 : index
    %c0_15 = arith.constant 0 : index
    %16 = vector.load %arg12[%c17, %c0_14, %c0_15] : memref<18x18x128xbf16, #tpu.memory_space<vmem>>, vector<1x18x128xbf16>
    tpu.vector_store %arg12[%c17, %c0_14, %c0_15], %15 {strides = array<i32>} : memref<18x18x128xbf16, #tpu.memory_space<vmem>>, vector<1x18x128xbf16>,
    %cst_16 = arith.constant 0.000000e+00 : bf16
    %17 = vector.broadcast %cst_16 : bf16 to vector<16x1x128xbf16>
    %c1 = arith.constant 1 : index
    %c0_17 = arith.constant 0 : index
    %c0_18 = arith.constant 0 : index
    %18 = vector.load %arg12[%c1, %c0_17, %c0_18] : memref<18x18x128xbf16, #tpu.memory_space<vmem>>, vector<16x1x128xbf16>
    tpu.vector_store %arg12[%c1, %c0_17, %c0_18], %17 {strides = array<i32>} : memref<18x18x128xbf16, #tpu.memory_space<vmem>>, vector<16x1x128xbf16>,
    %cst_19 = arith.constant 0.000000e+00 : bf16
    %19 = vector.broadcast %cst_19 : bf16 to vector<16x1x128xbf16>
    %c1_20 = arith.constant 1 : index
    %c17_21 = arith.constant 17 : index
    %c0_22 = arith.constant 0 : index
    %20 = vector.load %arg12[%c1_20, %c17_21, %c0_22] : memref<18x18x128xbf16, #tpu.memory_space<vmem>>, vector<16x1x128xbf16>
    tpu.vector_store %arg12[%c1_20, %c17_21, %c0_22], %19 {strides = array<i32>} : memref<18x18x128xbf16, #tpu.memory_space<vmem>>, vector<16x1x128xbf16>,
    %21 = vector.shape_cast %12 : vector<256x128xbf16> to vector<16x16x128xbf16>
    %c1_23 = arith.constant 1 : index
    %c1_24 = arith.constant 1 : index
    %c0_25 = arith.constant 0 : index
    %22 = vector.load %arg12[%c1_23, %c1_24, %c0_25] : memref<18x18x128xbf16, #tpu.memory_space<vmem>>, vector<16x16x128xbf16>
    tpu.vector_store %arg12[%c1_23, %c1_24, %c0_25], %21 {strides = array<i32>} : memref<18x18x128xbf16, #tpu.memory_space<vmem>>, vector<16x16x128xbf16>,
    %c0_26 = arith.constant 0 : index
    %c0_27 = arith.constant 0 : index
    %c0_28 = arith.constant 0 : index
    %23 = vector.load %arg12[%c0_26, %c0_27, %c0_28] : memref<18x18x128xbf16, #tpu.memory_space<vmem>>, vector<16x16x128xbf16>
    %24 = vector.shape_cast %23 : vector<16x16x128xbf16> to vector<256x128xbf16>
    %c0_29 = arith.constant 0 : index
    %c0_30 = arith.constant 0 : index
    %25 = vector.load %arg13[%c0_29, %c0_30] : memref<256x1152xbf16, #tpu.memory_space<vmem>>, vector<256x128xbf16>
    tpu.vector_store %arg13[%c0_29, %c0_30], %24 {strides = array<i32>} : memref<256x1152xbf16, #tpu.memory_space<vmem>>, vector<256x128xbf16>,
    %c0_31 = arith.constant 0 : index
    %c1_32 = arith.constant 1 : index
    %c0_33 = arith.constant 0 : index
    %26 = vector.load %arg12[%c0_31, %c1_32, %c0_33] : memref<18x18x128xbf16, #tpu.memory_space<vmem>>, vector<16x16x128xbf16>
    %27 = vector.shape_cast %26 : vector<16x16x128xbf16> to vector<256x128xbf16>
    %c0_34 = arith.constant 0 : index
    %c128 = arith.constant 128 : index
    %28 = vector.load %arg13[%c0_34, %c128] : memref<256x1152xbf16, #tpu.memory_space<vmem>>, vector<256x128xbf16>
    tpu.vector_store %arg13[%c0_34, %c128], %27 {strides = array<i32>} : memref<256x1152xbf16, #tpu.memory_space<vmem>>, vector<256x128xbf16>,
    %c0_35 = arith.constant 0 : index
    %c2 = arith.constant 2 : index
    %c0_36 = arith.constant 0 : index
    %29 = vector.load %arg12[%c0_35, %c2, %c0_36] : memref<18x18x128xbf16, #tpu.memory_space<vmem>>, vector<16x16x128xbf16>
    %30 = vector.shape_cast %29 : vector<16x16x128xbf16> to vector<256x128xbf16>
    %c0_37 = arith.constant 0 : index
    %c256 = arith.constant 256 : index
    %31 = vector.load %arg13[%c0_37, %c256] : memref<256x1152xbf16, #tpu.memory_space<vmem>>, vector<256x128xbf16>
    tpu.vector_store %arg13[%c0_37, %c256], %30 {strides = array<i32>} : memref<256x1152xbf16, #tpu.memory_space<vmem>>, vector<256x128xbf16>,
    %c1_38 = arith.constant 1 : index
    %c0_39 = arith.constant 0 : index
    %c0_40 = arith.constant 0 : index
    %32 = vector.load %arg12[%c1_38, %c0_39, %c0_40] : memref<18x18x128xbf16, #tpu.memory_space<vmem>>, vector<16x16x128xbf16>
    %33 = vector.shape_cast %32 : vector<16x16x128xbf16> to vector<256x128xbf16>
    %c0_41 = arith.constant 0 : index
    %c384 = arith.constant 384 : index
    %34 = vector.load %arg13[%c0_41, %c384] : memref<256x1152xbf16, #tpu.memory_space<vmem>>, vector<256x128xbf16>
    tpu.vector_store %arg13[%c0_41, %c384], %33 {strides = array<i32>} : memref<256x1152xbf16, #tpu.memory_space<vmem>>, vector<256x128xbf16>,
    %c1_42 = arith.constant 1 : index
    %c1_43 = arith.constant 1 : index
    %c0_44 = arith.constant 0 : index
    %35 = vector.load %arg12[%c1_42, %c1_43, %c0_44] : memref<18x18x128xbf16, #tpu.memory_space<vmem>>, vector<16x16x128xbf16>
    %36 = vector.shape_cast %35 : vector<16x16x128xbf16> to vector<256x128xbf16>
    %c0_45 = arith.constant 0 : index
    %c512 = arith.constant 512 : index
    %37 = vector.load %arg13[%c0_45, %c512] : memref<256x1152xbf16, #tpu.memory_space<vmem>>, vector<256x128xbf16>
    tpu.vector_store %arg13[%c0_45, %c512], %36 {strides = array<i32>} : memref<256x1152xbf16, #tpu.memory_space<vmem>>, vector<256x128xbf16>,
    %c1_46 = arith.constant 1 : index
    %c2_47 = arith.constant 2 : index
    %c0_48 = arith.constant 0 : index
    %38 = vector.load %arg12[%c1_46, %c2_47, %c0_48] : memref<18x18x128xbf16, #tpu.memory_space<vmem>>, vector<16x16x128xbf16>
    %39 = vector.shape_cast %38 : vector<16x16x128xbf16> to vector<256x128xbf16>
    %c0_49 = arith.constant 0 : index
    %c640 = arith.constant 640 : index
    %40 = vector.load %arg13[%c0_49, %c640] : memref<256x1152xbf16, #tpu.memory_space<vmem>>, vector<256x128xbf16>
    tpu.vector_store %arg13[%c0_49, %c640], %39 {strides = array<i32>} : memref<256x1152xbf16, #tpu.memory_space<vmem>>, vector<256x128xbf16>,
    %c2_50 = arith.constant 2 : index
    %c0_51 = arith.constant 0 : index
    %c0_52 = arith.constant 0 : index
    %41 = vector.load %arg12[%c2_50, %c0_51, %c0_52] : memref<18x18x128xbf16, #tpu.memory_space<vmem>>, vector<16x16x128xbf16>
    %42 = vector.shape_cast %41 : vector<16x16x128xbf16> to vector<256x128xbf16>
    %c0_53 = arith.constant 0 : index
    %c768 = arith.constant 768 : index
    %43 = vector.load %arg13[%c0_53, %c768] : memref<256x1152xbf16, #tpu.memory_space<vmem>>, vector<256x128xbf16>
    tpu.vector_store %arg13[%c0_53, %c768], %42 {strides = array<i32>} : memref<256x1152xbf16, #tpu.memory_space<vmem>>, vector<256x128xbf16>,
    %c2_54 = arith.constant 2 : index
    %c1_55 = arith.constant 1 : index
    %c0_56 = arith.constant 0 : index
    %44 = vector.load %arg12[%c2_54, %c1_55, %c0_56] : memref<18x18x128xbf16, #tpu.memory_space<vmem>>, vector<16x16x128xbf16>
    %45 = vector.shape_cast %44 : vector<16x16x128xbf16> to vector<256x128xbf16>
    %c0_57 = arith.constant 0 : index
    %c896 = arith.constant 896 : index
    %46 = vector.load %arg13[%c0_57, %c896] : memref<256x1152xbf16, #tpu.memory_space<vmem>>, vector<256x128xbf16>
    tpu.vector_store %arg13[%c0_57, %c896], %45 {strides = array<i32>} : memref<256x1152xbf16, #tpu.memory_space<vmem>>, vector<256x128xbf16>,
    %c2_58 = arith.constant 2 : index
    %c2_59 = arith.constant 2 : index
    %c0_60 = arith.constant 0 : index
    %47 = vector.load %arg12[%c2_58, %c2_59, %c0_60] : memref<18x18x128xbf16, #tpu.memory_space<vmem>>, vector<16x16x128xbf16>
    %48 = vector.shape_cast %47 : vector<16x16x128xbf16> to vector<256x128xbf16>
    %c0_61 = arith.constant 0 : index
    %c1024 = arith.constant 1024 : index
    %49 = vector.load %arg13[%c0_61, %c1024] : memref<256x1152xbf16, #tpu.memory_space<vmem>>, vector<256x128xbf16>
    tpu.vector_store %arg13[%c0_61, %c1024], %48 {strides = array<i32>} : memref<256x1152xbf16, #tpu.memory_space<vmem>>, vector<256x128xbf16>,
    %c0_62 = arith.constant 0 : index
    %c0_63 = arith.constant 0 : index
    %50 = vector.load %arg13[%c0_62, %c0_63] : memref<256x1152xbf16, #tpu.memory_space<vmem>>, vector<256x1152xbf16>
    %c0_64 = arith.constant 0 : index
    %c0_65 = arith.constant 0 : index
    %51 = vector.load %arg5[%c0_64, %c0_65] : memref<1152x128xbf16, #tpu.memory_space<vmem>>, vector<1152x128xbf16>
    %cst_66 = arith.constant dense<0.000000e+00> : vector<256x128xf32>
    %52 = tpu.matmul %50, %51, %cst_66 {dimension_numbers = #tpu.dot_dimension_numbers<[1], [0], [0], [1], [0, 0, 1, 1], [], []>} : vector<256x1152xbf16>, vector<1152x128xbf16>, vector<256x128xf32> -> vector<256x128xf32>
    %c0_67 = arith.constant 0 : index
    %c0_68 = arith.constant 0 : index
    %53 = vector.load %arg6[%c0_67, %c0_68] : memref<1x128xf32, #tpu.memory_space<vmem>>, vector<1x128xf32>
    %54 = vector.broadcast %53 : vector<1x128xf32> to vector<256x128xf32>
    %55 = arith.mulf %52, %54 : vector<256x128xf32>
    %c0_69 = arith.constant 0 : index
    %c0_70 = arith.constant 0 : index
    %56 = vector.load %arg7[%c0_69, %c0_70] : memref<1x128xf32, #tpu.memory_space<vmem>>, vector<1x128xf32>
    %57 = vector.broadcast %56 : vector<1x128xf32> to vector<256x128xf32>
    %58 = arith.addf %55, %57 : vector<256x128xf32>
    %cst_71 = arith.constant 0.000000e+00 : f32
    %59 = vector.broadcast %cst_71 : f32 to vector<256x128xf32>
    %60 = arith.maximumf %58, %59 : vector<256x128xf32>
    %61 = arith.truncf %60 : vector<256x128xf32> to vector<256x128xbf16>
    %c0_72 = arith.constant 0 : index
    %c0_73 = arith.constant 0 : index
    %62 = vector.load %arg8[%c0_72, %c0_73] : memref<128x512xbf16, #tpu.memory_space<vmem>>, vector<128x512xbf16>
    %cst_74 = arith.constant dense<0.000000e+00> : vector<256x512xf32>
    %63 = tpu.matmul %61, %62, %cst_74 {dimension_numbers = #tpu.dot_dimension_numbers<[1], [0], [0], [1], [0, 0, 1, 1], [], []>} : vector<256x128xbf16>, vector<128x512xbf16>, vector<256x512xf32> -> vector<256x512xf32>
    %c0_75 = arith.constant 0 : index
    %c0_76 = arith.constant 0 : index
    %64 = vector.load %arg9[%c0_75, %c0_76] : memref<1x512xf32, #tpu.memory_space<vmem>>, vector<1x512xf32>
    %65 = vector.broadcast %64 : vector<1x512xf32> to vector<256x512xf32>
    %66 = arith.mulf %63, %65 : vector<256x512xf32>
    %c0_77 = arith.constant 0 : index
    %c0_78 = arith.constant 0 : index
    %67 = vector.load %arg10[%c0_77, %c0_78] : memref<1x512xf32, #tpu.memory_space<vmem>>, vector<1x512xf32>
    %68 = vector.broadcast %67 : vector<1x512xf32> to vector<256x512xf32>
    %69 = arith.addf %66, %68 : vector<256x512xf32>
    %70 = arith.extf %1 : vector<256x512xbf16> to vector<256x512xf32>
    %71 = arith.addf %69, %70 : vector<256x512xf32>
    %cst_79 = arith.constant 0.000000e+00 : f32
    %72 = vector.broadcast %cst_79 : f32 to vector<256x512xf32>
    %73 = arith.maximumf %71, %72 : vector<256x512xf32>
    %74 = arith.truncf %73 : vector<256x512xf32> to vector<256x512xbf16>
    %c0_80 = arith.constant 0 : index
    %c0_81 = arith.constant 0 : index
    %c0_82 = arith.constant 0 : index
    %75 = vector.load %arg11[%c0_80, %c0_81, %c0_82] : memref<1x256x512xbf16, #tpu.memory_space<vmem>>, vector<1x256x512xbf16>
    %76 = vector.shape_cast %75 : vector<1x256x512xbf16> to vector<256x512xbf16>
    %77 = vector.shape_cast %74 : vector<256x512xbf16> to vector<1x256x512xbf16>
    tpu.vector_store %arg11[%c0_80, %c0_81, %c0_82], %77 {strides = array<i32>} : memref<1x256x512xbf16, #tpu.memory_space<vmem>>, vector<1x256x512xbf16>,
    return
  }
  func.func @transform_0(%arg0: i32) -> (i32, i32, i32) {
    %c0_i32 = arith.constant 0 : i32
    %c0_i32_0 = arith.constant 0 : i32
    %c0_i32_1 = arith.constant 0 : i32
    return %arg0, %c0_i32, %c0_i32_0 : i32, i32, i32
  }
  func.func @transform_1(%arg0: i32) -> (i32, i32) {
    %c0_i32 = arith.constant 0 : i32
    %c0_i32_0 = arith.constant 0 : i32
    %c0_i32_1 = arith.constant 0 : i32
    return %c0_i32, %c0_i32_0 : i32, i32
  }
  func.func @transform_2(%arg0: i32) -> (i32, i32) {
    %c0_i32 = arith.constant 0 : i32
    %c0_i32_0 = arith.constant 0 : i32
    %c0_i32_1 = arith.constant 0 : i32
    return %c0_i32, %c0_i32_0 : i32, i32
  }
  func.func @transform_3(%arg0: i32) -> (i32, i32) {
    %c0_i32 = arith.constant 0 : i32
    %c0_i32_0 = arith.constant 0 : i32
    %c0_i32_1 = arith.constant 0 : i32
    return %c0_i32, %c0_i32_0 : i32, i32
  }
  func.func @transform_4(%arg0: i32) -> (i32, i32) {
    %c0_i32 = arith.constant 0 : i32
    %c0_i32_0 = arith.constant 0 : i32
    %c0_i32_1 = arith.constant 0 : i32
    return %c0_i32, %c0_i32_0 : i32, i32
  }
  func.func @transform_5(%arg0: i32) -> (i32, i32) {
    %c0_i32 = arith.constant 0 : i32
    %c0_i32_0 = arith.constant 0 : i32
    %c0_i32_1 = arith.constant 0 : i32
    return %c0_i32, %c0_i32_0 : i32, i32
  }
  func.func @transform_6(%arg0: i32) -> (i32, i32) {
    %c0_i32 = arith.constant 0 : i32
    %c0_i32_0 = arith.constant 0 : i32
    %c0_i32_1 = arith.constant 0 : i32
    return %c0_i32, %c0_i32_0 : i32, i32
  }
  func.func @transform_7(%arg0: i32) -> (i32, i32) {
    %c0_i32 = arith.constant 0 : i32
    %c0_i32_0 = arith.constant 0 : i32
    %c0_i32_1 = arith.constant 0 : i32
    return %c0_i32, %c0_i32_0 : i32, i32
  }
  func.func @transform_8(%arg0: i32) -> (i32, i32) {
    %c0_i32 = arith.constant 0 : i32
    %c0_i32_0 = arith.constant 0 : i32
    %c0_i32_1 = arith.constant 0 : i32
    return %c0_i32, %c0_i32_0 : i32, i32
  }
  func.func @transform_9(%arg0: i32) -> (i32, i32) {
    %c0_i32 = arith.constant 0 : i32
    %c0_i32_0 = arith.constant 0 : i32
    %c0_i32_1 = arith.constant 0 : i32
    return %c0_i32, %c0_i32_0 : i32, i32
  }
  func.func @transform_10(%arg0: i32) -> (i32, i32, i32) {
    %c0_i32 = arith.constant 0 : i32
    %c0_i32_0 = arith.constant 0 : i32
    %c0_i32_1 = arith.constant 0 : i32
    return %arg0, %c0_i32, %c0_i32_0 : i32, i32, i32
  }
}

</mosaic_0001>

<bundles_post_ra>
// kernel: bottleneck_forward.1
= control target key start
LH: loop header
LB: loop body
LE: loop exit
PB: predicated region body
PF: predicated region fallthrough
CT: control target
= control target key end

     0   :  { %15 = vsyncpa [#allocation5], 0  ;;  %s13427_s0 = inlined_call_operand.vmem [shape: bf16[2,256,512], index: 0, kind: input, shape index: {}]   ;;  %s13428_s1 = inlined_call_operand.vmem [shape: bf16[512,128], index: 1, kind: input, shape index: {}]   ;;  %s13429_s2 = inlined_call_operand.vmem [shape: f32[1,128], index: 2, kind: input, shape index: {}]   ;;  %s13430_s3 = inlined_call_operand.vmem [shape: f32[1,128], index: 3, kind: input, shape index: {}]   ;;  %s13431_s4 = inlined_call_operand.vmem [shape: bf16[1152,128], index: 4, kind: input, shape index: {}]   ;;  %s13432_s5 = inlined_call_operand.vmem [shape: f32[1,128], index: 5, kind: input, shape index: {}]   ;;  %s13433_s6 = inlined_call_operand.vmem [shape: f32[1,128], index: 6, kind: input, shape index: {}]   ;;  %s13434_s7 = inlined_call_operand.vmem [shape: bf16[128,512], index: 7, kind: input, shape index: {}]   ;;  %s13435_s8 = inlined_call_operand.vmem [shape: f32[1,512], index: 8, kind: input, shape index: {}]   ;;  %s13436_s9 = inlined_call_operand.vmem [shape: f32[1,512], index: 9, kind: input, shape index: {}]   ;;  %s13437_s10 = inlined_call_operand.hbm [shape: bf16[2,256,512], index: 10, kind: output, shape index: {}]  }
   0x1   :  { %17 = vsyncpa [#allocation5 + $0x1], 0  ;;  %s10209_s13 = smov 0   ;;  %s10211_s14 = smov 0  }
   0x2   :  { %s10213_s15 = smov 0   ;;  %s10215_s16 = smov 0  }
   0x3 LB: > { %s10230_s17 = sadd.s32 4294967295, %s10148_s16   ;;  %s8348_s18 = sadd.s32 4294967294, %s10148_s16   ;;  %s10148_s16 = sphi %s10215_s16, %s13721_s16   ;;  %s10144_s15 = sphi %s10213_s15, %s13720_s15   ;;  %s10140_s14 = sphi %s10211_s14, %s13719_s14   ;;  %s10136_s13 = sphi %s10209_s13, %s13718_s13  }
   0x4   : > { %s10234_s19 = sadd.s32 1, %s10148_s16   ;;  %s245_s20 = sadd.s32 1, %s10144_s15 }
   0x5   : > { %s242_s21 = ssub.s32 %s10148_s16, %s10234_s19  ;;  %p255_p0 = scmp.ne.s32.totalorder %s10144_s15, %s10140_s14 }
   0x6   : > { %p243_p1 = scmp.eq.s32.totalorder %s242_s21, 0  ;;  %p256_p2 = scmp.eq.s32.totalorder %s10230_s17, 1 }
   0x7   : > { %p261_p3 = scmp.ne.s32.totalorder %s10140_s14, %s10136_s13  ;;  %p262_p4 = scmp.eq.s32.totalorder %s8348_s18, 1 }
   0x8   : > { %s10245_s22 = scalar_select %p243_p1, %s10144_s15, %s245_s20  }
   0x9   : > { %p10247_p5 = por %p256_p2, %p255_p0  ;;  %p10251_p6 = por %p262_p4, %p261_p3 }
   0xa   : > { %p8351_p7 = scmp.ge.s32.totalorder %s10148_s16, 1  ;;  %p315_p8 = scmp.lt.s32.totalorder %s10148_s16, 3 }
   0xc   : > { %p316_p9 = pnand %p8351_p7, %p315_p8 }
   0xe   : > { %319 = sbr.rel (%p316_p9) target bundleno = 1324 (0x52c), region = 60 }
  0x15   : > { %v9752_v0 = vld [vmem:[%s13428_s1 + $0x40] sm:$0xff]   ;;  %v9754_v2 = vld [vmem:[%s13428_s1 + $0x48] sm:$0xff]   ;;  %p353_p10 = scmp.lt.s32.totalorder %s10230_s17, 1  ;;  %v9756_v4 = vld [vmem:[%s13428_s1 + $0x50] sm:$0xff]   ;;  %vm1455_vm0 = vcmask 1040384   ;;  %vm1958_vm8 = vcmask 1043456  }
  0x16   : > { %v9753_v1 = vld [vmem:[%s13428_s1] sm:$0xff]   ;;  %9694 = vmatprep.subr.bf16.mxu1 %v9752_v0  ;;  %8950 = vmatprep.subr.bf16.mxu0 %v9752_v0  ;;  %v9755_v3 = vld [vmem:[%s13428_s1 + $0x8] sm:$0xff]   ;;  %v9757_v5 = vld [vmem:[%s13428_s1 + $0x10] sm:$0xff]   ;;  %vm1456_vm1 = vsmask.f32 256  ;;  %vm2827_vm9 = vcmask 1042432  }
  0x17   : > { %9702 = vmatpush3.bf16.msra.mxu1 %v9753_v1  ;;  %8951 = vmatpush3.bf16.msra.mxu0 %v9753_v1  ;;  %s354_s21 = scalar_select %p353_p10, %s10230_s17, 1  ;;  %v9758_v6 = vld [vmem:[%s13428_s1 + $0x58] sm:$0xff]   ;;  %v9760_v8 = vld [vmem:[%s13428_s1 + $0x60] sm:$0xff]   ;;  %v9762_v10 = vld [vmem:[%s13428_s1 + $0x68] sm:$0xff]   ;;  %vm1506_vm3 = vsmask.f32 7938 }
  0x18   : > { %9695 = vmatprep.subr.bf16.mxu1 %v9754_v2  ;;  %8952 = vmatprep.subr.bf16.mxu0 %v9754_v2  ;;  %v9759_v7 = vld [vmem:[%s13428_s1 + $0x18] sm:$0xff]   ;;  %v9761_v9 = vld [vmem:[%s13428_s1 + $0x20] sm:$0xff]   ;;  %v9763_v14 = vld [vmem:[%s13428_s1 + $0x28] sm:$0xff]   ;;  %vm2264_vm5 = vsmask.f32 3328  ;;  %vm2828_vm10 = vcmask 1046532  }
  0x19   : > { %s8852_s29 = sshll.u32 %s354_s21, 9  ;;  %v9764_v15 = vld [vmem:[%s13428_s1 + $0x70] sm:$0xff]   ;;  %v9766_v17 = vld [vmem:[%s13428_s1 + $0x78] sm:$0xff]   ;;  %v9770_v19 = vld [vmem:[%s13428_s1 + $0xc0] sm:$0xff]   ;;  %vm2265_vm6 = vsmask.f32 7440 }
  0x1a   : > { %s10289_s26 = scalar_lea.vmem %s13427_s0, %s8852_s29  ;;  %v9765_v16 = vld [vmem:[%s13428_s1 + $0x30] sm:$0xff]   ;;  %v9767_v18 = vld [vmem:[%s13428_s1 + $0x38] sm:$0xff]   ;;  %v9771_v23 = vld [vmem:[%s13428_s1 + $0x80] sm:$0xff]   ;;  %vm1636_vm11 = vsmask.f32 4368  ;;  %s350_s12 = sand.u32 1, %s10140_s14  }
  0x1b   : > { %9703 = vmatpush3.bf16.msra.mxu1 %v9755_v3  ;;  %8953 = vmatpush3.bf16.msra.mxu0 %v9755_v3  ;;  %v407_v11 = vld [vmem:[%s10289_s26 + $0x180] sm:$0xff]  ;;  %v409_v12 = vld [vmem:[%s10289_s26 + $0x190] sm:$0xff]  ;;  %v9772_v25 = vld [vmem:[%s13428_s1 + $0xc8] sm:$0xff]   ;;  %s12729_s18 = sshll.u32 %s350_s12, 9  ;;  %s13386_s30 = scalar_lea.sflag [#allocation5], %s350_s12 }
  0x1c   : > { %9696 = vmatprep.subr.bf16.mxu1 %v9756_v4  ;;  %8954 = vmatprep.subr.bf16.mxu0 %v9756_v4  ;;  %v8404_v13 = vcombine.high %v407_v11, %v409_v12  ;;  %v411_v20 = vld [vmem:[%s10289_s26 + $0x1a0] sm:$0xff]  ;;  %v413_v21 = vld [vmem:[%s10289_s26 + $0x1b0] sm:$0xff]  ;;  %v8403_v22 = vcombine.low %v407_v11, %v409_v12  ;;  %v9773_v28 = vld [vmem:[%s13428_s1 + $0x88] sm:$0xff]   ;;  %s12752_s20 = scalar_lea.vmem [#allocation4], %s12729_s18  ;;  %s10151_s29 = smov [#allocation4]  }
  0x1d   : > { %v8408_v24 = vcombine.high %v411_v20, %v413_v21  ;;  %v359_v26 = vld [vmem:[%s10289_s26] sm:$0xff]  ;;  %v361_v27 = vld [vmem:[%s10289_s26 + $0x10] sm:$0xff]  ;;  %v8407_v37 = vcombine.low %v411_v20, %v413_v21  ;;  %v9778_v40 = vld [vmem:[%s13428_s1 + $0xd8] sm:$0xff]   ;;  %s8286_s25 = sshll.u32 %s12752_s20, 4  ;;  %s10090_s11 = sshll.u32 %s10151_s29, 4  ;;  %s13380_s25 = int_to_ptr.vmem [resolvable:$true] %s8286_s25  ;;  %s10091_s11 = int_to_ptr.vmem [resolvable:$false] %s10090_s11 }
  0x1e   : > { %1127 = vmatprep.mubr.bf16.mxu1 %v8404_v13  ;;  %v9776_v29 = vld [vmem:[%s13428_s1 + $0xd0] sm:$0xff]   ;;  %v415_v30 = vld [vmem:[%s10289_s26 + $0x1c0] sm:$0xff]  ;;  %v8356_v31 = vcombine.high %v359_v26, %v361_v27  ;;  %v8355_v32 = vcombine.low %v359_v26, %v361_v27  ;;  %v9779_v44 = vld [vmem:[%s13428_s1 + $0x98] sm:$0xff]   ;;  %s10092_s18 = scalar_lea.vmem %s10091_s11, 16384  ;;  %p10093_p0 = scmp.lt.s32.totalorder %s13380_s25, %s10091_s11 }
  0x1f   : > { %9704 = vmatpush3.bf16.msra.mxu1 %v9757_v5  ;;  %8955 = vmatpush3.bf16.msra.mxu0 %v9757_v5  ;;  %v417_v33 = vld [vmem:[%s10289_s26 + $0x1d0] sm:$0xff]  ;;  %v363_v34 = vld [vmem:[%s10289_s26 + $0x20] sm:$0xff]  ;;  %v9784_v52 = vld [vmem:[%s13428_s1 + $0xe8] sm:$0xff]  }
  0x20   : > { %9697 = vmatprep.subr.bf16.mxu1 %v9758_v6  ;;  %8956 = vmatprep.subr.bf16.mxu0 %v9758_v6  ;;  %v365_v35 = vld [vmem:[%s10289_s26 + $0x30] sm:$0xff]  ;;  %v8412_v39 = vcombine.high %v415_v30, %v417_v33  ;;  %v367_v41 = vld [vmem:[%s10289_s26 + $0x40] sm:$0xff]  ;;  %v8411_v49 = vcombine.low %v415_v30, %v417_v33  ;;  %v9785_v56 = vld [vmem:[%s13428_s1 + $0xa8] sm:$0xff]  }
  0x21   : > { %1031 = vmatprep.mubr.bf16.mxu0 %v8356_v31  ;;  %v8360_v36 = vcombine.high %v363_v34, %v365_v35  ;;  %v9777_v38 = vld [vmem:[%s13428_s1 + $0x90] sm:$0xff]   ;;  %v8359_v43 = vcombine.low %v363_v34, %v365_v35  ;;  %v9782_v46 = vld [vmem:[%s13428_s1 + $0xe0] sm:$0xff]   ;;  %v360_v59 = vld [vmem:[%s10289_s26 + $0x8] sm:$0xff] }
  0x22   : > { %v369_v42 = vld [vmem:[%s10289_s26 + $0x50] sm:$0xff]  ;;  %v419_v47 = vld [vmem:[%s10289_s26 + $0x1e0] sm:$0xff]  ;;  %v362_v60 = vld [vmem:[%s10289_s26 + $0x18] sm:$0xff] }
  0x23   : > { %9705 = vmatpush3.bf16.msra.mxu1 %v9759_v7  ;;  %8957 = vmatpush3.bf16.msra.mxu0 %v9759_v7  ;;  %v8364_v45 = vcombine.high %v367_v41, %v369_v42  ;;  %v421_v48 = vld [vmem:[%s10289_s26 + $0x1f0] sm:$0xff]  ;;  %v9783_v50 = vld [vmem:[%s13428_s1 + $0xa0] sm:$0xff]   ;;  %v8363_v55 = vcombine.low %v367_v41, %v369_v42  ;;  %v9790_v63 = vld [vmem:[%s13428_s1 + $0xf8] sm:$0xff]   ;;  %v8358_v2 = vcombine.high %v360_v59, %v362_v60 }
  0x24   : > { %9698 = vmatprep.subr.bf16.mxu1 %v9760_v8  ;;  %8958 = vmatprep.subr.bf16.mxu0 %v9760_v8  ;;  %v8416_v51 = vcombine.high %v419_v47, %v421_v48  ;;  %v371_v53 = vld [vmem:[%s10289_s26 + $0x60] sm:$0xff]  ;;  %v373_v54 = vld [vmem:[%s10289_s26 + $0x70] sm:$0xff]  ;;  %v8415_v62 = vcombine.low %v419_v47, %v421_v48  ;;  %v9792_v3 = vld [vmem:[%s13428_s1 + $0xb8] sm:$0xff]   ;;  %v8357_v13 = vcombine.low %v360_v59, %v362_v60 }
  0x25   : > { %v8368_v57 = vcombine.high %v371_v53, %v373_v54  ;;  %v9788_v58 = vld [vmem:[%s13428_s1 + $0xf0] sm:$0xff]   ;;  %v375_v0 = vld [vmem:[%s10289_s26 + $0x80] sm:$0xff]  ;;  %v8367_v4 = vcombine.low %v371_v53, %v373_v54  ;;  %v9850_v7 = vld [vmem:[%s13431_s4 + $0x48] sm:$0xff]  }
  0x26   : > { %v9789_v61 = vld [vmem:[%s13428_s1 + $0xb0] sm:$0xff]   ;;  %v9848_v5 = vld [vmem:[%s13431_s4 + $0x40] sm:$0xff]   ;;  %v364_v8 = vld [vmem:[%s10289_s26 + $0x28] sm:$0xff] }
  0x27   : > { %9706 = vmatpush3.bf16.msra.mxu1 %v9761_v9  ;;  %8959 = vmatpush3.bf16.msra.mxu0 %v9761_v9  ;;  %v377_v1 = vld [vmem:[%s10289_s26 + $0x90] sm:$0xff]  ;;  %v9849_v6 = vld [vmem:[%s13431_s4] sm:$0xff]   ;;  %v366_v9 = vld [vmem:[%s10289_s26 + $0x38] sm:$0xff] }
  0x28   : > { %9699 = vmatprep.subr.bf16.mxu1 %v9762_v10  ;;  %8960 = vmatprep.subr.bf16.mxu0 %v9762_v10  ;;  %v8372_v10 = vcombine.high %v375_v0, %v377_v1  ;;  %v9851_v11 = vld [vmem:[%s13431_s4 + $0x8] sm:$0xff]   ;;  %v9852_v12 = vld [vmem:[%s13431_s4 + $0x50] sm:$0xff]   ;;  %v8371_v20 = vcombine.low %v375_v0, %v377_v1  ;;  %v374_v27 = vld [vmem:[%s10289_s26 + $0x78] sm:$0xff] }
  0x29   : > { %v372_v26 = vld [vmem:[%s10289_s26 + $0x68] sm:$0xff]  ;;  %v387_v31 = vld [vmem:[%s10289_s26 + $0xe0] sm:$0xff]  ;;  %v378_v35 = vld [vmem:[%s10289_s26 + $0x98] sm:$0xff] }
  0x2a   : > { %v8370_v33 = vcombine.high %v372_v26, %v374_v27  ;;  %v376_v34 = vld [vmem:[%s10289_s26 + $0x88] sm:$0xff]  ;;  %v395_v47 = vld [vmem:[%s10289_s26 + $0x120] sm:$0xff]  ;;  %v397_v48 = vld [vmem:[%s10289_s26 + $0x130] sm:$0xff] }
  0x2b   : > { %9707 = vmatpush3.bf16.msra.mxu1 %v9763_v14  ;;  %8961 = vmatpush3.bf16.msra.mxu0 %v9763_v14  ;;  %v379_v14 = vld [vmem:[%s10289_s26 + $0xa0] sm:$0xff]  ;;  %v8374_v41 = vcombine.high %v376_v34, %v378_v35  ;;  %v380_v42 = vld [vmem:[%s10289_s26 + $0xa8] sm:$0xff]  ;;  %v8392_v53 = vcombine.high %v395_v47, %v397_v48  ;;  %v390_v59 = vld [vmem:[%s10289_s26 + $0xf8] sm:$0xff]  ;;  %v8391_v60 = vcombine.low %v395_v47, %v397_v48 }
  0x2c   : > { %9700 = vmatprep.subr.bf16.mxu1 %v9764_v15  ;;  %8962 = vmatprep.subr.bf16.mxu0 %v9764_v15  ;;  %v381_v15 = vld [vmem:[%s10289_s26 + $0xb0] sm:$0xff]  ;;  %vm10475_vm2 = vmand %vm1455_vm0, %vm1456_vm1  ;;  %v9869_v48 = vld [vmem:[%s13431_s4 + $0x98] sm:$0xff]  }
  0x2d   : > { %v8376_v21 = vcombine.high %v379_v14, %v381_v15  ;;  %v405_v0 = vld [vmem:[%s10289_s26 + $0x170] sm:$0xff]  ;;  %vm10482_vm4 = vmand %vm1455_vm0, %vm1506_vm3 }
  0x2e   : > { %vm10548_vm7 = vmor %vm2264_vm5, %vm2265_vm6 }
  0x2f   : > { %9708 = vmatpush3.bf16.msra.mxu1 %v9765_v16  ;;  %8963 = vmatpush3.bf16.msra.mxu0 %v9765_v16  ;;  %v8362_v16 = vcombine.high %v364_v8, %v366_v9  ;;  %vm10677_vm12 = vmor %vm2827_vm9, %vm2828_vm10 }
  0x30   : > { %9701 = vmatprep.subr.bf16.mxu1 %v9766_v17  ;;  %8964 = vmatprep.subr.bf16.mxu0 %v9766_v17  ;;  %v9853_v17 = vld [vmem:[%s13431_s4 + $0x10] sm:$0xff]   ;;  %vm10683_vm13 = vmand %vm1958_vm8, %vm1506_vm3 }
  0x31   : > { %vm10694_vm14 = vmor %vm1456_vm1, %vm1636_vm11 }
  0x33   : > { %9709 = vmatpush3.bf16.msra.mxu1 %v9767_v18  ;;  %8965 = vmatpush3.bf16.msra.mxu0 %v9767_v18  ;;  %v368_v18 = vld [vmem:[%s10289_s26 + $0x48] sm:$0xff] }
  0x34   : > { %9062 = vmatprep.subr.bf16.mxu1 %v9770_v19  ;;  %9174 = vmatprep.subr.bf16.mxu0 %v9848_v5  ;;  %v370_v19 = vld [vmem:[%s10289_s26 + $0x58] sm:$0xff] }
  0x35   : > { %v8365_v30 = vcombine.low %v368_v18, %v370_v19  ;;  %v394_v5 = vld [vmem:[%s10289_s26 + $0x118] sm:$0xff] }
  0x36   : > { %1128 = vmatmul.mubr.bf16.vlgmr.msra.gmra.mrb[0].mxu1 %v8403_v22  ;;  %1032 = vmatmul.mubr.bf16.vlgmr.msra.gmra.mrb[0].mxu0 %v8355_v32  ;;  %v8361_v22 = vcombine.low %v364_v8, %v366_v9  ;;  %v389_v32 = vld [vmem:[%s10289_s26 + $0xf0] sm:$0xff]  ;;  %v9854_v8 = vld [vmem:[%s13431_s4 + $0x58] sm:$0xff]  }
  0x37   : > { %9063 = vmatpush3.bf16.msra.mxu1 %v9771_v23  ;;  %1135 = vmatprep.mubr.bf16.mxu1 %v8408_v24  ;;  %v383_v23 = vld [vmem:[%s10289_s26 + $0xc0] sm:$0xff]  ;;  %v385_v24 = vld [vmem:[%s10289_s26 + $0xd0] sm:$0xff] }
  0x38   : > { %9064 = vmatprep.subr.bf16.mxu1 %v9772_v25  ;;  %1039 = vmatprep.mubr.bf16.mxu0 %v8360_v36  ;;  %v8366_v25 = vcombine.high %v368_v18, %v370_v19  ;;  %v8379_v36 = vcombine.low %v383_v23, %v385_v24  ;;  %v9856_v19 = vld [vmem:[%s13431_s4 + $0x60] sm:$0xff]  }
  0x39   : > { %9175 = vmatpush3.bf16.msra.mxu0 %v9849_v6 }
  0x3a   : > { %9176 = vmatprep.subr.bf16.mxu0 %v9850_v7 }
  0x3b   : > { %9065 = vmatpush3.bf16.msra.mxu1 %v9773_v28  ;;  %v8375_v28 = vcombine.low %v379_v14, %v381_v15  ;;  %v400_v15 = vld [vmem:[%s10289_s26 + $0x148] sm:$0xff] }
  0x3c   : > { %9066 = vmatprep.subr.bf16.mxu1 %v9776_v29  ;;  %v8380_v29 = vcombine.high %v383_v23, %v385_v24 }
  0x3d   : > { %9177 = vmatpush3.bf16.msra.mxu0 %v9851_v11  ;;  %v398_v11 = vld [vmem:[%s10289_s26 + $0x138] sm:$0xff] }
  0x3e   : > { %1136 = vmatmul.mubr.bf16.gmra.mrb[4].mxu1 %v8407_v37  ;;  %1040 = vmatmul.mubr.bf16.gmra.mrb[4].mxu0 %v8359_v43  ;;  %v8384_v37 = vcombine.high %v387_v31, %v389_v32  ;;  %v382_v43 = vld [vmem:[%s10289_s26 + $0xb8] sm:$0xff] }
  0x3f   : > { %9067 = vmatpush3.bf16.msra.mxu1 %v9777_v38  ;;  %1143 = vmatprep.mubr.bf16.mxu1 %v8412_v39  ;;  %v8369_v38 = vcombine.low %v372_v26, %v374_v27  ;;  %v391_v39 = vld [vmem:[%s10289_s26 + $0x100] sm:$0xff]  ;;  %v8377_v54 = vcombine.low %v380_v42, %v382_v43  ;;  %v408_v26 = vld [vmem:[%s10289_s26 + $0x188] sm:$0xff]  ;;  %v410_v27 = vld [vmem:[%s10289_s26 + $0x198] sm:$0xff] }
  0x40   : > { %9068 = vmatprep.subr.bf16.mxu1 %v9778_v40  ;;  %1047 = vmatprep.mubr.bf16.mxu0 %v8364_v45  ;;  %v393_v40 = vld [vmem:[%s10289_s26 + $0x110] sm:$0xff] }
  0x41   : > { %9178 = vmatprep.subr.bf16.mxu0 %v9852_v12  ;;  %v8388_v45 = vcombine.high %v391_v39, %v393_v40  ;;  %v9855_v12 = vld [vmem:[%s13431_s4 + $0x18] sm:$0xff]  }
  0x42   : > { %9179 = vmatpush3.bf16.msra.mxu0 %v9853_v17 }
  0x43   : > { %9069 = vmatpush3.bf16.msra.mxu1 %v9779_v44  ;;  %v8383_v44 = vcombine.low %v387_v31, %v389_v32  ;;  %9180 = vmatprep.subr.bf16.mxu0 %v9854_v8  ;;  %v8406_v32 = vcombine.high %v408_v26, %v410_v27 }
  0x44   : > { %9070 = vmatprep.subr.bf16.mxu1 %v9782_v46  ;;  %v8373_v46 = vcombine.low %v376_v34, %v378_v35  ;;  %v9863_v34 = vld [vmem:[%s13431_s4 + $0x88] sm:$0xff]  }
  0x45   : > { %v412_v35 = vld [vmem:[%s10289_s26 + $0x1a8] sm:$0xff] }
  0x46   : > { %1144 = vmatmul.mubr.bf16.gmra.mrb[8].mxu1 %v8411_v49  ;;  %1048 = vmatmul.mubr.bf16.gmra.mrb[8].mxu0 %v8363_v55  ;;  %v8378_v49 = vcombine.high %v380_v42, %v382_v43  ;;  %v399_v55 = vld [vmem:[%s10289_s26 + $0x140] sm:$0xff]  ;;  %v1458_v42 = vld [vmem:[#allocation2 + $0xc] sm:$0x1] }
  0x47   : > { %9071 = vmatpush3.bf16.msra.mxu1 %v9783_v50  ;;  %1151 = vmatprep.mubr.bf16.mxu1 %v8416_v51  ;;  %v384_v50 = vld [vmem:[%s10289_s26 + $0xc8] sm:$0xff]  ;;  %v386_v51 = vld [vmem:[%s10289_s26 + $0xd8] sm:$0xff]  ;;  %v1459_v43 = vsel %vm10475_vm2, 0, %v1458_v42 }
  0x48   : > { %9072 = vmatprep.subr.bf16.mxu1 %v9784_v52  ;;  %1055 = vmatprep.mubr.bf16.mxu0 %v8368_v57  ;;  %v8387_v52 = vcombine.low %v391_v39, %v393_v40  ;;  %v8382_v57 = vcombine.high %v384_v50, %v386_v51  ;;  %v9866_v39 = vld [vmem:[%s13431_s4 + $0x90] sm:$0xff]   ;;  %1460 = vst [vmem:[#allocation2 + $0xc] sm:$0x1] %v1459_v43  ;;  %v1470_v42 = vld [vmem:[#allocation2 + $0x3c] sm:$0x1] }
  0x49   : > { %9181 = vmatpush3.bf16.msra.mxu0 %v9855_v12  ;;  %v1471_v43 = vsel %vm10475_vm2, 0, %v1470_v42 }
  0x4a   : > { %9182 = vmatprep.subr.bf16.mxu0 %v9856_v19  ;;  %1472 = vst [vmem:[#allocation2 + $0x3c] sm:$0x1] %v1471_v43 }
  0x4b   : > { %9073 = vmatpush3.bf16.msra.mxu1 %v9785_v56  ;;  %v401_v56 = vld [vmem:[%s10289_s26 + $0x150] sm:$0xff] }
  0x4c   : > { %9074 = vmatprep.subr.bf16.mxu1 %v9788_v58  ;;  %v388_v58 = vld [vmem:[%s10289_s26 + $0xe8] sm:$0xff] }
  0x4d   : > { %v8386_v1 = vcombine.high %v388_v58, %v390_v59  ;;  %v8385_v6 = vcombine.low %v388_v58, %v390_v59  ;;  %v10511_v58 = vld [vmem:[%s10289_s26 + $0x1e8] sm:$0xff]  ;;  %v1511_v59 = vld [vmem:[#allocation2 + $0x20] sm:$0x1] }
  0x4e   : > { %1152 = vmatmul.mubr.bf16.gmra.mrb[12].mxu1 %v8415_v62  ;;  %1056 = vmatmul.mubr.bf16.gmra.mrb[12].mxu0 %v8367_v4  ;;  %v8381_v62 = vcombine.low %v384_v50, %v386_v51  ;;  %v392_v4 = vld [vmem:[%s10289_s26 + $0x108] sm:$0xff]  ;;  %v418_v51 = vld [vmem:[%s10289_s26 + $0x1d8] sm:$0xff] }
  0x4f   : > { %9075 = vmatpush3.bf16.msra.mxu1 %v9789_v61  ;;  %1192 = vmatprep.mubr.bf16.mxu1 %v8358_v2  ;;  %v8396_v61 = vcombine.high %v399_v55, %v401_v56  ;;  %v8395_v2 = vcombine.low %v399_v55, %v401_v56  ;;  %v8390_v7 = vcombine.high %v392_v4, %v394_v5  ;;  %v416_v50 = vld [vmem:[%s10289_s26 + $0x1c8] sm:$0xff]  ;;  %v1461_v55 = vld [vmem:[#allocation2 + $0x18] sm:$0x1]  ;;  %v9871_v56 = vld [vmem:[%s13431_s4 + $0xa0] sm:$0xff]  }
  0x50   : > { %9076 = vmatprep.subr.bf16.mxu1 %v9790_v63  ;;  %1063 = vmatprep.mubr.bf16.mxu0 %v8372_v10  ;;  %v403_v63 = vld [vmem:[%s10289_s26 + $0x160] sm:$0xff]  ;;  %v396_v10 = vld [vmem:[%s10289_s26 + $0x128] sm:$0xff]  ;;  %v8413_v8 = vcombine.low %v416_v50, %v418_v51 }
  0x51   : > { %v8399_v9 = vcombine.low %v403_v63, %v405_v0  ;;  %v8394_v14 = vcombine.high %v396_v10, %v398_v11  ;;  %v8393_v17 = vcombine.low %v396_v10, %v398_v11 }
  0x53   : > { %9077 = vmatpush3.bf16.msra.mxu1 %v9792_v3  ;;  %v8400_v3 = vcombine.high %v403_v63, %v405_v0  ;;  %v422_v0 = vld [vmem:[%s10289_s26 + $0x1f8] sm:$0xff] }
  0x56   : > { %1193 = vmatmul.mubr.bf16.vlgmr.msra.gmra.mrb[16].mxu1 %v8357_v13  ;;  %1064 = vmatmul.mubr.bf16.gmra.mrb[16].mxu0 %v8371_v20  ;;  %v8389_v13 = vcombine.low %v392_v4, %v394_v5  ;;  %v9857_v20 = vld [vmem:[%s13431_s4 + $0x20] sm:$0xff]   ;;  %v9867_v5 = vld [vmem:[%s13431_s4 + $0x30] sm:$0xff]  }
  0x57   : > { %1200 = vmatprep.mubr.bf16.mxu1 %v8362_v16  ;;  %1071 = vmatprep.mubr.bf16.mxu0 %v8376_v21  ;;  %v402_v16 = vld [vmem:[%s10289_s26 + $0x158] sm:$0xff]  ;;  %v404_v21 = vld [vmem:[%s10289_s26 + $0x168] sm:$0xff] }
  0x58   : > { %v8398_v18 = vcombine.high %v400_v15, %v402_v16  ;;  %9183 = vmatpush3.bf16.msra.mxu0 %v9857_v20  ;;  %v8397_v23 = vcombine.low %v400_v15, %v402_v16 }
  0x5e   : > { %1201 = vmatmul.mubr.bf16.gmra.mrb[20].mxu1 %v8361_v22  ;;  %1072 = vmatmul.mubr.bf16.gmra.mrb[20].mxu0 %v8375_v28  ;;  %v406_v22 = vld [vmem:[%s10289_s26 + $0x178] sm:$0xff]  ;;  %v9860_v28 = vld [vmem:[%s13431_s4 + $0xc0] sm:$0xff]  }
  0x5f   : > { %1208 = vmatprep.mubr.bf16.mxu1 %v8366_v25  ;;  %1079 = vmatprep.mubr.bf16.mxu0 %v8380_v29  ;;  %v8402_v24 = vcombine.high %v404_v21, %v406_v22  ;;  %v9858_v25 = vld [vmem:[%s13431_s4 + $0x68] sm:$0xff]   ;;  %v8401_v31 = vcombine.low %v404_v21, %v406_v22  ;;  %v9873_v21 = vld [vmem:[%s13431_s4 + $0x78] sm:$0xff]  }
  0x60   : > { %9184 = vmatprep.subr.bf16.mxu0 %v9858_v25  ;;  %v9859_v29 = vld [vmem:[%s13431_s4 + $0x28] sm:$0xff]   ;;  %9286 = vmatprep.subr.bf16.mxu1 %v9860_v28  ;;  %v9878_v25 = vld [vmem:[%s13431_s4 + $0xf8] sm:$0xff]  }
  0x61   : > { %9185 = vmatpush3.bf16.msra.mxu0 %v9859_v29 }
  0x66   : > { %1209 = vmatmul.mubr.bf16.gmra.mrb[24].mxu1 %v8365_v30  ;;  %1080 = vmatmul.mubr.bf16.gmra.mrb[24].mxu0 %v8379_v36  ;;  %v9861_v30 = vld [vmem:[%s13431_s4 + $0x80] sm:$0xff]   ;;  %v414_v36 = vld [vmem:[%s10289_s26 + $0x1b8] sm:$0xff] }
  0x67   : > { %1216 = vmatprep.mubr.bf16.mxu1 %v8370_v33  ;;  %1087 = vmatprep.mubr.bf16.mxu0 %v8384_v37  ;;  %v9862_v33 = vld [vmem:[%s13431_s4 + $0xc8] sm:$0xff]   ;;  %v9864_v37 = vld [vmem:[%s13431_s4 + $0xd0] sm:$0xff]   ;;  %v8410_v40 = vcombine.high %v412_v35, %v414_v36 }
  0x68   : > { %9287 = vmatpush3.bf16.msra.mxu1 %v9861_v30 }
  0x69   : > { %9288 = vmatprep.subr.bf16.mxu1 %v9862_v33 }
  0x6c   : > { %9289 = vmatpush3.bf16.msra.mxu1 %v9863_v34 }
  0x6d   : > { %9290 = vmatprep.subr.bf16.mxu1 %v9864_v37  ;;  %v1467_v37 = vld [vmem:[#allocation2 + $0x30] sm:$0x1] }
  0x6e   : > { %1217 = vmatmul.mubr.bf16.gmra.mrb[28].mxu1 %v8369_v38  ;;  %1088 = vmatmul.mubr.bf16.gmra.mrb[28].mxu0 %v8383_v44  ;;  %v8405_v38 = vcombine.low %v408_v26, %v410_v27 }
  0x6f   : > { %1224 = vmatprep.mubr.bf16.mxu1 %v8374_v41  ;;  %1095 = vmatprep.mubr.bf16.mxu0 %v8388_v45  ;;  %v1508_v45 = vld [vmem:[#allocation2 + $0x14] sm:$0x1] }
  0x70   : > { %9291 = vmatpush3.bf16.msra.mxu1 %v9866_v39  ;;  %v1509_v47 = vsel %vm10482_vm4, 0, %v1508_v45  ;;  %v1517_v39 = vld [vmem:[#allocation2 + $0x38] sm:$0x1]  ;;  %v1520_v45 = vld [vmem:[#allocation2 + $0x44] sm:$0x1] }
  0x71   : > { %1510 = vst [vmem:[#allocation2 + $0x14] sm:$0x1] %v1509_v47  ;;  %v1473_v47 = vld [vmem:[#allocation2 + $0x48] sm:$0x1] }
  0x76   : > { %1225 = vmatmul.mubr.bf16.gmra.mrb[32].mxu1 %v8373_v46  ;;  %1096 = vmatmul.mubr.bf16.gmra.mrb[32].mxu0 %v8387_v52  ;;  %v9868_v46 = vld [vmem:[%s13431_s4 + $0xd8] sm:$0xff]   ;;  %v9870_v52 = vld [vmem:[%s13431_s4 + $0xe0] sm:$0xff]  }
  0x77   : > { %1232 = vmatprep.mubr.bf16.mxu1 %v8378_v49  ;;  %1103 = vmatprep.mubr.bf16.mxu0 %v8392_v53  ;;  %v13438_v49 = vmov 0   ;;  %v8409_v53 = vcombine.low %v412_v35, %v414_v36  ;;  %v8417_v35 = vcombine.low %v10511_v58, %v422_v0 }
  0x78   : > { %9292 = vmatprep.subr.bf16.mxu1 %v9868_v46  ;;  %1447 = vst [vmem:[#allocation2] sm:$0xf] %v13438_v49  ;;  %1448 = vst [vmem:[#allocation2 + $0x4] sm:$0xf] %v13438_v49  ;;  %v1521_v46 = vsel %vm10482_vm4, 0, %v1520_v45 }
  0x79   : > { %1449 = vst [vmem:[#allocation2 + $0x8] sm:$0x1] %v13438_v49  ;;  %1451 = vst [vmem:[#allocation2 + $0xcc] sm:$0xf] %v13438_v49  ;;  %9293 = vmatpush3.bf16.msra.mxu1 %v9869_v48  ;;  %v1474_v48 = vsel %vm10475_vm2, 0, %v1473_v47 }
  0x7a   : > { %1452 = vst [vmem:[#allocation2 + $0xd0] sm:$0xf] %v13438_v49  ;;  %1453 = vst [vmem:[#allocation2 + $0xd4] sm:$0x1] %v13438_v49  ;;  %9294 = vmatprep.subr.bf16.mxu1 %v9870_v52  ;;  %v1523_v52 = vld [vmem:[#allocation2 + $0x50] sm:$0x1] }
  0x7b   : > { %1522 = vst [vmem:[#allocation2 + $0x44] sm:$0x1] %v1521_v46  ;;  %1475 = vst [vmem:[#allocation2 + $0x48] sm:$0x1] %v1474_v48  ;;  %v1488_v47 = vld [vmem:[#allocation2 + $0x84] sm:$0x1] }
  0x7d   : > { %9295 = vmatpush3.bf16.msra.mxu1 %v9871_v56 }
  0x7e   : > { %1233 = vmatmul.mubr.bf16.gmra.mrb[36].mxu1 %v8377_v54  ;;  %1104 = vmatmul.mubr.bf16.gmra.mrb[36].mxu0 %v8391_v60  ;;  %v8414_v54 = vcombine.high %v416_v50, %v418_v51  ;;  %v1512_v60 = vsel %vm10482_vm4, 0, %v1511_v59  ;;  %v9882_v50 = vld [vmem:[%s13431_s4 + $0x140] sm:$0xff]   ;;  %v9889_v59 = vld [vmem:[%s13431_s4 + $0x108] sm:$0xff]  }
  0x7f   : > { %1240 = vmatprep.mubr.bf16.mxu1 %v8382_v57  ;;  %1111 = vmatprep.mubr.bf16.mxu0 %v8396_v61  ;;  %v1462_v57 = vsel %vm10475_vm2, 0, %v1461_v55  ;;  %v9872_v61 = vld [vmem:[%s13431_s4 + $0xe8] sm:$0xff]   ;;  %v2216_v63 = vld [vmem:[#allocation2] sm:$0xf]  ;;  %1513 = vst [vmem:[#allocation2 + $0x20] sm:$0x1] %v1512_v60 }
  0x80   : > { %1463 = vst [vmem:[#allocation2 + $0x18] sm:$0x1] %v1462_v57  ;;  %v2271_v4 = vshll.u32 %v2216_v63, 16  ;;  %9296 = vmatprep.subr.bf16.mxu1 %v9872_v61  ;;  %v2218_v10 = vld [vmem:[#allocation2 + $0x8] sm:$0x1]  ;;  %v9880_v34 = vld [vmem:[#allocation2] sm:$0xff]  }
  0x81   : > { %v2287_v16 = vshll.u32 %v2218_v10, 16  ;;  %v9883_v51 = vld [vmem:[%s13431_s4 + $0x100] sm:$0xff]   ;;  %v1526_v55 = vld [vmem:[#allocation2 + $0x5c] sm:$0x1] }
  0x82   : > { %v2273_v12 = vrot.slane %v2271_v4, 5  ;;  %v1527_v57 = vsel %vm10482_vm4, 0, %v1526_v55  ;;  %v1479_v60 = vld [vmem:[#allocation2 + $0x60] sm:$0x1] }
  0x83   : > { %v2289_v27 = vrot.slane %v2287_v16, 5  ;;  %1528 = vst [vmem:[#allocation2 + $0x5c] sm:$0x1] %v1527_v57  ;;  %v1480_v61 = vsel %vm10475_vm2, 0, %v1479_v60 }
  0x84   : > { %1481 = vst [vmem:[#allocation2 + $0x60] sm:$0x1] %v1480_v61 }
  0x86   : > { %1241 = vmatmul.mubr.bf16.gmra.mrb[40].mxu1 %v8381_v62  ;;  %1112 = vmatmul.mubr.bf16.gmra.mrb[40].mxu0 %v8395_v2  ;;  %v9874_v62 = vld [vmem:[%s13431_s4 + $0xa8] sm:$0xff]   ;;  %v2217_v2 = vld [vmem:[#allocation2 + $0x4] sm:$0xf] }
  0x87   : > { %1248 = vmatprep.mubr.bf16.mxu1 %v8386_v1  ;;  %1119 = vmatprep.mubr.bf16.mxu0 %v8400_v3  ;;  %v9865_v1 = vld [vmem:[%s13431_s4 + $0x70] sm:$0xff]   ;;  %v2268_v3 = vshrl.u32 %v2216_v63, 16 }
  0x88   : > { %9186 = vmatprep.subr.bf16.mxu0 %v9865_v1  ;;  %9297 = vmatpush3.bf16.msra.mxu1 %v9874_v62  ;;  %v1529_v62 = vld [vmem:[#allocation2 + $0x68] sm:$0x1] }
  0x89   : > { %v2270_v11 = vrot.slane %v2268_v3, 4  ;;  %9187 = vmatpush3.bf16.msra.mxu0 %v9867_v5  ;;  %v1530_v63 = vsel %vm10482_vm4, 0, %v1529_v62  ;;  %v1532_v3 = vld [vmem:[#allocation2 + $0x74] sm:$0x1] }
  0x8a   : > { %9188 = vmatprep.subr.bf16.mxu0 %v9873_v21  ;;  %1531 = vst [vmem:[#allocation2 + $0x68] sm:$0x1] %v1530_v63  ;;  %v1533_v5 = vsel %vm10482_vm4, 0, %v1532_v3  ;;  %v9894_v21 = vld [vmem:[%s13431_s4 + $0x150] sm:$0xff]  }
  0x8b   : > { %v2274_v19 = vor.u32 %v2273_v12, %v2270_v11  ;;  %1534 = vst [vmem:[#allocation2 + $0x74] sm:$0x1] %v1533_v5 }
  0x8d   : > { %v2275_v26 = vrot.slane %v2274_v19, 4 }
  0x8e   : > { %1249 = vmatmul.mubr.bf16.gmra.mrb[44].mxu1 %v8385_v6  ;;  %1120 = vmatmul.mubr.bf16.gmra.mrb[44].mxu0 %v8399_v9  ;;  %v2277_v6 = vshll.u32 %v2217_v2, 16  ;;  %v9876_v9 = vld [vmem:[%s13431_s4 + $0xf0] sm:$0xff]  }
  0x8f   : > { %1256 = vmatprep.mubr.bf16.mxu1 %v8390_v7  ;;  %v2281_v7 = vshrl.u32 %v2217_v2, 16  ;;  %9298 = vmatprep.subr.bf16.mxu1 %v9876_v9 }
  0x91   : > { %v2283_v15 = vrot.slane %v2281_v7, 4 }
  0x96   : > { %1257 = vmatmul.mubr.bf16.gmra.mrb[48].mxu1 %v8389_v13  ;;  %v8418_v13 = vcombine.high %v10511_v58, %v422_v0  ;;  %v9888_v58 = vld [vmem:[%s13431_s4 + $0x148] sm:$0xff]  }
  0x97   : > { %1264 = vmatprep.mubr.bf16.mxu1 %v8394_v14  ;;  %v2279_v14 = vrot.slane %v2277_v6, 5  ;;  %v1482_v0 = vld [vmem:[#allocation2 + $0x6c] sm:$0x1] }
  0x98   : > { %v1483_v1 = vsel %vm10475_vm2, 0, %v1482_v0 }
  0x99   : > { %v2284_v22 = vor.u32 %v2283_v15, %v2279_v14  ;;  %1484 = vst [vmem:[#allocation2 + $0x6c] sm:$0x1] %v1483_v1 }
  0x9b   : > { %v2285_v30 = vrot.slane %v2284_v22, 4  ;;  %v9895_v22 = vld [vmem:[%s13431_s4 + $0x110] sm:$0xff]  }
  0x9d   : > { %v2290_v33 = vsel %vm10548_vm7, %v2285_v30, %v2289_v27 }
  0x9e   : > { %1265 = vmatmul.mubr.bf16.gmra.mrb[52].mxu1 %v8393_v17  ;;  %v1464_v17 = vld [vmem:[#allocation2 + $0x24] sm:$0x1] }
  0x9f   : > { %1272 = vmatprep.mubr.bf16.mxu1 %v8398_v18  ;;  %v9877_v18 = vld [vmem:[%s13431_s4 + $0xb0] sm:$0xff]   ;;  %v1465_v20 = vsel %vm10475_vm2, 0, %v1464_v17 }
  0xa0   : > { %1466 = vst [vmem:[#allocation2 + $0x24] sm:$0x1] %v1465_v20  ;;  %9299 = vmatpush3.bf16.msra.mxu1 %v9877_v18 }
  0xa1   : > { %9300 = vmatprep.subr.bf16.mxu1 %v9878_v25  ;;  %v1485_v25 = vld [vmem:[#allocation2 + $0x78] sm:$0x1] }
  0xa2   : > { %v1486_v27 = vsel %vm10475_vm2, 0, %v1485_v25 }
  0xa3   : > { %1487 = vst [vmem:[#allocation2 + $0x78] sm:$0x1] %v1486_v27 }
  0xa6   : > { %1273 = vmatmul.mubr.bf16.gmra.mrb[56].mxu1 %v8397_v23  ;;  %v1514_v23 = vld [vmem:[#allocation2 + $0x2c] sm:$0x1] }
  0xa7   : > { %1280 = vmatprep.mubr.bf16.mxu1 %v8402_v24  ;;  %v9875_v24 = vld [vmem:[%s13431_s4 + $0x38] sm:$0xff]   ;;  %v1515_v28 = vsel %vm10482_vm4, 0, %v1514_v23 }
  0xa8   : > { %1516 = vst [vmem:[#allocation2 + $0x2c] sm:$0x1] %v1515_v28  ;;  %9189 = vmatpush3.bf16.msra.mxu0 %v9875_v24 }
  0xa9   : > { %9398 = vmatprep.subr.bf16.mxu0 %v9882_v50  ;;  %v1489_v50 = vsel %vm10475_vm2, 0, %v1488_v47 }
  0xaa   : > { %1490 = vst [vmem:[#allocation2 + $0x84] sm:$0x1] %v1489_v50 }
  0xae   : > { %1281 = vmatmul.mubr.bf16.gmra.mrb[60].mxu1 %v8401_v31  ;;  %v9879_v31 = vld [vmem:[%s13431_s4 + $0xb8] sm:$0xff]  }
  0xaf   : > { %1288 = vmatprep.mubr.bf16.mxu1 %v8406_v32  ;;  %v2280_v32 = vsel %vm10548_vm7, %v2275_v26, %v2279_v14  ;;  %9301 = vmatpush3.bf16.msra.mxu1 %v9879_v31 }
  0xb0   : > { %v8501_v36 = vcombine.low %v2280_v32, %v2290_v33  ;;  %v1535_v32 = vld [vmem:[#allocation2 + $0x80] sm:$0x1] }
  0xb2   : > { %5663 = vmatprep.mubr.bf16.mxu0 %v8501_v36 }
  0xb3   : > { %5664 = vmatmul.mubr.bf16.vlgmr.msra.gmra.mrb[48].mxu0 %v9880_v34 }
  0xb4   : > { %9399 = vmatpush3.bf16.msra.mxu0 %v9883_v51 }
  0xb5   : > { %9400 = vmatprep.subr.bf16.mxu0 %v9888_v58 }
  0xb6   : > { %1289 = vmatmul.mubr.bf16.gmra.mrb[64].mxu1 %v8405_v38  ;;  %v1468_v38 = vsel %vm10475_vm2, 0, %v1467_v37 }
  0xb7   : > { %1296 = vmatprep.mubr.bf16.mxu1 %v8410_v40  ;;  %1469 = vst [vmem:[#allocation2 + $0x30] sm:$0x1] %v1468_v38  ;;  %v1518_v40 = vsel %vm10482_vm4, 0, %v1517_v39 }
  0xb8   : > { %1519 = vst [vmem:[#allocation2 + $0x38] sm:$0x1] %v1518_v40  ;;  %9401 = vmatpush3.bf16.msra.mxu0 %v9889_v59 }
  0xb9   : > { %9402 = vmatprep.subr.bf16.mxu0 %v9894_v21 }
  0xbc   : > { %9403 = vmatpush3.bf16.msra.mxu0 %v9895_v22 }
  0xbe   : > { %1297 = vmatmul.mubr.bf16.gmra.mrb[68].mxu1 %v8409_v53  ;;  %v1524_v53 = vsel %vm10482_vm4, 0, %v1523_v52 }
  0xbf   : > { %1304 = vmatprep.mubr.bf16.mxu1 %v8414_v54  ;;  %1525 = vst [vmem:[#allocation2 + $0x50] sm:$0x1] %v1524_v53  ;;  %v1476_v54 = vld [vmem:[#allocation2 + $0x54] sm:$0x1] }
  0xc0   : > { %v1477_v56 = vsel %vm10475_vm2, 0, %v1476_v54 }
  0xc1   : > { %1478 = vst [vmem:[#allocation2 + $0x54] sm:$0x1] %v1477_v56  ;;  %v1538_v56 = vld [vmem:[#allocation2 + $0x8c] sm:$0x1] }
  0xc2   : > { %v1539_v58 = vsel %vm10482_vm4, 0, %v1538_v56 }
  0xc3   : > { %1540 = vst [vmem:[#allocation2 + $0x8c] sm:$0x1] %v1539_v58 }
  0xc6   : > { %1305 = vmatmul.mubr.bf16.gmra.mrb[72].mxu1 %v8413_v8 }
  0xc7   : > { %1312 = vmatprep.mubr.bf16.mxu1 %v8418_v13 }
  0xce   : > { %1313 = vmatmul.mubr.bf16.gmra.mrb[76].mxu1 %v8417_v35  ;;  %v1536_v35 = vsel %vm10482_vm4, 0, %v1535_v32 }
  0xcf   : > { %1537 = vst [vmem:[#allocation2 + $0x80] sm:$0x1] %v1536_v35 }
 0x109   : > { %v9038_v2 = vpop.f32.mrb[0].mxu1  ;;  %v8966_v10 = vpop.f32.mrb[0].mxu0 }
 0x10a   : > { %v9039_v4 = vpop.f32.mrb[1].mxu1  ;;  %v8967_v11 = vpop.f32.mrb[1].mxu0 }
 0x10b   : > { %v10596_v6 = vadd.f32 %v9039_v4, %v9038_v2  ;;  %v9041_v7 = vpop.f32.mrb[2].mxu1  ;;  %v8968_v12 = vadd.f32 %v8967_v11, %v8966_v10  ;;  %v8969_v13 = vpop.f32.mrb[2].mxu0 }
 0x10c   : > { %v9042_v8 = vpop.f32.mrb[3].mxu1  ;;  %v8970_v14 = vpop.f32.mrb[3].mxu0 }
 0x10d   : > { %v10598_v9 = vadd.f32 %v9042_v8, %v9041_v7  ;;  %v10600_v16 = vadd.f32 %v8970_v14, %v8969_v13  ;;  %v10643_v7 = vld [vmem:[%s13429_s2] ss:$0 sm:$0xff] }
 0x10e   : > { %v10648_v14 = vld [vmem:[%s13430_s3] ss:$0 sm:$0xff] }
 0x111   : > { %v9044_v15 = vpop.f32.mrb[4].mxu1  ;;  %v8972_v24 = vpop.f32.mrb[4].mxu0 }
 0x112   : > { %v9045_v17 = vpop.f32.mrb[5].mxu1  ;;  %v8973_v26 = vpop.f32.mrb[5].mxu0 }
 0x113   : > { %v10602_v18 = vadd.f32 %v9045_v17, %v9044_v15  ;;  %v9047_v19 = vpop.f32.mrb[6].mxu1  ;;  %v10614_v28 = vadd.f32 %v8973_v26, %v8972_v24  ;;  %v8975_v30 = vpop.f32.mrb[6].mxu0  ;;  %v9900_v17 = vld [vmem:[%s13431_s4 + $0x158] sm:$0xff]   ;;  %v1491_v24 = vld [vmem:[#allocation2 + $0x90] sm:$0x1] }
 0x114   : > { %v9048_v20 = vpop.f32.mrb[7].mxu1  ;;  %v8976_v31 = vpop.f32.mrb[7].mxu0  ;;  %9404 = vmatprep.subr.bf16.mxu0 %v9900_v17  ;;  %v1492_v26 = vsel %vm10475_vm2, 0, %v1491_v24 }
 0x115   : > { %v10610_v23 = vadd.f32 %v9048_v20, %v9047_v19  ;;  %v10616_v34 = vadd.f32 %v8976_v31, %v8975_v30  ;;  %v9901_v19 = vld [vmem:[%s13431_s4 + $0x118] sm:$0xff]   ;;  %1493 = vst [vmem:[#allocation2 + $0x90] sm:$0x1] %v1492_v26 }
 0x116   : > { %9405 = vmatpush3.bf16.msra.mxu0 %v9901_v19  ;;  %v1494_v19 = vld [vmem:[#allocation2 + $0x9c] sm:$0x1] }
 0x117   : > { %v1495_v26 = vsel %vm10475_vm2, 0, %v1494_v19 }
 0x118   : > { %1496 = vst [vmem:[#allocation2 + $0x9c] sm:$0x1] %v1495_v26 }
 0x119   : > { %v9050_v33 = vpop.f32.mrb[8].mxu1  ;;  %v8978_v42 = vpop.f32.mrb[8].mxu0 }
 0x11a   : > { %v9051_v36 = vpop.f32.mrb[9].mxu1  ;;  %v8979_v43 = vpop.f32.mrb[9].mxu0 }
 0x11b   : > { %v10620_v37 = vadd.f32 %v9051_v36, %v9050_v33  ;;  %v9053_v38 = vpop.f32.mrb[10].mxu1  ;;  %v10624_v45 = vadd.f32 %v8979_v43, %v8978_v42  ;;  %v8981_v46 = vpop.f32.mrb[10].mxu0  ;;  %v2732_v42 = vld [vmem:[#allocation2 + $0x4] sm:$0xf] }
 0x11c   : > { %v9054_v39 = vpop.f32.mrb[11].mxu1  ;;  %v8982_v48 = vpop.f32.mrb[11].mxu0 }
 0x11d   : > { %13491 = vst [vmem:[#allocation7_spill] sm:$0xff] %v10620_v37  ;;  %v10622_v40 = vadd.f32 %v9054_v39, %v9053_v38  ;;  %v10628_v52 = vadd.f32 %v8982_v48, %v8981_v46 }
 0x11f   : > { %13492 = vst [vmem:[#allocation8_spill] sm:$0xff] %v10622_v40 }
 0x121   : > { %v9056_v51 = vpop.f32.mrb[12].mxu1  ;;  %v8984_v60 = vpop.f32.mrb[12].mxu0 }
 0x122   : > { %v9057_v53 = vpop.f32.mrb[13].mxu1  ;;  %v8985_v61 = vpop.f32.mrb[13].mxu0 }
 0x123   : > { %v10630_v54 = vadd.f32 %v9057_v53, %v9056_v51  ;;  %v9059_v55 = vpop.f32.mrb[14].mxu1  ;;  %v10636_v62 = vadd.f32 %v8985_v61, %v8984_v60  ;;  %v8987_v63 = vpop.f32.mrb[14].mxu0  ;;  %v2731_v53 = vld [vmem:[#allocation2] sm:$0xe] }
 0x124   : > { %v9060_v57 = vpop.f32.mrb[15].mxu1  ;;  %v8988_v0 = vpop.f32.mrb[15].mxu0 }
 0x125   : > { %13493 = vst [vmem:[#allocation9_spill] sm:$0xff] %v10630_v54  ;;  %v10634_v59 = vadd.f32 %v9060_v57, %v9059_v55  ;;  %v10638_v2 = vadd.f32 %v8988_v0, %v8987_v63  ;;  %v2733_v55 = vld [vmem:[#allocation2 + $0x8] sm:$0x1]  ;;  %v2832_v57 = vrot.slane %v2732_v42, 5 }
 0x127   : > { %13494 = vst [vmem:[#allocation10_spill] sm:$0xff] %v10634_v59  ;;  %v2834_v24 = vrot.slane %v2832_v57, 4 }
 0x129   : > { %v9078_v1 = vpop.f32.mrb[16].mxu1  ;;  %v8990_v13 = vpop.f32.mrb[16].mxu0 }
 0x12a   : > { %v9079_v3 = vpop.f32.mrb[17].mxu1  ;;  %v8991_v15 = vpop.f32.mrb[17].mxu0 }
 0x12b   : > { %v9080_v4 = vadd.f32 %v9079_v3, %v9078_v1  ;;  %v9081_v5 = vpop.f32.mrb[18].mxu1  ;;  %v10658_v21 = vadd.f32 %v8991_v15, %v8990_v13  ;;  %v8993_v22 = vpop.f32.mrb[18].mxu0  ;;  %v8517_v3 = vrot.slane %v2731_v53, 9 }
 0x12c   : > { %v9082_v8 = vpop.f32.mrb[19].mxu1  ;;  %v8994_v25 = vpop.f32.mrb[19].mxu0 }
 0x12d   : > { %v1195_v10 = vadd.f32 %v9080_v4, %v8968_v12  ;;  %v9083_v11 = vadd.f32 %v9082_v8, %v9081_v5  ;;  %v10664_v32 = vadd.f32 %v8994_v25, %v8993_v22  ;;  %v2835_v4 = vrot.slane %v2733_v55, 5  ;;  %v1544_v55 = vld [vmem:[#allocation2 + $0xa4] sm:$0x1] }
 0x12f   : > { %v1328_v20 = vmul.f32 %v10643_v7, %v1195_v10  ;;  %v1198_v12 = vadd.f32 %v9083_v11, %v10600_v16  ;;  %v1541_v16 = vld [vmem:[#allocation2 + $0x98] sm:$0x1] }
 0x130   : > { %v1542_v43 = vsel %vm10482_vm4, 0, %v1541_v16 }
 0x131   : > { %v1367_v27 = vadd.f32 %v10648_v14, %v1328_v20  ;;  %v1329_v30 = vmul.f32 %v10643_v7, %v1198_v12  ;;  %v9084_v31 = vpop.f32.mrb[20].mxu1  ;;  %1543 = vst [vmem:[#allocation2 + $0x98] sm:$0x1] %v1542_v43  ;;  %v8996_v56 = vpop.f32.mrb[20].mxu0  ;;  %v1960_v20 = vld [vmem:[#allocation2 + $0xc] sm:$0xf] }
 0x132   : > { %v9085_v33 = vpop.f32.mrb[21].mxu1  ;;  %v8997_v58 = vpop.f32.mrb[21].mxu0 }
 0x133   : > { %v1399_v35 = vmax.f32 %v1367_v27, 0.0  ;;  %v1368_v36 = vadd.f32 %v10648_v14, %v1329_v30  ;;  %v9086_v38 = vadd.f32 %v9085_v33, %v9084_v31  ;;  %v9087_v39 = vpop.f32.mrb[22].mxu1  ;;  %v8999_v0 = vpop.f32.mrb[22].mxu0 }
 0x134   : > { %v9088_v46 = vpop.f32.mrb[23].mxu1  ;;  %v9000_v5 = vpop.f32.mrb[23].mxu0 }
 0x135   : > { %v8853_v47 = vpack.c.bf16 %v1399_v35, %v1399_v35  ;;  %v1400_v48 = vmax.f32 %v1368_v36, 0.0  ;;  %v1203_v50 = vadd.f32 %v9086_v38, %v10614_v28  ;;  %v9089_v51 = vadd.f32 %v9088_v46, %v9087_v39  ;;  %v1964_v38 = vld [vmem:[#allocation2 + $0x14] sm:$0x1] }
 0x136   : > { %v10672_v28 = vadd.f32 %v8997_v58, %v8996_v56  ;;  %v10688_v25 = vadd.f32 %v9000_v5, %v8999_v0  ;;  %v10701_v46 = vsel %vm10677_vm12, %v8517_v3, %v2832_v57  ;;  %v2836_v3 = vsel %vm10677_vm12, %v2834_v24, %v2835_v4 }
 0x137   : > { %v1639_v60 = vshrl.u32 %v8853_v47, 16  ;;  %v8854_v61 = vpack.c.bf16 %v1400_v48, %v1400_v48  ;;  %v1330_v63 = vmul.f32 %v10643_v7, %v1203_v50  ;;  %v1206_v1 = vadd.f32 %v9089_v51, %v10616_v34 }
 0x138   : > { %v1642_v10 = vshll.u32 %v8853_v47, 16 }
 0x139   : > { %v1641_v8 = vrot.slane %v1639_v60, 7  ;;  %v1647_v11 = vshrl.u32 %v8854_v61, 16  ;;  %v1369_v13 = vadd.f32 %v10648_v14, %v1330_v63  ;;  %v9090_v15 = vpop.f32.mrb[24].mxu1  ;;  %v1331_v12 = vmul.f32 %v10643_v7, %v1206_v1  ;;  %v9002_v53 = vpop.f32.mrb[24].mxu0 }
 0x13a   : > { %v9091_v22 = vpop.f32.mrb[25].mxu1  ;;  %v1650_v31 = vshll.u32 %v8854_v61, 16  ;;  %v9003_v61 = vpop.f32.mrb[25].mxu0  ;;  %v1545_v63 = vsel %vm10482_vm4, 0, %v1544_v55 }
 0x13b   : > { %v1644_v27 = vor.u32 %v1642_v10, %v1641_v8  ;;  %v1649_v30 = vrot.slane %v1647_v11, 7  ;;  %v1401_v33 = vmax.f32 %v1369_v13, 0.0  ;;  %v9093_v16 = vpop.f32.mrb[26].mxu1  ;;  %v1645_v35 = vrot.slane %v1641_v8, 4  ;;  %v9005_v5 = vpop.f32.mrb[26].mxu0 }
 0x13c   : > { %v1370_v39 = vadd.f32 %v10648_v14, %v1331_v12  ;;  %v9092_v42 = vadd.f32 %v9091_v22, %v9090_v15  ;;  %v9094_v43 = vpop.f32.mrb[27].mxu1  ;;  %1546 = vst [vmem:[#allocation2 + $0xa4] sm:$0x1] %v1545_v63  ;;  %v10716_v11 = vadd.f32 %v9003_v61, %v9002_v53  ;;  %v9006_v13 = vpop.f32.mrb[27].mxu0  ;;  %v1967_v22 = vld [vmem:[#allocation2 + $0x18] sm:$0xf] }
 0x13d   : > { %v1961_v47 = vsel %vm10683_vm13, %v1644_v27, %v1960_v20  ;;  %v1652_v48 = vor.u32 %v1650_v31, %v1649_v30  ;;  %v1654_v50 = vrot.slane %v1649_v30, 4  ;;  %v8855_v51 = vpack.c.bf16 %v1401_v33, %v1401_v33 }
 0x13e   : > { %1962 = vst [vmem:[#allocation2 + $0xc] sm:$0xf] %v1961_v47  ;;  %v1402_v56 = vmax.f32 %v1370_v39, 0.0  ;;  %v1211_v58 = vadd.f32 %v9092_v42, %v10624_v45  ;;  %v9095_v60 = vadd.f32 %v9094_v43, %v9093_v16  ;;  %v10718_v12 = vadd.f32 %v9006_v13, %v9005_v5 }
 0x13f   : > { %v1653_v57 = vsel %vm10694_vm14, %v1645_v35, %v1652_v48  ;;  %v1965_v0 = vsel %vm10475_vm2, %v1654_v50, %v1964_v38  ;;  %v1656_v1 = vshrl.u32 %v8855_v51, 16  ;;  %v1659_v19 = vshll.u32 %v8855_v51, 16  ;;  %v1971_v38 = vld [vmem:[#allocation2 + $0x20] sm:$0x1] }
 0x140   : > { %1963 = vst [vmem:[#allocation2 + $0x10] sm:$0xf] %v1653_v57  ;;  %1966 = vst [vmem:[#allocation2 + $0x14] sm:$0x1] %v1965_v0  ;;  %v8856_v45 = vpack.c.bf16 %v1402_v56, %v1402_v56  ;;  %v1332_v8 = vmul.f32 %v10643_v7, %v1211_v58  ;;  %v1214_v10 = vadd.f32 %v9095_v60, %v10628_v52 }
 0x141   : > { %v1658_v15 = vrot.slane %v1656_v1, 7  ;;  %v9096_v20 = vpop.f32.mrb[28].mxu1  ;;  %v8533_v52 = vcombine.low %v10701_v46, %v2836_v3  ;;  %v10727_v60 = vpop.f32.mrb[28].mxu0 }
 0x142   : > { %v1664_v26 = vshrl.u32 %v8856_v45, 16  ;;  %v1371_v4 = vadd.f32 %v10648_v14, %v1332_v8  ;;  %v1333_v24 = vmul.f32 %v10643_v7, %v1214_v10  ;;  %v9097_v27 = vpop.f32.mrb[29].mxu1  ;;  %v1667_v35 = vshll.u32 %v8856_v45, 16  ;;  %v1974_v8 = vld [vmem:[#allocation2 + $0x24] sm:$0xf] }
 0x143   : > { %v1661_v30 = vor.u32 %v1659_v19, %v1658_v15  ;;  %v9098_v31 = vadd.f32 %v9097_v27, %v9096_v20  ;;  %v9099_v33 = vpop.f32.mrb[30].mxu1  ;;  %v1662_v47 = vrot.slane %v1658_v15, 4 }
 0x144   : > { %v1666_v16 = vrot.slane %v1664_v26, 7  ;;  %v1403_v39 = vmax.f32 %v1371_v4, 0.0  ;;  %v1372_v42 = vadd.f32 %v10648_v14, %v1333_v24  ;;  %v9100_v43 = vpop.f32.mrb[31].mxu1 }
 0x145   : > { %v1968_v48 = vsel %vm10683_vm13, %v1661_v30, %v1967_v22  ;;  %v1219_v50 = vadd.f32 %v9098_v31, %v10636_v62  ;;  %v9101_v51 = vadd.f32 %v9100_v43, %v9099_v33  ;;  %v2219_v53 = vld [vmem:[#allocation2 + $0xc] sm:$0xf] }
 0x146   : > { %1969 = vst [vmem:[#allocation2 + $0x18] sm:$0xf] %v1968_v48  ;;  %v1669_v55 = vor.u32 %v1667_v35, %v1666_v16  ;;  %v1671_v56 = vrot.slane %v1666_v16, 4  ;;  %v8857_v58 = vpack.c.bf16 %v1403_v39, %v1403_v39  ;;  %v1404_v46 = vmax.f32 %v1372_v42, 0.0  ;;  %v10738_v35 = vpop.f32.mrb[29].mxu0 }
 0x147   : > { %v1334_v61 = vmul.f32 %v10643_v7, %v1219_v50  ;;  %v1222_v63 = vadd.f32 %v9101_v51, %v10638_v2  ;;  %v9881_v57 = vld [vmem:[#allocation2 + $0xc] sm:$0xff]   ;;  %v2292_v1 = vshrl.u32 %v2219_v53, 16  ;;  %v2295_v26 = vshll.u32 %v2219_v53, 16  ;;  %v10743_v48 = vpop.f32.mrb[30].mxu0 }
 0x148   : > { %v2220_v0 = vld [vmem:[#allocation2 + $0x10] sm:$0xf]  ;;  %v1670_v3 = vsel %vm10694_vm14, %v1662_v47, %v1669_v55  ;;  %v1972_v62 = vsel %vm10475_vm2, %v1671_v56, %v1971_v38  ;;  %v1673_v5 = vshrl.u32 %v8857_v58, 16  ;;  %v1676_v45 = vshll.u32 %v8857_v58, 16  ;;  %5824 = vmatprep.mubr.bf16.mxu1 %v9881_v57  ;;  %v9906_v38 = vld [vmem:[%s13431_s4 + $0x160] sm:$0xff]   ;;  %v10750_v57 = vpop.f32.mrb[31].mxu0 }
 0x149   : > { %1970 = vst [vmem:[#allocation2 + $0x1c] sm:$0xf] %v1670_v3  ;;  %1973 = vst [vmem:[#allocation2 + $0x20] sm:$0x1] %v1972_v62  ;;  %v8858_v10 = vpack.c.bf16 %v1404_v46, %v1404_v46  ;;  %v1373_v13 = vadd.f32 %v10648_v14, %v1334_v61  ;;  %v1335_v15 = vmul.f32 %v10643_v7, %v1222_v63  ;;  %v9102_v2 = vpop.f32.mrb[32].mxu1  ;;  %v2294_v19 = vrot.slane %v2292_v1, 4 }
 0x14a   : > { %v1675_v20 = vrot.slane %v1673_v5, 7  ;;  %v9103_v22 = vpop.f32.mrb[33].mxu1  ;;  %5825 = vmatmul.mubr.bf16.vlgmr.msra.gmra.mrb[80].mxu1 %v8533_v52  ;;  %v2301_v4 = vshll.u32 %v2220_v0, 16  ;;  %v2305_v24 = vshrl.u32 %v2220_v0, 16  ;;  %v2297_v52 = vrot.slane %v2295_v26, 5  ;;  %9406 = vmatprep.subr.bf16.mxu0 %v9906_v38  ;;  %v10752_v5 = vpop.f32.mrb[32].mxu0 }
 0x14b   : > { %v1681_v27 = vshrl.u32 %v8858_v10, 16  ;;  %v1684_v30 = vshll.u32 %v8858_v10, 16  ;;  %v1405_v31 = vmax.f32 %v1373_v13, 0.0  ;;  %v1374_v33 = vadd.f32 %v10648_v14, %v1335_v15  ;;  %v9105_v16 = vpop.f32.mrb[34].mxu1  ;;  %v1978_v58 = vld [vmem:[#allocation2 + $0x2c] sm:$0x1] }
 0x14c   : > { %v1678_v39 = vor.u32 %v1676_v45, %v1675_v20  ;;  %v1679_v42 = vrot.slane %v1675_v20, 4  ;;  %v9104_v43 = vadd.f32 %v9103_v22, %v9102_v2  ;;  %v9106_v47 = vpop.f32.mrb[35].mxu1  ;;  %v2298_v61 = vor.u32 %v2297_v52, %v2294_v19  ;;  %v9907_v45 = vld [vmem:[%s13431_s4 + $0x120] sm:$0xff]   ;;  %v2221_v38 = vld [vmem:[#allocation2 + $0x14] sm:$0x1] }
 0x14d   : > { %v1683_v50 = vrot.slane %v1681_v27, 7  ;;  %v8859_v51 = vpack.c.bf16 %v1405_v31, %v1405_v31  ;;  %v1406_v53 = vmax.f32 %v1374_v33, 0.0  ;;  %v9107_v55 = vadd.f32 %v9106_v47, %v9105_v16  ;;  %v2734_v27 = vld [vmem:[#allocation2 + $0xc] sm:$0xe]  ;;  %9407 = vmatpush3.bf16.msra.mxu0 %v9907_v45 }
 0x14e   : > { %v1975_v56 = vsel %vm10683_vm13, %v1678_v39, %v1974_v8  ;;  %v1227_v46 = vadd.f32 %v9104_v43, %v10658_v21  ;;  %v10748_v63 = vrot.slane %v2301_v4, 5  ;;  %v1981_v8 = vld [vmem:[#allocation2 + $0x30] sm:$0xf]  ;;  %v2299_v2 = vrot.slane %v2298_v61, 4  ;;  %v10765_v39 = vpop.f32.mrb[33].mxu0 }
 0x14f   : > { %1976 = vst [vmem:[#allocation2 + $0x24] sm:$0xf] %v1975_v56  ;;  %v1686_v0 = vor.u32 %v1684_v30, %v1683_v50  ;;  %v1688_v1 = vrot.slane %v1683_v50, 4  ;;  %v1690_v3 = vshrl.u32 %v8859_v51, 16  ;;  %v1693_v62 = vshll.u32 %v8859_v51, 16 }
 0x150   : > { %v8860_v10 = vpack.c.bf16 %v1406_v53, %v1406_v53  ;;  %v1336_v21 = vmul.f32 %v10643_v7, %v1227_v46  ;;  %v1230_v13 = vadd.f32 %v9107_v55, %v10664_v32  ;;  %v9884_v15 = vld [vmem:[#allocation2 + $0x18] sm:$0xff]   ;;  %v2307_v4 = vrot.slane %v2305_v24, 4  ;;  %v2735_v56 = vld [vmem:[#allocation2 + $0x10] sm:$0xf]  ;;  %v10772_v46 = vpop.f32.mrb[34].mxu0 }
 0x151   : > { %v1687_v19 = vsel %vm10694_vm14, %v1679_v42, %v1686_v0  ;;  %v1979_v20 = vsel %vm10475_vm2, %v1688_v1, %v1978_v58  ;;  %v1692_v22 = vrot.slane %v1690_v3, 7  ;;  %v9108_v26 = vpop.f32.mrb[36].mxu1  ;;  %5832 = vmatprep.mubr.bf16.mxu1 %v9884_v15  ;;  %v2304_v24 = vsel %vm10548_vm7, %v2299_v2, %v10748_v63  ;;  %v1985_v0 = vld [vmem:[#allocation2 + $0x38] sm:$0x1]  ;;  %v10777_v45 = vpop.f32.mrb[35].mxu0 }
 0x152   : > { %1977 = vst [vmem:[#allocation2 + $0x28] sm:$0xf] %v1687_v19  ;;  %1980 = vst [vmem:[#allocation2 + $0x2c] sm:$0x1] %v1979_v20  ;;  %v1698_v30 = vshrl.u32 %v8860_v10, 16  ;;  %v1701_v31 = vshll.u32 %v8860_v10, 16  ;;  %v1375_v33 = vadd.f32 %v10648_v14, %v1336_v21  ;;  %v1337_v32 = vmul.f32 %v10643_v7, %v1230_v13 }
 0x153   : > { %v9109_v16 = vpop.f32.mrb[37].mxu1  ;;  %v1695_v42 = vor.u32 %v1693_v62, %v1692_v22  ;;  %v1696_v43 = vrot.slane %v1692_v22, 4  ;;  %v2308_v55 = vor.u32 %v2307_v4, %v10748_v63  ;;  %v2311_v3 = vshll.u32 %v2221_v38, 16  ;;  %v2736_v20 = vld [vmem:[#allocation2 + $0x14] sm:$0x1] }
 0x154   : > { %v9110_v47 = vadd.f32 %v9109_v16, %v9108_v26  ;;  %v9111_v52 = vpop.f32.mrb[38].mxu1  ;;  %v1700_v50 = vrot.slane %v1698_v30, 7  ;;  %v1407_v51 = vmax.f32 %v1375_v33, 0.0  ;;  %v1376_v53 = vadd.f32 %v10648_v14, %v1337_v32  ;;  %v10780_v26 = vpop.f32.mrb[36].mxu0 }
 0x155   : > { %v9112_v58 = vpop.f32.mrb[39].mxu1  ;;  %v1982_v61 = vsel %vm10683_vm13, %v1695_v42, %v1981_v8  ;;  %v8518_v62 = vrot.slane %v2734_v27, 9  ;;  %v2309_v2 = vrot.slane %v2308_v55, 4  ;;  %v2313_v19 = vrot.slane %v2311_v3, 5  ;;  %v10786_v30 = vpop.f32.mrb[37].mxu0 }
 0x156   : > { %v1235_v1 = vadd.f32 %v9110_v47, %v10672_v28  ;;  %1983 = vst [vmem:[#allocation2 + $0x30] sm:$0xf] %v1982_v61  ;;  %v1703_v10 = vor.u32 %v1701_v31, %v1700_v50  ;;  %v1705_v21 = vrot.slane %v1700_v50, 4  ;;  %v8861_v13 = vpack.c.bf16 %v1407_v51, %v1407_v51  ;;  %v1988_v31 = vld [vmem:[#allocation2 + $0x3c] sm:$0xf] }
 0x157   : > { %v1408_v15 = vmax.f32 %v1376_v53, 0.0  ;;  %v2839_v22 = vrot.slane %v2735_v56, 5  ;;  %v2314_v16 = vsel %vm10548_vm7, %v2309_v2, %v2313_v19  ;;  %v2842_v51 = vrot.slane %v2736_v20, 5  ;;  %v9885_v53 = vld [vmem:[#allocation2 + $0xc] sm:$0xff]   ;;  %v1992_v19 = vld [vmem:[#allocation2 + $0x44] sm:$0x1] }
 0x158   : > { %v1338_v63 = vmul.f32 %v10643_v7, %v1235_v1  ;;  %v1704_v28 = vsel %vm10694_vm14, %v1696_v43, %v1703_v10  ;;  %v1986_v8 = vsel %vm10475_vm2, %v1705_v21, %v1985_v0  ;;  %v1707_v4 = vshrl.u32 %v8861_v13, 16  ;;  %v2222_v10 = vld [vmem:[#allocation2 + $0x18] sm:$0xf] }
 0x159   : > { %v1710_v27 = vshll.u32 %v8861_v13, 16  ;;  %1984 = vst [vmem:[#allocation2 + $0x34] sm:$0xf] %v1704_v28  ;;  %1987 = vst [vmem:[#allocation2 + $0x38] sm:$0x1] %v1986_v8  ;;  %v8862_v33 = vpack.c.bf16 %v1408_v15, %v1408_v15  ;;  %v2840_v38 = vsel %vm10677_vm12, %v8518_v62, %v2839_v22  ;;  %v9114_v42 = vpop.f32.mrb[40].mxu1  ;;  %v8502_v47 = vcombine.low %v2304_v24, %v2314_v16 }
 0x15a   : > { %v1377_v32 = vadd.f32 %v10648_v14, %v1338_v63  ;;  %v1709_v43 = vrot.slane %v1707_v4, 7  ;;  %v2841_v50 = vrot.slane %v2839_v22, 4  ;;  %v9115_v55 = vpop.f32.mrb[41].mxu1  ;;  %v9113_v1 = vadd.f32 %v9112_v58, %v9111_v52  ;;  %v9886_v63 = vld [vmem:[#allocation2 + $0x24] sm:$0xff]   ;;  %v2223_v8 = vld [vmem:[#allocation2 + $0x1c] sm:$0xf] }
 0x15b   : > { %v1715_v56 = vshrl.u32 %v8862_v33, 16  ;;  %v1718_v61 = vshll.u32 %v8862_v33, 16  ;;  %v10793_v3 = vpop.f32.mrb[42].mxu1  ;;  %5671 = vmatprep.mubr.bf16.mxu0 %v8502_v47  ;;  %v9116_v15 = vadd.f32 %v9115_v55, %v9114_v42  ;;  %v2316_v4 = vshrl.u32 %v2222_v10, 16  ;;  %v2224_v47 = vld [vmem:[#allocation2 + $0x20] sm:$0x1] }
 0x15c   : > { %v1409_v0 = vmax.f32 %v1377_v32, 0.0  ;;  %v1712_v21 = vor.u32 %v1710_v27, %v1709_v43  ;;  %v1713_v13 = vrot.slane %v1709_v43, 4  ;;  %v2843_v62 = vsel %vm10677_vm12, %v2841_v50, %v2842_v51  ;;  %v10797_v24 = vpop.f32.mrb[43].mxu1  ;;  %5672 = vmatmul.mubr.bf16.gmra.mrb[52].mxu0 %v9885_v53  ;;  %v10803_v43 = vpop.f32.mrb[38].mxu0  ;;  %v1995_v55 = vld [vmem:[#allocation2 + $0x48] sm:$0xf] }
 0x15d   : > { %v1717_v2 = vrot.slane %v1715_v56, 7  ;;  %v8534_v22 = vcombine.low %v2840_v38, %v2843_v62  ;;  %v1238_v28 = vadd.f32 %v9113_v1, %v10688_v25  ;;  %v1243_v58 = vadd.f32 %v9116_v15, %v10716_v11  ;;  %v2738_v15 = vld [vmem:[#allocation2 + $0x1c] sm:$0xf] }
 0x15e   : > { %v8863_v20 = vpack.c.bf16 %v1409_v0, %v1409_v0  ;;  %v1989_v52 = vsel %vm10683_vm13, %v1712_v21, %v1988_v31  ;;  %v2319_v27 = vshll.u32 %v2222_v10, 16  ;;  %v2318_v31 = vrot.slane %v2316_v4, 4  ;;  %v10815_v0 = vpop.f32.mrb[39].mxu0 }
 0x15f   : > { %1990 = vst [vmem:[#allocation2 + $0x3c] sm:$0xf] %v1989_v52  ;;  %v1720_v33 = vor.u32 %v1718_v61, %v1717_v2  ;;  %v1722_v32 = vrot.slane %v1717_v2, 4  ;;  %5833 = vmatmul.mubr.bf16.gmra.mrb[84].mxu1 %v8534_v22  ;;  %v1339_v38 = vmul.f32 %v10643_v7, %v1238_v28  ;;  %v1340_v25 = vmul.f32 %v10643_v7, %v1243_v58  ;;  %v2739_v28 = vld [vmem:[#allocation2 + $0x20] sm:$0x1] }
 0x160   : > { %v1724_v16 = vshrl.u32 %v8863_v20, 16  ;;  %v1727_v42 = vshll.u32 %v8863_v20, 16  ;;  %5840 = vmatprep.mubr.bf16.mxu1 %v9886_v63  ;;  %v2321_v50 = vrot.slane %v2319_v27, 5  ;;  %v2325_v56 = vshll.u32 %v2223_v8, 16 }
 0x161   : > { %v1721_v11 = vsel %vm10694_vm14, %v1713_v13, %v1720_v33  ;;  %v1993_v51 = vsel %vm10475_vm2, %v1722_v32, %v1992_v19  ;;  %v10813_v61 = vpop.f32.mrb[44].mxu1  ;;  %v1378_v1 = vadd.f32 %v10648_v14, %v1339_v38  ;;  %v1379_v10 = vadd.f32 %v10648_v14, %v1340_v25  ;;  %v2737_v13 = vld [vmem:[#allocation2 + $0x18] sm:$0xe] }
 0x162   : > { %v10811_v53 = vrot.slane %v1724_v16, 7  ;;  %1991 = vst [vmem:[#allocation2 + $0x40] sm:$0xf] %v1721_v11  ;;  %1994 = vst [vmem:[#allocation2 + $0x44] sm:$0x1] %v1993_v51  ;;  %v2322_v21 = vor.u32 %v2321_v50, %v2318_v31  ;;  %v2329_v62 = vshrl.u32 %v2223_v8, 16 }
 0x163   : > { %v9121_v63 = vpop.f32.mrb[45].mxu1  ;;  %v10821_v20 = vrot.slane %v2325_v56, 5  ;;  %v2335_v22 = vshll.u32 %v2224_v47, 16  ;;  %v1410_v58 = vmax.f32 %v1378_v1, 0.0  ;;  %v1411_v4 = vmax.f32 %v1379_v10, 0.0  ;;  %v10827_v8 = vpop.f32.mrb[40].mxu0 }
 0x164   : > { %v1729_v2 = vor.u32 %v1727_v42, %v10811_v53  ;;  %v10823_v52 = vpop.f32.mrb[46].mxu1  ;;  %v2323_v27 = vrot.slane %v2322_v21, 4  ;;  %v2331_v33 = vrot.slane %v2329_v62, 4  ;;  %v8519_v38 = vrot.slane %v2737_v13, 9  ;;  %v10831_v31 = vpop.f32.mrb[41].mxu0  ;;  %v9912_v13 = vld [vmem:[%s13431_s4 + $0x168] sm:$0xff]  }
 0x165   : > { %v10825_v32 = vpop.f32.mrb[47].mxu1  ;;  %v2337_v42 = vrot.slane %v2335_v22, 5  ;;  %v2846_v25 = vrot.slane %v2738_v15, 5  ;;  %v8864_v47 = vpack.c.bf16 %v1410_v58, %v1410_v58  ;;  %v8865_v50 = vpack.c.bf16 %v1411_v4, %v1411_v4  ;;  %v10837_v56 = vld [vmem:[#allocation2 + $0x24] sm:$0xf]  ;;  %v10843_v62 = vpop.f32.mrb[42].mxu0  ;;  %9408 = vmatprep.subr.bf16.mxu0 %v9912_v13 }
 0x166   : > { %v1996_v16 = vsel %vm10683_vm13, %v1729_v2, %v1995_v55  ;;  %v2328_v11 = vsel %vm10548_vm7, %v2323_v27, %v10821_v20  ;;  %v2332_v51 = vor.u32 %v2331_v33, %v10821_v20  ;;  %v2849_v10 = vrot.slane %v2739_v28, 5  ;;  %v10848_v58 = vpop.f32.mrb[43].mxu0  ;;  %v9913_v4 = vld [vmem:[%s13431_s4 + $0x128] sm:$0xff]   ;;  %v1999_v28 = vld [vmem:[#allocation2 + $0x50] sm:$0x1] }
 0x167   : > { %1997 = vst [vmem:[#allocation2 + $0x48] sm:$0xf] %v1996_v16  ;;  %v2847_v1 = vsel %vm10677_vm12, %v8519_v38, %v2846_v25  ;;  %v2848_v55 = vrot.slane %v2846_v25, 4  ;;  %v9119_v21 = vadd.f32 %v10797_v24, %v10793_v3  ;;  %v1732_v15 = vshrl.u32 %v8864_v47, 16  ;;  %v9890_v16 = vld [vmem:[#allocation2 + $0x30] sm:$0xff]   ;;  %9409 = vmatpush3.bf16.msra.mxu0 %v9913_v4  ;;  %v9887_v4 = vld [vmem:[#allocation2 + $0x18] sm:$0xff]  }
 0x168   : > { %v1735_v2 = vshll.u32 %v8864_v47, 16  ;;  %v1741_v22 = vshrl.u32 %v8865_v50, 16  ;;  %v1744_v20 = vshll.u32 %v8865_v50, 16  ;;  %v2333_v27 = vrot.slane %v2332_v51, 4  ;;  %v2002_v50 = vld [vmem:[#allocation2 + $0x54] sm:$0xf] }
 0x169   : > { %v2850_v3 = vsel %vm10677_vm12, %v2848_v55, %v2849_v10  ;;  %v1246_v24 = vadd.f32 %v9119_v21, %v10718_v12  ;;  %v9010_v33 = vadd.f32 %v10738_v35, %v10727_v60  ;;  %v10858_v38 = vpop.f32.mrb[48].mxu1  ;;  %v1734_v25 = vrot.slane %v1732_v15, 7  ;;  %v10868_v55 = vpop.f32.mrb[44].mxu0  ;;  %v2226_v10 = vld [vmem:[#allocation2 + $0x28] sm:$0xf] }
 0x16a   : > { %v10860_v47 = vrot.slane %v1741_v22, 7  ;;  %v8535_v49 = vcombine.low %v2847_v1, %v2850_v3  ;;  %v10864_v51 = vadd.f32 %v10750_v57, %v10743_v48  ;;  %v10866_v19 = vpop.f32.mrb[49].mxu1  ;;  %v2338_v12 = vsel %vm10548_vm7, %v2333_v27, %v2337_v42  ;;  %v2227_v21 = vld [vmem:[#allocation2 + $0x2c] sm:$0x1]  ;;  %v2740_v13 = vld [vmem:[#allocation2 + $0x24] sm:$0xe] }
 0x16b   : > { %v1341_v60 = vmul.f32 %v10643_v7, %v1246_v24  ;;  %v9122_v35 = vadd.f32 %v9121_v63, %v10813_v61  ;;  %v2340_v1 = vshrl.u32 %v10837_v56, 16  ;;  %v10875_v15 = vpop.f32.mrb[50].mxu1  ;;  %v1737_v48 = vor.u32 %v1735_v2, %v1734_v25  ;;  %v2741_v3 = vld [vmem:[#allocation2 + $0x28] sm:$0xf]  ;;  %v10881_v27 = vpop.f32.mrb[45].mxu0 }
 0x16c   : > { %v1739_v57 = vrot.slane %v1734_v25, 4  ;;  %v1746_v22 = vor.u32 %v1744_v20, %v10860_v47  ;;  %5841 = vmatmul.mubr.bf16.gmra.mrb[88].mxu1 %v8535_v49  ;;  %v10879_v42 = vpop.f32.mrb[51].mxu1  ;;  %v8503_v61 = vcombine.low %v2328_v11, %v2338_v12  ;;  %v10884_v54 = vpop.f32.mrb[46].mxu0  ;;  %v13501_v2 = vrot.slane %v10811_v53, 4 }
 0x16d   : > { %v1380_v63 = vadd.f32 %v10648_v14, %v1341_v60  ;;  %v1251_v24 = vadd.f32 %v9122_v35, %v9010_v33  ;;  %5848 = vmatprep.mubr.bf16.mxu1 %v9890_v16  ;;  %v2342_v59 = vrot.slane %v2340_v1, 4  ;;  %v2343_v11 = vshll.u32 %v10837_v56, 16  ;;  %v10895_v12 = vpop.f32.mrb[47].mxu0 }
 0x16e   : > { %v1738_v20 = vsel %vm10694_vm14, %v13501_v2, %v1737_v48  ;;  %v2000_v49 = vsel %vm10475_vm2, %v1739_v57, %v1999_v28  ;;  %v2003_v25 = vsel %vm10683_vm13, %v1746_v22, %v2002_v50  ;;  %5679 = vmatprep.mubr.bf16.mxu0 %v8503_v61  ;;  %v2349_v16 = vshll.u32 %v2226_v10, 16  ;;  %v9917_v28 = vld [vmem:[%s13431_s4 + $0x1c0] sm:$0xff]   ;;  %v2742_v61 = vld [vmem:[#allocation2 + $0x2c] sm:$0x1] }
 0x16f   : > { %1998 = vst [vmem:[#allocation2 + $0x4c] sm:$0xf] %v1738_v20  ;;  %2001 = vst [vmem:[#allocation2 + $0x50] sm:$0x1] %v2000_v49  ;;  %v1412_v33 = vmax.f32 %v1380_v63, 0.0  ;;  %v1342_v53 = vmul.f32 %v10643_v7, %v1251_v24  ;;  %v2353_v60 = vshrl.u32 %v2226_v10, 16  ;;  %5680 = vmatmul.mubr.bf16.gmra.mrb[56].mxu0 %v9887_v4  ;;  %9510 = vmatprep.subr.bf16.mxu1 %v9917_v28 }
 0x170   : > { %2004 = vst [vmem:[#allocation2 + $0x54] sm:$0xf] %v2003_v25  ;;  %v2345_v50 = vrot.slane %v2343_v11, 5  ;;  %v2359_v35 = vshll.u32 %v2227_v21, 16  ;;  %v8520_v1 = vrot.slane %v2740_v13, 9  ;;  %v2853_v56 = vrot.slane %v2741_v3, 5 }
 0x171   : > { %v8866_v48 = vpack.c.bf16 %v1412_v33, %v1412_v33  ;;  %v1381_v57 = vadd.f32 %v10648_v14, %v1342_v53  ;;  %v2351_v22 = vrot.slane %v2349_v16, 5  ;;  %v2355_v2 = vrot.slane %v2353_v60, 4  ;;  %v10902_v63 = vpop.f32.mrb[52].mxu1  ;;  %v9919_v10 = vld [vmem:[%s13431_s4 + $0x170] sm:$0xff]   ;;  %v9920_v3 = vld [vmem:[%s13431_s4 + $0x180] sm:$0xff]   ;;  %v9922_v16 = vld [vmem:[%s13431_s4 + $0x1c8] sm:$0xff]  }
 0x172   : > { %v2346_v24 = vor.u32 %v2345_v50, %v2342_v59  ;;  %v2361_v20 = vrot.slane %v2359_v35, 5  ;;  %v2854_v21 = vsel %vm10677_vm12, %v8520_v1, %v2853_v56  ;;  %v2855_v13 = vrot.slane %v2853_v56, 4  ;;  %v10909_v4 = vpop.f32.mrb[53].mxu1  ;;  %9410 = vmatprep.subr.bf16.mxu0 %v9919_v10  ;;  %v9921_v59 = vld [vmem:[%s13431_s4 + $0x130] sm:$0xff]   ;;  %9511 = vmatpush3.bf16.msra.mxu1 %v9920_v3  ;;  %v9923_v56 = vld [vmem:[%s13431_s4 + $0x188] sm:$0xff]  }
 0x173   : > { %v1749_v49 = vshrl.u32 %v8866_v48, 16  ;;  %v1752_v25 = vshll.u32 %v8866_v48, 16  ;;  %v1413_v11 = vmax.f32 %v1381_v57, 0.0  ;;  %v2356_v33 = vor.u32 %v2355_v2, %v2351_v22  ;;  %v10914_v53 = vpop.f32.mrb[54].mxu1  ;;  %9411 = vmatpush3.bf16.msra.mxu0 %v9921_v59  ;;  %9512 = vmatprep.subr.bf16.mxu1 %v9922_v16  ;;  %v2009_v59 = vld [vmem:[#allocation2 + $0x60] sm:$0xf] }
 0x174   : > { %v2347_v60 = vrot.slane %v2346_v24, 4  ;;  %v2856_v28 = vrot.slane %v2742_v61, 5  ;;  %v9125_v50 = vadd.f32 %v10825_v32, %v10823_v52  ;;  %v9016_v35 = vadd.f32 %v10765_v39, %v10752_v5  ;;  %v10926_v1 = vpop.f32.mrb[55].mxu1  ;;  %v9925_v5 = vld [vmem:[%s13431_s4 + $0x1d0] sm:$0xff]   ;;  %v2006_v39 = vld [vmem:[#allocation2 + $0x5c] sm:$0x1] }
 0x175   : > { %v1751_v48 = vrot.slane %v1749_v49, 7  ;;  %v8867_v57 = vpack.c.bf16 %v1413_v11, %v1413_v11  ;;  %v2357_v2 = vrot.slane %v2356_v33, 4  ;;  %v10933_v10 = vadd.f32 %v10777_v45, %v10772_v46  ;;  %v9892_v11 = vld [vmem:[#allocation2 + $0x3c] sm:$0xff]   ;;  %v2228_v33 = vld [vmem:[#allocation2 + $0x30] sm:$0xf] }
 0x176   : > { %v2352_v52 = vsel %vm10548_vm7, %v2347_v60, %v2351_v22  ;;  %v2857_v32 = vsel %vm10677_vm12, %v2855_v13, %v2856_v28  ;;  %v1254_v61 = vadd.f32 %v9125_v50, %v10864_v51  ;;  %v9128_v24 = vadd.f32 %v10866_v19, %v10858_v38  ;;  %v2229_v13 = vld [vmem:[#allocation2 + $0x34] sm:$0xf]  ;;  %v2230_v28 = vld [vmem:[#allocation2 + $0x38] sm:$0x1]  ;;  %9513 = vmatpush3.bf16.msra.mxu1 %v9923_v56  ;;  %v2743_v50 = vld [vmem:[#allocation2 + $0x30] sm:$0xe] }
 0x177   : > { %v1754_v46 = vor.u32 %v1752_v25, %v1751_v48  ;;  %v1756_v45 = vrot.slane %v1751_v48, 4  ;;  %v1758_v3 = vshrl.u32 %v8867_v57, 16  ;;  %v1761_v49 = vshll.u32 %v8867_v57, 16  ;;  %v9927_v19 = vld [vmem:[%s13431_s4 + $0x190] sm:$0xff]   ;;  %9514 = vmatprep.subr.bf16.mxu1 %v9925_v5  ;;  %v9928_v56 = vld [vmem:[%s13431_s4 + $0x1d8] sm:$0xff]   ;;  %v9891_v48 = vld [vmem:[#allocation2 + $0x24] sm:$0xff]  }
 0x178   : > { %v2362_v16 = vsel %vm10548_vm7, %v2357_v2, %v2361_v20  ;;  %v8536_v40 = vcombine.low %v2854_v21, %v2857_v32  ;;  %v1343_v22 = vmul.f32 %v10643_v7, %v1254_v61  ;;  %v1259_v60 = vadd.f32 %v9128_v24, %v9016_v35  ;;  %v2744_v32 = vld [vmem:[#allocation2 + $0x34] sm:$0xf]  ;;  %v9934_v24 = vld [vmem:[%s13431_s4 + $0x1a0] sm:$0xff]   ;;  %v9896_v37 = vld [vmem:[#allocation2 + $0x48] sm:$0xff]  }
 0x179   : > { %v13502_v38 = vrot.slane %v10860_v47, 4  ;;  %v2007_v25 = vsel %vm10475_vm2, %v1756_v45, %v2006_v39  ;;  %v10957_v20 = vrot.slane %v1758_v3, 7  ;;  %v8504_v21 = vcombine.low %v2352_v52, %v2362_v16  ;;  %v10959_v35 = vpop.f32.mrb[56].mxu1  ;;  %v2745_v52 = vld [vmem:[#allocation2 + $0x38] sm:$0x1] }
 0x17a   : > { %2008 = vst [vmem:[#allocation2 + $0x5c] sm:$0x1] %v2007_v25  ;;  %5849 = vmatmul.mubr.bf16.gmra.mrb[92].mxu1 %v8536_v40  ;;  %v1382_v47 = vadd.f32 %v10648_v14, %v1343_v22  ;;  %v1344_v57 = vmul.f32 %v10643_v7, %v1259_v60  ;;  %v2364_v2 = vshrl.u32 %v2228_v33, 16  ;;  %v2367_v39 = vshll.u32 %v2228_v33, 16  ;;  %v10966_v61 = vpop.f32.mrb[57].mxu1  ;;  %v9933_v22 = vld [vmem:[%s13431_s4 + $0x178] sm:$0xff]  }
 0x17b   : > { %v1755_v51 = vsel %vm10694_vm14, %v13502_v38, %v1754_v46  ;;  %v1763_v5 = vor.u32 %v1761_v49, %v10957_v20  ;;  %5687 = vmatprep.mubr.bf16.mxu0 %v8504_v21  ;;  %5856 = vmatprep.mubr.bf16.mxu1 %v9892_v11  ;;  %v2373_v46 = vshll.u32 %v2229_v13, 16  ;;  %v2377_v45 = vshrl.u32 %v2229_v13, 16  ;;  %v10970_v40 = vpop.f32.mrb[58].mxu1  ;;  %v10975_v7 = vld [vmem:[%s13430_s3] ss:$0 sm:$0xff]  ;;  %v9929_v11 = vld [vmem:[%s13431_s4 + $0x198] sm:$0xff]  }
 0x17c   : > { %2005 = vst [vmem:[#allocation2 + $0x58] sm:$0xf] %v1755_v51  ;;  %v1414_v14 = vmax.f32 %v1382_v47, 0.0  ;;  %5688 = vmatmul.mubr.bf16.gmra.mrb[60].mxu0 %v9891_v48  ;;  %v1383_v3 = vadd.f32 %v10975_v7, %v1344_v57  ;;  %v2366_v33 = vrot.slane %v2364_v2, 4  ;;  %v2369_v16 = vrot.slane %v2367_v39, 5  ;;  %v10978_v49 = vpop.f32.mrb[59].mxu1  ;;  %9515 = vmatpush3.bf16.msra.mxu1 %v9927_v19 }
 0x17d   : > { %v2010_v60 = vsel %vm10683_vm13, %v1763_v5, %v2009_v59  ;;  %v2375_v13 = vrot.slane %v2373_v46, 5  ;;  %v2379_v38 = vrot.slane %v2377_v45, 4  ;;  %v2383_v51 = vshll.u32 %v2230_v28, 16  ;;  %9516 = vmatprep.subr.bf16.mxu1 %v9928_v56  ;;  %v9931_v25 = vld [vmem:[%s13431_s4 + $0x1e0] sm:$0xff]   ;;  %v9935_v19 = vld [vmem:[%s13431_s4 + $0x138] sm:$0xff]   ;;  %9412 = vmatprep.subr.bf16.mxu0 %v9933_v22 }
 0x17e   : > { %2011 = vst [vmem:[#allocation2 + $0x60] sm:$0xf] %v2010_v60  ;;  %v8868_v21 = vpack.c.bf16 %v1414_v14, %v1414_v14  ;;  %v1415_v47 = vmax.f32 %v1383_v3, 0.0  ;;  %v2370_v48 = vor.u32 %v2369_v16, %v2366_v33  ;;  %v8521_v57 = vrot.slane %v2743_v50, 9  ;;  %9413 = vmatpush3.bf16.msra.mxu0 %v9935_v19  ;;  %v2013_v60 = vld [vmem:[#allocation2 + $0x68] sm:$0x1] }
 0x17f   : > { %v2380_v2 = vor.u32 %v2379_v38, %v2375_v13  ;;  %v2385_v59 = vrot.slane %v2383_v51, 5  ;;  %v2860_v39 = vrot.slane %v2744_v32, 5  ;;  %v2863_v5 = vrot.slane %v2745_v52, 5  ;;  %v9936_v33 = vld [vmem:[%s13431_s4 + $0x1e8] sm:$0xff]   ;;  %v2231_v51 = vld [vmem:[#allocation2 + $0x3c] sm:$0xf] }
 0x180   : > { %v1766_v28 = vshrl.u32 %v8868_v21, 16  ;;  %v1769_v56 = vshll.u32 %v8868_v21, 16  ;;  %v8869_v46 = vpack.c.bf16 %v1415_v47, %v1415_v47  ;;  %v2371_v45 = vrot.slane %v2370_v48, 4  ;;  %9517 = vmatpush3.bf16.msra.mxu1 %v9929_v11  ;;  %v2016_v21 = vld [vmem:[#allocation2 + $0x6c] sm:$0xf] }
 0x181   : > { %v2381_v14 = vrot.slane %v2380_v2, 4  ;;  %v2861_v50 = vsel %vm10677_vm12, %v8521_v57, %v2860_v39  ;;  %v2862_v3 = vrot.slane %v2860_v39, 4  ;;  %v9131_v32 = vadd.f32 %v10879_v42, %v10875_v15  ;;  %v11001_v52 = vpop.f32.mrb[60].mxu1  ;;  %9518 = vmatprep.subr.bf16.mxu1 %v9931_v25  ;;  %v2232_v48 = vld [vmem:[#allocation2 + $0x40] sm:$0xf] }
 0x182   : > { %v1768_v16 = vrot.slane %v1766_v28, 7  ;;  %v1775_v11 = vshrl.u32 %v8869_v46, 16  ;;  %v1778_v22 = vshll.u32 %v8869_v46, 16  ;;  %v2376_v38 = vsel %vm10548_vm7, %v2371_v45, %v2375_v13  ;;  %v11008_v19 = vpop.f32.mrb[61].mxu1  ;;  %v2233_v57 = vld [vmem:[#allocation2 + $0x44] sm:$0x1] }
 0x183   : > { %v2386_v15 = vsel %vm10548_vm7, %v2381_v14, %v2385_v59  ;;  %v2864_v42 = vsel %vm10677_vm12, %v2862_v3, %v2863_v5  ;;  %v1262_v25 = vadd.f32 %v9131_v32, %v10933_v10  ;;  %v9022_v47 = vadd.f32 %v10786_v30, %v10780_v26  ;;  %v11017_v2 = vpop.f32.mrb[62].mxu1  ;;  %v9893_v45 = vld [vmem:[#allocation2 + $0x30] sm:$0xff]   ;;  %v9937_v10 = vld [vmem:[%s13431_s4 + $0x1a8] sm:$0xff]   ;;  %v11029_v26 = vld [vmem:[%s13429_s2] ss:$0 sm:$0xff] }
 0x184   : > { %v1771_v13 = vor.u32 %v1769_v56, %v1768_v16  ;;  %v1773_v39 = vrot.slane %v1768_v16, 4  ;;  %v11019_v28 = vrot.slane %v1775_v11, 7  ;;  %v8505_v46 = vcombine.low %v2376_v38, %v2386_v15  ;;  %v11021_v59 = vpop.f32.mrb[63].mxu1  ;;  %9519 = vmatpush3.bf16.msra.mxu1 %v9934_v24  ;;  %v2746_v3 = vld [vmem:[#allocation2 + $0x3c] sm:$0xe]  ;;  %v9939_v24 = vld [vmem:[%s13431_s4 + $0x1f0] sm:$0xff]  }
 0x185   : > { %v8537_v5 = vcombine.low %v2861_v50, %v2864_v42  ;;  %v1345_v30 = vmul.f32 %v11029_v26, %v1262_v25  ;;  %v9025_v56 = vadd.f32 %v10815_v0, %v10803_v43  ;;  %v9134_v14 = vadd.f32 %v10909_v4, %v10902_v63  ;;  %9520 = vmatprep.subr.bf16.mxu1 %v9936_v33  ;;  %v2747_v0 = vld [vmem:[#allocation2 + $0x40] sm:$0xf]  ;;  %v2748_v38 = vld [vmem:[#allocation2 + $0x44] sm:$0x1] }
 0x186   : > { %v13503_v50 = vrot.slane %v10957_v20, 4  ;;  %v2014_v16 = vsel %vm10475_vm2, %v1773_v39, %v2013_v60  ;;  %v1780_v11 = vor.u32 %v1778_v22, %v11019_v28  ;;  %v1781_v43 = vrot.slane %v11019_v28, 4  ;;  %5695 = vmatprep.mubr.bf16.mxu0 %v8505_v46  ;;  %v9941_v60 = vld [vmem:[%s13431_s4 + $0x1b0] sm:$0xff]  }
 0x187   : > { %2015 = vst [vmem:[#allocation2 + $0x68] sm:$0x1] %v2014_v16  ;;  %5857 = vmatmul.mubr.bf16.gmra.mrb[96].mxu1 %v8537_v5  ;;  %v1384_v63 = vadd.f32 %v10975_v7, %v1345_v30  ;;  %5696 = vmatmul.mubr.bf16.gmra.mrb[64].mxu0 %v9893_v45  ;;  %v1267_v4 = vadd.f32 %v9134_v14, %v9022_v47  ;;  %v2388_v20 = vshrl.u32 %v2231_v51, 16  ;;  %v2391_v33 = vshll.u32 %v2231_v51, 16  ;;  %v2236_v28 = vld [vmem:[#allocation2 + $0x50] sm:$0x1] }
 0x188   : > { %v1772_v32 = vsel %vm10694_vm14, %v13503_v50, %v1771_v13  ;;  %v2017_v22 = vsel %vm10683_vm13, %v1780_v11, %v2016_v21  ;;  %5864 = vmatprep.mubr.bf16.mxu1 %v9896_v37  ;;  %v2397_v15 = vshll.u32 %v2232_v48, 16  ;;  %v2401_v42 = vshrl.u32 %v2232_v48, 16  ;;  %9521 = vmatpush3.bf16.msra.mxu1 %v9937_v10  ;;  %v9942_v13 = vld [vmem:[%s13431_s4 + $0x1f8] sm:$0xff]  }
 0x189   : > { %2012 = vst [vmem:[#allocation2 + $0x64] sm:$0xf] %v1772_v32  ;;  %v2407_v25 = vshll.u32 %v2233_v57, 16  ;;  %2018 = vst [vmem:[#allocation2 + $0x6c] sm:$0xf] %v2017_v22  ;;  %v1416_v47 = vmax.f32 %v1384_v63, 0.0  ;;  %v1346_v51 = vmul.f32 %v11029_v26, %v1267_v4  ;;  %9522 = vmatprep.subr.bf16.mxu1 %v9939_v24  ;;  %v9137_v63 = vadd.f32 %v10926_v1, %v10914_v53 }
 0x18a   : > { %v2390_v39 = vrot.slane %v2388_v20, 4  ;;  %v2393_v46 = vrot.slane %v2391_v33, 5  ;;  %v11057_v45 = vpop.f32.mrb[64].mxu1  ;;  %v2399_v5 = vrot.slane %v2397_v15, 5  ;;  %v2403_v21 = vrot.slane %v2401_v42, 4 }
 0x18b   : > { %v2409_v37 = vrot.slane %v2407_v25, 5  ;;  %v8522_v30 = vrot.slane %v2746_v3, 9  ;;  %v11059_v48 = vpop.f32.mrb[65].mxu1  ;;  %v8870_v57 = vpack.c.bf16 %v1416_v47, %v1416_v47  ;;  %v1385_v10 = vadd.f32 %v10975_v7, %v1346_v51  ;;  %v9943_v3 = vld [vmem:[%s13431_s4 + $0x1b8] sm:$0xff]   ;;  %v2234_v47 = vld [vmem:[#allocation2 + $0x48] sm:$0xf] }
 0x18c   : > { %v2394_v14 = vor.u32 %v2393_v46, %v2390_v39  ;;  %v2867_v50 = vrot.slane %v2747_v0, 5  ;;  %v11062_v32 = vpop.f32.mrb[66].mxu1  ;;  %v2404_v16 = vor.u32 %v2403_v21, %v2399_v5  ;;  %v2870_v11 = vrot.slane %v2748_v38, 5  ;;  %9523 = vmatpush3.bf16.msra.mxu1 %v9941_v60  ;;  %v2235_v21 = vld [vmem:[#allocation2 + $0x4c] sm:$0xf] }
 0x18d   : > { %v9028_v24 = vadd.f32 %v10831_v31, %v10827_v8  ;;  %v11068_v4 = vpop.f32.mrb[67].mxu1  ;;  %v1783_v20 = vshrl.u32 %v8870_v57, 16  ;;  %v1786_v33 = vshll.u32 %v8870_v57, 16  ;;  %v1417_v0 = vmax.f32 %v1385_v10, 0.0  ;;  %9524 = vmatprep.subr.bf16.mxu1 %v9942_v13  ;;  %v2020_v8 = vld [vmem:[#allocation2 + $0x74] sm:$0x1] }
 0x18e   : > { %v2395_v22 = vrot.slane %v2394_v14, 4  ;;  %v2405_v15 = vrot.slane %v2404_v16, 4  ;;  %v2868_v38 = vsel %vm10677_vm12, %v8522_v30, %v2867_v50  ;;  %v2869_v53 = vrot.slane %v2867_v50, 4  ;;  %v9945_v13 = vld [vmem:[%s13431_s4 + $0x200] sm:$0xff]   ;;  %v2023_v14 = vld [vmem:[#allocation2 + $0x78] sm:$0xf] }
 0x18f   : > { %v1270_v1 = vadd.f32 %v9137_v63, %v9025_v56  ;;  %v1785_v42 = vrot.slane %v1783_v20, 7  ;;  %v8871_v31 = vpack.c.bf16 %v1417_v0, %v1417_v0  ;;  %v11079_v25 = vadd.f32 %v10848_v58, %v10843_v62  ;;  %9646 = vmatprep.subr.bf16.mxu0 %v9945_v13  ;;  %v2749_v63 = vld [vmem:[#allocation2 + $0x48] sm:$0xe] }
 0x190   : > { %v2400_v60 = vsel %vm10548_vm7, %v2395_v22, %v2399_v5  ;;  %v2410_v51 = vsel %vm10548_vm7, %v2405_v15, %v2409_v37  ;;  %v2871_v56 = vsel %vm10677_vm12, %v2869_v53, %v2870_v11  ;;  %v9140_v46 = vadd.f32 %v10966_v61, %v10959_v35  ;;  %v9898_v5 = vld [vmem:[#allocation2 + $0x54] sm:$0xff]   ;;  %9525 = vmatpush3.bf16.msra.mxu1 %v9943_v3 }
 0x191   : > { %v1347_v39 = vmul.f32 %v11029_v26, %v1270_v1  ;;  %v1788_v62 = vor.u32 %v1786_v33, %v1785_v42  ;;  %v1790_v58 = vrot.slane %v1785_v42, 4  ;;  %v1792_v30 = vshrl.u32 %v8871_v31, 16  ;;  %v11091_v10 = vpop.f32.mrb[68].mxu1  ;;  %v9897_v33 = vld [vmem:[#allocation2 + $0x3c] sm:$0xff]  }
 0x192   : > { %v1795_v57 = vshll.u32 %v8871_v31, 16  ;;  %v8506_v37 = vcombine.low %v2400_v60, %v2410_v51  ;;  %v8538_v50 = vcombine.low %v2868_v38, %v2871_v56  ;;  %v1275_v11 = vadd.f32 %v9140_v46, %v9028_v24  ;;  %v11094_v20 = vpop.f32.mrb[69].mxu1  ;;  %v2751_v46 = vld [vmem:[#allocation2 + $0x50] sm:$0x1] }
 0x193   : > { %v1386_v16 = vadd.f32 %v10975_v7, %v1347_v39  ;;  %v1789_v35 = vsel %vm10694_vm14, %v1781_v43, %v1788_v62  ;;  %v2021_v61 = vsel %vm10475_vm2, %v1790_v58, %v2020_v8  ;;  %v11102_v3 = vrot.slane %v1792_v30, 7  ;;  %v11104_v22 = vpop.f32.mrb[70].mxu1  ;;  %v2750_v39 = vld [vmem:[#allocation2 + $0x4c] sm:$0xf] }
 0x194   : > { %v2412_v0 = vshrl.u32 %v2234_v47, 16  ;;  %2019 = vst [vmem:[#allocation2 + $0x70] sm:$0xf] %v1789_v35  ;;  %2022 = vst [vmem:[#allocation2 + $0x74] sm:$0x1] %v2021_v61  ;;  %5703 = vmatprep.mubr.bf16.mxu0 %v8506_v37  ;;  %5865 = vmatmul.mubr.bf16.gmra.mrb[100].mxu1 %v8538_v50  ;;  %v1348_v15 = vmul.f32 %v11029_v26, %v1275_v11  ;;  %v2415_v38 = vshll.u32 %v2234_v47, 16 }
 0x195   : > { %v1418_v24 = vmax.f32 %v1386_v16, 0.0  ;;  %v2421_v53 = vshll.u32 %v2235_v21, 16  ;;  %v11107_v43 = vpop.f32.mrb[71].mxu1  ;;  %v1797_v1 = vor.u32 %v1795_v57, %v11102_v3  ;;  %v1798_v42 = vrot.slane %v11102_v3, 4  ;;  %5704 = vmatmul.mubr.bf16.gmra.mrb[68].mxu0 %v9897_v33  ;;  %5872 = vmatprep.mubr.bf16.mxu1 %v9898_v5 }
 0x196   : > { %v2414_v8 = vrot.slane %v2412_v0, 4  ;;  %v2425_v31 = vshrl.u32 %v2235_v21, 16  ;;  %v1387_v13 = vadd.f32 %v10975_v7, %v1348_v15  ;;  %v2417_v51 = vrot.slane %v2415_v38, 5 }
 0x197   : > { %v8872_v60 = vpack.c.bf16 %v1418_v24, %v1418_v24  ;;  %v2423_v56 = vrot.slane %v2421_v53, 5  ;;  %v2024_v47 = vsel %vm10683_vm13, %v1797_v1, %v2023_v14  ;;  %v2431_v58 = vshll.u32 %v2236_v28, 16 }
 0x198   : > { %v2427_v62 = vrot.slane %v2425_v31, 4  ;;  %v8523_v30 = vrot.slane %v2749_v63, 9  ;;  %2025 = vst [vmem:[#allocation2 + $0x78] sm:$0xf] %v2024_v47  ;;  %v1419_v50 = vmax.f32 %v1387_v13, 0.0  ;;  %v2418_v5 = vor.u32 %v2417_v51, %v2414_v8 }
 0x199   : > { %v1800_v57 = vshrl.u32 %v8872_v60, 16  ;;  %v1803_v37 = vshll.u32 %v8872_v60, 16  ;;  %v2433_v21 = vrot.slane %v2431_v58, 5  ;;  %v2874_v11 = vrot.slane %v2750_v39, 5  ;;  %v11114_v61 = vpop.f32.mrb[72].mxu1 }
 0x19a   : > { %v2428_v16 = vor.u32 %v2427_v62, %v2423_v56  ;;  %v2877_v35 = vrot.slane %v2751_v46, 5  ;;  %v8873_v33 = vpack.c.bf16 %v1419_v50, %v1419_v50  ;;  %v2419_v0 = vrot.slane %v2418_v5, 4  ;;  %v11118_v24 = vpop.f32.mrb[73].mxu1  ;;  %v2027_v63 = vld [vmem:[#allocation2 + $0x80] sm:$0x1] }
 0x19b   : > { %v1802_v3 = vrot.slane %v1800_v57, 7  ;;  %v9143_v14 = vadd.f32 %v10978_v49, %v10970_v40  ;;  %v2875_v28 = vsel %vm10677_vm12, %v8523_v30, %v2874_v11  ;;  %v2876_v38 = vrot.slane %v2874_v11, 4  ;;  %v11124_v13 = vpop.f32.mrb[74].mxu1  ;;  %v2030_v51 = vld [vmem:[#allocation2 + $0x84] sm:$0xf] }
 0x19c   : > { %v2429_v15 = vrot.slane %v2428_v16, 4  ;;  %v9034_v53 = vadd.f32 %v10881_v27, %v10868_v55  ;;  %v1809_v31 = vshrl.u32 %v8873_v33, 16  ;;  %v1812_v60 = vshll.u32 %v8873_v33, 16  ;;  %v2237_v47 = vld [vmem:[#allocation2 + $0x54] sm:$0xf]  ;;  %v9902_v57 = vld [vmem:[#allocation2 + $0x60] sm:$0xff]  }
 0x19d   : > { %v1805_v1 = vor.u32 %v1803_v37, %v1802_v3  ;;  %v1807_v8 = vrot.slane %v1802_v3, 4  ;;  %v2424_v40 = vsel %vm10548_vm7, %v2419_v0, %v2423_v56  ;;  %v2878_v39 = vsel %vm10677_vm12, %v2876_v38, %v2877_v35  ;;  %v2238_v55 = vld [vmem:[#allocation2 + $0x58] sm:$0xf]  ;;  %v9899_v56 = vld [vmem:[#allocation2 + $0x48] sm:$0xff]   ;;  %v11139_v37 = vpop.f32.mrb[75].mxu1 }
 0x19e   : > { %v2434_v49 = vsel %vm10548_vm7, %v2429_v15, %v2433_v21  ;;  %v1278_v46 = vadd.f32 %v9143_v14, %v11079_v25  ;;  %v11137_v58 = vrot.slane %v1809_v31, 7  ;;  %v8539_v50 = vcombine.low %v2875_v28, %v2878_v39  ;;  %v2239_v16 = vld [vmem:[#allocation2 + $0x5c] sm:$0x1]  ;;  %v2752_v21 = vld [vmem:[#allocation2 + $0x54] sm:$0xe] }
 0x19f   : > { %v1806_v27 = vsel %vm10694_vm14, %v1798_v42, %v1805_v1  ;;  %v2028_v62 = vsel %vm10475_vm2, %v1807_v8, %v2027_v63  ;;  %v8507_v30 = vcombine.low %v2424_v40, %v2434_v49  ;;  %v9037_v5 = vadd.f32 %v10895_v12, %v10884_v54  ;;  %v2753_v54 = vld [vmem:[#allocation2 + $0x58] sm:$0xf]  ;;  %v2754_v1 = vld [vmem:[#allocation2 + $0x5c] sm:$0x1] }
 0x1a0   : > { %2026 = vst [vmem:[#allocation2 + $0x7c] sm:$0xf] %v1806_v27  ;;  %2029 = vst [vmem:[#allocation2 + $0x80] sm:$0x1] %v2028_v62  ;;  %v1349_v25 = vmul.f32 %v11029_v26, %v1278_v46  ;;  %v9146_v42 = vadd.f32 %v11008_v19, %v11001_v52  ;;  %v1814_v11 = vor.u32 %v1812_v60, %v11137_v58  ;;  %v1815_v35 = vrot.slane %v11137_v58, 4 }
 0x1a1   : > { %5711 = vmatprep.mubr.bf16.mxu0 %v8507_v30  ;;  %v2436_v3 = vshrl.u32 %v2237_v47, 16  ;;  %v2439_v33 = vshll.u32 %v2237_v47, 16  ;;  %5873 = vmatmul.mubr.bf16.gmra.mrb[104].mxu1 %v8539_v50  ;;  %v2445_v63 = vshll.u32 %v2238_v55, 16  ;;  %v2449_v15 = vshrl.u32 %v2238_v55, 16  ;;  %v11149_v12 = vpop.f32.mrb[76].mxu1 }
 0x1a2   : > { %v1388_v0 = vadd.f32 %v10975_v7, %v1349_v25  ;;  %5712 = vmatmul.mubr.bf16.gmra.mrb[72].mxu0 %v9899_v56  ;;  %v1283_v14 = vadd.f32 %v9146_v42, %v9034_v53  ;;  %v2031_v52 = vsel %vm10683_vm13, %v1814_v11, %v2030_v51  ;;  %5880 = vmatprep.mubr.bf16.mxu1 %v9902_v57  ;;  %v2455_v38 = vshll.u32 %v2239_v16, 16  ;;  %v11153_v8 = vpop.f32.mrb[77].mxu1 }
 0x1a3   : > { %v2438_v19 = vrot.slane %v2436_v3, 4  ;;  %v2441_v28 = vrot.slane %v2439_v33, 5  ;;  %2032 = vst [vmem:[#allocation2 + $0x84] sm:$0xf] %v2031_v52  ;;  %v2447_v53 = vrot.slane %v2445_v63, 5  ;;  %v2451_v40 = vrot.slane %v2449_v15, 4 }
 0x1a4   : > { %v1420_v31 = vmax.f32 %v1388_v0, 0.0  ;;  %v1350_v60 = vmul.f32 %v11029_v26, %v1283_v14  ;;  %v11156_v49 = vpop.f32.mrb[78].mxu1  ;;  %v2457_v46 = vrot.slane %v2455_v38, 5  ;;  %v8524_v47 = vrot.slane %v2752_v21, 9  ;;  %v2240_v33 = vld [vmem:[#allocation2 + $0x60] sm:$0xf] }
 0x1a5   : > { %v2442_v39 = vor.u32 %v2441_v28, %v2438_v19  ;;  %v2881_v55 = vrot.slane %v2753_v54, 5  ;;  %v11158_v51 = vpop.f32.mrb[79].mxu1  ;;  %v2452_v30 = vor.u32 %v2451_v40, %v2447_v53  ;;  %v2884_v56 = vrot.slane %v2754_v1, 5  ;;  %v2034_v0 = vld [vmem:[#allocation2 + $0x8c] sm:$0x1] }
 0x1a6   : > { %v8874_v27 = vpack.c.bf16 %v1420_v31, %v1420_v31  ;;  %v1389_v62 = vadd.f32 %v10975_v7, %v1350_v60  ;;  %v9149_v42 = vadd.f32 %v11021_v59, %v11017_v2  ;;  %v9152_v54 = vadd.f32 %v11059_v48, %v11057_v45  ;;  %v9904_v52 = vld [vmem:[#allocation2 + $0x6c] sm:$0xff]   ;;  %v2241_v60 = vld [vmem:[#allocation2 + $0x64] sm:$0xf]  ;;  %v9903_v45 = vld [vmem:[#allocation2 + $0x54] sm:$0xff]  }
 0x1a7   : > { %v2443_v57 = vrot.slane %v2442_v39, 4  ;;  %v2882_v50 = vsel %vm10677_vm12, %v8524_v47, %v2881_v55  ;;  %v2883_v25 = vrot.slane %v2881_v55, 4  ;;  %v2453_v21 = vrot.slane %v2452_v30, 4  ;;  %v2242_v48 = vld [vmem:[#allocation2 + $0x68] sm:$0x1] }
 0x1a8   : > { %v1817_v16 = vshrl.u32 %v8874_v27, 16  ;;  %v1820_v11 = vshll.u32 %v8874_v27, 16  ;;  %v1421_v3 = vmax.f32 %v1389_v62, 0.0  ;;  %v1286_v15 = vadd.f32 %v9149_v42, %v9037_v5 }
 0x1a9   : > { %v2448_v14 = vsel %vm10548_vm7, %v2443_v57, %v2447_v53  ;;  %v2885_v63 = vsel %vm10677_vm12, %v2883_v25, %v2884_v56  ;;  %v2458_v2 = vsel %vm10548_vm7, %v2453_v21, %v2457_v46  ;;  %v1291_v31 = vadd.f32 %v9152_v54, %v10596_v6  ;;  %v2037_v57 = vld [vmem:[#allocation2 + $0x90] sm:$0xf]  ;;  %v2755_v25 = vld [vmem:[#allocation2 + $0x60] sm:$0xe]  ;;  %v2756_v21 = vld [vmem:[#allocation2 + $0x64] sm:$0xf] }
 0x1aa   : > { %v1819_v19 = vrot.slane %v1817_v16, 7  ;;  %v8875_v28 = vpack.c.bf16 %v1421_v3, %v1421_v3  ;;  %v8540_v59 = vcombine.low %v2882_v50, %v2885_v63  ;;  %v8508_v38 = vcombine.low %v2448_v14, %v2458_v2 }
 0x1ab   : > { %v1351_v1 = vmul.f32 %v11029_v26, %v1286_v15  ;;  %v2460_v53 = vshrl.u32 %v2240_v33, 16  ;;  %v1352_v46 = vmul.f32 %v11029_v26, %v1291_v31  ;;  %v2463_v62 = vshll.u32 %v2240_v33, 16 }
 0x1ac   : > { %v1822_v40 = vor.u32 %v1820_v11, %v1819_v19  ;;  %v1824_v39 = vrot.slane %v1819_v19, 4  ;;  %v1826_v5 = vshrl.u32 %v8875_v28, 16  ;;  %v1829_v47 = vshll.u32 %v8875_v28, 16  ;;  %5881 = vmatmul.mubr.bf16.gmra.mrb[108].mxu1 %v8540_v59  ;;  %5719 = vmatprep.mubr.bf16.mxu0 %v8508_v38 }
 0x1ad   : > { %v1390_v55 = vadd.f32 %v10975_v7, %v1351_v1  ;;  %5888 = vmatprep.mubr.bf16.mxu1 %v9904_v52  ;;  %v2462_v27 = vrot.slane %v2460_v53, 4  ;;  %5720 = vmatmul.mubr.bf16.gmra.mrb[76].mxu0 %v9903_v45  ;;  %v2469_v50 = vshll.u32 %v2241_v60, 16  ;;  %v1391_v16 = vadd.f32 %v10975_v7, %v1352_v46  ;;  %v2757_v52 = vld [vmem:[#allocation2 + $0x68] sm:$0x1] }
 0x1ae   : > { %v1823_v6 = vsel %vm10694_vm14, %v1815_v35, %v1822_v40  ;;  %v2035_v30 = vsel %vm10475_vm2, %v1824_v39, %v2034_v0  ;;  %v1828_v56 = vrot.slane %v1826_v5, 7  ;;  %v2465_v11 = vrot.slane %v2463_v62, 5 }
 0x1af   : > { %2033 = vst [vmem:[#allocation2 + $0x88] sm:$0xf] %v1823_v6  ;;  %2036 = vst [vmem:[#allocation2 + $0x8c] sm:$0x1] %v2035_v30  ;;  %v1422_v42 = vmax.f32 %v1390_v55, 0.0  ;;  %v2473_v3 = vshrl.u32 %v2241_v60, 16  ;;  %v9155_v30 = vadd.f32 %v11068_v4, %v11062_v32 }
 0x1b0   : > { %v1831_v58 = vor.u32 %v1829_v47, %v1828_v56  ;;  %v1832_v33 = vrot.slane %v1828_v56, 4  ;;  %v2471_v14 = vrot.slane %v2469_v50, 5  ;;  %v2479_v35 = vshll.u32 %v2242_v48, 16  ;;  %v1497_v47 = vld [vmem:[#allocation2 + $0xa8] sm:$0x1] }
 0x1b1   : > { %v8876_v63 = vpack.c.bf16 %v1422_v42, %v1422_v42  ;;  %v1423_v15 = vmax.f32 %v1391_v16, 0.0  ;;  %v2466_v0 = vor.u32 %v2465_v11, %v2462_v27  ;;  %v2475_v54 = vrot.slane %v2473_v3, 4  ;;  %v2041_v27 = vld [vmem:[#allocation2 + $0x98] sm:$0x1]  ;;  %v2044_v16 = vld [vmem:[#allocation2 + $0x9c] sm:$0xf] }
 0x1b2   : > { %v2038_v19 = vsel %vm10683_vm13, %v1831_v58, %v2037_v57  ;;  %v2481_v28 = vrot.slane %v2479_v35, 5  ;;  %v8525_v2 = vrot.slane %v2755_v25, 9  ;;  %v2888_v59 = vrot.slane %v2756_v21, 5  ;;  %v9908_v57 = vld [vmem:[#allocation2 + $0x78] sm:$0xff]   ;;  %v2243_v3 = vld [vmem:[#allocation2 + $0x6c] sm:$0xf] }
 0x1b3   : > { %2039 = vst [vmem:[#allocation2 + $0x90] sm:$0xf] %v2038_v19  ;;  %v1834_v38 = vshrl.u32 %v8876_v63, 16  ;;  %v1837_v1 = vshll.u32 %v8876_v63, 16  ;;  %v8877_v31 = vpack.c.bf16 %v1423_v15, %v1423_v15  ;;  %v2467_v60 = vrot.slane %v2466_v0, 4  ;;  %v9905_v19 = vld [vmem:[#allocation2 + $0x60] sm:$0xff]  }
 0x1b4   : > { %v2476_v53 = vor.u32 %v2475_v54, %v2471_v14  ;;  %v2889_v40 = vsel %vm10677_vm12, %v8525_v2, %v2888_v59  ;;  %v2890_v39 = vrot.slane %v2888_v59, 4  ;;  %v2891_v5 = vrot.slane %v2757_v52, 5  ;;  %v2244_v4 = vld [vmem:[#allocation2 + $0x70] sm:$0xf]  ;;  %v2245_v15 = vld [vmem:[#allocation2 + $0x74] sm:$0x1] }
 0x1b5   : > { %v1836_v45 = vrot.slane %v1834_v38, 7  ;;  %v1843_v48 = vshrl.u32 %v8877_v31, 16  ;;  %v1846_v55 = vshll.u32 %v8877_v31, 16  ;;  %v2472_v46 = vsel %vm10548_vm7, %v2467_v60, %v2471_v14  ;;  %v2759_v38 = vld [vmem:[#allocation2 + $0x70] sm:$0xf] }
 0x1b6   : > { %v2477_v62 = vrot.slane %v2476_v53, 4  ;;  %v2892_v6 = vsel %vm10677_vm12, %v2890_v39, %v2891_v5  ;;  %v9158_v56 = vadd.f32 %v11094_v20, %v11091_v10  ;;  %v1294_v58 = vadd.f32 %v9155_v30, %v10598_v9 }
 0x1b7   : > { %v1839_v50 = vor.u32 %v1837_v1, %v1836_v45  ;;  %v1841_v25 = vrot.slane %v1836_v45, 4  ;;  %v11196_v42 = vrot.slane %v1843_v48, 7  ;;  %v8541_v11 = vcombine.low %v2889_v40, %v2892_v6  ;;  %v2760_v40 = vld [vmem:[#allocation2 + $0x74] sm:$0x1] }
 0x1b8   : > { %v2482_v21 = vsel %vm10548_vm7, %v2477_v62, %v2481_v28  ;;  %v1299_v14 = vadd.f32 %v9158_v56, %v10602_v18  ;;  %v1498_v32 = vsel %vm10475_vm2, 0, %v1497_v47  ;;  %v1353_v18 = vmul.f32 %v11029_v26, %v1294_v58  ;;  %v1547_v62 = vld [vmem:[#allocation2 + $0xb0] sm:$0x1] }
 0x1b9   : > { %v1840_v10 = vsel %vm10694_vm14, %v1832_v33, %v1839_v50  ;;  %v2042_v20 = vsel %vm10475_vm2, %v1841_v25, %v2041_v27  ;;  %v1848_v35 = vor.u32 %v1846_v55, %v11196_v42  ;;  %v1849_v63 = vrot.slane %v11196_v42, 4  ;;  %5889 = vmatmul.mubr.bf16.gmra.mrb[112].mxu1 %v8541_v11  ;;  %1499 = vst [vmem:[#allocation2 + $0xa8] sm:$0x1] %v1498_v32  ;;  %v2758_v33 = vld [vmem:[#allocation2 + $0x6c] sm:$0xe] }
 0x1ba   : > { %2040 = vst [vmem:[#allocation2 + $0x94] sm:$0xf] %v1840_v10  ;;  %2043 = vst [vmem:[#allocation2 + $0x98] sm:$0x1] %v2042_v20  ;;  %v8509_v9 = vcombine.low %v2472_v46, %v2482_v21  ;;  %v1354_v0 = vmul.f32 %v11029_v26, %v1299_v14  ;;  %5896 = vmatprep.mubr.bf16.mxu1 %v9908_v57  ;;  %v2484_v54 = vshrl.u32 %v2243_v3, 16  ;;  %v2487_v28 = vshll.u32 %v2243_v3, 16 }
 0x1bb   : > { %v2045_v52 = vsel %vm10683_vm13, %v1848_v35, %v2044_v16  ;;  %v2493_v2 = vshll.u32 %v2244_v4, 16  ;;  %v2497_v59 = vshrl.u32 %v2244_v4, 16  ;;  %v1392_v1 = vadd.f32 %v10975_v7, %v1353_v18  ;;  %v1500_v3 = vld [vmem:[#allocation2 + $0xb4] sm:$0x1] }
 0x1bc   : > { %2046 = vst [vmem:[#allocation2 + $0x9c] sm:$0xf] %v2045_v52  ;;  %5727 = vmatprep.mubr.bf16.mxu0 %v8509_v9  ;;  %v1393_v31 = vadd.f32 %v10975_v7, %v1354_v0  ;;  %v2486_v60 = vrot.slane %v2484_v54, 4  ;;  %v2503_v53 = vshll.u32 %v2245_v15, 16  ;;  %v2489_v39 = vrot.slane %v2487_v28, 5  ;;  %v9910_v0 = vld [vmem:[#allocation2 + $0x84] sm:$0xff]  }
 0x1bd   : > { %5728 = vmatmul.mubr.bf16.gmra.mrb[80].mxu0 %v9905_v19  ;;  %v2495_v5 = vrot.slane %v2493_v2, 5  ;;  %v2499_v47 = vrot.slane %v2497_v59, 4  ;;  %v8526_v45 = vrot.slane %v2758_v33, 9  ;;  %v1424_v48 = vmax.f32 %v1392_v1, 0.0  ;;  %v9909_v28 = vld [vmem:[#allocation2 + $0x6c] sm:$0xff]  }
 0x1be   : > { %v1425_v55 = vmax.f32 %v1393_v31, 0.0  ;;  %v2505_v46 = vrot.slane %v2503_v53, 5  ;;  %v2895_v27 = vrot.slane %v2759_v38, 5  ;;  %v2490_v6 = vor.u32 %v2489_v39, %v2486_v60  ;;  %v2247_v31 = vld [vmem:[#allocation2 + $0x7c] sm:$0xf] }
 0x1bf   : > { %v2500_v30 = vor.u32 %v2499_v47, %v2495_v5  ;;  %v2898_v56 = vrot.slane %v2760_v40, 5  ;;  %v9161_v57 = vadd.f32 %v11107_v43, %v11104_v22  ;;  %v8878_v50 = vpack.c.bf16 %v1424_v48, %v1424_v48  ;;  %v2246_v22 = vld [vmem:[#allocation2 + $0x78] sm:$0xf]  ;;  %v2048_v43 = vld [vmem:[#allocation2 + $0xa4] sm:$0x1] }
 0x1c0   : > { %v8879_v25 = vpack.c.bf16 %v1425_v55, %v1425_v55  ;;  %v2896_v16 = vsel %vm10677_vm12, %v8526_v45, %v2895_v27  ;;  %v2897_v11 = vrot.slane %v2895_v27, 4  ;;  %v2491_v21 = vrot.slane %v2490_v6, 4  ;;  %v2051_v2 = vld [vmem:[#allocation2 + $0xa8] sm:$0xf]  ;;  %v2761_v53 = vld [vmem:[#allocation2 + $0x78] sm:$0xe] }
 0x1c1   : > { %v2501_v58 = vrot.slane %v2500_v30, 4  ;;  %v1302_v14 = vadd.f32 %v9161_v57, %v10610_v23  ;;  %v1548_v32 = vsel %vm10482_vm4, 0, %v1547_v62  ;;  %v1851_v4 = vshrl.u32 %v8878_v50, 16  ;;  %v2248_v45 = vld [vmem:[#allocation2 + $0x80] sm:$0x1]  ;;  %v13504_v55 = vld [vmem:[#allocation7_spill] sm:$0xff] }
 0x1c2   : > { %v1854_v10 = vshll.u32 %v8878_v50, 16  ;;  %v1860_v20 = vshrl.u32 %v8879_v25, 16  ;;  %v1863_v35 = vshll.u32 %v8879_v25, 16  ;;  %1549 = vst [vmem:[#allocation2 + $0xb0] sm:$0x1] %v1548_v32  ;;  %v2496_v15 = vsel %vm10548_vm7, %v2491_v21, %v2495_v5 }
 0x1c3   : > { %v2506_v9 = vsel %vm10548_vm7, %v2501_v58, %v2505_v46  ;;  %v2899_v18 = vsel %vm10677_vm12, %v2897_v11, %v2898_v56  ;;  %v1355_v23 = vmul.f32 %v11029_v26, %v1302_v14  ;;  %v1853_v54 = vrot.slane %v1851_v4, 7  ;;  %v2762_v27 = vld [vmem:[#allocation2 + $0x7c] sm:$0xf] }
 0x1c4   : > { %v11230_v33 = vrot.slane %v1860_v20, 7  ;;  %v8510_v52 = vcombine.low %v2496_v15, %v2506_v9  ;;  %v8542_v19 = vcombine.low %v2896_v16, %v2899_v18  ;;  %v9164_v38 = vadd.f32 %v11118_v24, %v11114_v61 }
 0x1c5   : > { %v1394_v59 = vadd.f32 %v10975_v7, %v1355_v23  ;;  %v1501_v1 = vsel %vm10475_vm2, 0, %v1500_v3  ;;  %v2508_v60 = vshrl.u32 %v2246_v22, 16  ;;  %v1856_v40 = vor.u32 %v1854_v10, %v1853_v54  ;;  %v2763_v3 = vld [vmem:[#allocation2 + $0x80] sm:$0x1]  ;;  %v1550_v10 = vld [vmem:[#allocation2 + $0xbc] sm:$0x1] }
 0x1c6   : > { %v1858_v39 = vrot.slane %v1853_v54, 4  ;;  %v1865_v5 = vor.u32 %v1863_v35, %v11230_v33  ;;  %v1866_v47 = vrot.slane %v11230_v33, 4  ;;  %5735 = vmatprep.mubr.bf16.mxu0 %v8510_v52  ;;  %5897 = vmatmul.mubr.bf16.gmra.mrb[116].mxu1 %v8542_v19  ;;  %1502 = vst [vmem:[#allocation2 + $0xb4] sm:$0x1] %v1501_v1  ;;  %v1307_v61 = vadd.f32 %v9164_v38, %v13504_v55  ;;  %v1503_v38 = vld [vmem:[#allocation2 + $0xc0] sm:$0x1] }
 0x1c7   : > { %v1426_v48 = vmax.f32 %v1394_v59, 0.0  ;;  %5736 = vmatmul.mubr.bf16.gmra.mrb[84].mxu0 %v9909_v28  ;;  %5904 = vmatprep.mubr.bf16.mxu1 %v9910_v0  ;;  %v2510_v24 = vrot.slane %v2508_v60, 4  ;;  %v2511_v46 = vshll.u32 %v2246_v22, 16  ;;  %v1857_v62 = vsel %vm10694_vm14, %v1849_v63, %v1856_v40  ;;  %v2249_v1 = vld [vmem:[#allocation2 + $0x84] sm:$0xf] }
 0x1c8   : > { %v2049_v6 = vsel %vm10475_vm2, %v1858_v39, %v2048_v43  ;;  %v2052_v30 = vsel %vm10683_vm13, %v1865_v5, %v2051_v2  ;;  %v2517_v56 = vshll.u32 %v2247_v31, 16  ;;  %2047 = vst [vmem:[#allocation2 + $0xa0] sm:$0xf] %v1857_v62  ;;  %v1356_v50 = vmul.f32 %v11029_v26, %v1307_v61  ;;  %v2764_v62 = vld [vmem:[#allocation2 + $0x84] sm:$0xe] }
 0x1c9   : > { %2050 = vst [vmem:[#allocation2 + $0xa4] sm:$0x1] %v2049_v6  ;;  %2053 = vst [vmem:[#allocation2 + $0xa8] sm:$0xf] %v2052_v30  ;;  %v8880_v57 = vpack.c.bf16 %v1426_v48, %v1426_v48  ;;  %v2513_v25 = vrot.slane %v2511_v46, 5  ;;  %v2521_v16 = vshrl.u32 %v2247_v31, 16  ;;  %v9167_v33 = vadd.f32 %v11139_v37, %v11124_v13 }
 0x1ca   : > { %v2519_v11 = vrot.slane %v2517_v56, 5  ;;  %v2527_v42 = vshll.u32 %v2248_v45, 16  ;;  %v8527_v21 = vrot.slane %v2761_v53, 9  ;;  %v2902_v63 = vrot.slane %v2762_v27, 5  ;;  %v2055_v0 = vld [vmem:[#allocation2 + $0xb0] sm:$0x1] }
 0x1cb   : > { %v1868_v58 = vshrl.u32 %v8880_v57, 16  ;;  %v1871_v14 = vshll.u32 %v8880_v57, 16  ;;  %v1395_v32 = vadd.f32 %v10975_v7, %v1356_v50  ;;  %v2514_v4 = vor.u32 %v2513_v25, %v2510_v24  ;;  %v13505_v13 = vld [vmem:[#allocation8_spill] sm:$0xff]  ;;  %v13506_v53 = vld [vmem:[#allocation9_spill] sm:$0xff]  ;;  %v9914_v45 = vld [vmem:[#allocation2 + $0x90] sm:$0xff]  }
 0x1cc   : > { %v2523_v20 = vrot.slane %v2521_v16, 4  ;;  %v2529_v35 = vrot.slane %v2527_v42, 5  ;;  %v2903_v22 = vsel %vm10677_vm12, %v8527_v21, %v2902_v63  ;;  %v2904_v43 = vrot.slane %v2902_v63, 4  ;;  %v2250_v48 = vld [vmem:[#allocation2 + $0x88] sm:$0xf]  ;;  %v9911_v30 = vld [vmem:[#allocation2 + $0x78] sm:$0xff]  }
 0x1cd   : > { %v1870_v15 = vrot.slane %v1868_v58, 7  ;;  %v1427_v9 = vmax.f32 %v1395_v32, 0.0  ;;  %v2515_v18 = vrot.slane %v2514_v4, 4  ;;  %v2905_v23 = vrot.slane %v2763_v3, 5  ;;  %v2251_v27 = vld [vmem:[#allocation2 + $0x8c] sm:$0x1] }
 0x1ce   : > { %v2524_v54 = vor.u32 %v2523_v20, %v2519_v11  ;;  %v1551_v7 = vsel %vm10482_vm4, 0, %v1550_v10  ;;  %v9170_v52 = vadd.f32 %v11153_v8, %v11149_v12  ;;  %v1310_v37 = vadd.f32 %v9167_v33, %v13505_v13  ;;  %v2765_v50 = vld [vmem:[#allocation2 + $0x88] sm:$0xf]  ;;  %v2058_v25 = vld [vmem:[#allocation2 + $0xb4] sm:$0xf] }
 0x1cf   : > { %v1873_v19 = vor.u32 %v1871_v14, %v1870_v15  ;;  %v1875_v28 = vrot.slane %v1870_v15, 4  ;;  %v8881_v2 = vpack.c.bf16 %v1427_v9, %v1427_v9  ;;  %v2520_v59 = vsel %vm10548_vm7, %v2515_v18, %v2519_v11  ;;  %1552 = vst [vmem:[#allocation2 + $0xbc] sm:$0x1] %v1551_v7  ;;  %v11279_v16 = vld [vmem:[%s13430_s3] ss:$0 sm:$0xff] }
 0x1d0   : > { %v2525_v31 = vrot.slane %v2524_v54, 4  ;;  %v2906_v60 = vsel %vm10677_vm12, %v2904_v43, %v2905_v23  ;;  %v1315_v40 = vadd.f32 %v9170_v52, %v13506_v53  ;;  %v1357_v24 = vmul.f32 %v11029_v26, %v1310_v37 }
 0x1d1   : > { %v1874_v12 = vsel %vm10694_vm14, %v1866_v47, %v1873_v19  ;;  %v2056_v8 = vsel %vm10475_vm2, %v1875_v28, %v2055_v0  ;;  %v1877_v39 = vshrl.u32 %v8881_v2, 16  ;;  %v1880_v5 = vshll.u32 %v8881_v2, 16  ;;  %v1553_v28 = vld [vmem:[#allocation2 + $0xc8] sm:$0x1] }
 0x1d2   : > { %2054 = vst [vmem:[#allocation2 + $0xac] sm:$0xf] %v1874_v12  ;;  %2057 = vst [vmem:[#allocation2 + $0xb0] sm:$0x1] %v2056_v8  ;;  %v2530_v55 = vsel %vm10548_vm7, %v2525_v31, %v2529_v35  ;;  %v8543_v61 = vcombine.low %v2903_v22, %v2906_v60  ;;  %v1358_v46 = vmul.f32 %v11029_v26, %v1315_v40  ;;  %v1504_v56 = vsel %vm10475_vm2, 0, %v1503_v38  ;;  %v13507_v8 = vld [vmem:[#allocation10_spill] sm:$0xff] }
 0x1d3   : > { %v11272_v47 = vrot.slane %v1877_v39, 7  ;;  %v8511_v6 = vcombine.low %v2520_v59, %v2530_v55  ;;  %v2532_v57 = vshrl.u32 %v2249_v1, 16  ;;  %v1396_v26 = vadd.f32 %v11279_v16, %v1357_v24  ;;  %1505 = vst [vmem:[#allocation2 + $0xc0] sm:$0x1] %v1504_v56  ;;  %v2766_v35 = vld [vmem:[#allocation2 + $0x8c] sm:$0x1] }
 0x1d4   : > { %5905 = vmatmul.mubr.bf16.gmra.mrb[120].mxu1 %v8543_v61  ;;  %v1397_v11 = vadd.f32 %v11279_v16, %v1358_v46  ;;  %v2535_v42 = vshll.u32 %v2249_v1, 16  ;;  %v2541_v3 = vshll.u32 %v2250_v48, 16  ;;  %v2545_v14 = vshrl.u32 %v2250_v48, 16  ;;  %v2252_v31 = vld [vmem:[#allocation2 + $0x90] sm:$0xf]  ;;  %v9916_v56 = vld [vmem:[#allocation2 + $0x9c] sm:$0xff]  }
 0x1d5   : > { %v1882_v21 = vor.u32 %v1880_v5, %v11272_v47  ;;  %v1883_v63 = vrot.slane %v11272_v47, 4  ;;  %5743 = vmatprep.mubr.bf16.mxu0 %v8511_v6  ;;  %5912 = vmatprep.mubr.bf16.mxu1 %v9914_v45  ;;  %v2534_v58 = vrot.slane %v2532_v57, 4  ;;  %v1428_v32 = vmax.f32 %v1396_v26, 0.0  ;;  %v2254_v5 = vld [vmem:[#allocation2 + $0x98] sm:$0x1] }
 0x1d6   : > { %5744 = vmatmul.mubr.bf16.gmra.mrb[88].mxu0 %v9911_v30  ;;  %v1429_v4 = vmax.f32 %v1397_v11, 0.0  ;;  %v2537_v10 = vrot.slane %v2535_v42, 5  ;;  %v2543_v20 = vrot.slane %v2541_v3, 5  ;;  %v2547_v43 = vrot.slane %v2545_v14, 4  ;;  %v2062_v45 = vld [vmem:[#allocation2 + $0xbc] sm:$0x1] }
 0x1d7   : > { %v2059_v22 = vsel %vm10683_vm13, %v1882_v21, %v2058_v25  ;;  %v2551_v15 = vshll.u32 %v2251_v27, 16  ;;  %v8528_v9 = vrot.slane %v2764_v62, 9  ;;  %v8882_v18 = vpack.c.bf16 %v1428_v32, %v1428_v32  ;;  %v2767_v27 = vld [vmem:[#allocation2 + $0x90] sm:$0xe]  ;;  %v2768_v62 = vld [vmem:[#allocation2 + $0x94] sm:$0xf] }
 0x1d8   : > { %2060 = vst [vmem:[#allocation2 + $0xb4] sm:$0xf] %v2059_v22  ;;  %v8883_v23 = vpack.c.bf16 %v1429_v4, %v1429_v4  ;;  %v2538_v0 = vor.u32 %v2537_v10, %v2534_v58  ;;  %v2909_v54 = vrot.slane %v2765_v50, 5  ;;  %v2548_v33 = vor.u32 %v2547_v43, %v2543_v20  ;;  %v10019_v25 = vld [vmem:[%s13429_s2] ss:$0 sm:$0xff]  ;;  %v9915_v14 = vld [vmem:[#allocation2 + $0x84] sm:$0xff]  }
 0x1d9   : > { %v2553_v7 = vrot.slane %v2551_v15, 5  ;;  %v2912_v52 = vrot.slane %v2766_v35, 5  ;;  %v9173_v19 = vadd.f32 %v11158_v51, %v11156_v49  ;;  %v1885_v2 = vshrl.u32 %v8882_v18, 16  ;;  %v2253_v51 = vld [vmem:[#allocation2 + $0x94] sm:$0xf] }
 0x1da   : > { %v1888_v59 = vshll.u32 %v8882_v18, 16  ;;  %v1894_v38 = vshrl.u32 %v8883_v23, 16  ;;  %v1897_v1 = vshll.u32 %v8883_v23, 16  ;;  %v2539_v60 = vrot.slane %v2538_v0, 4  ;;  %v2065_v48 = vld [vmem:[#allocation2 + $0xc0] sm:$0xf] }
 0x1db   : > { %v2549_v13 = vrot.slane %v2548_v33, 4  ;;  %v2910_v37 = vsel %vm10677_vm12, %v8528_v9, %v2909_v54  ;;  %v2911_v53 = vrot.slane %v2909_v54, 4  ;;  %v1887_v40 = vrot.slane %v1885_v2, 7  ;;  %v2769_v42 = vld [vmem:[#allocation2 + $0x98] sm:$0x1] }
 0x1dc   : > { %v11291_v12 = vrot.slane %v1894_v38, 7  ;;  %v1318_v39 = vadd.f32 %v9173_v19, %v13507_v8  ;;  %v1554_v49 = vsel %vm10482_vm4, 0, %v1553_v28  ;;  %v2544_v55 = vsel %vm10548_vm7, %v2539_v60, %v2543_v20  ;;  %v2255_v22 = vld [vmem:[#allocation2 + $0x9c] sm:$0xf]  ;;  %v2256_v9 = vld [vmem:[#allocation2 + $0xa0] sm:$0xf] }
 0x1dd   : > { %v2554_v61 = vsel %vm10548_vm7, %v2549_v13, %v2553_v7  ;;  %v2913_v24 = vsel %vm10677_vm12, %v2911_v53, %v2912_v52  ;;  %1555 = vst [vmem:[#allocation2 + $0xc8] sm:$0x1] %v1554_v49  ;;  %v2556_v46 = vshrl.u32 %v2252_v31, 16  ;;  %v1890_v47 = vor.u32 %v1888_v59, %v1887_v40  ;;  %v2770_v19 = vld [vmem:[#allocation2 + $0x9c] sm:$0xe] }
 0x1de   : > { %v1892_v44 = vrot.slane %v1887_v40, 4  ;;  %v1899_v6 = vor.u32 %v1897_v1, %v11291_v12  ;;  %v1900_v30 = vrot.slane %v11291_v12, 4  ;;  %v8512_v57 = vcombine.low %v2544_v55, %v2554_v61  ;;  %v2257_v59 = vld [vmem:[#allocation2 + $0xa4] sm:$0x1] }
 0x1df   : > { %v8544_v50 = vcombine.low %v2910_v37, %v2913_v24  ;;  %v1359_v26 = vmul.f32 %v10019_v25, %v1318_v39  ;;  %v2558_v11 = vrot.slane %v2556_v46, 4  ;;  %v1891_v3 = vsel %vm10694_vm14, %v1883_v63, %v1890_v47  ;;  %v9924_v37 = vld [vmem:[#allocation2 + $0xa8] sm:$0xff]   ;;  %v2772_v8 = vld [vmem:[#allocation2 + $0xa4] sm:$0x1]  ;;  %v2261_v41 = vld [vmem:[#allocation2 + $0xb4] sm:$0xf] }
 0x1e0   : > { %v2063_v21 = vsel %vm10475_vm2, %v1892_v44, %v2062_v45  ;;  %v2066_v58 = vsel %vm10683_vm13, %v1899_v6, %v2065_v48  ;;  %v2559_v32 = vshll.u32 %v2252_v31, 16  ;;  %2061 = vst [vmem:[#allocation2 + $0xb8] sm:$0xf] %v1891_v3  ;;  %5751 = vmatprep.mubr.bf16.mxu0 %v8512_v57  ;;  %v2565_v10 = vshll.u32 %v2253_v51, 16  ;;  %v2771_v31 = vld [vmem:[#allocation2 + $0xa0] sm:$0xf] }
 0x1e1   : > { %2064 = vst [vmem:[#allocation2 + $0xbc] sm:$0x1] %v2063_v21  ;;  %2067 = vst [vmem:[#allocation2 + $0xc0] sm:$0xf] %v2066_v58  ;;  %5913 = vmatmul.mubr.bf16.gmra.mrb[124].mxu1 %v8544_v50  ;;  %v1398_v4 = vadd.f32 %v11279_v16, %v1359_v26  ;;  %v2569_v20 = vshrl.u32 %v2253_v51, 16  ;;  %v2575_v35 = vshll.u32 %v2254_v5, 16  ;;  %5752 = vmatmul.mubr.bf16.gmra.mrb[92].mxu0 %v9915_v14 }
 0x1e2   : > { %5920 = vmatprep.mubr.bf16.mxu1 %v9916_v56  ;;  %v2561_v63 = vrot.slane %v2559_v32, 5  ;;  %v8529_v43 = vrot.slane %v2767_v27, 9  ;;  %v2916_v15 = vrot.slane %v2768_v62, 5  ;;  %v2919_v34 = vrot.slane %v2769_v42, 5  ;;  %v2258_v50 = vld [vmem:[#allocation2 + $0xa8] sm:$0xf] }
 0x1e3   : > { %v1430_v18 = vmax.f32 %v1398_v4, 0.0  ;;  %v2567_v23 = vrot.slane %v2565_v10, 5  ;;  %v2571_v0 = vrot.slane %v2569_v20, 4  ;;  %v2577_v54 = vrot.slane %v2575_v35, 5  ;;  %v2259_v21 = vld [vmem:[#allocation2 + $0xac] sm:$0xf] }
 0x1e4   : > { %v2562_v33 = vor.u32 %v2561_v63, %v2558_v11  ;;  %v2917_v7 = vsel %vm10677_vm12, %v8529_v43, %v2916_v15  ;;  %v2918_v16 = vrot.slane %v2916_v15, 4  ;;  %v2580_v52 = vshrl.u32 %v2255_v22, 16  ;;  %v2069_v47 = vld [vmem:[#allocation2 + $0xc8] sm:$0x1]  ;;  %v9918_v11 = vld [vmem:[#allocation2 + $0x90] sm:$0xff]  }
 0x1e5   : > { %v8884_v28 = vpack.c.bf16 %v1430_v18, %v1430_v18  ;;  %v2572_v2 = vor.u32 %v2571_v0, %v2567_v23  ;;  %v2583_v38 = vshll.u32 %v2255_v22, 16  ;;  %v2589_v1 = vshll.u32 %v2256_v9, 16  ;;  %v2773_v58 = vld [vmem:[#allocation2 + $0xa8] sm:$0xe]  ;;  %v2260_v20 = vld [vmem:[#allocation2 + $0xb0] sm:$0x1] }
 0x1e6   : > { %v2563_v60 = vrot.slane %v2562_v33, 4  ;;  %v2920_v13 = vsel %vm10677_vm12, %v2918_v16, %v2919_v34  ;;  %v2582_v53 = vrot.slane %v2580_v52, 4  ;;  %v2593_v40 = vshrl.u32 %v2256_v9, 16  ;;  %v2774_v15 = vld [vmem:[#allocation2 + $0xac] sm:$0xf] }
 0x1e7   : > { %v1902_v39 = vshrl.u32 %v8884_v28, 16  ;;  %v1905_v49 = vshll.u32 %v8884_v28, 16  ;;  %v2573_v51 = vrot.slane %v2572_v2, 4  ;;  %v8545_v5 = vcombine.low %v2917_v7, %v2920_v13  ;;  %v9930_v36 = vld [vmem:[#allocation2 + $0xb4] sm:$0xff]   ;;  %v2775_v18 = vld [vmem:[#allocation2 + $0xb0] sm:$0x1] }
 0x1e8   : > { %v2568_v45 = vsel %vm10548_vm7, %v2563_v60, %v2567_v23  ;;  %v2585_v48 = vrot.slane %v2583_v38, 5  ;;  %v2591_v55 = vrot.slane %v2589_v1, 5  ;;  %v2595_v61 = vrot.slane %v2593_v40, 4  ;;  %v2262_v7 = vld [vmem:[#allocation2 + $0xb8] sm:$0xf] }
 0x1e9   : > { %v1904_v24 = vrot.slane %v1902_v39, 7  ;;  %v2578_v46 = vsel %vm10548_vm7, %v2573_v51, %v2577_v54  ;;  %5921 = vmatmul.mubr.bf16.gmra.mrb[128].mxu1 %v8545_v5  ;;  %v2599_v27 = vshll.u32 %v2257_v59, 16  ;;  %v8530_v62 = vrot.slane %v2770_v19, 9  ;;  %v2776_v2 = vld [vmem:[#allocation2 + $0xb4] sm:$0xe] }
 0x1ea   : > { %v8513_v44 = vcombine.low %v2568_v45, %v2578_v46  ;;  %5928 = vmatprep.mubr.bf16.mxu1 %v9924_v37  ;;  %v2586_v6 = vor.u32 %v2585_v48, %v2582_v53  ;;  %v2596_v56 = vor.u32 %v2595_v61, %v2591_v55  ;;  %v2923_v57 = vrot.slane %v2771_v31, 5  ;;  %v2263_v31 = vld [vmem:[#allocation2 + $0xbc] sm:$0x1]  ;;  %v4111_v39 = vld [vmem:[#allocation2 + $0x18] sm:$0xf] }
 0x1eb   : > { %v1907_v25 = vor.u32 %v1905_v49, %v1904_v24  ;;  %v1909_v26 = vrot.slane %v1904_v24, 4  ;;  %v2601_v42 = vrot.slane %v2599_v27, 5  ;;  %v2926_v3 = vrot.slane %v2772_v8, 5  ;;  %v2777_v8 = vld [vmem:[#allocation2 + $0xb8] sm:$0xf]  ;;  %v9926_v49 = vld [vmem:[#allocation2 + $0x9c] sm:$0xff]  }
 0x1ec   : > { %5759 = vmatprep.mubr.bf16.mxu0 %v8513_v44  ;;  %v2587_v14 = vrot.slane %v2586_v6, 4  ;;  %v2597_v32 = vrot.slane %v2596_v56, 4  ;;  %v2924_v4 = vsel %vm10677_vm12, %v8530_v62, %v2923_v57  ;;  %v2925_v10 = vrot.slane %v2923_v57, 4 }
 0x1ed   : > { %v1908_v35 = vsel %vm10694_vm14, %v1900_v30, %v1907_v25  ;;  %v2070_v22 = vsel %vm10475_vm2, %v1909_v26, %v2069_v47  ;;  %5760 = vmatmul.mubr.bf16.gmra.mrb[96].mxu0 %v9918_v11  ;;  %v2604_v63 = vshrl.u32 %v2258_v50, 16  ;;  %v2607_v43 = vshll.u32 %v2258_v50, 16 }
 0x1ee   : > { %2068 = vst [vmem:[#allocation2 + $0xc4] sm:$0xf] %v1908_v35  ;;  %2071 = vst [vmem:[#allocation2 + $0xc8] sm:$0x1] %v2070_v22  ;;  %v2592_v34 = vsel %vm10548_vm7, %v2587_v14, %v2591_v55  ;;  %v2602_v9 = vsel %vm10548_vm7, %v2597_v32, %v2601_v42  ;;  %v2927_v12 = vsel %vm10677_vm12, %v2925_v10, %v2926_v3  ;;  %v2613_v30 = vshll.u32 %v2259_v21, 16 }
 0x1ef   : > { %v8514_v23 = vcombine.low %v2592_v34, %v2602_v9  ;;  %v8546_v0 = vcombine.low %v2924_v4, %v2927_v12  ;;  %v2606_v54 = vrot.slane %v2604_v63, 4  ;;  %v2609_v33 = vrot.slane %v2607_v43, 5  ;;  %v2778_v55 = vld [vmem:[#allocation2 + $0xbc] sm:$0x1]  ;;  %v4113_v10 = vld [vmem:[#allocation2 + $0x20] sm:$0x1] }
 0x1f0   : > { %v2615_v16 = vrot.slane %v2613_v30, 5  ;;  %v2617_v52 = vshrl.u32 %v2259_v21, 16  ;;  %v2623_v19 = vshll.u32 %v2260_v20, 16  ;;  %v8531_v28 = vrot.slane %v2773_v58, 9  ;;  %v4112_v21 = vld [vmem:[#allocation2 + $0x1c] sm:$0xf] }
 0x1f1   : > { %5767 = vmatprep.mubr.bf16.mxu0 %v8514_v23  ;;  %5929 = vmatmul.mubr.bf16.gmra.mrb[132].mxu1 %v8546_v0  ;;  %v2610_v59 = vor.u32 %v2609_v33, %v2606_v54  ;;  %v2930_v38 = vrot.slane %v2774_v15, 5  ;;  %v2933_v1 = vrot.slane %v2775_v18, 5  ;;  %v2628_v60 = vshrl.u32 %v2261_v41, 16  ;;  %v3678_v35 = vld [vmem:[#allocation2 + $0xc] sm:$0xe]  ;;  %v11348_v23 = vpop.f32.mrb[48].mxu0 }
 0x1f2   : > { %5936 = vmatprep.mubr.bf16.mxu1 %v9930_v36  ;;  %v2619_v13 = vrot.slane %v2617_v52, 4  ;;  %v2625_v37 = vrot.slane %v2623_v19, 5  ;;  %v2631_v53 = vshll.u32 %v2261_v41, 16  ;;  %v2637_v40 = vshll.u32 %v2262_v7, 16  ;;  %v3679_v34 = vld [vmem:[#allocation2 + $0x10] sm:$0xf] }
 0x1f3   : > { %v2611_v51 = vrot.slane %v2610_v59, 4  ;;  %v2931_v5 = vsel %vm10677_vm12, %v8531_v28, %v2930_v38  ;;  %v2932_v45 = vrot.slane %v2930_v38, 4  ;;  %v2630_v48 = vrot.slane %v2628_v60, 4  ;;  %v3680_v9 = vld [vmem:[#allocation2 + $0x14] sm:$0x1]  ;;  %v9932_v0 = vld [vmem:[#allocation2 + $0xa8] sm:$0xff]  }
 0x1f4   : > { %v2620_v61 = vor.u32 %v2619_v13, %v2615_v16  ;;  %v2633_v24 = vrot.slane %v2631_v53, 5  ;;  %v2639_v46 = vrot.slane %v2637_v40, 5  ;;  %v2641_v27 = vshrl.u32 %v2262_v7, 16  ;;  %v3166_v41 = vld [vmem:[#allocation2 + $0xc] sm:$0xf]  ;;  %v11352_v52 = vpop.f32.mrb[49].mxu0 }
 0x1f5   : > { %5768 = vmatmul.mubr.bf16.gmra.mrb[100].mxu0 %v9926_v49  ;;  %v2616_v62 = vsel %vm10548_vm7, %v2611_v51, %v2615_v16  ;;  %v2934_v47 = vsel %vm10677_vm12, %v2932_v45, %v2933_v1  ;;  %v2647_v44 = vshll.u32 %v2263_v31, 16  ;;  %v8532_v6 = vrot.slane %v2776_v2, 9  ;;  %v9938_v50 = vld [vmem:[#allocation2 + $0xc0] sm:$0xff]   ;;  %v3167_v38 = vld [vmem:[#allocation2 + $0x10] sm:$0xf]  ;;  %v11356_v1 = vpop.f32.mrb[50].mxu0 }
 0x1f6   : > { %v2621_v56 = vrot.slane %v2620_v61, 4  ;;  %v8547_v57 = vcombine.low %v2931_v5, %v2934_v47  ;;  %v2634_v25 = vor.u32 %v2633_v24, %v2630_v48  ;;  %v2643_v26 = vrot.slane %v2641_v27, 4  ;;  %v11358_v53 = vpop.f32.mrb[51].mxu0  ;;  %v4114_v61 = vld [vmem:[#allocation2 + $0x24] sm:$0xf] }
 0x1f7   : > { %v2649_v11 = vrot.slane %v2647_v44, 5  ;;  %v2937_v42 = vrot.slane %v2777_v8, 5  ;;  %v2940_v3 = vrot.slane %v2778_v55, 5  ;;  %v4160_v58 = vshrl.u32 %v4111_v39, 16  ;;  %v4115_v47 = vld [vmem:[#allocation2 + $0x28] sm:$0xf] }
 0x1f8   : > { %v2626_v14 = vsel %vm10548_vm7, %v2621_v56, %v2625_v37  ;;  %v2635_v32 = vrot.slane %v2634_v25, 4  ;;  %v2644_v4 = vor.u32 %v2643_v26, %v2639_v46  ;;  %v4163_v20 = vshll.u32 %v4111_v39, 16  ;;  %v3168_v39 = vld [vmem:[#allocation2 + $0x14] sm:$0x1] }
 0x1f9   : > { %v8515_v22 = vcombine.low %v2616_v62, %v2626_v14  ;;  %5937 = vmatmul.mubr.bf16.gmra.mrb[136].mxu1 %v8547_v57  ;;  %v2938_v63 = vsel %vm10677_vm12, %v8532_v6, %v2937_v42  ;;  %v2939_v43 = vrot.slane %v2937_v42, 4  ;;  %v4162_v15 = vrot.slane %v4160_v58, 4  ;;  %v9940_v58 = vld [vmem:[#allocation2 + $0xb4] sm:$0xff]  }
 0x1fa   : > { %5944 = vmatprep.mubr.bf16.mxu1 %v9938_v50  ;;  %v2640_v12 = vsel %vm10548_vm7, %v2635_v32, %v2639_v46  ;;  %v2645_v36 = vrot.slane %v2644_v4, 4  ;;  %v4165_v30 = vrot.slane %v4163_v20, 5  ;;  %v4169_v18 = vshll.u32 %v4112_v21, 16  ;;  %v4116_v50 = vld [vmem:[#allocation2 + $0x2c] sm:$0x1] }
 0x1fb   : > { %5775 = vmatprep.mubr.bf16.mxu0 %v8515_v22  ;;  %v2941_v54 = vsel %vm10677_vm12, %v2939_v43, %v2940_v3  ;;  %v4173_v33 = vshrl.u32 %v4112_v21, 16  ;;  %v4179_v7 = vshll.u32 %v4113_v10, 16  ;;  %v8581_v16 = vrot.slane %v3678_v35, 9  ;;  %v3681_v3 = vld [vmem:[#allocation2 + $0x18] sm:$0xe] }
 0x1fc   : > { %v2650_v19 = vsel %vm10548_vm7, %v2645_v36, %v2649_v11  ;;  %v8548_v28 = vcombine.low %v2938_v63, %v2941_v54  ;;  %v4166_v2 = vor.u32 %v4165_v30, %v4162_v15  ;;  %v4171_v59 = vrot.slane %v4169_v18, 5  ;;  %v3682_v21 = vld [vmem:[#allocation2 + $0x1c] sm:$0xf]  ;;  %v3683_v20 = vld [vmem:[#allocation2 + $0x20] sm:$0x1] }
 0x1fd   : > { %5776 = vmatmul.mubr.bf16.gmra.mrb[104].mxu0 %v9932_v0  ;;  %v8516_v31 = vcombine.low %v2640_v12, %v2650_v19  ;;  %v4175_v60 = vrot.slane %v4173_v33, 4  ;;  %v4181_v13 = vrot.slane %v4179_v7, 5  ;;  %v3776_v37 = vrot.slane %v3679_v34, 5  ;;  %v3169_v15 = vld [vmem:[#allocation2 + $0x18] sm:$0xf] }
 0x1fe   : > { %v4167_v40 = vrot.slane %v4166_v2, 4  ;;  %v3779_v8 = vrot.slane %v3680_v9, 5  ;;  %v3215_v49 = vshrl.u32 %v3166_v41, 16  ;;  %v3218_v51 = vshll.u32 %v3166_v41, 16  ;;  %v9944_v54 = vld [vmem:[#allocation2 + $0x18] sm:$0xff]  }
 0x1ff   : > { %5783 = vmatprep.mubr.bf16.mxu0 %v8516_v31  ;;  %v4176_v5 = vor.u32 %v4175_v60, %v4171_v59  ;;  %v3777_v45 = vsel %vm10677_vm12, %v8581_v16, %v3776_v37  ;;  %v3778_v48 = vrot.slane %v3776_v37, 4  ;;  %v3224_v55 = vshll.u32 %v3167_v38, 16 }
 0x200   : > { %v4172_v24 = vsel %vm10548_vm7, %v4167_v40, %v4171_v59  ;;  %v3217_v46 = vrot.slane %v3215_v49, 4  ;;  %v3220_v27 = vrot.slane %v3218_v51, 5  ;;  %v3228_v62 = vshrl.u32 %v3167_v38, 16  ;;  %v3171_v40 = vld [vmem:[#allocation2 + $0x20] sm:$0x1] }
 0x201   : > { %5945 = vmatmul.mubr.bf16.gmra.mrb[140].mxu1 %v8548_v28  ;;  %v4177_v44 = vrot.slane %v4176_v5, 4  ;;  %v3780_v6 = vsel %vm10677_vm12, %v3778_v48, %v3779_v8  ;;  %v3226_v56 = vrot.slane %v3224_v55, 5  ;;  %v3234_v57 = vshll.u32 %v3168_v39, 16  ;;  %v3170_v28 = vld [vmem:[#allocation2 + $0x1c] sm:$0xf] }
 0x202   : > { %v8597_v25 = vcombine.low %v3777_v45, %v3780_v6  ;;  %v3221_v26 = vor.u32 %v3220_v27, %v3217_v46  ;;  %v3230_v11 = vrot.slane %v3228_v62, 4  ;;  %v4184_v42 = vshrl.u32 %v4114_v61, 16  ;;  %v4117_v39 = vld [vmem:[#allocation2 + $0x30] sm:$0xf]  ;;  %v4118_v48 = vld [vmem:[#allocation2 + $0x34] sm:$0xf] }
 0x203   : > { %v4182_v14 = vsel %vm10548_vm7, %v4177_v44, %v4181_v13  ;;  %v3236_v32 = vrot.slane %v3234_v57, 5  ;;  %v4187_v4 = vshll.u32 %v4114_v61, 16  ;;  %v4193_v10 = vshll.u32 %v4115_v47, 16  ;;  %v4119_v27 = vld [vmem:[#allocation2 + $0x38] sm:$0x1] }
 0x204   : > { %v8629_v35 = vcombine.low %v4172_v24, %v4182_v14  ;;  %v3222_v22 = vrot.slane %v3221_v26, 4  ;;  %v3231_v63 = vor.u32 %v3230_v11, %v3226_v56  ;;  %v4186_v43 = vrot.slane %v4184_v42, 4  ;;  %v3684_v62 = vld [vmem:[#allocation2 + $0x24] sm:$0xe]  ;;  %v3685_v42 = vld [vmem:[#allocation2 + $0x28] sm:$0xf] }
 0x205   : > { %5784 = vmatmul.mubr.bf16.gmra.mrb[108].mxu0 %v9940_v58  ;;  %v4189_v34 = vrot.slane %v4187_v4, 5  ;;  %v4195_v9 = vrot.slane %v4193_v10, 5  ;;  %v4197_v12 = vshrl.u32 %v4115_v47, 16  ;;  %v4203_v36 = vshll.u32 %v4116_v50, 16  ;;  %v9948_v47 = vld [vmem:[%s13431_s4 + $0x208] sm:$0xff]  }
 0x206   : > { %6146 = vmatprep.mubr.bf16.mxu1 %v8629_v35  ;;  %5985 = vmatprep.mubr.bf16.mxu0 %v8597_v25  ;;  %v3227_v30 = vsel %vm10548_vm7, %v3222_v22, %v3226_v56  ;;  %v3232_v18 = vrot.slane %v3231_v63, 4  ;;  %v8582_v41 = vrot.slane %v3681_v3, 9  ;;  %v3783_v0 = vrot.slane %v3682_v21, 5  ;;  %v10020_v21 = vld [vmem:[%s13431_s4 + $0x200] sm:$0xff]   ;;  %v3686_v4 = vld [vmem:[#allocation2 + $0x2c] sm:$0x1] }
 0x207   : > { %v4190_v33 = vor.u32 %v4189_v34, %v4186_v43  ;;  %v4199_v7 = vrot.slane %v4197_v12, 4  ;;  %v4205_v16 = vrot.slane %v4203_v36, 5  ;;  %v3786_v19 = vrot.slane %v3683_v20, 5  ;;  %v9946_v10 = vld [vmem:[#allocation2 + $0x24] sm:$0xff]   ;;  %v9951_v43 = vld [vmem:[%s13431_s4 + $0x210] sm:$0xff]  }
 0x208   : > { %v3237_v2 = vsel %vm10548_vm7, %v3232_v18, %v3236_v32  ;;  %v3784_v59 = vsel %vm10677_vm12, %v8582_v41, %v3783_v0  ;;  %v3785_v38 = vrot.slane %v3783_v0, 4  ;;  %v3239_v31 = vshrl.u32 %v3169_v15, 16  ;;  %v3172_v36 = vld [vmem:[#allocation2 + $0x24] sm:$0xf] }
 0x209   : > { %6147 = vmatmul.mubr.bf16.vlgmr.msra.gmra.mrb[144].mxu1 %v9944_v54  ;;  %v8565_v60 = vcombine.low %v3227_v30, %v3237_v2  ;;  %v4191_v13 = vrot.slane %v4190_v33, 4  ;;  %v4200_v37 = vor.u32 %v4199_v7, %v4195_v9  ;;  %v3242_v8 = vshll.u32 %v3169_v15, 16  ;;  %v3173_v54 = vld [vmem:[#allocation2 + $0x28] sm:$0xf]  ;;  %v3174_v33 = vld [vmem:[#allocation2 + $0x2c] sm:$0x1] }
 0x20a   : > { %v3787_v49 = vsel %vm10677_vm12, %v3785_v38, %v3786_v19  ;;  %v3241_v51 = vrot.slane %v3239_v31, 4  ;;  %v3248_v5 = vshll.u32 %v3170_v28, 16  ;;  %v3252_v45 = vshrl.u32 %v3170_v28, 16  ;;  %v4120_v2 = vld [vmem:[#allocation2 + $0x3c] sm:$0xf] }
 0x20b   : > { %v4196_v55 = vsel %vm10548_vm7, %v4191_v13, %v4195_v9  ;;  %v4201_v61 = vrot.slane %v4200_v37, 4  ;;  %v8598_v24 = vcombine.low %v3784_v59, %v3787_v49  ;;  %v3244_v46 = vrot.slane %v3242_v8, 5  ;;  %v9954_v59 = vld [vmem:[%s13431_s4 + $0x218] sm:$0xff]   ;;  %v4121_v49 = vld [vmem:[#allocation2 + $0x40] sm:$0xf] }
 0x20c   : > { %v3250_v44 = vrot.slane %v3248_v5, 5  ;;  %v3254_v6 = vrot.slane %v3252_v45, 4  ;;  %v3258_v56 = vshll.u32 %v3171_v40, 16  ;;  %v4208_v57 = vshrl.u32 %v4117_v39, 16 }
 0x20d   : > { %5986 = vmatmul.mubr.bf16.vlgmr.msra.gmra.mrb[112].mxu0 %v8565_v60  ;;  %v4206_v50 = vsel %vm10548_vm7, %v4201_v61, %v4205_v16  ;;  %v3245_v25 = vor.u32 %v3244_v46, %v3241_v51  ;;  %v4211_v26 = vshll.u32 %v4117_v39, 16  ;;  %v4217_v11 = vshll.u32 %v4118_v48, 16 }
 0x20e   : > { %v8630_v3 = vcombine.low %v4196_v55, %v4206_v50  ;;  %5993 = vmatprep.mubr.bf16.mxu0 %v8598_v24  ;;  %9647 = vmatpush3.bf16.msra.mxu0 %v10020_v21  ;;  %v3255_v58 = vor.u32 %v3254_v6, %v3250_v44  ;;  %v3260_v14 = vrot.slane %v3258_v56, 5  ;;  %v4210_v32 = vrot.slane %v4208_v57, 4  ;;  %v3687_v56 = vld [vmem:[#allocation2 + $0x30] sm:$0xe]  ;;  %v9957_v57 = vld [vmem:[%s13431_s4 + $0x220] sm:$0xff]  }
 0x20f   : > { %v3246_v20 = vrot.slane %v3245_v25, 4  ;;  %v4213_v35 = vrot.slane %v4211_v26, 5  ;;  %v4219_v22 = vrot.slane %v4217_v11, 5  ;;  %v4221_v63 = vshrl.u32 %v4118_v48, 16  ;;  %9648 = vmatprep.subr.bf16.mxu0 %v9948_v47  ;;  %v9947_v25 = vld [vmem:[#allocation2 + $0x30] sm:$0xff]  }
 0x210   : > { %6154 = vmatprep.mubr.bf16.mxu1 %v8630_v3  ;;  %v3256_v15 = vrot.slane %v3255_v58, 4  ;;  %v4227_v34 = vshll.u32 %v4119_v27, 16  ;;  %v8583_v9 = vrot.slane %v3684_v62, 9  ;;  %v3790_v12 = vrot.slane %v3685_v42, 5  ;;  %v4122_v27 = vld [vmem:[#allocation2 + $0x44] sm:$0x1] }
 0x211   : > { %6155 = vmatmul.mubr.bf16.gmra.mrb[148].mxu1 %v9946_v10  ;;  %v3251_v30 = vsel %vm10548_vm7, %v3246_v20, %v3250_v44  ;;  %v4214_v18 = vor.u32 %v4213_v35, %v4210_v32  ;;  %v4223_v41 = vrot.slane %v4221_v63, 4  ;;  %v3793_v0 = vrot.slane %v3686_v4, 5  ;;  %v3688_v3 = vld [vmem:[#allocation2 + $0x34] sm:$0xf]  ;;  %v3689_v21 = vld [vmem:[#allocation2 + $0x38] sm:$0x1] }
 0x212   : > { %v3261_v7 = vsel %vm10548_vm7, %v3256_v15, %v3260_v14  ;;  %v4229_v16 = vrot.slane %v4227_v34, 5  ;;  %v3791_v19 = vsel %vm10677_vm12, %v8583_v9, %v3790_v12  ;;  %v3792_v28 = vrot.slane %v3790_v12, 4  ;;  %9649 = vmatpush3.bf16.msra.mxu0 %v9948_v47  ;;  %v3175_v10 = vld [vmem:[#allocation2 + $0x30] sm:$0xf] }
 0x213   : > { %v8566_v38 = vcombine.low %v3251_v30, %v3261_v7  ;;  %v4215_v31 = vrot.slane %v4214_v18, 4  ;;  %v4224_v60 = vor.u32 %v4223_v41, %v4219_v22  ;;  %v3263_v13 = vshrl.u32 %v3172_v36, 16  ;;  %9650 = vmatprep.subr.bf16.mxu0 %v9951_v43 }
 0x214   : > { %v3794_v37 = vsel %vm10677_vm12, %v3792_v28, %v3793_v0  ;;  %v3266_v40 = vshll.u32 %v3172_v36, 16  ;;  %v3272_v8 = vshll.u32 %v3173_v54, 16  ;;  %v3276_v39 = vshrl.u32 %v3173_v54, 16  ;;  %v9960_v36 = vld [vmem:[%s13431_s4 + $0x228] sm:$0xff]   ;;  %v3177_v0 = vld [vmem:[#allocation2 + $0x38] sm:$0x1] }
 0x215   : > { %5994 = vmatmul.mubr.bf16.gmra.mrb[116].mxu0 %v8566_v38  ;;  %v4220_v51 = vsel %vm10548_vm7, %v4215_v31, %v4219_v22  ;;  %v4225_v5 = vrot.slane %v4224_v60, 4  ;;  %v8599_v45 = vcombine.low %v3791_v19, %v3794_v37  ;;  %v3265_v48 = vrot.slane %v3263_v13, 4  ;;  %v4123_v28 = vld [vmem:[#allocation2 + $0x48] sm:$0xf]  ;;  %v4124_v60 = vld [vmem:[#allocation2 + $0x4c] sm:$0xf] }
 0x216   : > { %v3268_v55 = vrot.slane %v3266_v40, 5  ;;  %v3274_v61 = vrot.slane %v3272_v8, 5  ;;  %v3278_v24 = vrot.slane %v3276_v39, 4  ;;  %v3282_v46 = vshll.u32 %v3174_v33, 16  ;;  %9651 = vmatpush3.bf16.msra.mxu0 %v9951_v43  ;;  %v3176_v43 = vld [vmem:[#allocation2 + $0x34] sm:$0xf] }
 0x217   : > { %v4230_v62 = vsel %vm10548_vm7, %v4225_v5, %v4229_v16  ;;  %6001 = vmatprep.mubr.bf16.mxu0 %v8599_v45  ;;  %v4232_v47 = vshrl.u32 %v4120_v2, 16  ;;  %v4235_v44 = vshll.u32 %v4120_v2, 16  ;;  %v4241_v6 = vshll.u32 %v4121_v49, 16  ;;  %9652 = vmatprep.subr.bf16.mxu0 %v9954_v59  ;;  %v4125_v13 = vld [vmem:[#allocation2 + $0x50] sm:$0x1] }
 0x218   : > { %v8631_v50 = vcombine.low %v4220_v51, %v4230_v62  ;;  %v3269_v26 = vor.u32 %v3268_v55, %v3265_v48  ;;  %v3279_v11 = vor.u32 %v3278_v24, %v3274_v61  ;;  %v3284_v42 = vrot.slane %v3282_v46, 5  ;;  %v9963_v5 = vld [vmem:[%s13431_s4 + $0x230] sm:$0xff]   ;;  %v3690_v24 = vld [vmem:[#allocation2 + $0x3c] sm:$0xe] }
 0x219   : > { %v4234_v58 = vrot.slane %v4232_v47, 4  ;;  %v4237_v14 = vrot.slane %v4235_v44, 5  ;;  %v4243_v32 = vrot.slane %v4241_v6, 5  ;;  %v4245_v4 = vshrl.u32 %v4121_v49, 16  ;;  %v9949_v47 = vld [vmem:[#allocation2 + $0x3c] sm:$0xff]  }
 0x21a   : > { %6162 = vmatprep.mubr.bf16.mxu1 %v8631_v50  ;;  %v3270_v20 = vrot.slane %v3269_v26, 4  ;;  %v3280_v35 = vrot.slane %v3279_v11, 4  ;;  %v4251_v22 = vshll.u32 %v4122_v27, 16  ;;  %v8584_v63 = vrot.slane %v3687_v56, 9  ;;  %9653 = vmatpush3.bf16.msra.mxu0 %v9954_v59  ;;  %v3691_v56 = vld [vmem:[#allocation2 + $0x40] sm:$0xf] }
 0x21b   : > { %6163 = vmatmul.mubr.bf16.gmra.mrb[152].mxu1 %v9947_v25  ;;  %v4238_v15 = vor.u32 %v4237_v14, %v4234_v58  ;;  %v4247_v34 = vrot.slane %v4245_v4, 4  ;;  %v3797_v9 = vrot.slane %v3688_v3, 5  ;;  %v3800_v12 = vrot.slane %v3689_v21, 5  ;;  %9654 = vmatprep.subr.bf16.mxu0 %v9957_v57  ;;  %v3178_v3 = vld [vmem:[#allocation2 + $0x3c] sm:$0xf] }
 0x21c   : > { %v3275_v30 = vsel %vm10548_vm7, %v3270_v20, %v3274_v61  ;;  %v3285_v18 = vsel %vm10548_vm7, %v3280_v35, %v3284_v42  ;;  %v4253_v41 = vrot.slane %v4251_v22, 5  ;;  %v3287_v54 = vshrl.u32 %v3175_v10, 16  ;;  %v3692_v42 = vld [vmem:[#allocation2 + $0x44] sm:$0x1]  ;;  %v3179_v4 = vld [vmem:[#allocation2 + $0x40] sm:$0xf] }
 0x21d   : > { %v8567_v33 = vcombine.low %v3275_v30, %v3285_v18  ;;  %v4239_v7 = vrot.slane %v4238_v15, 4  ;;  %v4248_v16 = vor.u32 %v4247_v34, %v4243_v32  ;;  %v3798_v19 = vsel %vm10677_vm12, %v8584_v63, %v3797_v9  ;;  %v11416_v37 = vpop.f32.mrb[80].mxu1 }
 0x21e   : > { %v3799_v2 = vrot.slane %v3797_v9, 4  ;;  %v3289_v59 = vrot.slane %v3287_v54, 4  ;;  %v3290_v38 = vshll.u32 %v3175_v10, 16  ;;  %v3296_v31 = vshll.u32 %v3176_v43, 16  ;;  %9655 = vmatpush3.bf16.msra.mxu0 %v9957_v57  ;;  %v11420_v51 = vpop.f32.mrb[81].mxu1  ;;  %v9966_v10 = vld [vmem:[%s13431_s4 + $0x238] sm:$0xff]  }
 0x21f   : > { %6002 = vmatmul.mubr.bf16.gmra.mrb[120].mxu0 %v8567_v33  ;;  %v4244_v40 = vsel %vm10548_vm7, %v4239_v7, %v4243_v32  ;;  %v4249_v8 = vrot.slane %v4248_v16, 4  ;;  %v3300_v39 = vshrl.u32 %v3176_v43, 16  ;;  %v3306_v49 = vshll.u32 %v3177_v0, 16  ;;  %9656 = vmatprep.subr.bf16.mxu0 %v9960_v36  ;;  %v11427_v46 = vpop.f32.mrb[82].mxu1  ;;  %v3180_v33 = vld [vmem:[#allocation2 + $0x44] sm:$0x1] }
 0x220   : > { %v3801_v45 = vsel %vm10677_vm12, %v3799_v2, %v3800_v12  ;;  %v3292_v48 = vrot.slane %v3290_v38, 5  ;;  %v3298_v55 = vrot.slane %v3296_v31, 5  ;;  %v4256_v61 = vshrl.u32 %v4123_v28, 16  ;;  %v11431_v57 = vpop.f32.mrb[83].mxu1 }
 0x221   : > { %v4254_v27 = vsel %vm10548_vm7, %v4249_v8, %v4253_v41  ;;  %v8600_v62 = vcombine.low %v3798_v19, %v3801_v45  ;;  %v3302_v44 = vrot.slane %v3300_v39, 4  ;;  %v3308_v6 = vrot.slane %v3306_v49, 5  ;;  %v4128_v45 = vld [vmem:[#allocation2 + $0x5c] sm:$0x1] }
 0x222   : > { %v8632_v50 = vcombine.low %v4244_v40, %v4254_v27  ;;  %v3293_v25 = vor.u32 %v3292_v48, %v3289_v59  ;;  %v4258_v26 = vrot.slane %v4256_v61, 4  ;;  %v4259_v11 = vshll.u32 %v4123_v28, 16  ;;  %9657 = vmatpush3.bf16.msra.mxu0 %v9960_v36  ;;  %v4126_v59 = vld [vmem:[#allocation2 + $0x54] sm:$0xf]  ;;  %v4127_v40 = vld [vmem:[#allocation2 + $0x58] sm:$0xf] }
 0x223   : > { %6009 = vmatprep.mubr.bf16.mxu0 %v8600_v62  ;;  %v3303_v21 = vor.u32 %v3302_v44, %v3298_v55  ;;  %v4265_v58 = vshll.u32 %v4124_v60, 16  ;;  %v4269_v14 = vshrl.u32 %v4124_v60, 16  ;;  %v4275_v32 = vshll.u32 %v4125_v13, 16  ;;  %9658 = vmatprep.subr.bf16.mxu0 %v9963_v5  ;;  %v3693_v48 = vld [vmem:[#allocation2 + $0x48] sm:$0xe] }
 0x224   : > { %6170 = vmatprep.mubr.bf16.mxu1 %v8632_v50  ;;  %v3294_v20 = vrot.slane %v3293_v25, 4  ;;  %v4261_v35 = vrot.slane %v4259_v11, 5  ;;  %v8585_v22 = vrot.slane %v3690_v24, 9  ;;  %v3804_v63 = vrot.slane %v3691_v56, 5  ;;  %v3694_v62 = vld [vmem:[#allocation2 + $0x4c] sm:$0xf] }
 0x225   : > { %6171 = vmatmul.mubr.bf16.gmra.mrb[156].mxu1 %v9949_v47  ;;  %v3304_v43 = vrot.slane %v3303_v21, 4  ;;  %v4267_v15 = vrot.slane %v4265_v58, 5  ;;  %v4271_v34 = vrot.slane %v4269_v14, 4  ;;  %v4277_v9 = vrot.slane %v4275_v32, 5  ;;  %v9950_v50 = vld [vmem:[#allocation2 + $0x48] sm:$0xff]  }
 0x226   : > { %v3299_v12 = vsel %vm10548_vm7, %v3294_v20, %v3298_v55  ;;  %v4262_v36 = vor.u32 %v4261_v35, %v4258_v26  ;;  %v3805_v30 = vsel %vm10677_vm12, %v8585_v22, %v3804_v63  ;;  %v3806_v18 = vrot.slane %v3804_v63, 4  ;;  %9659 = vmatpush3.bf16.msra.mxu0 %v9963_v5  ;;  %v3181_v22 = vld [vmem:[#allocation2 + $0x48] sm:$0xf] }
 0x227   : > { %v3309_v41 = vsel %vm10548_vm7, %v3304_v43, %v3308_v6  ;;  %v4272_v0 = vor.u32 %v4271_v34, %v4267_v15  ;;  %v3807_v54 = vrot.slane %v3692_v42, 5  ;;  %v3311_v7 = vshrl.u32 %v3178_v3, 16  ;;  %9660 = vmatprep.subr.bf16.mxu0 %v9966_v10 }
 0x228   : > { %v8568_v16 = vcombine.low %v3299_v12, %v3309_v41  ;;  %v4263_v19 = vrot.slane %v4262_v36, 4  ;;  %v3314_v28 = vshll.u32 %v3178_v3, 16  ;;  %v3320_v2 = vshll.u32 %v3179_v4, 16  ;;  %v3695_v3 = vld [vmem:[#allocation2 + $0x50] sm:$0x1] }
 0x229   : > { %v4273_v38 = vrot.slane %v4272_v0, 4  ;;  %v3808_v31 = vsel %vm10677_vm12, %v3806_v18, %v3807_v54  ;;  %v3313_v60 = vrot.slane %v3311_v7, 4  ;;  %v3324_v13 = vshrl.u32 %v3179_v4, 16  ;;  %v3183_v41 = vld [vmem:[#allocation2 + $0x50] sm:$0x1] }
 0x22a   : > { %6010 = vmatmul.mubr.bf16.gmra.mrb[124].mxu0 %v8568_v16  ;;  %v4268_v8 = vsel %vm10548_vm7, %v4263_v19, %v4267_v15  ;;  %v8601_v39 = vcombine.low %v3805_v30, %v3808_v31  ;;  %v3316_v49 = vrot.slane %v3314_v28, 5  ;;  %v3322_v5 = vrot.slane %v3320_v2, 5  ;;  %v4129_v0 = vld [vmem:[#allocation2 + $0x60] sm:$0xf]  ;;  %v4130_v28 = vld [vmem:[#allocation2 + $0x64] sm:$0xf] }
 0x22b   : > { %v4278_v55 = vsel %vm10548_vm7, %v4273_v38, %v4277_v9  ;;  %v3326_v61 = vrot.slane %v3324_v13, 4  ;;  %v3330_v24 = vshll.u32 %v3180_v33, 16  ;;  %v4280_v27 = vshrl.u32 %v4126_v59, 16  ;;  %9661 = vmatpush3.bf16.msra.mxu0 %v9966_v10  ;;  %v3182_v9 = vld [vmem:[#allocation2 + $0x4c] sm:$0xf] }
 0x22c   : > { %v8633_v47 = vcombine.low %v4268_v8, %v4278_v55  ;;  %6017 = vmatprep.mubr.bf16.mxu0 %v8601_v39  ;;  %v3317_v44 = vor.u32 %v3316_v49, %v3313_v60  ;;  %v4283_v6 = vshll.u32 %v4126_v59, 16  ;;  %v4289_v56 = vshll.u32 %v4127_v40, 16 }
 0x22d   : > { %v3327_v25 = vor.u32 %v3326_v61, %v3322_v5  ;;  %v3332_v26 = vrot.slane %v3330_v24, 5  ;;  %v4282_v11 = vrot.slane %v4280_v27, 4  ;;  %v4293_v42 = vshrl.u32 %v4127_v40, 16 }
 0x22e   : > { %6178 = vmatprep.mubr.bf16.mxu1 %v8633_v47  ;;  %v3318_v21 = vrot.slane %v3317_v44, 4  ;;  %v4285_v58 = vrot.slane %v4283_v6, 5  ;;  %v4291_v14 = vrot.slane %v4289_v56, 5  ;;  %v4299_v32 = vshll.u32 %v4128_v45, 16  ;;  %v4131_v45 = vld [vmem:[#allocation2 + $0x68] sm:$0x1] }
 0x22f   : > { %6179 = vmatmul.mubr.bf16.gmra.mrb[160].mxu1 %v9950_v50  ;;  %v3328_v4 = vrot.slane %v3327_v25, 4  ;;  %v4295_v20 = vrot.slane %v4293_v42, 4  ;;  %v8586_v10 = vrot.slane %v3693_v48, 9  ;;  %v3811_v35 = vrot.slane %v3694_v62, 5  ;;  %v11454_v54 = vpop.f32.mrb[52].mxu0  ;;  %v9952_v42 = vld [vmem:[#allocation2 + $0x54] sm:$0xff]  }
 0x230   : > { %v3323_v63 = vsel %vm10548_vm7, %v3318_v21, %v3322_v5  ;;  %v4286_v43 = vor.u32 %v4285_v58, %v4282_v11  ;;  %v4301_v15 = vrot.slane %v4299_v32, 5  ;;  %v3814_v34 = vrot.slane %v3695_v3, 5  ;;  %v11456_v2 = vpop.f32.mrb[53].mxu0  ;;  %v3696_v47 = vld [vmem:[#allocation2 + $0x54] sm:$0xe] }
 0x231   : > { %v3333_v12 = vsel %vm10548_vm7, %v3328_v4, %v3332_v26  ;;  %v4296_v36 = vor.u32 %v4295_v20, %v4291_v14  ;;  %v3812_v30 = vsel %vm10677_vm12, %v8586_v10, %v3811_v35  ;;  %v3813_v18 = vrot.slane %v3811_v35, 4  ;;  %v11462_v40 = vpop.f32.mrb[54].mxu0  ;;  %v3697_v26 = vld [vmem:[#allocation2 + $0x58] sm:$0xf]  ;;  %v3698_v32 = vld [vmem:[#allocation2 + $0x5c] sm:$0x1] }
 0x232   : > { %v8569_v33 = vcombine.low %v3323_v63, %v3333_v12  ;;  %v4287_v7 = vrot.slane %v4286_v43, 4  ;;  %v3335_v16 = vshrl.u32 %v3181_v22, 16  ;;  %v3338_v19 = vshll.u32 %v3181_v22, 16  ;;  %v11460_v13 = vpop.f32.mrb[84].mxu1  ;;  %v11468_v55 = vpop.f32.mrb[55].mxu0 }
 0x233   : > { %v4297_v59 = vrot.slane %v4296_v36, 4  ;;  %v3815_v38 = vsel %vm10677_vm12, %v3813_v18, %v3814_v34  ;;  %v3344_v31 = vshll.u32 %v3182_v9, 16  ;;  %v3348_v60 = vshrl.u32 %v3182_v9, 16  ;;  %v11466_v48 = vpop.f32.mrb[85].mxu1  ;;  %v3184_v22 = vld [vmem:[#allocation2 + $0x54] sm:$0xf] }
 0x234   : > { %6018 = vmatmul.mubr.bf16.gmra.mrb[128].mxu0 %v8569_v33  ;;  %v4292_v8 = vsel %vm10548_vm7, %v4287_v7, %v4291_v14  ;;  %v8602_v39 = vcombine.low %v3812_v30, %v3815_v38  ;;  %v3337_v49 = vrot.slane %v3335_v16, 4  ;;  %v3340_v5 = vrot.slane %v3338_v19, 5  ;;  %v11472_v44 = vpop.f32.mrb[86].mxu1  ;;  %v3185_v18 = vld [vmem:[#allocation2 + $0x58] sm:$0xf] }
 0x235   : > { %v4302_v61 = vsel %vm10548_vm7, %v4297_v59, %v4301_v15  ;;  %v3346_v24 = vrot.slane %v3344_v31, 5  ;;  %v3350_v27 = vrot.slane %v3348_v60, 4  ;;  %v3354_v62 = vshll.u32 %v3183_v41, 16  ;;  %v11474_v11 = vpop.f32.mrb[87].mxu1  ;;  %v3186_v7 = vld [vmem:[#allocation2 + $0x5c] sm:$0x1] }
 0x236   : > { %v8634_v6 = vcombine.low %v4292_v8, %v4302_v61  ;;  %6025 = vmatprep.mubr.bf16.mxu0 %v8602_v39  ;;  %v3341_v56 = vor.u32 %v3340_v5, %v3337_v49  ;;  %v4304_v50 = vshrl.u32 %v4129_v0, 16  ;;  %v4307_v25 = vshll.u32 %v4129_v0, 16  ;;  %v4132_v49 = vld [vmem:[#allocation2 + $0x6c] sm:$0xf] }
 0x237   : > { %v3351_v3 = vor.u32 %v3350_v27, %v3346_v24  ;;  %v3356_v21 = vrot.slane %v3354_v62, 5  ;;  %v4313_v58 = vshll.u32 %v4130_v28, 16  ;;  %v4317_v14 = vshrl.u32 %v4130_v28, 16  ;;  %v4133_v27 = vld [vmem:[#allocation2 + $0x70] sm:$0xf] }
 0x238   : > { %6186 = vmatprep.mubr.bf16.mxu1 %v8634_v6  ;;  %v3342_v4 = vrot.slane %v3341_v56, 4  ;;  %v4306_v20 = vrot.slane %v4304_v50, 4  ;;  %v4309_v10 = vrot.slane %v4307_v25, 5  ;;  %v4323_v35 = vshll.u32 %v4131_v45, 16  ;;  %v9953_v6 = vld [vmem:[#allocation2 + $0x60] sm:$0xff]  }
 0x239   : > { %6187 = vmatmul.mubr.bf16.gmra.mrb[164].mxu1 %v9952_v42  ;;  %v3352_v63 = vrot.slane %v3351_v3, 4  ;;  %v4315_v43 = vrot.slane %v4313_v58, 5  ;;  %v4319_v15 = vrot.slane %v4317_v14, 4  ;;  %v8587_v34 = vrot.slane %v3696_v47, 9  ;;  %v4134_v25 = vld [vmem:[#allocation2 + $0x74] sm:$0x1] }
 0x23a   : > { %v3347_v9 = vsel %vm10548_vm7, %v3342_v4, %v3346_v24  ;;  %v4310_v12 = vor.u32 %v4309_v10, %v4306_v20  ;;  %v4325_v36 = vrot.slane %v4323_v35, 5  ;;  %v3818_v30 = vrot.slane %v3697_v26, 5  ;;  %v3699_v26 = vld [vmem:[#allocation2 + $0x60] sm:$0xe]  ;;  %v3700_v14 = vld [vmem:[#allocation2 + $0x64] sm:$0xf] }
 0x23b   : > { %v3357_v41 = vsel %vm10548_vm7, %v3352_v63, %v3356_v21  ;;  %v4320_v0 = vor.u32 %v4319_v15, %v4315_v43  ;;  %v3821_v33 = vrot.slane %v3698_v32, 5  ;;  %v3359_v16 = vshrl.u32 %v3184_v22, 16 }
 0x23c   : > { %v8570_v19 = vcombine.low %v3347_v9, %v3357_v41  ;;  %v4311_v28 = vrot.slane %v4310_v12, 4  ;;  %v3819_v59 = vsel %vm10677_vm12, %v8587_v34, %v3818_v30  ;;  %v3820_v38 = vrot.slane %v3818_v30, 4  ;;  %v3187_v12 = vld [vmem:[#allocation2 + $0x60] sm:$0xf] }
 0x23d   : > { %v4321_v31 = vrot.slane %v4320_v0, 4  ;;  %v3361_v60 = vrot.slane %v3359_v16, 4  ;;  %v3362_v8 = vshll.u32 %v3184_v22, 16  ;;  %v3368_v39 = vshll.u32 %v3185_v18, 16  ;;  %v3701_v22 = vld [vmem:[#allocation2 + $0x68] sm:$0x1] }
 0x23e   : > { %6026 = vmatmul.mubr.bf16.gmra.mrb[132].mxu0 %v8570_v19  ;;  %v4316_v5 = vsel %vm10548_vm7, %v4311_v28, %v4315_v43  ;;  %v3822_v45 = vsel %vm10677_vm12, %v3820_v38, %v3821_v33  ;;  %v3372_v61 = vshrl.u32 %v3185_v18, 16  ;;  %v3378_v24 = vshll.u32 %v3186_v7, 16 }
 0x23f   : > { %v4326_v62 = vsel %vm10548_vm7, %v4321_v31, %v4325_v36  ;;  %v8603_v47 = vcombine.low %v3819_v59, %v3822_v45  ;;  %v3364_v56 = vrot.slane %v3362_v8, 5  ;;  %v3370_v50 = vrot.slane %v3368_v39, 5  ;;  %v11488_v32 = vpop.f32.mrb[88].mxu1  ;;  %v3188_v8 = vld [vmem:[#allocation2 + $0x64] sm:$0xf] }
 0x240   : > { %v8635_v42 = vcombine.low %v4316_v5, %v4326_v62  ;;  %v3374_v3 = vrot.slane %v3372_v61, 4  ;;  %v3380_v21 = vrot.slane %v3378_v24, 5  ;;  %v4328_v58 = vshrl.u32 %v4132_v49, 16  ;;  %v11490_v63 = vpop.f32.mrb[89].mxu1  ;;  %v3189_v24 = vld [vmem:[#allocation2 + $0x68] sm:$0x1] }
 0x241   : > { %6033 = vmatprep.mubr.bf16.mxu0 %v8603_v47  ;;  %v3365_v4 = vor.u32 %v3364_v56, %v3361_v60  ;;  %v4331_v20 = vshll.u32 %v4132_v49, 16  ;;  %v4337_v10 = vshll.u32 %v4133_v27, 16  ;;  %v4341_v35 = vshrl.u32 %v4133_v27, 16  ;;  %v11492_v36 = vpop.f32.mrb[90].mxu1 }
 0x242   : > { %6194 = vmatprep.mubr.bf16.mxu1 %v8635_v42  ;;  %v3375_v43 = vor.u32 %v3374_v3, %v3370_v50  ;;  %v4330_v15 = vrot.slane %v4328_v58, 4  ;;  %v4347_v34 = vshll.u32 %v4134_v25, 16  ;;  %v8588_v9 = vrot.slane %v3699_v26, 9  ;;  %v11494_v33 = vpop.f32.mrb[91].mxu1  ;;  %v11496_v59 = vpop.f32.mrb[56].mxu0 }
 0x243   : > { %6195 = vmatmul.mubr.bf16.gmra.mrb[168].mxu1 %v9953_v6  ;;  %v3366_v30 = vrot.slane %v3365_v4, 4  ;;  %v4333_v18 = vrot.slane %v4331_v20, 5  ;;  %v4339_v41 = vrot.slane %v4337_v10, 5  ;;  %v4343_v0 = vrot.slane %v4341_v35, 4  ;;  %v11500_v49 = vpop.f32.mrb[57].mxu0  ;;  %v9955_v35 = vld [vmem:[#allocation2 + $0x6c] sm:$0xff]  }
 0x244   : > { %v3376_v7 = vrot.slane %v3375_v43, 4  ;;  %v4349_v16 = vrot.slane %v4347_v34, 5  ;;  %v3825_v19 = vrot.slane %v3700_v14, 5  ;;  %v3828_v28 = vrot.slane %v3701_v22, 5  ;;  %v11506_v62 = vpop.f32.mrb[58].mxu0 }
 0x245   : > { %v3371_v38 = vsel %vm10548_vm7, %v3366_v30, %v3370_v50  ;;  %v4334_v31 = vor.u32 %v4333_v18, %v4330_v15  ;;  %v4344_v60 = vor.u32 %v4343_v0, %v4339_v41  ;;  %v3383_v39 = vshrl.u32 %v3187_v12, 16  ;;  %v4135_v25 = vld [vmem:[#allocation2 + $0x78] sm:$0xf]  ;;  %v11508_v26 = vpop.f32.mrb[59].mxu0  ;;  %v4136_v14 = vld [vmem:[#allocation2 + $0x7c] sm:$0xf] }
 0x246   : > { %v3381_v5 = vsel %vm10548_vm7, %v3376_v7, %v3380_v21  ;;  %v3826_v45 = vsel %vm10677_vm12, %v8588_v9, %v3825_v19  ;;  %v3827_v61 = vrot.slane %v3825_v19, 4  ;;  %v3386_v27 = vshll.u32 %v3187_v12, 16  ;;  %v4137_v43 = vld [vmem:[#allocation2 + $0x80] sm:$0x1]  ;;  %v3702_v30 = vld [vmem:[#allocation2 + $0x6c] sm:$0xe] }
 0x247   : > { %v8571_v47 = vcombine.low %v3371_v38, %v3381_v5  ;;  %v4335_v6 = vrot.slane %v4334_v31, 4  ;;  %v4345_v56 = vrot.slane %v4344_v60, 4  ;;  %v3385_v50 = vrot.slane %v3383_v39, 4  ;;  %v3703_v18 = vld [vmem:[#allocation2 + $0x70] sm:$0xf] }
 0x248   : > { %v3829_v42 = vsel %vm10677_vm12, %v3827_v61, %v3828_v28  ;;  %v3388_v3 = vrot.slane %v3386_v27, 5  ;;  %v3392_v21 = vshll.u32 %v3188_v8, 16  ;;  %v3396_v58 = vshrl.u32 %v3188_v8, 16  ;;  %v3704_v38 = vld [vmem:[#allocation2 + $0x74] sm:$0x1] }
 0x249   : > { %6034 = vmatmul.mubr.bf16.gmra.mrb[136].mxu0 %v8571_v47  ;;  %v4340_v4 = vsel %vm10548_vm7, %v4335_v6, %v4339_v41  ;;  %v4350_v20 = vsel %vm10548_vm7, %v4345_v56, %v4349_v16  ;;  %v8604_v10 = vcombine.low %v3826_v45, %v3829_v42  ;;  %v3402_v22 = vshll.u32 %v3189_v24, 16  ;;  %v3190_v8 = vld [vmem:[#allocation2 + $0x6c] sm:$0xf]  ;;  %v3191_v24 = vld [vmem:[#allocation2 + $0x70] sm:$0xf] }
 0x24a   : > { %v8636_v15 = vcombine.low %v4340_v4, %v4350_v20  ;;  %v3389_v34 = vor.u32 %v3388_v3, %v3385_v50  ;;  %v3394_v9 = vrot.slane %v3392_v21, 5  ;;  %v3398_v12 = vrot.slane %v3396_v58, 4  ;;  %v3192_v20 = vld [vmem:[#allocation2 + $0x74] sm:$0x1] }
 0x24b   : > { %6041 = vmatprep.mubr.bf16.mxu0 %v8604_v10  ;;  %v3404_v0 = vrot.slane %v3402_v22, 5  ;;  %v4352_v7 = vshrl.u32 %v4135_v25, 16  ;;  %v4355_v19 = vshll.u32 %v4135_v25, 16  ;;  %v4361_v28 = vshll.u32 %v4136_v14, 16 }
 0x24c   : > { %6202 = vmatprep.mubr.bf16.mxu1 %v8636_v15  ;;  %v3390_v41 = vrot.slane %v3389_v34, 4  ;;  %v3399_v31 = vor.u32 %v3398_v12, %v3394_v9  ;;  %v4365_v16 = vshrl.u32 %v4136_v14, 16  ;;  %v4371_v60 = vshll.u32 %v4137_v43, 16 }
 0x24d   : > { %6203 = vmatmul.mubr.bf16.gmra.mrb[172].mxu1 %v9955_v35  ;;  %v4354_v39 = vrot.slane %v4352_v7, 4  ;;  %v4357_v5 = vrot.slane %v4355_v19, 5  ;;  %v4363_v45 = vrot.slane %v4361_v28, 5  ;;  %v8589_v61 = vrot.slane %v3702_v30, 9  ;;  %v11518_v50 = vpop.f32.mrb[92].mxu1 }
 0x24e   : > { %v3395_v27 = vsel %vm10548_vm7, %v3390_v41, %v3394_v9  ;;  %v3400_v47 = vrot.slane %v3399_v31, 4  ;;  %v4367_v6 = vrot.slane %v4365_v16, 4  ;;  %v4373_v56 = vrot.slane %v4371_v60, 5  ;;  %v11520_v58 = vpop.f32.mrb[93].mxu1  ;;  %v4138_v30 = vld [vmem:[#allocation2 + $0x84] sm:$0xf] }
 0x24f   : > { %v4358_v25 = vor.u32 %v4357_v5, %v4354_v39  ;;  %v3832_v42 = vrot.slane %v3703_v18, 5  ;;  %v3835_v3 = vrot.slane %v3704_v38, 5  ;;  %v3407_v21 = vshrl.u32 %v3190_v8, 16  ;;  %v11524_v22 = vpop.f32.mrb[60].mxu0  ;;  %v11526_v43 = vpop.f32.mrb[94].mxu1 }
 0x250   : > { %v3405_v14 = vsel %vm10548_vm7, %v3400_v47, %v3404_v0  ;;  %v4368_v4 = vor.u32 %v4367_v6, %v4363_v45  ;;  %v3410_v10 = vshll.u32 %v3190_v8, 16  ;;  %v3416_v35 = vshll.u32 %v3191_v24, 16  ;;  %v11530_v18 = vpop.f32.mrb[61].mxu0  ;;  %v11532_v7 = vpop.f32.mrb[95].mxu1  ;;  %v4139_v39 = vld [vmem:[#allocation2 + $0x88] sm:$0xf] }
 0x251   : > { %v8572_v15 = vcombine.low %v3395_v27, %v3405_v14  ;;  %v4359_v34 = vrot.slane %v4358_v25, 4  ;;  %v3833_v9 = vsel %vm10677_vm12, %v8589_v61, %v3832_v42  ;;  %v3834_v12 = vrot.slane %v3832_v42, 4  ;;  %v11534_v41 = vpop.f32.mrb[62].mxu0  ;;  %v4140_v6 = vld [vmem:[#allocation2 + $0x8c] sm:$0x1]  ;;  %v9956_v14 = vld [vmem:[#allocation2 + $0x78] sm:$0xff]  }
 0x252   : > { %v4369_v0 = vrot.slane %v4368_v4, 4  ;;  %v3409_v19 = vrot.slane %v3407_v21, 4  ;;  %v3412_v28 = vrot.slane %v3410_v10, 5  ;;  %v3418_v38 = vrot.slane %v3416_v35, 5  ;;  %v11540_v5 = vpop.f32.mrb[63].mxu0 }
 0x253   : > { %6042 = vmatmul.mubr.bf16.gmra.mrb[140].mxu0 %v8572_v15  ;;  %v4364_v31 = vsel %vm10548_vm7, %v4359_v34, %v4363_v45  ;;  %v3836_v16 = vsel %vm10677_vm12, %v3834_v12, %v3835_v3  ;;  %v3420_v60 = vshrl.u32 %v3191_v24, 16  ;;  %v3426_v8 = vshll.u32 %v3192_v20, 16  ;;  %v3705_v42 = vld [vmem:[#allocation2 + $0x78] sm:$0xe]  ;;  %v3706_v35 = vld [vmem:[#allocation2 + $0x7c] sm:$0xf] }
 0x254   : > { %v4374_v61 = vsel %vm10548_vm7, %v4369_v0, %v4373_v56  ;;  %v8605_v27 = vcombine.low %v3833_v9, %v3836_v16  ;;  %v3413_v47 = vor.u32 %v3412_v28, %v3409_v19  ;;  %v4376_v25 = vshrl.u32 %v4138_v30, 16  ;;  %v3707_v34 = vld [vmem:[#allocation2 + $0x80] sm:$0x1]  ;;  %v3193_v19 = vld [vmem:[#allocation2 + $0x78] sm:$0xf] }
 0x255   : > { %v8637_v21 = vcombine.low %v4364_v31, %v4374_v61  ;;  %v3422_v4 = vrot.slane %v3420_v60, 4  ;;  %v3428_v45 = vrot.slane %v3426_v8, 5  ;;  %v4379_v10 = vshll.u32 %v4138_v30, 16  ;;  %v3194_v60 = vld [vmem:[#allocation2 + $0x7c] sm:$0xf] }
 0x256   : > { %6049 = vmatprep.mubr.bf16.mxu0 %v8605_v27  ;;  %v3414_v24 = vrot.slane %v3413_v47, 4  ;;  %v4378_v3 = vrot.slane %v4376_v25, 4  ;;  %v4385_v20 = vshll.u32 %v4139_v39, 16  ;;  %v4389_v15 = vshrl.u32 %v4139_v39, 16 }
 0x257   : > { %6210 = vmatprep.mubr.bf16.mxu1 %v8637_v21  ;;  %v3423_v12 = vor.u32 %v3422_v4, %v3418_v38  ;;  %v4381_v56 = vrot.slane %v4379_v10, 5  ;;  %v4395_v9 = vshll.u32 %v4140_v6, 16  ;;  %v8590_v0 = vrot.slane %v3705_v42, 9  ;;  %v3195_v6 = vld [vmem:[#allocation2 + $0x80] sm:$0x1] }
 0x258   : > { %6211 = vmatmul.mubr.bf16.gmra.mrb[176].mxu1 %v9956_v14  ;;  %v3419_v28 = vsel %vm10548_vm7, %v3414_v24, %v3418_v38  ;;  %v4387_v31 = vrot.slane %v4385_v20, 5  ;;  %v4391_v16 = vrot.slane %v4389_v15, 4  ;;  %v3839_v30 = vrot.slane %v3706_v35, 5  ;;  %v4141_v4 = vld [vmem:[#allocation2 + $0x90] sm:$0xf] }
 0x259   : > { %v3424_v8 = vrot.slane %v3423_v12, 4  ;;  %v4382_v61 = vor.u32 %v4381_v56, %v4378_v3  ;;  %v4397_v27 = vrot.slane %v4395_v9, 5  ;;  %v3842_v47 = vrot.slane %v3707_v34, 5  ;;  %v4142_v56 = vld [vmem:[#allocation2 + $0x94] sm:$0xf] }
 0x25a   : > { %v4392_v39 = vor.u32 %v4391_v16, %v4387_v31  ;;  %v3840_v25 = vsel %vm10677_vm12, %v8590_v0, %v3839_v30  ;;  %v3841_v21 = vrot.slane %v3839_v30, 4  ;;  %v3431_v42 = vshrl.u32 %v3193_v19, 16  ;;  %v11550_v35 = vpop.f32.mrb[96].mxu1  ;;  %v11552_v20 = vpop.f32.mrb[64].mxu0 }
 0x25b   : > { %v3429_v14 = vsel %vm10548_vm7, %v3424_v8, %v3428_v45  ;;  %v4383_v38 = vrot.slane %v4382_v61, 4  ;;  %v3434_v10 = vshll.u32 %v3193_v19, 16  ;;  %v3440_v24 = vshll.u32 %v3194_v60, 16  ;;  %13508 = vst [vmem:[#allocation7_spill] sm:$0xff] %v11550_v35  ;;  %13509 = vst [vmem:[#allocation8_spill] sm:$0xff] %v11552_v20  ;;  %v11556_v9 = vpop.f32.mrb[97].mxu1 }
 0x25c   : > { %v8573_v3 = vcombine.low %v3419_v28, %v3429_v14  ;;  %v4393_v15 = vrot.slane %v4392_v39, 4  ;;  %v3843_v34 = vsel %vm10677_vm12, %v3841_v21, %v3842_v47  ;;  %v3433_v12 = vrot.slane %v3431_v42, 4  ;;  %13510 = vst [vmem:[#allocation9_spill] sm:$0xff] %v11556_v9  ;;  %v11558_v0 = vpop.f32.mrb[65].mxu0  ;;  %v4143_v8 = vld [vmem:[#allocation2 + $0x98] sm:$0x1] }
 0x25d   : > { %13511 = vst [vmem:[#allocation10_spill] sm:$0xff] %v11558_v0  ;;  %v4388_v45 = vsel %vm10548_vm7, %v4383_v38, %v4387_v31  ;;  %v8606_v19 = vcombine.low %v3840_v25, %v3843_v34  ;;  %v3436_v16 = vrot.slane %v3434_v10, 5  ;;  %v3442_v30 = vrot.slane %v3440_v24, 5  ;;  %v11562_v61 = vpop.f32.mrb[98].mxu1  ;;  %v11564_v28 = vpop.f32.mrb[66].mxu0  ;;  %v9958_v39 = vld [vmem:[#allocation2 + $0x84] sm:$0xff]  }
 0x25e   : > { %13512 = vst [vmem:[#allocation11_spill] sm:$0xff] %v11562_v61  ;;  %13513 = vst [vmem:[#allocation12_spill] sm:$0xff] %v11564_v28  ;;  %6050 = vmatmul.mubr.bf16.gmra.mrb[144].mxu0 %v8573_v3  ;;  %v4398_v47 = vsel %vm10548_vm7, %v4393_v15, %v4397_v27  ;;  %v3444_v21 = vshrl.u32 %v3194_v60, 16  ;;  %v3450_v42 = vshll.u32 %v3195_v6, 16  ;;  %v4400_v14 = vshrl.u32 %v4141_v4, 16  ;;  %v11568_v0 = vpop.f32.mrb[99].mxu1 }
 0x25f   : > { %13514 = vst [vmem:[#allocation13_spill] sm:$0xff] %v11568_v0  ;;  %v11570_v20 = vpop.f32.mrb[67].mxu0  ;;  %v8638_v31 = vcombine.low %v4388_v45, %v4398_v47  ;;  %6057 = vmatprep.mubr.bf16.mxu0 %v8606_v19  ;;  %v3437_v25 = vor.u32 %v3436_v16, %v3433_v12  ;;  %v4403_v38 = vshll.u32 %v4141_v4, 16  ;;  %v4409_v10 = vshll.u32 %v4142_v56, 16  ;;  %v3708_v24 = vld [vmem:[#allocation2 + $0x84] sm:$0xe] }
 0x260   : > { %13515 = vst [vmem:[#allocation14_spill] sm:$0xff] %v11570_v20  ;;  %v3709_v34 = vld [vmem:[#allocation2 + $0x88] sm:$0xf]  ;;  %v3446_v28 = vrot.slane %v3444_v21, 4  ;;  %v3452_v3 = vrot.slane %v3450_v42, 5  ;;  %v4402_v61 = vrot.slane %v4400_v14, 4 }
 0x261   : > { %v4413_v9 = vshrl.u32 %v4142_v56, 16  ;;  %v3710_v27 = vld [vmem:[#allocation2 + $0x8c] sm:$0x1]  ;;  %6218 = vmatprep.mubr.bf16.mxu1 %v8638_v31  ;;  %v3438_v60 = vrot.slane %v3437_v25, 4  ;;  %v4405_v6 = vrot.slane %v4403_v38, 5  ;;  %v4411_v15 = vrot.slane %v4409_v10, 5 }
 0x262   : > { %v4419_v35 = vshll.u32 %v4143_v8, 16  ;;  %v3196_v0 = vld [vmem:[#allocation2 + $0x84] sm:$0xf]  ;;  %6219 = vmatmul.mubr.bf16.gmra.mrb[180].mxu1 %v9958_v39  ;;  %v3447_v20 = vor.u32 %v3446_v28, %v3442_v30  ;;  %v8591_v19 = vrot.slane %v3708_v24, 9  ;;  %v3846_v12 = vrot.slane %v3709_v34, 5 }
 0x263   : > { %v4415_v45 = vrot.slane %v4413_v9, 4  ;;  %v3197_v4 = vld [vmem:[#allocation2 + $0x88] sm:$0xf]  ;;  %v3443_v16 = vsel %vm10548_vm7, %v3438_v60, %v3442_v30  ;;  %v4406_v47 = vor.u32 %v4405_v6, %v4402_v61  ;;  %v3849_v42 = vrot.slane %v3710_v27, 5  ;;  %v3198_v61 = vld [vmem:[#allocation2 + $0x8c] sm:$0x1] }
 0x264   : > { %v4421_v21 = vrot.slane %v4419_v35, 5  ;;  %v3448_v56 = vrot.slane %v3447_v20, 4  ;;  %v3847_v31 = vsel %vm10677_vm12, %v8591_v19, %v3846_v12  ;;  %v3848_v25 = vrot.slane %v3846_v12, 4  ;;  %v4144_v24 = vld [vmem:[#allocation2 + $0x9c] sm:$0xf] }
 0x265   : > { %v4416_v14 = vor.u32 %v4415_v45, %v4411_v15  ;;  %v4407_v8 = vrot.slane %v4406_v47, 4  ;;  %v3455_v38 = vshrl.u32 %v3196_v0, 16  ;;  %v3458_v39 = vshll.u32 %v3196_v0, 16  ;;  %v4145_v6 = vld [vmem:[#allocation2 + $0xa0] sm:$0xf] }
 0x266   : > { %v3464_v28 = vshll.u32 %v3197_v4, 16  ;;  %v3453_v9 = vsel %vm10548_vm7, %v3448_v56, %v3452_v3  ;;  %v3850_v30 = vsel %vm10677_vm12, %v3848_v25, %v3849_v42  ;;  %v3468_v35 = vshrl.u32 %v3197_v4, 16  ;;  %v4146_v45 = vld [vmem:[#allocation2 + $0xa4] sm:$0x1]  ;;  %v3711_v47 = vld [vmem:[#allocation2 + $0x90] sm:$0xe] }
 0x267   : > { %v4417_v10 = vrot.slane %v4416_v14, 4  ;;  %v8574_v20 = vcombine.low %v3443_v16, %v3453_v9  ;;  %v4412_v34 = vsel %vm10548_vm7, %v4407_v8, %v4411_v15  ;;  %v8607_v27 = vcombine.low %v3847_v31, %v3850_v30  ;;  %v3712_v56 = vld [vmem:[#allocation2 + $0x94] sm:$0xf]  ;;  %v11584_v42 = vpop.f32.mrb[100].mxu1  ;;  %v3713_v9 = vld [vmem:[#allocation2 + $0x98] sm:$0x1] }
 0x268   : > { %v3457_v60 = vrot.slane %v3455_v38, 4  ;;  %v3460_v19 = vrot.slane %v3458_v39, 5  ;;  %v3466_v3 = vrot.slane %v3464_v28, 5  ;;  %v3470_v12 = vrot.slane %v3468_v35, 4  ;;  %v9959_v16 = vld [vmem:[#allocation2 + $0x90] sm:$0xff]   ;;  %v11586_v31 = vpop.f32.mrb[68].mxu0 }
 0x269   : > { %v4422_v0 = vsel %vm10548_vm7, %v4417_v10, %v4421_v21  ;;  %6058 = vmatmul.mubr.bf16.gmra.mrb[148].mxu0 %v8574_v20  ;;  %v3474_v14 = vshll.u32 %v3198_v61, 16  ;;  %v4424_v25 = vshrl.u32 %v4144_v24, 16  ;;  %v4427_v15 = vshll.u32 %v4144_v24, 16  ;;  %13516 = vst [vmem:[#allocation15_spill] sm:$0xff] %v11586_v31  ;;  %v11588_v8 = vpop.f32.mrb[101].mxu1  ;;  %v11590_v10 = vpop.f32.mrb[69].mxu0 }
 0x26a   : > { %v8639_v4 = vcombine.low %v4412_v34, %v4422_v0  ;;  %13517 = vst [vmem:[#allocation16_spill] sm:$0xff] %v11588_v8  ;;  %6065 = vmatprep.mubr.bf16.mxu0 %v8607_v27  ;;  %v3461_v38 = vor.u32 %v3460_v19, %v3457_v60  ;;  %v3471_v21 = vor.u32 %v3470_v12, %v3466_v3  ;;  %v4433_v39 = vshll.u32 %v4145_v6, 16  ;;  %v11592_v30 = vpop.f32.mrb[102].mxu1  ;;  %v11594_v24 = vpop.f32.mrb[70].mxu0 }
 0x26b   : > { %v4437_v28 = vshrl.u32 %v4145_v6, 16  ;;  %13518 = vst [vmem:[#allocation17_spill] sm:$0xff] %v11590_v10  ;;  %13519 = vst [vmem:[#allocation18_spill] sm:$0xff] %v11592_v30  ;;  %v3476_v35 = vrot.slane %v3474_v14, 5  ;;  %v4426_v20 = vrot.slane %v4424_v25, 4  ;;  %v4429_v61 = vrot.slane %v4427_v15, 5 }
 0x26c   : > { %6226 = vmatprep.mubr.bf16.mxu1 %v8639_v4  ;;  %v4443_v34 = vshll.u32 %v4146_v45, 16  ;;  %v11596_v0 = vpop.f32.mrb[103].mxu1  ;;  %v3462_v27 = vrot.slane %v3461_v38, 4  ;;  %v3472_v60 = vrot.slane %v3471_v21, 4  ;;  %v4435_v19 = vrot.slane %v4433_v39, 5  ;;  %v11598_v6 = vpop.f32.mrb[71].mxu0 }
 0x26d   : > { %6227 = vmatmul.mubr.bf16.gmra.mrb[184].mxu1 %v9959_v16  ;;  %v4439_v12 = vrot.slane %v4437_v28, 4  ;;  %v4430_v31 = vor.u32 %v4429_v61, %v4426_v20  ;;  %v8592_v8 = vrot.slane %v3711_v47, 9  ;;  %v3853_v30 = vrot.slane %v3712_v56, 5  ;;  %v3199_v4 = vld [vmem:[#allocation2 + $0x90] sm:$0xf] }
 0x26e   : > { %v4445_v10 = vrot.slane %v4443_v34, 5  ;;  %v3467_v14 = vsel %vm10548_vm7, %v3462_v27, %v3466_v3  ;;  %v3477_v45 = vsel %vm10548_vm7, %v3472_v60, %v3476_v35  ;;  %v3856_v15 = vrot.slane %v3713_v9, 5  ;;  %v9968_v16 = vld [vmem:[%s13434_s7] ss:$16 sps:$4 sm:$0xff]   ;;  %v9970_v38 = vld [vmem:[%s13434_s7 + $0x4] ss:$16 sps:$4 sm:$0xff]  }
 0x26f   : > { %v4440_v25 = vor.u32 %v4439_v12, %v4435_v19  ;;  %v8575_v21 = vcombine.low %v3467_v14, %v3477_v45  ;;  %v4431_v47 = vrot.slane %v4430_v31, 4  ;;  %v3854_v56 = vsel %vm10677_vm12, %v8592_v8, %v3853_v30  ;;  %v3200_v20 = vld [vmem:[#allocation2 + $0x94] sm:$0xf]  ;;  %6754 = vmatprep.subr.bf16.mxu1 %v9970_v38  ;;  %v3201_v61 = vld [vmem:[#allocation2 + $0x98] sm:$0x1] }
 0x270   : > { %v3855_v39 = vrot.slane %v3853_v30, 4  ;;  %v9192_v28 = vadd.f32 %v11352_v52, %v11348_v23  ;;  %v9304_v9 = vadd.f32 %v11420_v51, %v11416_v37  ;;  %v9195_v35 = vadd.f32 %v11358_v53, %v11356_v1  ;;  %v4147_v52 = vld [vmem:[#allocation2 + $0xa8] sm:$0xf]  ;;  %6755 = vmatpush1.bf16.msra.mxu1 %v9968_v16  ;;  %v9961_v51 = vld [vmem:[#allocation2 + $0x9c] sm:$0xff]   ;;  %v4148_v27 = vld [vmem:[#allocation2 + $0xac] sm:$0xf] }
 0x271   : > { %v4441_v3 = vrot.slane %v4440_v25, 4  ;;  %6066 = vmatmul.mubr.bf16.gmra.mrb[152].mxu0 %v8575_v21  ;;  %v4436_v31 = vsel %vm10548_vm7, %v4431_v47, %v4435_v19  ;;  %v9307_v30 = vadd.f32 %v11431_v57, %v11427_v46  ;;  %v3479_v23 = vshrl.u32 %v3199_v4, 16  ;;  %v4149_v60 = vld [vmem:[#allocation2 + $0xb0] sm:$0x1]  ;;  %v3714_v46 = vld [vmem:[#allocation2 + $0x9c] sm:$0xe] }
 0x272   : > { %v3857_v8 = vsel %vm10677_vm12, %v3855_v39, %v3856_v15  ;;  %v11626_v53 = vadd.f32 %v9304_v9, %v9192_v28  ;;  %v3482_v34 = vshll.u32 %v3199_v4, 16  ;;  %v3488_v45 = vshll.u32 %v3200_v20, 16  ;;  %v3715_v57 = vld [vmem:[#allocation2 + $0xa0] sm:$0xf] }
 0x273   : > { %v4446_v37 = vsel %vm10548_vm7, %v4441_v3, %v4445_v10  ;;  %v8608_v1 = vcombine.low %v3854_v56, %v3857_v8  ;;  %v11628_v12 = vadd.f32 %v9307_v30, %v9195_v35  ;;  %v3481_v14 = vrot.slane %v3479_v23, 4  ;;  %v3716_v10 = vld [vmem:[#allocation2 + $0xa4] sm:$0x1] }
 0x274   : > { %13520 = vst [vmem:[#allocation19_spill] sm:$0xff] %v11626_v53  ;;  %v8640_v19 = vcombine.low %v4436_v31, %v4446_v37  ;;  %v3484_v25 = vrot.slane %v3482_v34, 5  ;;  %v3492_v15 = vshrl.u32 %v3200_v20, 16  ;;  %v3498_v16 = vshll.u32 %v3201_v61, 16  ;;  %v11630_v39 = vpop.f32.mrb[104].mxu1 }
 0x275   : > { %13521 = vst [vmem:[#allocation20_spill] sm:$0xff] %v11628_v12  ;;  %6073 = vmatprep.mubr.bf16.mxu0 %v8608_v1  ;;  %v4448_v38 = vshrl.u32 %v4147_v52, 16  ;;  %v3490_v21 = vrot.slane %v3488_v45, 5  ;;  %v4451_v47 = vshll.u32 %v4147_v52, 16  ;;  %v4457_v56 = vshll.u32 %v4148_v27, 16  ;;  %v11632_v3 = vpop.f32.mrb[72].mxu0 }
 0x276   : > { %6234 = vmatprep.mubr.bf16.mxu1 %v8640_v19  ;;  %v4461_v4 = vshrl.u32 %v4148_v27, 16  ;;  %v3485_v28 = vor.u32 %v3484_v25, %v3481_v14  ;;  %v3494_v9 = vrot.slane %v3492_v15, 4  ;;  %v3500_v35 = vrot.slane %v3498_v16, 5  ;;  %v11634_v8 = vpop.f32.mrb[105].mxu1  ;;  %v11636_v20 = vpop.f32.mrb[73].mxu0 }
 0x277   : > { %6235 = vmatmul.mubr.bf16.gmra.mrb[188].mxu1 %v9961_v51  ;;  %v4450_v31 = vrot.slane %v4448_v38, 4  ;;  %v4453_v30 = vrot.slane %v4451_v47, 5  ;;  %v4459_v61 = vrot.slane %v4457_v56, 5  ;;  %v4467_v37 = vshll.u32 %v4149_v60, 16  ;;  %v11638_v52 = vpop.f32.mrb[106].mxu1  ;;  %v11640_v1 = vpop.f32.mrb[74].mxu0 }
 0x278   : > { %v4463_v23 = vrot.slane %v4461_v4, 4  ;;  %v3486_v34 = vrot.slane %v3485_v28, 4  ;;  %v3495_v27 = vor.u32 %v3494_v9, %v3490_v21  ;;  %v8593_v19 = vrot.slane %v3714_v46, 9  ;;  %v11642_v14 = vpop.f32.mrb[107].mxu1  ;;  %v11644_v45 = vpop.f32.mrb[75].mxu0 }
 0x279   : > { %v3860_v51 = vrot.slane %v3715_v57, 5  ;;  %v4454_v25 = vor.u32 %v4453_v30, %v4450_v31  ;;  %v4469_v16 = vrot.slane %v4467_v37, 5  ;;  %v3863_v38 = vrot.slane %v3716_v10, 5  ;;  %v3202_v31 = vld [vmem:[#allocation2 + $0x9c] sm:$0xf] }
 0x27a   : > { %v4464_v15 = vor.u32 %v4463_v23, %v4459_v61  ;;  %v3491_v47 = vsel %vm10548_vm7, %v3486_v34, %v3490_v21  ;;  %v3496_v60 = vrot.slane %v3495_v27, 4  ;;  %v9310_v46 = vadd.f32 %v11466_v48, %v11460_v13  ;;  %v3203_v37 = vld [vmem:[#allocation2 + $0xa0] sm:$0xf]  ;;  %v3204_v34 = vld [vmem:[#allocation2 + $0xa4] sm:$0x1] }
 0x27b   : > { %v3861_v56 = vsel %vm10677_vm12, %v8593_v19, %v3860_v51  ;;  %v3862_v4 = vrot.slane %v3860_v51, 4  ;;  %v4455_v28 = vrot.slane %v4454_v25, 4  ;;  %v9198_v57 = vadd.f32 %v11456_v2, %v11454_v54  ;;  %v4150_v48 = vld [vmem:[#allocation2 + $0xb4] sm:$0xf] }
 0x27c   : > { %v4465_v9 = vrot.slane %v4464_v15, 4  ;;  %v3501_v10 = vsel %vm10548_vm7, %v3496_v60, %v3500_v35  ;;  %v9313_v30 = vadd.f32 %v11474_v11, %v11472_v44  ;;  %v9201_v23 = vadd.f32 %v11468_v55, %v11462_v40  ;;  %v4151_v35 = vld [vmem:[#allocation2 + $0xb8] sm:$0xf]  ;;  %v4152_v11 = vld [vmem:[#allocation2 + $0xbc] sm:$0x1]  ;;  %v9962_v55 = vld [vmem:[#allocation2 + $0xa8] sm:$0xff]  }
 0x27d   : > { %v3864_v21 = vsel %vm10677_vm12, %v3862_v4, %v3863_v38  ;;  %v8576_v27 = vcombine.low %v3491_v47, %v3501_v10  ;;  %v4460_v13 = vsel %vm10548_vm7, %v4455_v28, %v4459_v61  ;;  %v11666_v51 = vadd.f32 %v9310_v46, %v9198_v57  ;;  %v3717_v40 = vld [vmem:[#allocation2 + $0xa8] sm:$0xe]  ;;  %v3718_v60 = vld [vmem:[#allocation2 + $0xac] sm:$0xf]  ;;  %v3719_v4 = vld [vmem:[#allocation2 + $0xb0] sm:$0x1] }
 0x27e   : > { %v4470_v54 = vsel %vm10548_vm7, %v4465_v9, %v4469_v16  ;;  %v8609_v2 = vcombine.low %v3861_v56, %v3864_v21  ;;  %v11668_v25 = vadd.f32 %v9313_v30, %v9201_v23  ;;  %v3503_v44 = vshrl.u32 %v3202_v31, 16 }
 0x27f   : > { %v8641_v19 = vcombine.low %v4460_v13, %v4470_v54  ;;  %13522 = vst [vmem:[#allocation21_spill] sm:$0xff] %v11666_v51  ;;  %6074 = vmatmul.mubr.bf16.gmra.mrb[156].mxu0 %v8576_v27  ;;  %v3506_v15 = vshll.u32 %v3202_v31, 16  ;;  %v3512_v38 = vshll.u32 %v3203_v37, 16  ;;  %v3516_v47 = vshrl.u32 %v3203_v37, 16  ;;  %v11670_v16 = vpop.f32.mrb[108].mxu1 }
 0x280   : > { %13523 = vst [vmem:[#allocation22_spill] sm:$0xff] %v11668_v25  ;;  %v3522_v61 = vshll.u32 %v3204_v34, 16  ;;  %6081 = vmatprep.mubr.bf16.mxu0 %v8609_v2  ;;  %v3505_v56 = vrot.slane %v3503_v44, 4  ;;  %v4472_v28 = vshrl.u32 %v4150_v48, 16  ;;  %v4475_v9 = vshll.u32 %v4150_v48, 16  ;;  %v11672_v57 = vpop.f32.mrb[109].mxu1 }
 0x281   : > { %6242 = vmatprep.mubr.bf16.mxu1 %v8641_v19  ;;  %v4481_v46 = vshll.u32 %v4151_v35, 16  ;;  %v3508_v10 = vrot.slane %v3506_v15, 5  ;;  %v3514_v21 = vrot.slane %v3512_v38, 5  ;;  %v3518_v30 = vrot.slane %v3516_v47, 4  ;;  %v11674_v23 = vpop.f32.mrb[76].mxu0  ;;  %v11676_v37 = vpop.f32.mrb[110].mxu1 }
 0x282   : > { %6243 = vmatmul.mubr.bf16.gmra.mrb[192].mxu1 %v9962_v55  ;;  %v3524_v31 = vrot.slane %v3522_v61, 5  ;;  %v4474_v34 = vrot.slane %v4472_v28, 4  ;;  %v4477_v27 = vrot.slane %v4475_v9, 5  ;;  %v4485_v54 = vshrl.u32 %v4151_v35, 16  ;;  %v11678_v2 = vpop.f32.mrb[77].mxu0  ;;  %v11680_v19 = vpop.f32.mrb[111].mxu1 }
 0x283   : > { %v4483_v13 = vrot.slane %v4481_v46, 5  ;;  %v3509_v48 = vor.u32 %v3508_v10, %v3505_v56  ;;  %v3519_v44 = vor.u32 %v3518_v30, %v3514_v21  ;;  %v4491_v25 = vshll.u32 %v4152_v11, 16  ;;  %v11682_v15 = vpop.f32.mrb[78].mxu0  ;;  %v9971_v38 = vld [vmem:[%s13434_s7 + $0x20] ss:$16 sps:$4 sm:$0xff]  }
 0x284   : > { %v8594_v55 = vrot.slane %v3717_v40, 9  ;;  %v4478_v47 = vor.u32 %v4477_v27, %v4474_v34  ;;  %v4487_v61 = vrot.slane %v4485_v54, 4  ;;  %v3867_v28 = vrot.slane %v3718_v60, 5  ;;  %v11687_v46 = vpop.f32.mrb[79].mxu0  ;;  %v9973_v35 = vld [vmem:[%s13434_s7 + $0x24] ss:$16 sps:$4 sm:$0xff]  }
 0x285   : > { %v3870_v9 = vrot.slane %v3719_v4, 5  ;;  %v3510_v56 = vrot.slane %v3509_v48, 4  ;;  %v3520_v10 = vrot.slane %v3519_v44, 4  ;;  %v4493_v11 = vrot.slane %v4491_v25, 5  ;;  %v3205_v60 = vld [vmem:[#allocation2 + $0xa8] sm:$0xf]  ;;  %6756 = vmatprep.subr.bf16.mxu1 %v9973_v35 }
 0x286   : > { %v9316_v40 = vadd.f32 %v11490_v63, %v11488_v32  ;;  %v4479_v30 = vrot.slane %v4478_v47, 4  ;;  %v4488_v51 = vor.u32 %v4487_v61, %v4483_v13  ;;  %v3868_v34 = vsel %vm10677_vm12, %v8594_v55, %v3867_v28  ;;  %v3206_v63 = vld [vmem:[#allocation2 + $0xac] sm:$0xf]  ;;  %6757 = vmatpush1.bf16.msra.mxu1 %v9971_v38  ;;  %v4155_v35 = vld [vmem:[#allocation2 + $0xc8] sm:$0x1] }
 0x287   : > { %v3869_v27 = vrot.slane %v3867_v28, 4  ;;  %v3515_v4 = vsel %vm10548_vm7, %v3510_v56, %v3514_v21  ;;  %v3525_v54 = vsel %vm10548_vm7, %v3520_v10, %v3524_v31  ;;  %v9204_v25 = vadd.f32 %v11500_v49, %v11496_v59  ;;  %v3207_v21 = vld [vmem:[#allocation2 + $0xb0] sm:$0x1]  ;;  %v4153_v31 = vld [vmem:[#allocation2 + $0xc0] sm:$0xf] }
 0x288   : > { %v9319_v32 = vadd.f32 %v11494_v33, %v11492_v36  ;;  %v8577_v48 = vcombine.low %v3515_v4, %v3525_v54  ;;  %v4484_v44 = vsel %vm10548_vm7, %v4479_v30, %v4483_v13  ;;  %v4489_v55 = vrot.slane %v4488_v51, 4  ;;  %v4154_v36 = vld [vmem:[#allocation2 + $0xc4] sm:$0xf]  ;;  %v3720_v30 = vld [vmem:[#allocation2 + $0xb4] sm:$0xe] }
 0x289   : > { %v3871_v47 = vsel %vm10677_vm12, %v3869_v27, %v3870_v9  ;;  %v11708_v28 = vadd.f32 %v9316_v40, %v9204_v25  ;;  %v9207_v59 = vadd.f32 %v11508_v26, %v11506_v62  ;;  %v3527_v49 = vshrl.u32 %v3205_v60, 16  ;;  %v9964_v62 = vld [vmem:[#allocation2 + $0xb4] sm:$0xff]  }
 0x28a   : > { %v8610_v61 = vcombine.low %v3868_v34, %v3871_v47  ;;  %6082 = vmatmul.mubr.bf16.gmra.mrb[160].mxu0 %v8577_v48  ;;  %v4494_v33 = vsel %vm10548_vm7, %v4489_v55, %v4493_v11  ;;  %v3530_v38 = vshll.u32 %v3205_v60, 16  ;;  %v3536_v13 = vshll.u32 %v3206_v63, 16  ;;  %v3721_v34 = vld [vmem:[#allocation2 + $0xb8] sm:$0xf] }
 0x28b   : > { %13524 = vst [vmem:[#allocation23_spill] sm:$0xff] %v11708_v28  ;;  %v3540_v51 = vshrl.u32 %v3206_v63, 16  ;;  %v8642_v56 = vcombine.low %v4484_v44, %v4494_v33  ;;  %v11714_v9 = vadd.f32 %v9319_v32, %v9207_v59  ;;  %v3529_v10 = vrot.slane %v3527_v49, 4 }
 0x28c   : > { %6089 = vmatprep.mubr.bf16.mxu0 %v8610_v61  ;;  %v3546_v40 = vshll.u32 %v3207_v21, 16  ;;  %v3532_v26 = vrot.slane %v3530_v38, 5  ;;  %v3538_v27 = vrot.slane %v3536_v13, 5  ;;  %v4496_v54 = vshrl.u32 %v4153_v31, 16  ;;  %v11716_v25 = vpop.f32.mrb[112].mxu1 }
 0x28d   : > { %13525 = vst [vmem:[#allocation24_spill] sm:$0xff] %v11714_v9  ;;  %v3542_v4 = vrot.slane %v3540_v51, 4  ;;  %6250 = vmatprep.mubr.bf16.mxu1 %v8642_v56  ;;  %v4499_v60 = vshll.u32 %v4153_v31, 16  ;;  %v4505_v63 = vshll.u32 %v4154_v36, 16  ;;  %v4509_v48 = vshrl.u32 %v4154_v36, 16  ;;  %v11718_v44 = vpop.f32.mrb[113].mxu1 }
 0x28e   : > { %v3548_v11 = vrot.slane %v3546_v40, 5  ;;  %6251 = vmatmul.mubr.bf16.gmra.mrb[196].mxu1 %v9964_v62  ;;  %v3533_v32 = vor.u32 %v3532_v26, %v3529_v10  ;;  %v4498_v47 = vrot.slane %v4496_v54, 4  ;;  %v4515_v21 = vshll.u32 %v4155_v35, 16  ;;  %v3722_v61 = vld [vmem:[#allocation2 + $0xbc] sm:$0x1]  ;;  %v11720_v59 = vpop.f32.mrb[114].mxu1 }
 0x28f   : > { %v3543_v55 = vor.u32 %v3542_v4, %v3538_v27  ;;  %v4501_v49 = vrot.slane %v4499_v60, 5  ;;  %v4507_v33 = vrot.slane %v4505_v63, 5  ;;  %v4511_v38 = vrot.slane %v4509_v48, 4  ;;  %v11722_v51 = vpop.f32.mrb[115].mxu1  ;;  %v3208_v4 = vld [vmem:[#allocation2 + $0xb4] sm:$0xf] }
 0x290   : > { %v8595_v13 = vrot.slane %v3720_v30, 9  ;;  %v3534_v56 = vrot.slane %v3533_v32, 4  ;;  %v4517_v40 = vrot.slane %v4515_v21, 5  ;;  %v3874_v36 = vrot.slane %v3721_v34, 5  ;;  %v11724_v9 = vpop.f32.mrb[80].mxu0 }
 0x291   : > { %v3544_v31 = vrot.slane %v3543_v55, 4  ;;  %v4502_v62 = vor.u32 %v4501_v49, %v4498_v47  ;;  %v4512_v10 = vor.u32 %v4511_v38, %v4507_v33  ;;  %v3877_v26 = vrot.slane %v3722_v61, 5  ;;  %v11728_v54 = vpop.f32.mrb[81].mxu0  ;;  %v3209_v61 = vld [vmem:[#allocation2 + $0xb8] sm:$0xf] }
 0x292   : > { %v9322_v35 = vadd.f32 %v11520_v58, %v11518_v50  ;;  %v3539_v30 = vsel %vm10548_vm7, %v3534_v56, %v3538_v27  ;;  %v3875_v34 = vsel %vm10677_vm12, %v8595_v13, %v3874_v36  ;;  %v3876_v63 = vrot.slane %v3874_v36, 4  ;;  %v11736_v48 = vpop.f32.mrb[82].mxu0  ;;  %v3210_v49 = vld [vmem:[#allocation2 + $0xbc] sm:$0x1]  ;;  %v3724_v36 = vld [vmem:[#allocation2 + $0xc4] sm:$0xf] }
 0x293   : > { %v3549_v60 = vsel %vm10548_vm7, %v3544_v31, %v3548_v11  ;;  %v4503_v55 = vrot.slane %v4502_v62, 4  ;;  %v4513_v47 = vrot.slane %v4512_v10, 4  ;;  %v9210_v50 = vadd.f32 %v11530_v18, %v11524_v22  ;;  %v11740_v58 = vpop.f32.mrb[83].mxu0  ;;  %v3723_v31 = vld [vmem:[#allocation2 + $0xc0] sm:$0xe] }
 0x294   : > { %v8578_v32 = vcombine.low %v3539_v30, %v3549_v60  ;;  %v3878_v27 = vsel %vm10677_vm12, %v3876_v63, %v3877_v26  ;;  %v9325_v11 = vadd.f32 %v11532_v7, %v11526_v43  ;;  %v9213_v21 = vadd.f32 %v11540_v5, %v11534_v41  ;;  %v3725_v5 = vld [vmem:[#allocation2 + $0xc8] sm:$0x1]  ;;  %v3211_v10 = vld [vmem:[#allocation2 + $0xc0] sm:$0xf] }
 0x295   : > { %v3551_v38 = vshrl.u32 %v3208_v4, 16  ;;  %v4508_v13 = vsel %vm10548_vm7, %v4503_v55, %v4507_v33  ;;  %v4518_v22 = vsel %vm10548_vm7, %v4513_v47, %v4517_v40  ;;  %v8611_v18 = vcombine.low %v3875_v34, %v3878_v27  ;;  %v9965_v26 = vld [vmem:[#allocation2 + $0xc0] sm:$0xff]   ;;  %v13529_v55 = vld [vmem:[#allocation9_spill] sm:$0xff] }
 0x296   : > { %6090 = vmatmul.mubr.bf16.gmra.mrb[164].mxu0 %v8578_v32  ;;  %v11752_v56 = vadd.f32 %v9322_v35, %v9210_v50  ;;  %v8643_v62 = vcombine.low %v4508_v13, %v4518_v22  ;;  %v11754_v43 = vadd.f32 %v9325_v11, %v9213_v21  ;;  %v3554_v41 = vshll.u32 %v3208_v4, 16  ;;  %v9974_v40 = vld [vmem:[%s13434_s7 + $0x40] ss:$16 sps:$4 sm:$0xff]   ;;  %v13528_v32 = vld [vmem:[#allocation7_spill] sm:$0xff]  ;;  %v9976_v4 = vld [vmem:[%s13434_s7 + $0x44] ss:$16 sps:$4 sm:$0xff]  }
 0x297   : > { %v3553_v7 = vrot.slane %v3551_v38, 4  ;;  %6097 = vmatprep.mubr.bf16.mxu0 %v8611_v18  ;;  %v3560_v30 = vshll.u32 %v3209_v61, 16  ;;  %v3564_v60 = vshrl.u32 %v3209_v61, 16  ;;  %v3570_v33 = vshll.u32 %v3210_v49, 16  ;;  %v13530_v21 = vld [vmem:[#allocation8_spill] sm:$0xff]  ;;  %v13531_v61 = vld [vmem:[#allocation10_spill] sm:$0xff]  ;;  %6758 = vmatprep.subr.bf16.mxu1 %v9976_v4 }
 0x298   : > { %13526 = vst [vmem:[#allocation25_spill] sm:$0xff] %v11752_v56  ;;  %13527 = vst [vmem:[#allocation26_spill] sm:$0xff] %v11754_v43  ;;  %6258 = vmatprep.mubr.bf16.mxu1 %v8643_v62  ;;  %v3556_v35 = vrot.slane %v3554_v41, 5  ;;  %v8596_v34 = vrot.slane %v3723_v31, 9  ;;  %v3881_v63 = vrot.slane %v3724_v36, 5  ;;  %v9328_v47 = vadd.f32 %v13529_v55, %v13528_v32  ;;  %v13532_v36 = vld [vmem:[#allocation11_spill] sm:$0xff]  ;;  %6759 = vmatpush1.bf16.msra.mxu1 %v9974_v40 }
 0x299   : > { %6259 = vmatmul.mubr.bf16.gmra.mrb[200].mxu1 %v9965_v26  ;;  %v3562_v50 = vrot.slane %v3560_v30, 5  ;;  %v3566_v27 = vrot.slane %v3564_v60, 4  ;;  %v3884_v11 = vrot.slane %v3725_v5, 5  ;;  %v9216_v49 = vadd.f32 %v13531_v61, %v13530_v21  ;;  %v3212_v38 = vld [vmem:[#allocation2 + $0xc4] sm:$0xf]  ;;  %v11766_v13 = vpop.f32.mrb[116].mxu1 }
 0x29a   : > { %v3557_v22 = vor.u32 %v3556_v35, %v3553_v7  ;;  %v3572_v18 = vrot.slane %v3570_v33, 5  ;;  %v3883_v31 = vrot.slane %v3881_v63, 4  ;;  %v13533_v62 = vld [vmem:[#allocation13_spill] sm:$0xff]  ;;  %v11770_v55 = vpop.f32.mrb[84].mxu0  ;;  %v11772_v43 = vpop.f32.mrb[117].mxu1  ;;  %v13535_v30 = vld [vmem:[#allocation12_spill] sm:$0xff] }
 0x29b   : > { %v9331_v41 = vadd.f32 %v13533_v62, %v13532_v36  ;;  %v3213_v32 = vld [vmem:[#allocation2 + $0xc8] sm:$0x1]  ;;  %v3567_v26 = vor.u32 %v3566_v27, %v3562_v50  ;;  %v11774_v5 = vadd.f32 %v9328_v47, %v9216_v49  ;;  %v13536_v60 = vld [vmem:[#allocation14_spill] sm:$0xff]  ;;  %v3575_v61 = vshrl.u32 %v3211_v10, 16  ;;  %v4156_v56 = vld [vmem:[#allocation2 + $0xcc] sm:$0xf] }
 0x29c   : > { %v9219_v21 = vadd.f32 %v13536_v60, %v13535_v30  ;;  %v11778_v7 = vpop.f32.mrb[85].mxu0  ;;  %v11780_v33 = vpop.f32.mrb[118].mxu1  ;;  %v3558_v35 = vrot.slane %v3557_v22, 4  ;;  %v3882_v36 = vsel %vm10677_vm12, %v8596_v34, %v3881_v63  ;;  %v3578_v62 = vshll.u32 %v3211_v10, 16 }
 0x29d   : > { %13534 = vst [vmem:[#allocation7_spill] sm:$0xff] %v11774_v5  ;;  %13537 = vst [vmem:[#allocation9_spill] sm:$0xff] %v11778_v7  ;;  %v3584_v28 = vshll.u32 %v3212_v38, 16  ;;  %v11784_v4 = vpop.f32.mrb[86].mxu0  ;;  %v11786_v47 = vpop.f32.mrb[119].mxu1  ;;  %v3568_v27 = vrot.slane %v3567_v26, 4  ;;  %v3885_v49 = vsel %vm10677_vm12, %v3883_v31, %v3884_v11 }
 0x29e   : > { %13538 = vst [vmem:[#allocation8_spill] sm:$0xff] %v11780_v33  ;;  %13539 = vst [vmem:[#allocation10_spill] sm:$0xff] %v11784_v4  ;;  %v11790_v30 = vadd.f32 %v9331_v41, %v9219_v21  ;;  %v3577_v60 = vrot.slane %v3575_v61, 4  ;;  %v4157_v5 = vld [vmem:[#allocation2 + $0xd0] sm:$0xf]  ;;  %v11792_v12 = vpop.f32.mrb[87].mxu0  ;;  %v3563_v40 = vsel %vm10548_vm7, %v3558_v35, %v3562_v50 }
 0x29f   : > { %13540 = vst [vmem:[#allocation11_spill] sm:$0xff] %v11786_v47  ;;  %13542 = vst [vmem:[#allocation12_spill] sm:$0xff] %v11792_v12  ;;  %v3580_v34 = vrot.slane %v3578_v62, 5  ;;  %v3586_v10 = vrot.slane %v3584_v28, 5  ;;  %v3588_v63 = vshrl.u32 %v3212_v38, 16  ;;  %v3573_v22 = vsel %vm10548_vm7, %v3568_v27, %v3572_v18 }
 0x2a0   : > { %13541 = vst [vmem:[#allocation13_spill] sm:$0xff] %v11790_v30  ;;  %v3594_v53 = vshll.u32 %v3213_v32, 16  ;;  %v4158_v26 = vld [vmem:[#allocation2 + $0xd4] sm:$0x1]  ;;  %v4520_v4 = vshrl.u32 %v4156_v56, 16  ;;  %v4523_v47 = vshll.u32 %v4156_v56, 16  ;;  %v8579_v11 = vcombine.low %v3563_v40, %v3573_v22 }
 0x2a1   : > { %v3581_v31 = vor.u32 %v3580_v34, %v3577_v60  ;;  %v3590_v41 = vrot.slane %v3588_v63, 4  ;;  %v4529_v21 = vshll.u32 %v4157_v5, 16  ;;  %v4624_v61 = vld [vmem:[#allocation2 + $0x1c] sm:$0xf]  ;;  %v8612_v30 = vcombine.low %v3882_v36, %v3885_v49  ;;  %v4623_v50 = vld [vmem:[#allocation2 + $0x18] sm:$0xe] }
 0x2a2   : > { %v4522_v12 = vrot.slane %v4520_v4, 4  ;;  %v4525_v33 = vrot.slane %v4523_v47, 5  ;;  %v4533_v7 = vshrl.u32 %v4157_v5, 16  ;;  %6098 = vmatmul.mubr.bf16.gmra.mrb[168].mxu0 %v8579_v11  ;;  %v4539_v35 = vshll.u32 %v4158_v26, 16  ;;  %v4625_v62 = vld [vmem:[#allocation2 + $0x20] sm:$0x1] }
 0x2a3   : > { %v3591_v28 = vor.u32 %v3590_v41, %v3586_v10  ;;  %v4531_v38 = vrot.slane %v4529_v21, 5  ;;  %6105 = vmatprep.mubr.bf16.mxu0 %v8612_v30  ;;  %v3582_v18 = vrot.slane %v3581_v31, 4  ;;  %v4721_v56 = vrot.slane %v4624_v61, 5  ;;  %v13543_v49 = vld [vmem:[#allocation16_spill] sm:$0xff]  ;;  %v13544_v11 = vld [vmem:[#allocation15_spill] sm:$0xff]  ;;  %v13545_v30 = vld [vmem:[#allocation17_spill] sm:$0xff] }
 0x2a4   : > { %v4526_v32 = vor.u32 %v4525_v33, %v4522_v12  ;;  %v4535_v27 = vrot.slane %v4533_v7, 4  ;;  %v3596_v60 = vrot.slane %v3594_v53, 5  ;;  %v4541_v34 = vrot.slane %v4539_v35, 5  ;;  %v13546_v12 = vld [vmem:[#allocation18_spill] sm:$0xff]  ;;  %v4626_v33 = vld [vmem:[#allocation2 + $0x24] sm:$0xe] }
 0x2a5   : > { %v3592_v40 = vrot.slane %v3591_v28, 4  ;;  %v8645_v63 = vrot.slane %v4623_v50, 9  ;;  %v4723_v4 = vrot.slane %v4721_v56, 4  ;;  %v4724_v47 = vrot.slane %v4625_v62, 5  ;;  %v4627_v53 = vld [vmem:[#allocation2 + $0x28] sm:$0xf] }
 0x2a6   : > { %v4527_v22 = vrot.slane %v4526_v32, 4  ;;  %v4536_v36 = vor.u32 %v4535_v27, %v4531_v38  ;;  %v9334_v26 = vadd.f32 %v13543_v49, %v11584_v42  ;;  %v9222_v31 = vadd.f32 %v13545_v30, %v13544_v11  ;;  %v4628_v28 = vld [vmem:[#allocation2 + $0x2c] sm:$0x1]  ;;  %v4630_v42 = vld [vmem:[#allocation2 + $0x34] sm:$0xf] }
 0x2a7   : > { %v3597_v5 = vsel %vm10548_vm7, %v3592_v40, %v3596_v60  ;;  %v9337_v7 = vadd.f32 %v11596_v0, %v13546_v12  ;;  %v3587_v41 = vsel %vm10548_vm7, %v3582_v18, %v3586_v10  ;;  %v4725_v50 = vsel %vm10677_vm12, %v4723_v4, %v4724_v47  ;;  %v11812_v35 = vpop.f32.mrb[120].mxu1  ;;  %v9967_v32 = vld [vmem:[#allocation2 + $0xcc] sm:$0xff]   ;;  %v4631_v18 = vld [vmem:[#allocation2 + $0x38] sm:$0x1] }
 0x2a8   : > { %v4532_v21 = vsel %vm10548_vm7, %v4527_v22, %v4531_v38  ;;  %v4537_v61 = vrot.slane %v4536_v36, 4  ;;  %v8580_v62 = vcombine.low %v3587_v41, %v3597_v5  ;;  %v4722_v0 = vsel %vm10677_vm12, %v8645_v63, %v4721_v56  ;;  %v11820_v38 = vpop.f32.mrb[121].mxu1  ;;  %v4629_v4 = vld [vmem:[#allocation2 + $0x30] sm:$0xe] }
 0x2a9   : > { %v11816_v27 = vadd.f32 %v9334_v26, %v9222_v31  ;;  %v9225_v10 = vadd.f32 %v11598_v6, %v11594_v24  ;;  %v8661_v60 = vcombine.low %v4722_v0, %v4725_v50  ;;  %v8646_v22 = vrot.slane %v4626_v33, 9  ;;  %v11824_v47 = vpop.f32.mrb[88].mxu0  ;;  %v11826_v5 = vpop.f32.mrb[122].mxu1  ;;  %v11830_v6 = vld [vmem:[#allocation2 + $0x40] sm:$0xf] }
 0x2aa   : > { %v4542_v40 = vsel %vm10548_vm7, %v4537_v61, %v4541_v34  ;;  %v4728_v36 = vrot.slane %v4627_v53, 5  ;;  %6106 = vmatmul.mubr.bf16.gmra.mrb[172].mxu0 %v8580_v62  ;;  %v4731_v49 = vrot.slane %v4628_v28, 5  ;;  %v4735_v24 = vrot.slane %v4630_v42, 5  ;;  %v11832_v26 = vpop.f32.mrb[89].mxu0  ;;  %v11834_v29 = vpop.f32.mrb[123].mxu1 }
 0x2ab   : > { %v8644_v56 = vcombine.low %v4532_v21, %v4542_v40  ;;  %v11828_v63 = vadd.f32 %v9337_v7, %v9225_v10  ;;  %9662 = vmatprep.mubr.bf16.mxu0 %v8661_v60  ;;  %v4738_v11 = vrot.slane %v4631_v18, 5  ;;  %v9340_v30 = vadd.f32 %v11634_v8, %v11630_v39  ;;  %v11840_v12 = vpop.f32.mrb[90].mxu0  ;;  %v9977_v21 = vld [vmem:[%s13434_s7 + $0x60] ss:$16 sps:$4 sm:$0xff]   ;;  %v9979_v39 = vld [vmem:[%s13434_s7 + $0x64] ss:$16 sps:$4 sm:$0xff]  }
 0x2ac   : > { %v4730_v34 = vrot.slane %v4728_v36, 4  ;;  %v9228_v31 = vadd.f32 %v11636_v20, %v11632_v3  ;;  %v4737_v7 = vrot.slane %v4735_v24, 4  ;;  %v9343_v33 = vadd.f32 %v11642_v14, %v11638_v52  ;;  %v11846_v41 = vpop.f32.mrb[91].mxu0  ;;  %6760 = vmatprep.subr.bf16.mxu1 %v9979_v39  ;;  %v4634_v62 = vld [vmem:[#allocation2 + $0x44] sm:$0x1] }
 0x2ad   : > { %6266 = vmatprep.mubr.bf16.mxu1 %v8644_v56  ;;  %v9231_v53 = vadd.f32 %v11644_v45, %v11640_v1  ;;  %v8647_v8 = vrot.slane %v4629_v4, 9  ;;  %v4742_v52 = vrot.slane %v11830_v6, 5  ;;  %v4636_v1 = vld [vmem:[#allocation2 + $0x4c] sm:$0xf]  ;;  %v13547_v61 = vmov 0   ;;  %6761 = vmatpush1.bf16.msra.mxu1 %v9977_v21 }
 0x2ae   : > { %6267 = vmatmul.mubr.bf16.gmra.mrb[204].mxu1 %v9967_v32  ;;  %v4732_v3 = vsel %vm10677_vm12, %v4730_v34, %v4731_v49  ;;  %v11856_v20 = vadd.f32 %v9340_v30, %v9228_v31  ;;  %v4739_v14 = vsel %vm10677_vm12, %v4737_v7, %v4738_v11  ;;  %v4729_v50 = vsel %vm10677_vm12, %v8646_v22, %v4728_v36  ;;  %v4632_v40 = vld [vmem:[#allocation2 + $0x3c] sm:$0xe]  ;;  %v4637_v4 = vld [vmem:[#allocation2 + $0x50] sm:$0x1]  ;;  %v4635_v56 = vld [vmem:[#allocation2 + $0x48] sm:$0xe] }
 0x2af   : > { %v11861_v45 = vadd.f32 %v9343_v33, %v9231_v53  ;;  %6786 = vmatprep.mubr.bf16.mxu1 %v13547_v61  ;;  %v4736_v28 = vsel %vm10677_vm12, %v8647_v8, %v4735_v24  ;;  %v8662_v42 = vcombine.low %v4729_v50, %v4732_v3  ;;  %v4749_v0 = vrot.slane %v4636_v1, 5  ;;  %v4639_v6 = vld [vmem:[#allocation2 + $0x58] sm:$0xf] }
 0x2b0   : > { %v9346_v32 = vadd.f32 %v11672_v57, %v11670_v16  ;;  %v9234_v10 = vadd.f32 %v11678_v2, %v11674_v23  ;;  %v8663_v18 = vcombine.low %v4736_v28, %v4739_v14  ;;  %v4744_v60 = vrot.slane %v4742_v52, 4  ;;  %v4642_v23 = vld [vmem:[#allocation2 + $0x64] sm:$0xf]  ;;  %v4643_v28 = vld [vmem:[#allocation2 + $0x68] sm:$0x1] }
 0x2b1   : > { %v9349_v22 = vadd.f32 %v11680_v19, %v11676_v37  ;;  %v9237_v36 = vadd.f32 %v11687_v46, %v11682_v15  ;;  %v4751_v49 = vrot.slane %v4749_v0, 4  ;;  %v4745_v16 = vrot.slane %v4634_v62, 5  ;;  %v11916_v62 = vld [vmem:[#allocation2 + $0x70] sm:$0xf] }
 0x2b2   : > { %9663 = vmatmul.mubr.bf16.vlgmr.msra.gmra.mrb[176].mxu0 %v8662_v42  ;;  %v11876_v24 = vadd.f32 %v9346_v32, %v9234_v10  ;;  %v8648_v2 = vrot.slane %v4632_v40, 9  ;;  %v4752_v34 = vrot.slane %v4637_v4, 5  ;;  %v9352_v11 = vadd.f32 %v11718_v44, %v11716_v25  ;;  %v13548_v10 = vld [vmem:[#allocation9_spill] sm:$0xff]  ;;  %v4641_v40 = vld [vmem:[#allocation2 + $0x60] sm:$0xe] }
 0x2b3   : > { %9666 = vmatprep.mubr.bf16.mxu0 %v8663_v18  ;;  %v11878_v57 = vadd.f32 %v9349_v22, %v9237_v36  ;;  %v4746_v19 = vsel %vm10677_vm12, %v4744_v60, %v4745_v16  ;;  %v8649_v15 = vrot.slane %v4635_v56, 9  ;;  %v4756_v46 = vrot.slane %v4639_v6, 5  ;;  %v11922_v60 = vld [vmem:[#allocation2 + $0x7c] sm:$0xf]  ;;  %v13549_v4 = vld [vmem:[#allocation8_spill] sm:$0xff]  ;;  %v13551_v56 = vld [vmem:[#allocation10_spill] sm:$0xff] }
 0x2b4   : > { %v11882_v37 = vpop.f32.mrb[124].mxu1  ;;  %v9240_v30 = vadd.f32 %v11728_v54, %v11724_v9  ;;  %v11888_v31 = vpop.f32.mrb[92].mxu0  ;;  %v4753_v33 = vsel %vm10677_vm12, %v4751_v49, %v4752_v34  ;;  %v4763_v53 = vrot.slane %v4642_v23, 5  ;;  %v9355_v25 = vadd.f32 %v11722_v51, %v11720_v59  ;;  %v4640_v51 = vld [vmem:[#allocation2 + $0x5c] sm:$0x1]  ;;  %v13552_v49 = vld [vmem:[#allocation12_spill] sm:$0xff] }
 0x2b5   : > { %v11890_v7 = vpop.f32.mrb[125].mxu1  ;;  %v9243_v44 = vadd.f32 %v11740_v58, %v11736_v48  ;;  %v11898_v21 = vpop.f32.mrb[93].mxu0  ;;  %v4743_v9 = vsel %vm10677_vm12, %v8648_v2, %v4742_v52  ;;  %v4750_v59 = vsel %vm10677_vm12, %v8649_v15, %v4749_v0  ;;  %v4758_v50 = vrot.slane %v4756_v46, 4  ;;  %v4638_v52 = vld [vmem:[#allocation2 + $0x54] sm:$0xe]  ;;  %v13550_v22 = vld [vmem:[#allocation11_spill] sm:$0xff] }
 0x2b6   : > { %v11900_v39 = vpop.f32.mrb[126].mxu1  ;;  %v11904_v54 = vadd.f32 %v9352_v11, %v9240_v30  ;;  %v11906_v3 = vpop.f32.mrb[94].mxu0  ;;  %v8664_v1 = vcombine.low %v4743_v9, %v4746_v19  ;;  %v8665_v58 = vcombine.low %v4750_v59, %v4753_v33  ;;  %v4765_v42 = vrot.slane %v4763_v53, 4  ;;  %v4644_v9 = vld [vmem:[#allocation2 + $0x6c] sm:$0xe] }
 0x2b7   : > { %v11908_v8 = vpop.f32.mrb[127].mxu1  ;;  %v11912_v14 = vadd.f32 %v9355_v25, %v9243_v44  ;;  %v11914_v48 = vpop.f32.mrb[95].mxu0  ;;  %v9358_v32 = vadd.f32 %v11772_v43, %v11766_v13  ;;  %v9246_v18 = vadd.f32 %v13548_v10, %v11770_v55  ;;  %v4759_v0 = vrot.slane %v4640_v51, 5 }
 0x2b8   : > { %v9361_v36 = vadd.f32 %v13550_v22, %v13549_v4  ;;  %v9249_v6 = vadd.f32 %v13552_v49, %v13551_v56  ;;  %v4766_v16 = vrot.slane %v4643_v28, 5  ;;  %v8650_v43 = vrot.slane %v4638_v52, 9  ;;  %v4649_v28 = vld [vmem:[#allocation2 + $0x80] sm:$0x1] }
 0x2b9   : > { %v11928_v23 = vadd.f32 %v9358_v32, %v9246_v18  ;;  %v4760_v13 = vsel %vm10677_vm12, %v4758_v50, %v4759_v0  ;;  %v4770_v55 = vrot.slane %v11916_v62, 5  ;;  %v8651_v19 = vrot.slane %v4641_v40, 9  ;;  %v4646_v50 = vld [vmem:[#allocation2 + $0x74] sm:$0x1]  ;;  %v4647_v62 = vld [vmem:[#allocation2 + $0x78] sm:$0xe] }
 0x2ba   : > { %9667 = vmatmul.mubr.bf16.gmra.mrb[180].mxu0 %v8664_v1  ;;  %v11935_v34 = vadd.f32 %v9361_v36, %v9249_v6  ;;  %v4767_v15 = vsel %vm10677_vm12, %v4765_v42, %v4766_v16  ;;  %v4777_v30 = vrot.slane %v11922_v60, 5  ;;  %v9364_v33 = vadd.f32 %v11820_v38, %v11812_v35  ;;  %v11958_v32 = vld [vmem:[#allocation2 + $0x88] sm:$0xf]  ;;  %v9985_v6 = vld [vmem:[%s13434_s7 + $0xc] ss:$16 sps:$4 sm:$0xff]  }
 0x2bb   : > { %9670 = vmatprep.mubr.bf16.mxu0 %v8665_v58  ;;  %v4757_v44 = vsel %vm10677_vm12, %v8650_v43, %v4756_v46  ;;  %v9252_v1 = vadd.f32 %v11832_v26, %v11824_v47  ;;  %v4764_v58 = vsel %vm10677_vm12, %v8651_v19, %v4763_v53  ;;  %v9367_v35 = vadd.f32 %v11834_v29, %v11826_v5  ;;  %v11960_v47 = vld [vmem:[#allocation2 + $0x94] sm:$0xf]  ;;  %v9980_v5 = vld [vmem:[%s13434_s7 + $0x80] ss:$16 sps:$4 sm:$0xff]   ;;  %v9983_v60 = vld [vmem:[%s13434_s7 + $0x8] ss:$16 sps:$4 sm:$0xff]  }
 0x2bc   : > { %v11930_v2 = vpop.f32.mrb[128].mxu1  ;;  %v8666_v51 = vcombine.low %v4757_v44, %v4760_v13  ;;  %v9255_v38 = vadd.f32 %v11846_v41, %v11840_v12  ;;  %v8667_v46 = vcombine.low %v4764_v58, %v4767_v15  ;;  %v4772_v42 = vrot.slane %v4770_v55, 4  ;;  %v9982_v29 = vld [vmem:[%s13434_s7 + $0x84] ss:$16 sps:$4 sm:$0xff]   ;;  %6947 = vmatprep.subr.bf16.mxu0 %v9985_v6  ;;  %v4655_v58 = vld [vmem:[#allocation2 + $0x98] sm:$0x1] }
 0x2bd   : > { %v11937_v11 = vpop.f32.mrb[129].mxu1  ;;  %v11962_v26 = vadd.f32 %v9364_v33, %v9252_v1  ;;  %v4779_v53 = vrot.slane %v4777_v30, 4  ;;  %v8652_v12 = vrot.slane %v4644_v9, 9  ;;  %v4773_v41 = vrot.slane %v4646_v50, 5  ;;  %6762 = vmatprep.subr.bf16.mxu1 %v9982_v29  ;;  %v4650_v44 = vld [vmem:[#allocation2 + $0x84] sm:$0xe]  ;;  %6948 = vmatpush1.bf16.msra.mxu0 %v9983_v60 }
 0x2be   : > { %v11944_v25 = vpop.f32.mrb[130].mxu1  ;;  %v11964_v18 = vadd.f32 %v9367_v35, %v9255_v38  ;;  %v4780_v4 = vrot.slane %v4649_v28, 5  ;;  %v4784_v22 = vrot.slane %v11958_v32, 5  ;;  %v9370_v36 = vadd.f32 %v11890_v7, %v11882_v37  ;;  %6763 = vmatpush1.bf16.msra.mxu1 %v9980_v5  ;;  %v4652_v9 = vld [vmem:[#allocation2 + $0x8c] sm:$0x1] }
 0x2bf   : > { %v11950_v59 = vpop.f32.mrb[131].mxu1  ;;  %v9258_v56 = vadd.f32 %v11898_v21, %v11888_v31  ;;  %v4774_v16 = vsel %vm10677_vm12, %v4772_v42, %v4773_v41  ;;  %v4791_v43 = vrot.slane %v11960_v47, 5  ;;  %v9373_v13 = vadd.f32 %v11908_v8, %v11900_v39  ;;  %v12004_v38 = vld [vmem:[#allocation2 + $0xa0] sm:$0xf] }
 0x2c0   : > { %v9262_v52 = vpop.f32.mrb[96].mxu0  ;;  %v9261_v37 = vadd.f32 %v11914_v48, %v11906_v3  ;;  %v8653_v31 = vrot.slane %v4647_v62, 9  ;;  %v4781_v21 = vsel %vm10677_vm12, %v4779_v53, %v4780_v4  ;;  %v4771_v33 = vsel %vm10677_vm12, %v8652_v12, %v4770_v55 }
 0x2c1   : > { %v9263_v10 = vpop.f32.mrb[97].mxu0  ;;  %v11992_v19 = vadd.f32 %v9370_v36, %v9258_v56  ;;  %v8668_v3 = vcombine.low %v4771_v33, %v4774_v16  ;;  %v4786_v48 = vrot.slane %v4784_v22, 4  ;;  %v9376_v50 = vadd.f32 %v11937_v11, %v11930_v2  ;;  %v9986_v2 = vld [vmem:[%s13434_s7 + $0x28] ss:$16 sps:$4 sm:$0xff]   ;;  %v9988_v11 = vld [vmem:[%s13434_s7 + $0x2c] ss:$16 sps:$4 sm:$0xff]  }
 0x2c2   : > { %9671 = vmatmul.mubr.bf16.gmra.mrb[184].mxu0 %v8666_v51  ;;  %v9265_v0 = vpop.f32.mrb[98].mxu0  ;;  %v11996_v1 = vadd.f32 %v9373_v13, %v9261_v37  ;;  %v4778_v8 = vsel %vm10677_vm12, %v8653_v31, %v4777_v30  ;;  %v4653_v51 = vld [vmem:[#allocation2 + $0x90] sm:$0xe]  ;;  %v4793_v35 = vrot.slane %v4791_v43, 4  ;;  %v9264_v42 = vadd.f32 %v9263_v10, %v9262_v52  ;;  %6949 = vmatprep.subr.bf16.mxu0 %v9988_v11 }
 0x2c3   : > { %9674 = vmatprep.mubr.bf16.mxu0 %v8667_v46  ;;  %v9266_v40 = vpop.f32.mrb[99].mxu0  ;;  %v8669_v55 = vcombine.low %v4778_v8, %v4781_v21  ;;  %v12006_v46 = vld [vmem:[#allocation2 + $0xac] sm:$0xf]  ;;  %v4787_v47 = vrot.slane %v4652_v9, 5  ;;  %v9379_v30 = vadd.f32 %v11950_v59, %v11944_v25  ;;  %v4794_v29 = vrot.slane %v4655_v58, 5  ;;  %6950 = vmatpush1.bf16.msra.mxu0 %v9986_v2 }
 0x2c4   : > { %v9380_v49 = vpop.f32.mrb[132].mxu1  ;;  %v9267_v53 = vadd.f32 %v9266_v40, %v9265_v0  ;;  %v12016_v12 = vadd.f32 %v9376_v50, %v9264_v42  ;;  %v8654_v10 = vrot.slane %v4650_v44, 9  ;;  %v8655_v25 = vrot.slane %v4653_v51, 9  ;;  %v4661_v58 = vld [vmem:[#allocation2 + $0xb0] sm:$0x1] }
 0x2c5   : > { %v9381_v7 = vpop.f32.mrb[133].mxu1  ;;  %v4788_v41 = vsel %vm10677_vm12, %v4786_v48, %v4787_v47  ;;  %v4795_v40 = vsel %vm10677_vm12, %v4793_v35, %v4794_v29  ;;  %v4798_v60 = vrot.slane %v12004_v38, 5  ;;  %v4805_v4 = vrot.slane %v12006_v46, 5  ;;  %v4656_v48 = vld [vmem:[#allocation2 + $0x9c] sm:$0xe] }
 0x2c6   : > { %v9383_v15 = vpop.f32.mrb[134].mxu1  ;;  %v12020_v59 = vadd.f32 %v9379_v30, %v9267_v53  ;;  %v9382_v36 = vadd.f32 %v9381_v7, %v9380_v49  ;;  %v4785_v21 = vsel %vm10677_vm12, %v8654_v10, %v4784_v22  ;;  %v4792_v33 = vsel %vm10677_vm12, %v8655_v25, %v4791_v43  ;;  %v4659_v50 = vld [vmem:[#allocation2 + $0xa8] sm:$0xe]  ;;  %v12038_v38 = vld [vmem:[#allocation2 + $0xc4] sm:$0xf] }
 0x2c7   : > { %v9384_v39 = vpop.f32.mrb[135].mxu1  ;;  %v8670_v9 = vcombine.low %v4785_v21, %v4788_v41  ;;  %v4800_v51 = vrot.slane %v4798_v60, 4  ;;  %v4807_v22 = vrot.slane %v4805_v4, 4  ;;  %v4808_v42 = vrot.slane %v4661_v58, 5  ;;  %v4664_v10 = vld [vmem:[#allocation2 + $0xbc] sm:$0x1] }
 0x2c8   : > { %v9268_v28 = vpop.f32.mrb[100].mxu0  ;;  %v9385_v16 = vadd.f32 %v9384_v39, %v9383_v15  ;;  %v8671_v39 = vcombine.low %v4792_v33, %v4795_v40  ;;  %v8656_v53 = vrot.slane %v4656_v48, 9  ;;  %v8657_v2 = vrot.slane %v4659_v50, 9  ;;  %v9989_v33 = vld [vmem:[%s13434_s7 + $0xa0] ss:$16 sps:$4 sm:$0xff]  }
 0x2c9   : > { %v9269_v62 = vpop.f32.mrb[101].mxu0  ;;  %v4819_v41 = vrot.slane %v12038_v38, 5  ;;  %v4815_v58 = vrot.slane %v4664_v10, 5 }
 0x2ca   : > { %9675 = vmatmul.mubr.bf16.gmra.mrb[188].mxu0 %v8668_v3  ;;  %v9271_v5 = vpop.f32.mrb[102].mxu0  ;;  %v9270_v6 = vadd.f32 %v9269_v62, %v9268_v28  ;;  %v4658_v3 = vld [vmem:[#allocation2 + $0xa4] sm:$0x1]  ;;  %v12036_v28 = vld [vmem:[#allocation2 + $0xb8] sm:$0xf] }
 0x2cb   : > { %9678 = vmatprep.mubr.bf16.mxu0 %v8669_v55  ;;  %v9272_v52 = vpop.f32.mrb[103].mxu0  ;;  %v4801_v35 = vrot.slane %v4658_v3, 5  ;;  %v4812_v11 = vrot.slane %v12036_v28, 5 }
 0x2cc   : > { %v9386_v0 = vpop.f32.mrb[136].mxu1  ;;  %v9273_v13 = vadd.f32 %v9272_v52, %v9271_v5  ;;  %v12032_v8 = vadd.f32 %v9382_v36, %v9270_v6  ;;  %v4809_v52 = vsel %vm10677_vm12, %v4807_v22, %v4808_v42  ;;  %v4799_v36 = vsel %vm10677_vm12, %v8656_v53, %v4798_v60  ;;  %v4669_v6 = vld [vmem:[#allocation2 + $0xd0] sm:$0xf] }
 0x2cd   : > { %v9387_v56 = vpop.f32.mrb[137].mxu1  ;;  %v4802_v5 = vsel %vm10677_vm12, %v4800_v51, %v4801_v35  ;;  %v4814_v3 = vrot.slane %v4812_v11, 4  ;;  %v4826_v50 = vrot.slane %v4669_v6, 5 }
 0x2ce   : > { %v9388_v37 = vadd.f32 %v9387_v56, %v9386_v0  ;;  %v9389_v31 = vpop.f32.mrb[138].mxu1  ;;  %v12034_v49 = vadd.f32 %v9385_v16, %v9273_v13  ;;  %v4667_v56 = vld [vmem:[#allocation2 + $0xc8] sm:$0x1]  ;;  %v8672_v13 = vcombine.low %v4799_v36, %v4802_v5 }
 0x2cf   : > { %v9390_v44 = vpop.f32.mrb[139].mxu1  ;;  %v4822_v28 = vrot.slane %v4667_v56, 5 }
 0x2d0   : > { %v9274_v7 = vpop.f32.mrb[104].mxu0  ;;  %v9391_v15 = vadd.f32 %v9390_v44, %v9389_v31  ;;  %v9991_v44 = vld [vmem:[%s13434_s7 + $0xa4] ss:$16 sps:$4 sm:$0xff]  }
 0x2d1   : > { %v9275_v32 = vpop.f32.mrb[105].mxu0  ;;  %6764 = vmatprep.subr.bf16.mxu1 %v9991_v44 }
 0x2d2   : > { %9679 = vmatmul.mubr.bf16.gmra.mrb[192].mxu0 %v8670_v9  ;;  %v9276_v43 = vadd.f32 %v9275_v32, %v9274_v7  ;;  %v9277_v55 = vpop.f32.mrb[106].mxu0  ;;  %v9992_v7 = vld [vmem:[%s13434_s7 + $0x48] ss:$16 sps:$4 sm:$0xff]   ;;  %v4665_v32 = vld [vmem:[#allocation2 + $0xc0] sm:$0xe]  ;;  %6765 = vmatpush1.bf16.msra.mxu1 %v9989_v33 }
 0x2d3   : > { %9682 = vmatprep.mubr.bf16.mxu0 %v8671_v39  ;;  %v9278_v46 = vpop.f32.mrb[107].mxu0  ;;  %v4821_v39 = vrot.slane %v4819_v41, 4  ;;  %v8659_v53 = vrot.slane %v4665_v32, 9 }
 0x2d4   : > { %v12040_v62 = vadd.f32 %v9388_v37, %v9276_v43  ;;  %v9279_v47 = vadd.f32 %v9278_v46, %v9277_v55  ;;  %v9392_v30 = vpop.f32.mrb[140].mxu1  ;;  %v4806_v37 = vsel %vm10677_vm12, %v8657_v2, %v4805_v4  ;;  %v9994_v4 = vld [vmem:[%s13434_s7 + $0x4c] ss:$16 sps:$4 sm:$0xff]   ;;  %v4670_v55 = vld [vmem:[#allocation2 + $0xd4] sm:$0x1] }
 0x2d5   : > { %v9393_v29 = vpop.f32.mrb[141].mxu1  ;;  %v8673_v9 = vcombine.low %v4806_v37, %v4809_v52  ;;  %6951 = vmatprep.subr.bf16.mxu0 %v9994_v4  ;;  %v4668_v43 = vld [vmem:[#allocation2 + $0xcc] sm:$0xe]  ;;  %v4823_v5 = vsel %vm10677_vm12, %v4821_v39, %v4822_v28  ;;  %v4829_v36 = vrot.slane %v4670_v55, 5 }
 0x2d6   : > { %v12048_v25 = vadd.f32 %v9391_v15, %v9279_v47  ;;  %v9394_v0 = vadd.f32 %v9393_v29, %v9392_v30  ;;  %v9395_v40 = vpop.f32.mrb[142].mxu1  ;;  %v4662_v15 = vld [vmem:[#allocation2 + $0xb4] sm:$0xe]  ;;  %6952 = vmatpush1.bf16.msra.mxu0 %v9992_v7  ;;  %v4816_v47 = vsel %vm10677_vm12, %v4814_v3, %v4815_v58  ;;  %v13553_v7 = vld [vmem:[#allocation19_spill] sm:$0xff]  ;;  %v13554_v58 = vld [vmem:[#allocation20_spill] sm:$0xff] }
 0x2d7   : > { %v9396_v16 = vpop.f32.mrb[143].mxu1  ;;  %v8658_v42 = vrot.slane %v4662_v15, 9 }
 0x2d8   : > { %v9280_v31 = vpop.f32.mrb[108].mxu0  ;;  %v9397_v21 = vadd.f32 %v9396_v16, %v9395_v40  ;;  %v4828_v40 = vrot.slane %v4826_v50, 4  ;;  %v4820_v16 = vsel %vm10677_vm12, %v8659_v53, %v4819_v41  ;;  %v9995_v41 = vld [vmem:[%s13434_s7 + $0x68] ss:$16 sps:$4 sm:$0xff]  }
 0x2d9   : > { %v9281_v60 = vpop.f32.mrb[109].mxu0  ;;  %v4813_v10 = vsel %vm10677_vm12, %v8658_v42, %v4812_v11 }
 0x2da   : > { %9683 = vmatmul.mubr.bf16.gmra.mrb[196].mxu0 %v8672_v13  ;;  %v9282_v48 = vadd.f32 %v9281_v60, %v9280_v31  ;;  %v9283_v51 = vpop.f32.mrb[110].mxu0  ;;  %v8674_v6 = vcombine.low %v4813_v10, %v4816_v47  ;;  %v8675_v31 = vcombine.low %v4820_v16, %v4823_v5  ;;  %v9997_v60 = vld [vmem:[%s13434_s7 + $0x6c] ss:$16 sps:$4 sm:$0xff]   ;;  %v13556_v5 = vld [vmem:[#allocation22_spill] sm:$0xff] }
 0x2db   : > { %9686 = vmatprep.mubr.bf16.mxu0 %v8673_v9  ;;  %v9284_v22 = vpop.f32.mrb[111].mxu0  ;;  %v4830_v9 = vsel %vm10677_vm12, %v4828_v40, %v4829_v36  ;;  %6953 = vmatprep.subr.bf16.mxu0 %v9997_v60  ;;  %v13555_v47 = vld [vmem:[#allocation21_spill] sm:$0xff]  ;;  %v10000_v40 = vld [vmem:[%s13434_s7 + $0xc4] ss:$16 sps:$4 sm:$0xff]  }
 0x2dc   : > { %v12066_v35 = vadd.f32 %v9394_v0, %v9282_v48  ;;  %v9285_v38 = vadd.f32 %v9284_v22, %v9283_v51  ;;  %v9526_v46 = vpop.f32.mrb[144].mxu1  ;;  %v8660_v0 = vrot.slane %v4668_v43, 9  ;;  %6954 = vmatpush1.bf16.msra.mxu0 %v9995_v41  ;;  %6766 = vmatprep.subr.bf16.mxu1 %v10000_v40  ;;  %v13557_v41 = vld [vmem:[#allocation23_spill] sm:$0xff] }
 0x2dd   : > { %v9527_v30 = vpop.f32.mrb[145].mxu1 }
 0x2de   : > { %v12072_v2 = vadd.f32 %v9397_v21, %v9285_v38  ;;  %v12074_v29 = vadd.f32 %v9527_v30, %v9526_v46  ;;  %v9529_v52 = vpop.f32.mrb[146].mxu1  ;;  %v4827_v11 = vsel %vm10677_vm12, %v8660_v0, %v4826_v50  ;;  %v9998_v0 = vld [vmem:[%s13434_s7 + $0xc0] ss:$16 sps:$4 sm:$0xff]  }
 0x2df   : > { %v9530_v56 = vpop.f32.mrb[147].mxu1  ;;  %v8676_v51 = vcombine.low %v4827_v11, %v4830_v9  ;;  %6767 = vmatpush1.bf16.msra.mxu1 %v9998_v0 }
 0x2e0   : > { %v9414_v13 = vpop.f32.mrb[112].mxu0  ;;  %v12080_v37 = vadd.f32 %v9530_v56, %v9529_v52  ;;  %v10001_v56 = vld [vmem:[%s13434_s7 + $0x88] ss:$16 sps:$4 sm:$0xff]  }
 0x2e1   : > { %v9415_v21 = vpop.f32.mrb[113].mxu0 }
 0x2e2   : > { %9687 = vmatmul.mubr.bf16.gmra.mrb[200].mxu0 %v8674_v6  ;;  %v9416_v33 = vadd.f32 %v9415_v21, %v9414_v13  ;;  %v9417_v44 = vpop.f32.mrb[114].mxu0  ;;  %v10003_v6 = vld [vmem:[%s13434_s7 + $0x8c] ss:$16 sps:$4 sm:$0xff]  }
 0x2e3   : > { %9690 = vmatprep.mubr.bf16.mxu0 %v8675_v31  ;;  %v9418_v3 = vpop.f32.mrb[115].mxu0  ;;  %6955 = vmatprep.subr.bf16.mxu0 %v10003_v6 }
 0x2e4   : > { %v12093_v4 = vadd.f32 %v9416_v33, %v13553_v7  ;;  %v9419_v15 = vadd.f32 %v9418_v3, %v9417_v44  ;;  %v9532_v39 = vpop.f32.mrb[148].mxu1  ;;  %6956 = vmatpush1.bf16.msra.mxu0 %v10001_v56  ;;  %v13560_v56 = vld [vmem:[#allocation26_spill] sm:$0xff] }
 0x2e5   : > { %v9533_v48 = vpop.f32.mrb[149].mxu1 }
 0x2e6   : > { %v12096_v17 = vadd.f32 %v9419_v15, %v13554_v58  ;;  %v9534_v32 = vadd.f32 %v9533_v48, %v9532_v39  ;;  %v9535_v50 = vpop.f32.mrb[150].mxu1  ;;  %v13558_v15 = vld [vmem:[#allocation24_spill] sm:$0xff] }
 0x2e7   : > { %v9536_v22 = vpop.f32.mrb[151].mxu1 }
 0x2e8   : > { %v9420_v28 = vpop.f32.mrb[116].mxu0  ;;  %v12098_v43 = vadd.f32 %v9536_v22, %v9535_v50 }
 0x2e9   : > { %v9421_v55 = vpop.f32.mrb[117].mxu0 }
 0x2ea   : > { %9691 = vmatmul.mubr.bf16.gmra.mrb[204].mxu0 %v8676_v51  ;;  %v9422_v38 = vadd.f32 %v9421_v55, %v9420_v28  ;;  %v9423_v46 = vpop.f32.mrb[118].mxu0  ;;  %v10004_v28 = vld [vmem:[%s13434_s7 + $0xa8] ss:$16 sps:$4 sm:$0xff]   ;;  %v10006_v55 = vld [vmem:[%s13434_s7 + $0xac] ss:$16 sps:$4 sm:$0xff]  }
 0x2eb   : > { %v9424_v42 = vpop.f32.mrb[119].mxu0  ;;  %6979 = vmatprep.mubr.bf16.mxu0 %v13547_v61  ;;  %6957 = vmatprep.subr.bf16.mxu0 %v10006_v55 }
 0x2ec   : > { %v5996_v30 = vadd.f32 %v9422_v38, %v13555_v47  ;;  %v9425_v53 = vadd.f32 %v9424_v42, %v9423_v46  ;;  %6958 = vmatpush1.bf16.msra.mxu0 %v10004_v28 }
 0x2ee   : > { %v12103_v52 = vadd.f32 %v9425_v53, %v13556_v5  ;;  %v9538_v10 = vpop.f32.mrb[152].mxu1 }
 0x2ef   : > { %v9539_v36 = vpop.f32.mrb[153].mxu1 }
 0x2f0   : > { %v12117_v16 = vadd.f32 %v9539_v36, %v9538_v10  ;;  %v9541_v13 = vpop.f32.mrb[154].mxu1  ;;  %v13559_v10 = vld [vmem:[#allocation25_spill] sm:$0xff] }
 0x2f1   : > { %v9542_v31 = vpop.f32.mrb[155].mxu1 }
 0x2f2   : > { %v9426_v21 = vpop.f32.mrb[120].mxu0  ;;  %v12119_v33 = vadd.f32 %v9542_v31, %v9541_v13 }
 0x2f3   : > { %v9427_v44 = vpop.f32.mrb[121].mxu0 }
 0x2f4   : > { %v9428_v11 = vadd.f32 %v9427_v44, %v9426_v21  ;;  %v9429_v9 = vpop.f32.mrb[122].mxu0  ;;  %v10007_v44 = vld [vmem:[%s13434_s7 + $0xe0] ss:$16 sps:$4 sm:$0xff]  }
 0x2f5   : > { %v9430_v3 = vpop.f32.mrb[123].mxu0 }
 0x2f6   : > { %v12122_v60 = vadd.f32 %v9428_v11, %v13557_v41  ;;  %v9431_v7 = vadd.f32 %v9430_v3, %v9429_v9  ;;  %v10009_v11 = vld [vmem:[%s13434_s7 + $0xe4] ss:$16 sps:$4 sm:$0xff]   ;;  %v12141_v9 = vadd.f32 %v9534_v32, %v5996_v30  ;;  %v10010_v41 = vld [vmem:[%s13434_s7 + $0xc8] ss:$16 sps:$4 sm:$0xff]  }
 0x2f7   : > { %6768 = vmatprep.subr.bf16.mxu1 %v10009_v11  ;;  %v13561_v30 = vld [vmem:[#allocation7_spill] sm:$0xff] }
 0x2f8   : > { %v12125_v39 = vadd.f32 %v9431_v7, %v13558_v15  ;;  %v9544_v48 = vpop.f32.mrb[156].mxu1  ;;  %v10012_v7 = vld [vmem:[%s13434_s7 + $0xcc] ss:$16 sps:$4 sm:$0xff]   ;;  %6769 = vmatpush1.bf16.msra.mxu1 %v10007_v44 }
 0x2f9   : > { %v9545_v51 = vpop.f32.mrb[157].mxu1  ;;  %6959 = vmatprep.subr.bf16.mxu0 %v10012_v7 }
 0x2fa   : > { %v9546_v58 = vadd.f32 %v9545_v51, %v9544_v48  ;;  %v9547_v50 = vpop.f32.mrb[158].mxu1  ;;  %6960 = vmatpush1.bf16.msra.mxu0 %v10010_v41 }
 0x2fb   : > { %v9548_v22 = vpop.f32.mrb[159].mxu1 }
 0x2fc   : > { %v9549_v38 = vadd.f32 %v9548_v22, %v9547_v50 }
 0x2fd   : > { %v9432_v46 = vpop.f32.mrb[124].mxu0 }
 0x2fe   : > { %v9433_v42 = vpop.f32.mrb[125].mxu0 }
 0x2ff   : > { %v9434_v47 = vadd.f32 %v9433_v42, %v9432_v46  ;;  %v9435_v53 = vpop.f32.mrb[126].mxu0  ;;  %v12152_v42 = vadd.f32 %v12074_v29, %v12093_v4  ;;  %v10013_v29 = vld [vmem:[%s13434_s7 + $0xe8] ss:$16 sps:$4 sm:$0xff]   ;;  %v10015_v4 = vld [vmem:[%s13434_s7 + $0xec] ss:$16 sps:$4 sm:$0xff]  }
 0x300   : > { %v9436_v5 = vpop.f32.mrb[127].mxu0  ;;  %6961 = vmatprep.subr.bf16.mxu0 %v10015_v4 }
 0x301   : > { %v6012_v0 = vadd.f32 %v9434_v47, %v13559_v10  ;;  %v9437_v40 = vadd.f32 %v9436_v5, %v9435_v53  ;;  %v13562_v47 = vld [vmem:[#allocation13_spill] sm:$0xff]  ;;  %v12157_v10 = vadd.f32 %v12098_v43, %v12103_v52  ;;  %6962 = vmatpush1.bf16.msra.mxu0 %v10013_v29 }
 0x302   : > { %v9550_v36 = vpop.f32.mrb[160].mxu1 }
 0x303   : > { %v6015_v6 = vadd.f32 %v9437_v40, %v13560_v56  ;;  %v9551_v13 = vpop.f32.mrb[161].mxu1  ;;  %v12161_v56 = vadd.f32 %v12080_v37, %v12096_v17  ;;  %v12169_v11 = vadd.f32 %v9546_v58, %v6012_v0  ;;  %v12173_v37 = vadd.f32 %v12117_v16, %v12122_v60 }
 0x304   : > { %v9552_v31 = vadd.f32 %v9551_v13, %v9550_v36  ;;  %v9553_v21 = vpop.f32.mrb[162].mxu1  ;;  %v12180_v58 = vadd.f32 %v12119_v33, %v12125_v39 }
 0x305   : > { %v9554_v3 = vpop.f32.mrb[163].mxu1 }
 0x306   : > { %v9555_v15 = vadd.f32 %v9554_v3, %v9553_v21 }
 0x307   : > { %v9438_v48 = vpop.f32.mrb[128].mxu0 }
 0x308   : > { %v9439_v51 = vpop.f32.mrb[129].mxu0 }
 0x309   : > { %v9440_v50 = vadd.f32 %v9439_v51, %v9438_v48  ;;  %v9441_v22 = vpop.f32.mrb[130].mxu0  ;;  %v12176_v48 = vadd.f32 %v9549_v38, %v6015_v6 }
 0x30a   : > { %v9442_v32 = vpop.f32.mrb[131].mxu0 }
 0x30b   : > { %v6020_v28 = vadd.f32 %v9440_v50, %v13561_v30  ;;  %v9443_v55 = vadd.f32 %v9442_v32, %v9441_v22 }
 0x30c   : > { %v9556_v46 = vpop.f32.mrb[164].mxu1 }
 0x30d   : > { %v6023_v53 = vadd.f32 %v9443_v55, %v13562_v47  ;;  %v9557_v5 = vpop.f32.mrb[165].mxu1 }
 0x30e   : > { %v9558_v40 = vadd.f32 %v9557_v5, %v9556_v46  ;;  %v9559_v36 = vpop.f32.mrb[166].mxu1  ;;  %v12185_v46 = vadd.f32 %v9552_v31, %v6020_v28 }
 0x30f   : > { %v9560_v13 = vpop.f32.mrb[167].mxu1  ;;  %v12189_v5 = vadd.f32 %v9555_v15, %v6023_v53 }
 0x310   : > { %v9561_v21 = vadd.f32 %v9560_v13, %v9559_v36 }
 0x311   : > { %v9444_v44 = vpop.f32.mrb[132].mxu0 }
 0x312   : > { %v9445_v43 = vpop.f32.mrb[133].mxu0 }
 0x313   : > { %v9446_v52 = vadd.f32 %v9445_v43, %v9444_v44  ;;  %v9447_v3 = vpop.f32.mrb[134].mxu0 }
 0x314   : > { %v9448_v41 = vpop.f32.mrb[135].mxu0 }
 0x315   : > { %v6028_v17 = vadd.f32 %v9446_v52, %v11816_v27  ;;  %v9449_v7 = vadd.f32 %v9448_v41, %v9447_v3 }
 0x316   : > { %v9562_v51 = vpop.f32.mrb[168].mxu1 }
 0x317   : > { %v6031_v0 = vadd.f32 %v9449_v7, %v11828_v63  ;;  %v9563_v50 = vpop.f32.mrb[169].mxu1  ;;  %v12183_v22 = vadd.f32 %v9558_v40, %v6028_v17 }
 0x318   : > { %v9564_v32 = vadd.f32 %v9563_v50, %v9562_v51  ;;  %v9565_v30 = vpop.f32.mrb[170].mxu1 }
 0x319   : > { %v9566_v55 = vpop.f32.mrb[171].mxu1  ;;  %v12187_v38 = vadd.f32 %v9561_v21, %v6031_v0 }
 0x31a   : > { %v9567_v16 = vadd.f32 %v9566_v55, %v9565_v30 }
 0x31c   : > { %v9450_v60 = vpop.f32.mrb[136].mxu0 }
 0x31d   : > { %v9451_v27 = vpop.f32.mrb[137].mxu0 }
 0x31e   : > { %v9452_v6 = vadd.f32 %v9451_v27, %v9450_v60  ;;  %v9453_v47 = vpop.f32.mrb[138].mxu0 }
 0x31f   : > { %v9454_v33 = vpop.f32.mrb[139].mxu0 }
 0x320   : > { %v6036_v63 = vadd.f32 %v9452_v6, %v11856_v20  ;;  %v9455_v39 = vadd.f32 %v9454_v33, %v9453_v47  ;;  %v9568_v40 = vpop.f32.mrb[172].mxu1 }
 0x321   : > { %v9569_v36 = vpop.f32.mrb[173].mxu1 }
 0x322   : > { %v6039_v13 = vadd.f32 %v9455_v39, %v11861_v45  ;;  %v9570_v44 = vadd.f32 %v9569_v36, %v9568_v40  ;;  %v9571_v29 = vpop.f32.mrb[174].mxu1  ;;  %v12193_v28 = vadd.f32 %v9564_v32, %v6036_v63 }
 0x323   : > { %v9572_v4 = vpop.f32.mrb[175].mxu1 }
 0x324   : > { %v9573_v31 = vadd.f32 %v9572_v4, %v9571_v29  ;;  %v12195_v43 = vadd.f32 %v9567_v16, %v6039_v13 }
 0x326   : > { %v9456_v21 = vpop.f32.mrb[140].mxu0 }
 0x327   : > { %v9457_v52 = vpop.f32.mrb[141].mxu0 }
 0x328   : > { %v9458_v15 = vadd.f32 %v9457_v52, %v9456_v21  ;;  %v9459_v53 = vpop.f32.mrb[142].mxu0 }
 0x329   : > { %v9460_v3 = vpop.f32.mrb[143].mxu0 }
 0x32a   : > { %v6044_v20 = vadd.f32 %v9458_v15, %v11876_v24  ;;  %v9461_v41 = vadd.f32 %v9460_v3, %v9459_v53 }
 0x32b   : > { %v9574_v17 = vpop.f32.mrb[176].mxu1 }
 0x32c   : > { %v6047_v7 = vadd.f32 %v9461_v41, %v11878_v57  ;;  %v9575_v45 = vpop.f32.mrb[177].mxu1  ;;  %v12199_v51 = vadd.f32 %v9570_v44, %v6044_v20 }
 0x32d   : > { %v9576_v0 = vadd.f32 %v9575_v45, %v9574_v17  ;;  %v9577_v50 = vpop.f32.mrb[178].mxu1 }
 0x32e   : > { %v9578_v32 = vpop.f32.mrb[179].mxu1  ;;  %v12201_v30 = vadd.f32 %v9573_v31, %v6047_v7 }
 0x32f   : > { %v9579_v55 = vadd.f32 %v9578_v32, %v9577_v50 }
 0x331   : > { %v9462_v16 = vpop.f32.mrb[144].mxu0 }
 0x332   : > { %v9463_v60 = vpop.f32.mrb[145].mxu0 }
 0x333   : > { %v9464_v27 = vadd.f32 %v9463_v60, %v9462_v16  ;;  %v9465_v6 = vpop.f32.mrb[146].mxu0 }
 0x334   : > { %v9466_v47 = vpop.f32.mrb[147].mxu0 }
 0x335   : > { %v6052_v24 = vadd.f32 %v9464_v27, %v11904_v54  ;;  %v9467_v33 = vadd.f32 %v9466_v47, %v9465_v6  ;;  %v9580_v63 = vpop.f32.mrb[180].mxu1 }
 0x336   : > { %v9581_v39 = vpop.f32.mrb[181].mxu1 }
 0x337   : > { %v6055_v57 = vadd.f32 %v9467_v33, %v11912_v14  ;;  %v9582_v40 = vadd.f32 %v9581_v39, %v9580_v63  ;;  %v9583_v36 = vpop.f32.mrb[182].mxu1  ;;  %v12205_v13 = vadd.f32 %v9576_v0, %v6052_v24 }
 0x338   : > { %v9584_v44 = vpop.f32.mrb[183].mxu1 }
 0x339   : > { %v9585_v29 = vadd.f32 %v9584_v44, %v9583_v36  ;;  %v12207_v4 = vadd.f32 %v9579_v55, %v6055_v57 }
 0x33c   : > { %v9468_v31 = vpop.f32.mrb[148].mxu0 }
 0x33d   : > { %v9469_v21 = vpop.f32.mrb[149].mxu0 }
 0x33e   : > { %v9470_v52 = vadd.f32 %v9469_v21, %v9468_v31  ;;  %v9471_v15 = vpop.f32.mrb[150].mxu0 }
 0x33f   : > { %v9472_v53 = vpop.f32.mrb[151].mxu0 }
 0x340   : > { %v9586_v3 = vpop.f32.mrb[184].mxu1  ;;  %v6060_v54 = vadd.f32 %v9470_v52, %v11928_v23  ;;  %v9473_v20 = vadd.f32 %v9472_v53, %v9471_v15 }
 0x341   : > { %v9587_v41 = vpop.f32.mrb[185].mxu1 }
 0x342   : > { %v9588_v17 = vadd.f32 %v9587_v41, %v9586_v3  ;;  %v9589_v14 = vpop.f32.mrb[186].mxu1  ;;  %v6063_v7 = vadd.f32 %v9473_v20, %v11935_v34  ;;  %v12211_v0 = vadd.f32 %v9582_v40, %v6060_v54 }
 0x343   : > { %v9590_v45 = vpop.f32.mrb[187].mxu1 }
 0x344   : > { %v9591_v50 = vadd.f32 %v9590_v45, %v9589_v14  ;;  %v9474_v32 = vpop.f32.mrb[152].mxu0  ;;  %v12213_v55 = vadd.f32 %v9585_v29, %v6063_v7 }
 0x345   : > { %v9475_v16 = vpop.f32.mrb[153].mxu0 }
 0x346   : > { %v9476_v60 = vadd.f32 %v9475_v16, %v9474_v32  ;;  %v9477_v27 = vpop.f32.mrb[154].mxu0 }
 0x347   : > { %v9478_v6 = vpop.f32.mrb[155].mxu0 }
 0x348   : > { %v6068_v47 = vadd.f32 %v9476_v60, %v11962_v26  ;;  %v9479_v23 = vadd.f32 %v9478_v6, %v9477_v27 }
 0x34a   : > { %v9592_v24 = vpop.f32.mrb[188].mxu1  ;;  %v6071_v33 = vadd.f32 %v9479_v23, %v11964_v18  ;;  %v12217_v39 = vadd.f32 %v9588_v17, %v6068_v47 }
 0x34b   : > { %v9593_v63 = vpop.f32.mrb[189].mxu1 }
 0x34c   : > { %v9594_v34 = vadd.f32 %v9593_v63, %v9592_v24  ;;  %v9595_v57 = vpop.f32.mrb[190].mxu1  ;;  %v12219_v36 = vadd.f32 %v9591_v50, %v6071_v33 }
 0x34d   : > { %v9596_v40 = vpop.f32.mrb[191].mxu1 }
 0x34e   : > { %v9597_v44 = vadd.f32 %v9596_v40, %v9595_v57 }
 0x352   : > { %v9480_v29 = vpop.f32.mrb[156].mxu0 }
 0x353   : > { %v9481_v31 = vpop.f32.mrb[157].mxu0 }
 0x354   : > { %v9482_v21 = vadd.f32 %v9481_v31, %v9480_v29  ;;  %v9483_v52 = vpop.f32.mrb[158].mxu0 }
 0x355   : > { %v9598_v15 = vpop.f32.mrb[192].mxu1  ;;  %v9484_v53 = vpop.f32.mrb[159].mxu0 }
 0x356   : > { %v9599_v26 = vpop.f32.mrb[193].mxu1  ;;  %v6076_v3 = vadd.f32 %v9482_v21, %v11992_v19  ;;  %v9485_v54 = vadd.f32 %v9484_v53, %v9483_v52 }
 0x357   : > { %v9600_v18 = vadd.f32 %v9599_v26, %v9598_v15  ;;  %v9601_v20 = vpop.f32.mrb[194].mxu1 }
 0x358   : > { %v9602_v41 = vpop.f32.mrb[195].mxu1  ;;  %v6079_v17 = vadd.f32 %v9485_v54, %v11996_v1  ;;  %v12223_v7 = vadd.f32 %v9594_v34, %v6076_v3 }
 0x359   : > { %v9603_v14 = vadd.f32 %v9602_v41, %v9601_v20 }
 0x35a   : > { %v12225_v45 = vadd.f32 %v9597_v44, %v6079_v17 }
 0x35d   : > { %v9486_v50 = vpop.f32.mrb[160].mxu0 }
 0x35e   : > { %v9487_v32 = vpop.f32.mrb[161].mxu0 }
 0x35f   : > { %v9488_v16 = vadd.f32 %v9487_v32, %v9486_v50  ;;  %v9489_v60 = vpop.f32.mrb[162].mxu0 }
 0x360   : > { %v9490_v27 = vpop.f32.mrb[163].mxu0 }
 0x361   : > { %v6084_v6 = vadd.f32 %v9488_v16, %v12016_v12  ;;  %v9491_v47 = vadd.f32 %v9490_v27, %v9489_v60  ;;  %v9604_v19 = vpop.f32.mrb[196].mxu1 }
 0x362   : > { %v9605_v23 = vpop.f32.mrb[197].mxu1 }
 0x363   : > { %v6087_v24 = vadd.f32 %v9491_v47, %v12020_v59  ;;  %v9606_v33 = vadd.f32 %v9605_v23, %v9604_v19  ;;  %v9607_v63 = vpop.f32.mrb[198].mxu1  ;;  %v12229_v1 = vadd.f32 %v9600_v18, %v6084_v6 }
 0x364   : > { %v9608_v34 = vpop.f32.mrb[199].mxu1 }
 0x365   : > { %v9609_v57 = vadd.f32 %v9608_v34, %v9607_v63  ;;  %v12231_v40 = vadd.f32 %v9603_v14, %v6087_v24 }
 0x369   : > { %v9492_v44 = vpop.f32.mrb[164].mxu0 }
 0x36a   : > { %v9493_v29 = vpop.f32.mrb[165].mxu0 }
 0x36b   : > { %v9494_v31 = vadd.f32 %v9493_v29, %v9492_v44  ;;  %v9495_v21 = vpop.f32.mrb[166].mxu0 }
 0x36c   : > { %v9496_v52 = vpop.f32.mrb[167].mxu0  ;;  %v9610_v53 = vpop.f32.mrb[200].mxu1 }
 0x36d   : > { %v6092_v12 = vadd.f32 %v9494_v31, %v12032_v8  ;;  %v9497_v15 = vadd.f32 %v9496_v52, %v9495_v21  ;;  %v9611_v26 = vpop.f32.mrb[201].mxu1 }
 0x36e   : > { %v9612_v3 = vadd.f32 %v9611_v26, %v9610_v53  ;;  %v9613_v54 = vpop.f32.mrb[202].mxu1  ;;  %v12252_v53 = vld [vmem:[%s13432_s5] ss:$0 sm:$0xff] }
 0x36f   : > { %v6095_v59 = vadd.f32 %v9497_v15, %v12034_v49  ;;  %v12235_v18 = vadd.f32 %v9606_v33, %v6092_v12  ;;  %v9614_v20 = vpop.f32.mrb[203].mxu1 }
 0x370   : > { %v9615_v41 = vadd.f32 %v9614_v20, %v9613_v54 }
 0x371   : > { %v12237_v17 = vadd.f32 %v9609_v57, %v6095_v59 }
 0x375   : > { %v9498_v14 = vpop.f32.mrb[168].mxu0 }
 0x376   : > { %v9499_v50 = vpop.f32.mrb[169].mxu0 }
 0x377   : > { %v9500_v32 = vadd.f32 %v9499_v50, %v9498_v14  ;;  %v9501_v16 = vpop.f32.mrb[170].mxu0 }
 0x378   : > { %v9502_v60 = vpop.f32.mrb[171].mxu0 }
 0x379   : > { %v6100_v8 = vadd.f32 %v9500_v32, %v12040_v62  ;;  %v9503_v27 = vadd.f32 %v9502_v60, %v9501_v16 }
 0x37b   : > { %v6103_v6 = vadd.f32 %v9503_v27, %v12048_v25  ;;  %v12241_v47 = vadd.f32 %v9612_v3, %v6100_v8  ;;  %v12260_v3 = vld [vmem:[%s13433_s6] ss:$0 sm:$0xff] }
 0x37d   : > { %v9504_v49 = vpop.f32.mrb[172].mxu0  ;;  %v12243_v19 = vadd.f32 %v9615_v41, %v6103_v6 }
 0x37e   : > { %v9505_v23 = vpop.f32.mrb[173].mxu0 }
 0x37f   : > { %v9506_v24 = vadd.f32 %v9505_v23, %v9504_v49  ;;  %v9507_v33 = vpop.f32.mrb[174].mxu0 }
 0x380   : > { %v9508_v34 = vpop.f32.mrb[175].mxu0 }
 0x381   : > { %v9616_v63 = vpop.f32.mrb[204].mxu1  ;;  %v6108_v57 = vadd.f32 %v9506_v24, %v12066_v35  ;;  %v9509_v44 = vadd.f32 %v9508_v34, %v9507_v33 }
 0x382   : > { %v9617_v29 = vpop.f32.mrb[205].mxu1 }
 0x383   : > { %v9618_v31 = vadd.f32 %v9617_v29, %v9616_v63  ;;  %v9619_v21 = vpop.f32.mrb[206].mxu1  ;;  %v6111_v62 = vadd.f32 %v9509_v44, %v12072_v2 }
 0x384   : > { %v9620_v52 = vpop.f32.mrb[207].mxu1 }
 0x385   : > { %v9621_v25 = vadd.f32 %v9620_v52, %v9619_v21  ;;  %v12247_v12 = vadd.f32 %v9618_v31, %v6108_v57  ;;  %v9664_v15 = vpop.f32.mrb[176].mxu0 }
 0x386   : > { %v6318_v26 = vadd.f32 %v9664_v15, %v12141_v9  ;;  %v6309_v59 = vpop.f32.mrb[177].mxu0 }
 0x387   : > { %v12255_v35 = vadd.f32 %v9621_v25, %v6111_v62  ;;  %v6310_v2 = vadd.f32 %v6309_v59, %v12152_v42  ;;  %v9665_v54 = vpop.f32.mrb[178].mxu0 }
 0x388   : > { %v6445_v20 = vmul.f32 %v12252_v53, %v6318_v26  ;;  %v6321_v41 = vadd.f32 %v9665_v54, %v12157_v10  ;;  %v6312_v14 = vpop.f32.mrb[179].mxu0 }
 0x389   : > { %v6443_v50 = vmul.f32 %v12252_v53, %v6310_v2  ;;  %v6313_v9 = vadd.f32 %v6312_v14, %v12161_v56 }
 0x38a   : > { %v6484_v32 = vadd.f32 %v12260_v3, %v6445_v20  ;;  %v6446_v16 = vmul.f32 %v12252_v53, %v6321_v41 }
 0x38b   : > { %v6482_v60 = vadd.f32 %v12260_v3, %v6443_v50  ;;  %v6444_v8 = vmul.f32 %v12252_v53, %v6313_v9 }
 0x38c   : > { %v6485_v42 = vadd.f32 %v12260_v3, %v6446_v16  ;;  %v6516_v49 = vmax.f32 %v6484_v32, 0.0 }
 0x38d   : > { %v6483_v27 = vadd.f32 %v12260_v3, %v6444_v8  ;;  %v9668_v6 = vpop.f32.mrb[180].mxu0  ;;  %v6514_v33 = vmax.f32 %v6482_v60, 0.0 }
 0x38e   : > { %v6517_v10 = vmax.f32 %v6485_v42, 0.0  ;;  %v6334_v23 = vadd.f32 %v9668_v6, %v12169_v11  ;;  %v6325_v24 = vpop.f32.mrb[181].mxu0 }
 0x38f   : > { %v6515_v56 = vmax.f32 %v6483_v27, 0.0  ;;  %v6326_v63 = vadd.f32 %v6325_v24, %v12173_v37  ;;  %v9669_v34 = vpop.f32.mrb[182].mxu0 }
 0x390   : > { %v6449_v57 = vmul.f32 %v12252_v53, %v6334_v23  ;;  %v6337_v44 = vadd.f32 %v9669_v34, %v12176_v48  ;;  %v6328_v29 = vpop.f32.mrb[183].mxu0  ;;  %v6547_v31 = vpack.c.bf16 %v6517_v10, %v6516_v49 }
 0x391   : > { %v6546_v21 = vpack.c.bf16 %v6515_v56, %v6514_v33  ;;  %v6447_v62 = vmul.f32 %v12252_v53, %v6326_v63  ;;  %v6329_v52 = vadd.f32 %v6328_v29, %v12180_v58 }
 0x392   : > { %v6488_v25 = vadd.f32 %v12260_v3, %v6449_v57  ;;  %v6450_v11 = vmul.f32 %v12252_v53, %v6337_v44 }
 0x393   : > { %v6486_v15 = vadd.f32 %v12260_v3, %v6447_v62  ;;  %v6448_v37 = vmul.f32 %v12252_v53, %v6329_v52  ;;  %6787 = vmatmul.mubr.bf16.vlgmr.msra.gmra.mrb[208].mxu1 %v6546_v21  ;;  %6980 = vmatmul.mubr.bf16.vlgmr.msra.gmra.mrb[208].mxu0 %v6546_v21 }
 0x394   : > { %v6489_v26 = vadd.f32 %v12260_v3, %v6450_v11  ;;  %6796 = vmatprep.mubr.bf16.mxu1 %v13547_v61  ;;  %6989 = vmatprep.mubr.bf16.mxu0 %v13547_v61  ;;  %v6520_v58 = vmax.f32 %v6488_v25, 0.0 }
 0x395   : > { %v6487_v48 = vadd.f32 %v12260_v3, %v6448_v37  ;;  %v9672_v59 = vpop.f32.mrb[184].mxu0  ;;  %v6518_v41 = vmax.f32 %v6486_v15, 0.0 }
 0x396   : > { %v6521_v2 = vmax.f32 %v6489_v26, 0.0  ;;  %v6350_v54 = vadd.f32 %v9672_v59, %v12183_v22  ;;  %v6341_v20 = vpop.f32.mrb[185].mxu0 }
 0x397   : > { %v6519_v14 = vmax.f32 %v6487_v48, 0.0  ;;  %v6342_v50 = vadd.f32 %v6341_v20, %v12185_v46  ;;  %v9673_v9 = vpop.f32.mrb[186].mxu0 }
 0x398   : > { %v6453_v32 = vmul.f32 %v12252_v53, %v6350_v54  ;;  %v6353_v16 = vadd.f32 %v9673_v9, %v12187_v38  ;;  %v6344_v60 = vpop.f32.mrb[187].mxu0  ;;  %v6549_v8 = vpack.c.bf16 %v6521_v2, %v6520_v58 }
 0x399   : > { %v6451_v42 = vmul.f32 %v12252_v53, %v6342_v50  ;;  %v6345_v27 = vadd.f32 %v6344_v60, %v12189_v5  ;;  %v6548_v6 = vpack.c.bf16 %v6519_v14, %v6518_v41 }
 0x39a   : > { %v6492_v49 = vadd.f32 %v12260_v3, %v6453_v32  ;;  %v6454_v22 = vmul.f32 %v12252_v53, %v6353_v16 }
 0x39b   : > { %v6490_v10 = vadd.f32 %v12260_v3, %v6451_v42  ;;  %v6452_v46 = vmul.f32 %v12252_v53, %v6345_v27  ;;  %6797 = vmatmul.mubr.bf16.gmra.mrb[212].mxu1 %v6547_v31  ;;  %6990 = vmatmul.mubr.bf16.gmra.mrb[212].mxu0 %v6547_v31 }
 0x39c   : > { %v6493_v23 = vadd.f32 %v12260_v3, %v6454_v22  ;;  %6806 = vmatprep.mubr.bf16.mxu1 %v13547_v61  ;;  %6999 = vmatprep.mubr.bf16.mxu0 %v13547_v61  ;;  %v6524_v24 = vmax.f32 %v6492_v49, 0.0 }
 0x39d   : > { %v6491_v38 = vadd.f32 %v12260_v3, %v6452_v46  ;;  %v9676_v5 = vpop.f32.mrb[188].mxu0  ;;  %v6522_v34 = vmax.f32 %v6490_v10, 0.0 }
 0x39e   : > { %v6525_v33 = vmax.f32 %v6493_v23, 0.0  ;;  %v6366_v56 = vadd.f32 %v9676_v5, %v12199_v51  ;;  %v6357_v63 = vpop.f32.mrb[189].mxu0 }
 0x39f   : > { %v6523_v57 = vmax.f32 %v6491_v38, 0.0  ;;  %v6358_v44 = vadd.f32 %v6357_v63, %v12193_v28  ;;  %v9677_v29 = vpop.f32.mrb[190].mxu0 }
 0x3a0   : > { %v6457_v31 = vmul.f32 %v12252_v53, %v6366_v56  ;;  %v6369_v21 = vadd.f32 %v9677_v29, %v12201_v30  ;;  %v6360_v62 = vpop.f32.mrb[191].mxu0  ;;  %v12305_v52 = vpack.c.bf16 %v6525_v33, %v6524_v24 }
 0x3a1   : > { %v6455_v25 = vmul.f32 %v12252_v53, %v6358_v44  ;;  %v6361_v11 = vadd.f32 %v6360_v62, %v12195_v43  ;;  %v6550_v15 = vpack.c.bf16 %v6523_v57, %v6522_v34 }
 0x3a2   : > { %v6496_v51 = vadd.f32 %v12260_v3, %v6457_v31  ;;  %v6458_v37 = vmul.f32 %v12252_v53, %v6369_v21 }
 0x3a3   : > { %v6494_v26 = vadd.f32 %v12260_v3, %v6455_v25  ;;  %v6456_v28 = vmul.f32 %v12252_v53, %v6361_v11  ;;  %6807 = vmatmul.mubr.bf16.gmra.mrb[216].mxu1 %v6548_v6  ;;  %7000 = vmatmul.mubr.bf16.gmra.mrb[216].mxu0 %v6548_v6 }
 0x3a4   : > { %v6497_v30 = vadd.f32 %v12260_v3, %v6458_v37  ;;  %6816 = vmatprep.mubr.bf16.mxu1 %v13547_v61  ;;  %7009 = vmatprep.mubr.bf16.mxu0 %v13547_v61  ;;  %v6528_v59 = vmax.f32 %v6496_v51, 0.0 }
 0x3a5   : > { %v6495_v48 = vadd.f32 %v12260_v3, %v6456_v28  ;;  %v9680_v43 = vpop.f32.mrb[192].mxu0  ;;  %v6526_v20 = vmax.f32 %v6494_v26, 0.0 }
 0x3a6   : > { %v6529_v58 = vmax.f32 %v6497_v30, 0.0  ;;  %v6382_v2 = vadd.f32 %v9680_v43, %v12211_v0  ;;  %v6373_v54 = vpop.f32.mrb[193].mxu0 }
 0x3a7   : > { %v6527_v41 = vmax.f32 %v6495_v48, 0.0  ;;  %v6374_v14 = vadd.f32 %v6373_v54, %v12205_v13  ;;  %v9681_v50 = vpop.f32.mrb[194].mxu0 }
 0x3a8   : > { %v6461_v9 = vmul.f32 %v12252_v53, %v6382_v2  ;;  %v6385_v32 = vadd.f32 %v9681_v50, %v12213_v55  ;;  %v6376_v16 = vpop.f32.mrb[195].mxu0  ;;  %v12321_v60 = vpack.c.bf16 %v6529_v58, %v6528_v59 }
 0x3a9   : > { %v6459_v42 = vmul.f32 %v12252_v53, %v6374_v14  ;;  %v6377_v27 = vadd.f32 %v6376_v16, %v12207_v4  ;;  %v12325_v6 = vpack.c.bf16 %v6527_v41, %v6526_v20 }
 0x3aa   : > { %v6500_v0 = vadd.f32 %v12260_v3, %v6461_v9  ;;  %v6462_v49 = vmul.f32 %v12252_v53, %v6385_v32 }
 0x3ab   : > { %v6498_v13 = vadd.f32 %v12260_v3, %v6459_v42  ;;  %v6460_v22 = vmul.f32 %v12252_v53, %v6377_v27  ;;  %6817 = vmatmul.mubr.bf16.gmra.mrb[220].mxu1 %v6549_v8  ;;  %7010 = vmatmul.mubr.bf16.gmra.mrb[220].mxu0 %v6549_v8 }
 0x3ac   : > { %v6501_v55 = vadd.f32 %v12260_v3, %v6462_v49  ;;  %6826 = vmatprep.mubr.bf16.mxu1 %v13547_v61  ;;  %7019 = vmatprep.mubr.bf16.mxu0 %v13547_v61  ;;  %v6532_v46 = vmax.f32 %v6500_v0, 0.0 }
 0x3ad   : > { %v6499_v4 = vadd.f32 %v12260_v3, %v6460_v22  ;;  %v9684_v10 = vpop.f32.mrb[196].mxu0  ;;  %v6530_v24 = vmax.f32 %v6498_v13, 0.0 }
 0x3ae   : > { %v6533_v23 = vmax.f32 %v6501_v55, 0.0  ;;  %v6398_v38 = vadd.f32 %v9684_v10, %v12223_v7  ;;  %v6389_v5 = vpop.f32.mrb[197].mxu0 }
 0x3af   : > { %v6531_v33 = vmax.f32 %v6499_v4, 0.0  ;;  %v6390_v56 = vadd.f32 %v6389_v5, %v12217_v39  ;;  %v9685_v63 = vpop.f32.mrb[198].mxu0 }
 0x3b0   : > { %v6465_v8 = vmul.f32 %v12252_v53, %v6398_v38  ;;  %v6401_v34 = vadd.f32 %v9685_v63, %v12225_v45  ;;  %v6392_v57 = vpop.f32.mrb[199].mxu0  ;;  %v12339_v44 = vpack.c.bf16 %v6533_v23, %v6532_v46 }
 0x3b1   : > { %v6463_v29 = vmul.f32 %v12252_v53, %v6390_v56  ;;  %v6393_v31 = vadd.f32 %v6392_v57, %v12219_v36  ;;  %v12343_v21 = vpack.c.bf16 %v6531_v33, %v6530_v24 }
 0x3b2   : > { %v6504_v7 = vadd.f32 %v12260_v3, %v6465_v8  ;;  %v6466_v62 = vmul.f32 %v12252_v53, %v6401_v34 }
 0x3b3   : > { %v6502_v39 = vadd.f32 %v12260_v3, %v6463_v29  ;;  %v6464_v25 = vmul.f32 %v12252_v53, %v6393_v31  ;;  %6827 = vmatmul.mubr.bf16.gmra.mrb[224].mxu1 %v6550_v15  ;;  %7020 = vmatmul.mubr.bf16.gmra.mrb[224].mxu0 %v6550_v15 }
 0x3b4   : > { %v6505_v45 = vadd.f32 %v12260_v3, %v6466_v62  ;;  %6836 = vmatprep.mubr.bf16.mxu1 %v13547_v61  ;;  %7029 = vmatprep.mubr.bf16.mxu0 %v13547_v61  ;;  %v6536_v51 = vmax.f32 %v6504_v7, 0.0 }
 0x3b5   : > { %v6503_v36 = vadd.f32 %v12260_v3, %v6464_v25  ;;  %v9688_v11 = vpop.f32.mrb[200].mxu0  ;;  %v6534_v30 = vmax.f32 %v6502_v39, 0.0  ;;  %v12418_v39 = vld [vmem:[%s10289_s26] sm:$0xff] }
 0x3b6   : > { %v6537_v37 = vmax.f32 %v6505_v45, 0.0  ;;  %v6414_v26 = vadd.f32 %v9688_v11, %v12235_v18  ;;  %v6405_v28 = vpop.f32.mrb[201].mxu0  ;;  %v12426_v11 = vld [vmem:[%s10289_s26 + $0x8] sm:$0xff]  ;;  %v12670_v25 = vld [vmem:[%s10289_s26 + $0x180] sm:$0xff] }
 0x3b7   : > { %v6535_v48 = vmax.f32 %v6503_v36, 0.0  ;;  %v6406_v43 = vadd.f32 %v6405_v28, %v12229_v1  ;;  %v9689_v59 = vpop.f32.mrb[202].mxu0  ;;  %13577 = vst [vmem:[#allocation23_spill] sm:$0xff] %v12670_v25 }
 0x3b8   : > { %v6469_v15 = vmul.f32 %v12252_v53, %v6414_v26  ;;  %v6417_v58 = vadd.f32 %v9689_v59, %v12237_v17  ;;  %v6408_v2 = vpop.f32.mrb[203].mxu0  ;;  %v6557_v54 = vpack.c.bf16 %v6537_v37, %v6536_v51  ;;  %v12664_v37 = vld [vmem:[%s10289_s26 + $0x178] sm:$0xff] }
 0x3b9   : > { %v6467_v20 = vmul.f32 %v12252_v53, %v6406_v43  ;;  %v6409_v41 = vadd.f32 %v6408_v2, %v12231_v40  ;;  %v6556_v14 = vpack.c.bf16 %v6535_v48, %v6534_v30  ;;  %v12436_v48 = vld [vmem:[%s10289_s26 + $0x10] sm:$0xff]  ;;  %v12654_v43 = vld [vmem:[%s10289_s26 + $0x168] sm:$0xff]  ;;  %13576 = vst [vmem:[#allocation22_spill] sm:$0xff] %v12664_v37  ;;  %v12684_v2 = vld [vmem:[%s10289_s26 + $0x198] sm:$0xff] }
 0x3ba   : > { %v6508_v50 = vadd.f32 %v12260_v3, %v6469_v15  ;;  %v6470_v18 = vmul.f32 %v12252_v53, %v6417_v58  ;;  %v12444_v58 = vld [vmem:[%s10289_s26 + $0x18] sm:$0xff]  ;;  %13574 = vst [vmem:[#allocation20_spill] sm:$0xff] %v12654_v43  ;;  %13580 = vst [vmem:[#allocation26_spill] sm:$0xff] %v12684_v2  ;;  %v12690_v30 = vld [vmem:[%s10289_s26 + $0x1a0] sm:$0xff] }
 0x3bb   : > { %v6506_v9 = vadd.f32 %v12260_v3, %v6467_v20  ;;  %v6468_v1 = vmul.f32 %v12252_v53, %v6409_v41  ;;  %6837 = vmatmul.mubr.bf16.gmra.mrb[228].mxu1 %v12305_v52  ;;  %7030 = vmatmul.mubr.bf16.gmra.mrb[228].mxu0 %v12305_v52  ;;  %v12450_v41 = vld [vmem:[%s10289_s26 + $0x20] sm:$0xff]  ;;  %v12674_v20 = vld [vmem:[%s10289_s26 + $0x188] sm:$0xff]  ;;  %13581 = vst [vmem:[#allocation7_spill] sm:$0xff] %v12690_v30  ;;  %v12702_v2 = vld [vmem:[%s10289_s26 + $0x1b0] sm:$0xff] }
 0x3bc   : > { %v6509_v17 = vadd.f32 %v12260_v3, %v6470_v18  ;;  %6846 = vmatprep.mubr.bf16.mxu1 %v13547_v61  ;;  %7039 = vmatprep.mubr.bf16.mxu0 %v13547_v61  ;;  %v6540_v16 = vmax.f32 %v6508_v50, 0.0  ;;  %v12454_v50 = vld [vmem:[%s10289_s26 + $0x28] sm:$0xff]  ;;  %v12660_v18 = vld [vmem:[%s10289_s26 + $0x170] sm:$0xff]  ;;  %13578 = vst [vmem:[#allocation24_spill] sm:$0xff] %v12674_v20  ;;  %13583 = vst [vmem:[#allocation27_spill] sm:$0xff] %v12702_v2 }
 0x3bd   : > { %v6507_v40 = vadd.f32 %v12260_v3, %v6468_v1  ;;  %v9692_v32 = vpop.f32.mrb[204].mxu0  ;;  %v6538_v49 = vmax.f32 %v6506_v9, 0.0  ;;  %v12624_v9 = vld [vmem:[%s10289_s26 + $0x138] sm:$0xff]  ;;  %v12650_v1 = vld [vmem:[%s10289_s26 + $0x160] sm:$0xff]  ;;  %13575 = vst [vmem:[#allocation21_spill] sm:$0xff] %v12660_v18 }
 0x3be   : > { %v6541_v42 = vmax.f32 %v6509_v17, 0.0  ;;  %v6430_v27 = vadd.f32 %v9692_v32, %v12247_v12  ;;  %v6421_v0 = vpop.f32.mrb[205].mxu0  ;;  %v12460_v17 = vld [vmem:[%s10289_s26 + $0x30] sm:$0xff]  ;;  %v12464_v32 = vld [vmem:[%s10289_s26 + $0x38] sm:$0xff]  ;;  %13568 = vst [vmem:[#allocation9_spill] sm:$0xff] %v12624_v9  ;;  %13573 = vst [vmem:[#allocation19_spill] sm:$0xff] %v12650_v1 }
 0x3bf   : > { %v6539_v13 = vmax.f32 %v6507_v40, 0.0  ;;  %v6422_v22 = vadd.f32 %v6421_v0, %v12241_v47  ;;  %v9693_v55 = vpop.f32.mrb[206].mxu0  ;;  %v12470_v0 = vld [vmem:[%s10289_s26 + $0x40] sm:$0xff]  ;;  %v12614_v40 = vld [vmem:[%s10289_s26 + $0x128] sm:$0xff]  ;;  %v12680_v1 = vld [vmem:[%s10289_s26 + $0x190] sm:$0xff] }
 0x3c0   : > { %v6559_v52 = vpack.c.bf16 %v6541_v42, %v6540_v16  ;;  %v6473_v4 = vmul.f32 %v12252_v53, %v6430_v27  ;;  %v6433_v10 = vadd.f32 %v9693_v55, %v12255_v35  ;;  %v6424_v46 = vpop.f32.mrb[207].mxu0  ;;  %v12584_v55 = vld [vmem:[%s10289_s26 + $0xf8] sm:$0xff]  ;;  %13566 = vst [vmem:[#allocation17_spill] sm:$0xff] %v12614_v40  ;;  %v12630_v27 = vld [vmem:[%s10289_s26 + $0x140] sm:$0xff]  ;;  %v12640_v16 = vld [vmem:[%s10289_s26 + $0x150] sm:$0xff] }
 0x3c1   : > { %v6558_v23 = vpack.c.bf16 %v6539_v13, %v6538_v49  ;;  %v6471_v38 = vmul.f32 %v12252_v53, %v6422_v22  ;;  %v6425_v5 = vadd.f32 %v6424_v46, %v12243_v19  ;;  %v12474_v13 = vld [vmem:[%s10289_s26 + $0x48] sm:$0xff]  ;;  %v12484_v46 = vld [vmem:[%s10289_s26 + $0x58] sm:$0xff]  ;;  %v12620_v22 = vld [vmem:[%s10289_s26 + $0x130] sm:$0xff]  ;;  %13569 = vst [vmem:[#allocation8_spill] sm:$0xff] %v12630_v27 }
 0x3c2   : > { %v6512_v24 = vadd.f32 %v12260_v3, %v6473_v4  ;;  %v6474_v12 = vmul.f32 %v12252_v53, %v6433_v10  ;;  %v12480_v4 = vld [vmem:[%s10289_s26 + $0x50] sm:$0xff]  ;;  %v12574_v10 = vld [vmem:[%s10289_s26 + $0xe8] sm:$0xff]  ;;  %v12604_v42 = vld [vmem:[%s10289_s26 + $0x118] sm:$0xff]  ;;  %13567 = vst [vmem:[#allocation18_spill] sm:$0xff] %v12620_v22 }
 0x3c3   : > { %v6510_v33 = vadd.f32 %v12260_v3, %v6471_v38  ;;  %v6472_v47 = vmul.f32 %v12252_v53, %v6425_v5  ;;  %6847 = vmatmul.mubr.bf16.gmra.mrb[232].mxu1 %v12325_v6  ;;  %7040 = vmatmul.mubr.bf16.gmra.mrb[232].mxu0 %v12325_v6  ;;  %v7142_v53 = vlaneseq  ;;  %v7140_v6 = vld [vmem:[%s13435_s8] sm:$0xf]  ;;  %v12564_v38 = vld [vmem:[%s10289_s26 + $0xd8] sm:$0xff]  ;;  %v12594_v49 = vld [vmem:[%s10289_s26 + $0x108] sm:$0xff]  ;;  %13564 = vst [vmem:[#allocation16_spill] sm:$0xff] %v12604_v42 }
 0x3c4   : > { %v6513_v35 = vadd.f32 %v12260_v3, %v6474_v12  ;;  %6856 = vmatprep.mubr.bf16.mxu1 %v13547_v61  ;;  %7049 = vmatprep.mubr.bf16.mxu0 %v13547_v61  ;;  %v6544_v56 = vmax.f32 %v6512_v24, 0.0  ;;  %v12490_v24 = vld [vmem:[%s10289_s26 + $0x60] sm:$0xff]  ;;  %v12554_v12 = vld [vmem:[%s10289_s26 + $0xc8] sm:$0xff]  ;;  %13571 = vst [vmem:[#allocation10_spill] sm:$0xff] %v12640_v16  ;;  %13579 = vst [vmem:[#allocation25_spill] sm:$0xff] %v12680_v1 }
 0x3c5   : > { %v6511_v19 = vadd.f32 %v12260_v3, %v6472_v47  ;;  %v6542_v8 = vmax.f32 %v6510_v33, 0.0  ;;  %v7143_v3 = vshrl.u32 %v7142_v53, 7  ;;  %v12494_v33 = vld [vmem:[%s10289_s26 + $0x68] sm:$0xff]  ;;  %v12510_v53 = vld [vmem:[%s10289_s26 + $0x80] sm:$0xff]  ;;  %v12580_v47 = vld [vmem:[%s10289_s26 + $0xf0] sm:$0xff] }
 0x3c6   : > { %v6545_v63 = vmax.f32 %v6513_v35, 0.0  ;;  %v12544_v35 = vld [vmem:[%s10289_s26 + $0xb8] sm:$0xff]  ;;  %v12590_v5 = vld [vmem:[%s10289_s26 + $0x100] sm:$0xff] }
 0x3c7   : > { %v6543_v34 = vmax.f32 %v6511_v19, 0.0  ;;  %v7152_v31 = vsub.s32 2, %v7143_v3  ;;  %v7156_v7 = vsub.s32 3, %v7143_v3  ;;  %v12570_v19 = vld [vmem:[%s10289_s26 + $0xe0] sm:$0xff]  ;;  %v12708_v20 = vld [vmem:[%s10289_s26 + $0x1b8] sm:$0xff] }
 0x3c8   : > { %v6561_v57 = vpack.c.bf16 %v6545_v63, %v6544_v56  ;;  %v12500_v56 = vld [vmem:[%s10289_s26 + $0x70] sm:$0xff]  ;;  %v12534_v63 = vld [vmem:[%s10289_s26 + $0xa8] sm:$0xff]  ;;  %13584 = vst [vmem:[#allocation28_spill] sm:$0xff] %v12708_v20  ;;  %v13585_v20 = vunpack.c.l.bf16 %v12418_v39 }
 0x3c9   : > { %v6560_v29 = vpack.c.bf16 %v6543_v34, %v6542_v8  ;;  %v12421_v45 = vrot.slane %v7140_v6, %v7152_v31  ;;  %v12439_v59 = vrot.slane %v7140_v6, %v7156_v7  ;;  %v12504_v8 = vld [vmem:[%s10289_s26 + $0x78] sm:$0xff]  ;;  %v12560_v34 = vld [vmem:[%s10289_s26 + $0xd0] sm:$0xff] }
 0x3cb   : > { %6857 = vmatmul.mubr.bf16.gmra.mrb[236].mxu1 %v12321_v60  ;;  %7050 = vmatmul.mubr.bf16.gmra.mrb[236].mxu0 %v12321_v60  ;;  %v7144_v60 = vsub.s32 0, %v7143_v3 }
 0x3cc   : > { %6866 = vmatprep.mubr.bf16.mxu1 %v13547_v61  ;;  %7059 = vmatprep.mubr.bf16.mxu0 %v13547_v61 }
 0x3cd   : > { %v12413_v62 = vrot.slane %v7140_v6, %v7144_v60 }
 0x3d3   : > { %6867 = vmatmul.mubr.bf16.gmra.mrb[240].mxu1 %v12343_v21  ;;  %7060 = vmatmul.mubr.bf16.gmra.mrb[240].mxu0 %v12343_v21  ;;  %v7148_v21 = vsub.s32 1, %v7143_v3  ;;  %v12694_v3 = vld [vmem:[%s10289_s26 + $0x1a8] sm:$0xff] }
 0x3d4   : > { %6876 = vmatprep.mubr.bf16.mxu1 %v13547_v61  ;;  %7069 = vmatprep.mubr.bf16.mxu0 %v13547_v61  ;;  %13582 = vst [vmem:[#allocation13_spill] sm:$0xff] %v12694_v3 }
 0x3d5   : > { %v12430_v26 = vrot.slane %v7140_v6, %v7148_v21  ;;  %v12530_v6 = vld [vmem:[%s10289_s26 + $0xa0] sm:$0xff] }
 0x3db   : > { %6877 = vmatmul.mubr.bf16.gmra.mrb[244].mxu1 %v12339_v44  ;;  %7070 = vmatmul.mubr.bf16.gmra.mrb[244].mxu0 %v12339_v44  ;;  %v7290_v44 = vld [vmem:[%s13436_s9] sm:$0xf] }
 0x3dc   : > { %6886 = vmatprep.mubr.bf16.mxu1 %v13547_v61  ;;  %7079 = vmatprep.mubr.bf16.mxu0 %v13547_v61  ;;  %v12423_v36 = vrot.slane %v7290_v44, %v7152_v31  ;;  %v12432_v28 = vrot.slane %v7290_v44, %v7148_v21  ;;  %v12441_v15 = vrot.slane %v7290_v44, %v7156_v7  ;;  %v12520_v21 = vld [vmem:[%s10289_s26 + $0x90] sm:$0xff]  ;;  %v12550_v31 = vld [vmem:[%s10289_s26 + $0xc0] sm:$0xff] }
 0x3e3   : > { %6887 = vmatmul.mubr.bf16.gmra.mrb[248].mxu1 %v6556_v14  ;;  %7080 = vmatmul.mubr.bf16.gmra.mrb[248].mxu0 %v6556_v14  ;;  %v12634_v14 = vld [vmem:[%s10289_s26 + $0x148] sm:$0xff] }
 0x3e4   : > { %6896 = vmatprep.mubr.bf16.mxu1 %v13547_v61  ;;  %7089 = vmatprep.mubr.bf16.mxu0 %v13547_v61  ;;  %13570 = vst [vmem:[#allocation11_spill] sm:$0xff] %v12634_v14 }
 0x3eb   : > { %6897 = vmatmul.mubr.bf16.gmra.mrb[252].mxu1 %v6557_v54  ;;  %7090 = vmatmul.mubr.bf16.gmra.mrb[252].mxu0 %v6557_v54  ;;  %v12644_v54 = vld [vmem:[%s10289_s26 + $0x158] sm:$0xff] }
 0x3ec   : > { %6906 = vmatprep.mubr.bf16.mxu1 %v13547_v61  ;;  %7099 = vmatprep.mubr.bf16.mxu0 %v13547_v61  ;;  %13572 = vst [vmem:[#allocation12_spill] sm:$0xff] %v12644_v54 }
 0x3f3   : > { %6907 = vmatmul.mubr.bf16.gmra.mrb[0].mxu1 %v6558_v23  ;;  %7100 = vmatmul.mubr.bf16.gmra.mrb[0].mxu0 %v6558_v23  ;;  %v12600_v23 = vld [vmem:[%s10289_s26 + $0x110] sm:$0xff] }
 0x3f4   : > { %6916 = vmatprep.mubr.bf16.mxu1 %v13547_v61  ;;  %7109 = vmatprep.mubr.bf16.mxu0 %v13547_v61  ;;  %13563 = vst [vmem:[#allocation14_spill] sm:$0xff] %v12600_v23 }
 0x3fb   : > { %6917 = vmatmul.mubr.bf16.gmra.mrb[4].mxu1 %v6559_v52  ;;  %7110 = vmatmul.mubr.bf16.gmra.mrb[4].mxu0 %v6559_v52  ;;  %v12610_v52 = vld [vmem:[%s10289_s26 + $0x120] sm:$0xff] }
 0x3fc   : > { %6926 = vmatprep.mubr.bf16.mxu1 %v13547_v61  ;;  %7119 = vmatprep.mubr.bf16.mxu0 %v13547_v61  ;;  %13565 = vst [vmem:[#allocation15_spill] sm:$0xff] %v12610_v52 }
 0x403   : > { %6927 = vmatmul.mubr.bf16.gmra.mrb[8].mxu1 %v6560_v29  ;;  %7120 = vmatmul.mubr.bf16.gmra.mrb[8].mxu0 %v6560_v29  ;;  %v12540_v29 = vld [vmem:[%s10289_s26 + $0xb0] sm:$0xff] }
 0x404   : > { %6936 = vmatprep.mubr.bf16.mxu1 %v13547_v61  ;;  %7129 = vmatprep.mubr.bf16.mxu0 %v13547_v61  ;;  %v12415_v61 = vrot.slane %v7290_v44, %v7144_v60  ;;  %v12514_v60 = vld [vmem:[%s10289_s26 + $0x88] sm:$0xff] }
 0x40b   : > { %6937 = vmatmul.mubr.bf16.gmra.mrb[12].mxu1 %v6561_v57  ;;  %7130 = vmatmul.mubr.bf16.gmra.mrb[12].mxu0 %v6561_v57  ;;  %v12524_v57 = vld [vmem:[%s10289_s26 + $0x98] sm:$0xff] }
 0x466   : > { %v6788_v7 = vpop.f32.mrb[208].mxu1  ;;  %v6981_v18 = vpop.f32.mrb[208].mxu0 }
 0x467   : > { %v7162_v25 = vmul.f32 %v12413_v62, %v6788_v7  ;;  %v7164_v37 = vmul.f32 %v12421_v45, %v6981_v18  ;;  %v6790_v51 = vpop.f32.mrb[209].mxu1  ;;  %v6983_v1 = vpop.f32.mrb[209].mxu0 }
 0x468   : > { %v7163_v43 = vmul.f32 %v12430_v26, %v6790_v51  ;;  %v7165_v14 = vmul.f32 %v12439_v59, %v6983_v1  ;;  %v6792_v44 = vpop.f32.mrb[210].mxu1  ;;  %v6985_v27 = vpop.f32.mrb[210].mxu0 }
 0x469   : > { %v7312_v30 = vadd.f32 %v12415_v61, %v7162_v25  ;;  %v7314_v54 = vadd.f32 %v12423_v36, %v7164_v37  ;;  %v7166_v16 = vmul.f32 %v12413_v62, %v6792_v44  ;;  %v7168_v51 = vmul.f32 %v12421_v45, %v6985_v27  ;;  %v6794_v3 = vpop.f32.mrb[211].mxu1  ;;  %v6987_v1 = vpop.f32.mrb[211].mxu0 }
 0x46a   : > { %v7313_v9 = vadd.f32 %v12432_v28, %v7163_v43  ;;  %v7315_v22 = vadd.f32 %v12441_v15, %v7165_v14  ;;  %v7167_v7 = vmul.f32 %v12430_v26, %v6794_v3  ;;  %v7169_v18 = vmul.f32 %v12439_v59, %v6987_v1 }
 0x46b   : > { %v7568_v25 = vadd.f32 %v13585_v20, %v7312_v30  ;;  %v13586_v37 = vunpack.c.l.bf16 %v12426_v11  ;;  %v7316_v44 = vadd.f32 %v12415_v61, %v7166_v16  ;;  %v7318_v27 = vadd.f32 %v12423_v36, %v7168_v51 }
 0x46c   : > { %v13587_v43 = vunpack.c.h.bf16 %v12418_v39  ;;  %v13588_v3 = vunpack.c.h.bf16 %v12426_v11  ;;  %v7317_v1 = vadd.f32 %v12432_v28, %v7167_v7  ;;  %v7319_v30 = vadd.f32 %v12441_v15, %v7169_v18 }
 0x46d   : > { %v7570_v2 = vadd.f32 %v13586_v37, %v7314_v54  ;;  %v7696_v20 = vmax.f32 %v7568_v25, 0.0  ;;  %v13589_v54 = vunpack.c.l.bf16 %v12436_v48  ;;  %v13590_v51 = vunpack.c.l.bf16 %v12444_v58 }
 0x46e   : > { %v7569_v14 = vadd.f32 %v13587_v43, %v7313_v9  ;;  %v7571_v40 = vadd.f32 %v13588_v3, %v7315_v22  ;;  %v13591_v39 = vunpack.c.h.bf16 %v12436_v48  ;;  %v13592_v11 = vunpack.c.h.bf16 %v12444_v58  ;;  %v6798_v43 = vpop.f32.mrb[212].mxu1  ;;  %v6991_v7 = vpop.f32.mrb[212].mxu0 }
 0x46f   : > { %v7698_v52 = vmax.f32 %v7570_v2, 0.0  ;;  %v7572_v16 = vadd.f32 %v13589_v54, %v7316_v44  ;;  %v7574_v37 = vadd.f32 %v13590_v51, %v7318_v27  ;;  %v7170_v2 = vmul.f32 %v12413_v62, %v6798_v43  ;;  %v6800_v44 = vpop.f32.mrb[213].mxu1  ;;  %v6993_v54 = vpop.f32.mrb[213].mxu0 }
 0x470   : > { %v7697_v42 = vmax.f32 %v7569_v14, 0.0  ;;  %v7699_v23 = vmax.f32 %v7571_v40, 0.0  ;;  %v7573_v9 = vadd.f32 %v13591_v39, %v7317_v1  ;;  %v7575_v22 = vadd.f32 %v13592_v11, %v7319_v30  ;;  %v6802_v48 = vpop.f32.mrb[214].mxu1  ;;  %v6995_v1 = vpop.f32.mrb[214].mxu0 }
 0x471   : > { %v7700_v3 = vmax.f32 %v7572_v16, 0.0  ;;  %v7702_v18 = vmax.f32 %v7574_v37, 0.0  ;;  %v7172_v25 = vmul.f32 %v12421_v45, %v6991_v7  ;;  %v7320_v58 = vadd.f32 %v12415_v61, %v7170_v2  ;;  %v6804_v39 = vpop.f32.mrb[215].mxu1  ;;  %v6997_v11 = vpop.f32.mrb[215].mxu0 }
 0x472   : > { %v8885_v27 = vpack.c.bf16 %v7697_v42, %v7696_v20  ;;  %v8886_v14 = vpack.c.bf16 %v7699_v23, %v7698_v52  ;;  %v7701_v40 = vmax.f32 %v7573_v9, 0.0  ;;  %v7703_v51 = vmax.f32 %v7575_v22, 0.0 }
 0x473   : > { %v7322_v30 = vadd.f32 %v12423_v36, %v7172_v25  ;;  %v7171_v16 = vmul.f32 %v12430_v26, %v6800_v44  ;;  %v7173_v37 = vmul.f32 %v12439_v59, %v6993_v54  ;;  %v7174_v23 = vmul.f32 %v12413_v62, %v6802_v48 }
 0x474   : > { %8208 = vst [vmem:[%s12752_s20] sm:$0xff] %v8885_v27  ;;  %8209 = vst [vmem:[%s12752_s20 + $0x8] sm:$0xff] %v8886_v14  ;;  %v8887_v42 = vpack.c.bf16 %v7701_v40, %v7700_v3  ;;  %v8888_v52 = vpack.c.bf16 %v7703_v51, %v7702_v18  ;;  %v7176_v20 = vmul.f32 %v12421_v45, %v6995_v1  ;;  %v13593_v9 = vunpack.c.l.bf16 %v12450_v41 }
 0x475   : > { %v13594_v43 = vunpack.c.l.bf16 %v12454_v50  ;;  %v7321_v2 = vadd.f32 %v12432_v28, %v7171_v16  ;;  %v7323_v25 = vadd.f32 %v12441_v15, %v7173_v37  ;;  %v7324_v44 = vadd.f32 %v12415_v61, %v7174_v23 }
 0x476   : > { %v7576_v22 = vadd.f32 %v13593_v9, %v7320_v58  ;;  %8210 = vst [vmem:[%s12752_s20 + $0x10] sm:$0xff] %v8887_v42  ;;  %8211 = vst [vmem:[%s12752_s20 + $0x18] sm:$0xff] %v8888_v52  ;;  %v7326_v3 = vadd.f32 %v12423_v36, %v7176_v20  ;;  %v7175_v18 = vmul.f32 %v12430_v26, %v6804_v39  ;;  %v13595_v40 = vunpack.c.h.bf16 %v12450_v41  ;;  %v6808_v52 = vpop.f32.mrb[216].mxu1 }
 0x477   : > { %v7578_v7 = vadd.f32 %v13594_v43, %v7322_v30  ;;  %v7177_v54 = vmul.f32 %v12439_v59, %v6997_v11  ;;  %v13596_v48 = vunpack.c.h.bf16 %v12454_v50  ;;  %v13597_v58 = vunpack.c.l.bf16 %v12460_v17  ;;  %v7001_v11 = vpop.f32.mrb[216].mxu0  ;;  %v6810_v50 = vpop.f32.mrb[217].mxu1 }
 0x478   : > { %v7704_v27 = vmax.f32 %v7576_v22, 0.0  ;;  %v7577_v51 = vadd.f32 %v13595_v40, %v7321_v2  ;;  %v13598_v16 = vunpack.c.l.bf16 %v12464_v32  ;;  %v7325_v42 = vadd.f32 %v12432_v28, %v7175_v18  ;;  %v7003_v22 = vpop.f32.mrb[217].mxu0  ;;  %v6812_v18 = vpop.f32.mrb[218].mxu1 }
 0x479   : > { %v7706_v14 = vmax.f32 %v7578_v7, 0.0  ;;  %v7579_v1 = vadd.f32 %v13596_v48, %v7323_v25  ;;  %v7580_v30 = vadd.f32 %v13597_v58, %v7324_v44  ;;  %v7327_v39 = vadd.f32 %v12441_v15, %v7177_v54  ;;  %v7005_v54 = vpop.f32.mrb[218].mxu0  ;;  %v6814_v58 = vpop.f32.mrb[219].mxu1 }
 0x47a   : > { %v7582_v37 = vadd.f32 %v13598_v16, %v7326_v3  ;;  %v7705_v23 = vmax.f32 %v7577_v51, 0.0  ;;  %v7178_v41 = vmul.f32 %v12413_v62, %v6808_v52  ;;  %v7180_v9 = vmul.f32 %v12421_v45, %v7001_v11  ;;  %v7007_v16 = vpop.f32.mrb[219].mxu0 }
 0x47b   : > { %v7707_v20 = vmax.f32 %v7579_v1, 0.0  ;;  %v7708_v43 = vmax.f32 %v7580_v30, 0.0  ;;  %v13599_v2 = vunpack.c.h.bf16 %v12460_v17  ;;  %v13600_v44 = vunpack.c.h.bf16 %v12464_v32 }
 0x47c   : > { %v7710_v7 = vmax.f32 %v7582_v37, 0.0  ;;  %v8889_v40 = vpack.c.bf16 %v7705_v23, %v7704_v27  ;;  %v7328_v48 = vadd.f32 %v12415_v61, %v7178_v41  ;;  %v7330_v1 = vadd.f32 %v12423_v36, %v7180_v9 }
 0x47d   : > { %v7581_v25 = vadd.f32 %v13599_v2, %v7325_v42  ;;  %v7583_v3 = vadd.f32 %v13600_v44, %v7327_v39  ;;  %v8890_v51 = vpack.c.bf16 %v7707_v20, %v7706_v14  ;;  %v7179_v37 = vmul.f32 %v12430_v26, %v6810_v50 }
 0x47e   : > { %v7181_v17 = vmul.f32 %v12439_v59, %v7003_v22  ;;  %8212 = vst [vmem:[%s12752_s20 + $0x20] sm:$0xff] %v8889_v40  ;;  %v13601_v32 = vunpack.c.l.bf16 %v12470_v0  ;;  %v13602_v14 = vunpack.c.l.bf16 %v12474_v13  ;;  %v7182_v39 = vmul.f32 %v12413_v62, %v6812_v18  ;;  %v6818_v40 = vpop.f32.mrb[220].mxu1 }
 0x47f   : > { %v7709_v30 = vmax.f32 %v7581_v25, 0.0  ;;  %v7711_v52 = vmax.f32 %v7583_v3, 0.0  ;;  %8213 = vst [vmem:[%s12752_s20 + $0x28] sm:$0xff] %v8890_v51  ;;  %v7184_v11 = vmul.f32 %v12421_v45, %v7005_v54  ;;  %v7329_v41 = vadd.f32 %v12432_v28, %v7179_v37  ;;  %v7011_v51 = vpop.f32.mrb[220].mxu0 }
 0x480   : > { %v7584_v27 = vadd.f32 %v13601_v32, %v7328_v48  ;;  %v7586_v42 = vadd.f32 %v13602_v14, %v7330_v1  ;;  %v7331_v9 = vadd.f32 %v12441_v15, %v7181_v17  ;;  %v7332_v2 = vadd.f32 %v12415_v61, %v7182_v39  ;;  %v6820_v17 = vpop.f32.mrb[221].mxu1  ;;  %v7013_v32 = vpop.f32.mrb[221].mxu0 }
 0x481   : > { %v8891_v23 = vpack.c.bf16 %v7709_v30, %v7708_v43  ;;  %v8892_v20 = vpack.c.bf16 %v7711_v52, %v7710_v7  ;;  %v7334_v25 = vadd.f32 %v12423_v36, %v7184_v11  ;;  %v13603_v44 = vunpack.c.h.bf16 %v12470_v0  ;;  %v6822_v14 = vpop.f32.mrb[222].mxu1 }
 0x482   : > { %v7712_v50 = vmax.f32 %v7584_v27, 0.0  ;;  %v7714_v22 = vmax.f32 %v7586_v42, 0.0  ;;  %v13604_v18 = vunpack.c.h.bf16 %v12474_v13  ;;  %v7183_v43 = vmul.f32 %v12430_v26, %v6814_v58  ;;  %v7015_v42 = vpop.f32.mrb[222].mxu0 }
 0x483   : > { %8214 = vst [vmem:[%s12752_s20 + $0x30] sm:$0xff] %v8891_v23  ;;  %8215 = vst [vmem:[%s12752_s20 + $0x38] sm:$0xff] %v8892_v20  ;;  %v7585_v3 = vadd.f32 %v13603_v44, %v7329_v41  ;;  %v7185_v7 = vmul.f32 %v12439_v59, %v7007_v16  ;;  %v13605_v48 = vunpack.c.l.bf16 %v12480_v4  ;;  %v13606_v30 = vunpack.c.l.bf16 %v12484_v46  ;;  %v6824_v41 = vpop.f32.mrb[223].mxu1 }
 0x484   : > { %v7587_v54 = vadd.f32 %v13604_v18, %v7331_v9  ;;  %v7186_v37 = vmul.f32 %v12413_v62, %v6818_v40  ;;  %v7188_v0 = vmul.f32 %v12421_v45, %v7011_v51  ;;  %v7333_v58 = vadd.f32 %v12432_v28, %v7183_v43  ;;  %v7017_v9 = vpop.f32.mrb[223].mxu0 }
 0x485   : > { %v7588_v1 = vadd.f32 %v13605_v48, %v7332_v2  ;;  %v7590_v52 = vadd.f32 %v13606_v30, %v7334_v25  ;;  %v7713_v13 = vmax.f32 %v7585_v3, 0.0  ;;  %v7335_v16 = vadd.f32 %v12441_v15, %v7185_v7 }
 0x486   : > { %v7715_v27 = vmax.f32 %v7587_v54, 0.0  ;;  %v7336_v23 = vadd.f32 %v12415_v61, %v7186_v37  ;;  %v7338_v20 = vadd.f32 %v12423_v36, %v7188_v0  ;;  %v13607_v44 = vunpack.c.h.bf16 %v12480_v4 }
 0x487   : > { %v7716_v39 = vmax.f32 %v7588_v1, 0.0  ;;  %v7718_v11 = vmax.f32 %v7590_v52, 0.0  ;;  %v8893_v2 = vpack.c.bf16 %v7713_v13, %v7712_v50  ;;  %v13608_v18 = vunpack.c.h.bf16 %v12484_v46 }
 0x488   : > { %v8894_v25 = vpack.c.bf16 %v7715_v27, %v7714_v22  ;;  %v7589_v3 = vadd.f32 %v13607_v44, %v7333_v58  ;;  %v13609_v43 = vunpack.c.l.bf16 %v12490_v24  ;;  %v13610_v40 = vunpack.c.l.bf16 %v12494_v33  ;;  %v6828_v58 = vpop.f32.mrb[224].mxu1 }
 0x489   : > { %v7591_v54 = vadd.f32 %v13608_v18, %v7335_v16  ;;  %v7187_v48 = vmul.f32 %v12430_v26, %v6820_v17  ;;  %v7189_v1 = vmul.f32 %v12439_v59, %v7013_v32  ;;  %8216 = vst [vmem:[%s12752_s20 + $0x40] sm:$0xff] %v8893_v2  ;;  %v7190_v4 = vmul.f32 %v12413_v62, %v6822_v14  ;;  %v7021_v16 = vpop.f32.mrb[224].mxu0  ;;  %v6830_v44 = vpop.f32.mrb[225].mxu1 }
 0x48a   : > { %v7592_v7 = vadd.f32 %v13609_v43, %v7336_v23  ;;  %v7594_v51 = vadd.f32 %v13610_v40, %v7338_v20  ;;  %8217 = vst [vmem:[%s12752_s20 + $0x48] sm:$0xff] %v8894_v25  ;;  %v7717_v50 = vmax.f32 %v7589_v3, 0.0  ;;  %v7192_v30 = vmul.f32 %v12421_v45, %v7015_v42  ;;  %v7023_v3 = vpop.f32.mrb[225].mxu0 }
 0x48b   : > { %v7719_v22 = vmax.f32 %v7591_v54, 0.0  ;;  %v7337_v37 = vadd.f32 %v12432_v28, %v7187_v48  ;;  %v7339_v0 = vadd.f32 %v12441_v15, %v7189_v1  ;;  %v7340_v32 = vadd.f32 %v12415_v61, %v7190_v4 }
 0x48c   : > { %v7720_v46 = vmax.f32 %v7592_v7, 0.0  ;;  %v7722_v52 = vmax.f32 %v7594_v51, 0.0  ;;  %v8895_v13 = vpack.c.bf16 %v7717_v50, %v7716_v39  ;;  %v7342_v27 = vadd.f32 %v12423_v36, %v7192_v30  ;;  %v7025_v7 = vpop.f32.mrb[226].mxu0 }
 0x48d   : > { %v8896_v17 = vpack.c.bf16 %v7719_v22, %v7718_v11  ;;  %v13611_v14 = vunpack.c.h.bf16 %v12490_v24  ;;  %v13612_v42 = vunpack.c.h.bf16 %v12494_v33  ;;  %v7191_v2 = vmul.f32 %v12430_v26, %v6824_v41  ;;  %v6832_v33 = vpop.f32.mrb[226].mxu1  ;;  %v7027_v1 = vpop.f32.mrb[227].mxu0 }
 0x48e   : > { %v7193_v25 = vmul.f32 %v12439_v59, %v7017_v9  ;;  %8218 = vst [vmem:[%s12752_s20 + $0x50] sm:$0xff] %v8895_v13  ;;  %v13613_v39 = vunpack.c.l.bf16 %v12500_v56  ;;  %v13614_v18 = vunpack.c.l.bf16 %v12504_v8  ;;  %v7194_v24 = vmul.f32 %v12413_v62, %v6828_v58  ;;  %v6834_v48 = vpop.f32.mrb[227].mxu1 }
 0x48f   : > { %v7593_v23 = vadd.f32 %v13611_v14, %v7337_v37  ;;  %v7595_v20 = vadd.f32 %v13612_v42, %v7339_v0  ;;  %8219 = vst [vmem:[%s12752_s20 + $0x58] sm:$0xff] %v8896_v17  ;;  %v7196_v43 = vmul.f32 %v12421_v45, %v7021_v16  ;;  %v7341_v9 = vadd.f32 %v12432_v28, %v7191_v2 }
 0x490   : > { %v7596_v11 = vadd.f32 %v13613_v39, %v7340_v32  ;;  %v7598_v54 = vadd.f32 %v13614_v18, %v7342_v27  ;;  %v7343_v51 = vadd.f32 %v12441_v15, %v7193_v25  ;;  %v7344_v4 = vadd.f32 %v12415_v61, %v7194_v24  ;;  %v6838_v18 = vpop.f32.mrb[228].mxu1 }
 0x491   : > { %v7721_v40 = vmax.f32 %v7593_v23, 0.0  ;;  %v7723_v41 = vmax.f32 %v7595_v20, 0.0  ;;  %v7346_v30 = vadd.f32 %v12423_v36, %v7196_v43  ;;  %v13615_v13 = vunpack.c.h.bf16 %v12500_v56 }
 0x492   : > { %v7724_v50 = vmax.f32 %v7596_v11, 0.0  ;;  %v7726_v22 = vmax.f32 %v7598_v54, 0.0  ;;  %v13616_v32 = vunpack.c.h.bf16 %v12504_v8  ;;  %v13617_v58 = vunpack.c.l.bf16 %v12510_v53 }
 0x493   : > { %v8897_v37 = vpack.c.bf16 %v7721_v40, %v7720_v46  ;;  %v8898_v0 = vpack.c.bf16 %v7723_v41, %v7722_v52  ;;  %v7597_v17 = vadd.f32 %v13615_v13, %v7341_v9  ;;  %v13618_v14 = vunpack.c.l.bf16 %v12514_v60  ;;  %v6840_v40 = vpop.f32.mrb[229].mxu1 }
 0x494   : > { %v7599_v27 = vadd.f32 %v13616_v32, %v7343_v51  ;;  %v7600_v16 = vadd.f32 %v13617_v58, %v7344_v4  ;;  %v7195_v42 = vmul.f32 %v12430_v26, %v6830_v44  ;;  %v7197_v20 = vmul.f32 %v12439_v59, %v7023_v3  ;;  %v7031_v44 = vpop.f32.mrb[228].mxu0 }
 0x495   : > { %v7602_v23 = vadd.f32 %v13618_v14, %v7346_v30  ;;  %8220 = vst [vmem:[%s12752_s20 + $0x60] sm:$0xff] %v8897_v37  ;;  %8221 = vst [vmem:[%s12752_s20 + $0x68] sm:$0xff] %v8898_v0  ;;  %v7725_v46 = vmax.f32 %v7597_v17, 0.0  ;;  %v7198_v56 = vmul.f32 %v12413_v62, %v6832_v33  ;;  %v7200_v2 = vmul.f32 %v12421_v45, %v7025_v7  ;;  %v7033_v33 = vpop.f32.mrb[229].mxu0  ;;  %v6842_v37 = vpop.f32.mrb[230].mxu1 }
 0x496   : > { %v7727_v52 = vmax.f32 %v7599_v27, 0.0  ;;  %v7728_v8 = vmax.f32 %v7600_v16, 0.0  ;;  %v7345_v39 = vadd.f32 %v12432_v28, %v7195_v42  ;;  %v7347_v11 = vadd.f32 %v12441_v15, %v7197_v20  ;;  %v7035_v0 = vpop.f32.mrb[230].mxu0 }
 0x497   : > { %v7730_v25 = vmax.f32 %v7602_v23, 0.0  ;;  %v8899_v54 = vpack.c.bf16 %v7725_v46, %v7724_v50  ;;  %v7348_v24 = vadd.f32 %v12415_v61, %v7198_v56  ;;  %v7350_v43 = vadd.f32 %v12423_v36, %v7200_v2  ;;  %v7037_v27 = vpop.f32.mrb[231].mxu0 }
 0x498   : > { %v8900_v3 = vpack.c.bf16 %v7727_v52, %v7726_v22  ;;  %v13619_v7 = vunpack.c.h.bf16 %v12510_v53  ;;  %v13620_v9 = vunpack.c.h.bf16 %v12514_v60  ;;  %v7199_v4 = vmul.f32 %v12430_v26, %v6834_v48  ;;  %v6844_v60 = vpop.f32.mrb[231].mxu1 }
 0x499   : > { %v7201_v30 = vmul.f32 %v12439_v59, %v7027_v1  ;;  %8222 = vst [vmem:[%s12752_s20 + $0x70] sm:$0xff] %v8899_v54  ;;  %v13621_v50 = vunpack.c.l.bf16 %v12520_v21  ;;  %v13622_v13 = vunpack.c.l.bf16 %v12524_v57  ;;  %v7202_v53 = vmul.f32 %v12413_v62, %v6838_v18 }
 0x49a   : > { %v7601_v41 = vadd.f32 %v13619_v7, %v7345_v39  ;;  %v7603_v51 = vadd.f32 %v13620_v9, %v7347_v11  ;;  %8223 = vst [vmem:[%s12752_s20 + $0x78] sm:$0xff] %v8900_v3  ;;  %v7204_v32 = vmul.f32 %v12421_v45, %v7031_v44  ;;  %v7349_v1 = vadd.f32 %v12432_v28, %v7199_v4 }
 0x49b   : > { %v7604_v22 = vadd.f32 %v13621_v50, %v7348_v24  ;;  %v7606_v17 = vadd.f32 %v13622_v13, %v7350_v43  ;;  %v7351_v16 = vadd.f32 %v12441_v15, %v7201_v30  ;;  %v7352_v42 = vadd.f32 %v12415_v61, %v7202_v53 }
 0x49c   : > { %v7729_v58 = vmax.f32 %v7601_v41, 0.0  ;;  %v7731_v48 = vmax.f32 %v7603_v51, 0.0  ;;  %v7354_v20 = vadd.f32 %v12423_v36, %v7204_v32  ;;  %v13623_v56 = vunpack.c.h.bf16 %v12520_v21  ;;  %v7041_v41 = vpop.f32.mrb[232].mxu0 }
 0x49d   : > { %v7732_v14 = vmax.f32 %v7604_v22, 0.0  ;;  %v7734_v23 = vmax.f32 %v7606_v17, 0.0  ;;  %v13624_v39 = vunpack.c.h.bf16 %v12524_v57  ;;  %v13625_v18 = vunpack.c.l.bf16 %v12530_v6  ;;  %v6848_v57 = vpop.f32.mrb[232].mxu1 }
 0x49e   : > { %v8901_v46 = vpack.c.bf16 %v7729_v58, %v7728_v8  ;;  %v8902_v52 = vpack.c.bf16 %v7731_v48, %v7730_v25  ;;  %v7605_v2 = vadd.f32 %v13623_v56, %v7349_v1  ;;  %v13626_v54 = vunpack.c.l.bf16 %v12534_v63 }
 0x49f   : > { %v7607_v11 = vadd.f32 %v13624_v39, %v7351_v16  ;;  %v7608_v44 = vadd.f32 %v13625_v18, %v7352_v42  ;;  %v7203_v24 = vmul.f32 %v12430_v26, %v6840_v40  ;;  %v7205_v43 = vmul.f32 %v12439_v59, %v7033_v33  ;;  %v6850_v40 = vpop.f32.mrb[233].mxu1  ;;  %v7043_v33 = vpop.f32.mrb[233].mxu0 }
 0x4a0   : > { %v7610_v3 = vadd.f32 %v13626_v54, %v7354_v20  ;;  %8224 = vst [vmem:[%s12752_s20 + $0x80] sm:$0xff] %v8901_v46  ;;  %8225 = vst [vmem:[%s12752_s20 + $0x88] sm:$0xff] %v8902_v52  ;;  %v7733_v8 = vmax.f32 %v7605_v2, 0.0  ;;  %v7206_v21 = vmul.f32 %v12413_v62, %v6842_v37  ;;  %v7208_v7 = vmul.f32 %v12421_v45, %v7035_v0  ;;  %v6852_v17 = vpop.f32.mrb[234].mxu1  ;;  %v7045_v0 = vpop.f32.mrb[234].mxu0 }
 0x4a1   : > { %v7735_v25 = vmax.f32 %v7607_v11, 0.0  ;;  %v7736_v9 = vmax.f32 %v7608_v44, 0.0  ;;  %v7353_v4 = vadd.f32 %v12432_v28, %v7203_v24  ;;  %v7355_v30 = vadd.f32 %v12441_v15, %v7205_v43  ;;  %v6854_v42 = vpop.f32.mrb[235].mxu1  ;;  %v7047_v20 = vpop.f32.mrb[235].mxu0 }
 0x4a2   : > { %v7738_v51 = vmax.f32 %v7610_v3, 0.0  ;;  %v8903_v50 = vpack.c.bf16 %v7733_v8, %v7732_v14  ;;  %v7356_v13 = vadd.f32 %v12415_v61, %v7206_v21  ;;  %v7358_v37 = vadd.f32 %v12423_v36, %v7208_v7 }
 0x4a3   : > { %v8904_v22 = vpack.c.bf16 %v7735_v25, %v7734_v23  ;;  %v13627_v53 = vunpack.c.h.bf16 %v12530_v6  ;;  %v13628_v58 = vunpack.c.h.bf16 %v12534_v63  ;;  %v7207_v1 = vmul.f32 %v12430_v26, %v6844_v60 }
 0x4a4   : > { %v7209_v16 = vmul.f32 %v12439_v59, %v7037_v27  ;;  %8226 = vst [vmem:[%s12752_s20 + $0x90] sm:$0xff] %v8903_v50  ;;  %v13629_v14 = vunpack.c.l.bf16 %v12540_v29  ;;  %v13630_v46 = vunpack.c.l.bf16 %v12544_v35  ;;  %v7210_v6 = vmul.f32 %v12413_v62, %v6848_v57  ;;  %v6858_v50 = vpop.f32.mrb[236].mxu1 }
 0x4a5   : > { %v7609_v32 = vadd.f32 %v13627_v53, %v7353_v4  ;;  %v7611_v48 = vadd.f32 %v13628_v58, %v7355_v30  ;;  %8227 = vst [vmem:[%s12752_s20 + $0x98] sm:$0xff] %v8904_v22  ;;  %v7212_v56 = vmul.f32 %v12421_v45, %v7041_v41  ;;  %v7357_v60 = vadd.f32 %v12432_v28, %v7207_v1  ;;  %v7051_v22 = vpop.f32.mrb[236].mxu0 }
 0x4a6   : > { %v7612_v23 = vadd.f32 %v13629_v14, %v7356_v13  ;;  %v7614_v52 = vadd.f32 %v13630_v46, %v7358_v37  ;;  %v7359_v27 = vadd.f32 %v12441_v15, %v7209_v16  ;;  %v7360_v18 = vadd.f32 %v12415_v61, %v7210_v6  ;;  %v6860_v13 = vpop.f32.mrb[237].mxu1  ;;  %v7053_v37 = vpop.f32.mrb[237].mxu0 }
 0x4a7   : > { %v7737_v63 = vmax.f32 %v7609_v32, 0.0  ;;  %v7739_v2 = vmax.f32 %v7611_v48, 0.0  ;;  %v7362_v44 = vadd.f32 %v12423_v36, %v7212_v56  ;;  %v13631_v24 = vunpack.c.h.bf16 %v12540_v29  ;;  %v6862_v58 = vpop.f32.mrb[238].mxu1  ;;  %v7055_v48 = vpop.f32.mrb[238].mxu0 }
 0x4a8   : > { %v7740_v39 = vmax.f32 %v7612_v23, 0.0  ;;  %v7742_v11 = vmax.f32 %v7614_v52, 0.0  ;;  %v13632_v8 = vunpack.c.h.bf16 %v12544_v35  ;;  %v13633_v21 = vunpack.c.l.bf16 %v12550_v31  ;;  %v6864_v23 = vpop.f32.mrb[239].mxu1 }
 0x4a9   : > { %v8905_v54 = vpack.c.bf16 %v7737_v63, %v7736_v9  ;;  %v8906_v3 = vpack.c.bf16 %v7739_v2, %v7738_v51  ;;  %v7613_v43 = vadd.f32 %v13631_v24, %v7357_v60  ;;  %v13634_v57 = vunpack.c.l.bf16 %v12554_v12 }
 0x4aa   : > { %v7615_v25 = vadd.f32 %v13632_v8, %v7359_v27  ;;  %v7616_v7 = vadd.f32 %v13633_v21, %v7360_v18  ;;  %v7211_v4 = vmul.f32 %v12430_v26, %v6850_v40  ;;  %v7213_v30 = vmul.f32 %v12439_v59, %v7043_v33 }
 0x4ab   : > { %v7618_v41 = vadd.f32 %v13634_v57, %v7362_v44  ;;  %8228 = vst [vmem:[%s12752_s20 + $0xa0] sm:$0xff] %v8905_v54  ;;  %8229 = vst [vmem:[%s12752_s20 + $0xa8] sm:$0xff] %v8906_v3  ;;  %v7741_v9 = vmax.f32 %v7613_v43, 0.0  ;;  %v7214_v51 = vmul.f32 %v12413_v62, %v6852_v17  ;;  %v7216_v35 = vmul.f32 %v12421_v45, %v7045_v0  ;;  %v7057_v0 = vpop.f32.mrb[239].mxu0 }
 0x4ac   : > { %v7743_v29 = vmax.f32 %v7615_v25, 0.0  ;;  %v7744_v53 = vmax.f32 %v7616_v7, 0.0  ;;  %v7361_v40 = vadd.f32 %v12432_v28, %v7211_v4  ;;  %v7363_v33 = vadd.f32 %v12441_v15, %v7213_v30  ;;  %v6868_v4 = vpop.f32.mrb[240].mxu1  ;;  %v7061_v30 = vpop.f32.mrb[240].mxu0 }
 0x4ad   : > { %v7746_v32 = vmax.f32 %v7618_v41, 0.0  ;;  %v8907_v1 = vpack.c.bf16 %v7741_v9, %v7740_v39  ;;  %v7364_v14 = vadd.f32 %v12415_v61, %v7214_v51  ;;  %v7366_v17 = vadd.f32 %v12423_v36, %v7216_v35 }
 0x4ae   : > { %v8908_v16 = vpack.c.bf16 %v7743_v29, %v7742_v11  ;;  %v13635_v46 = vunpack.c.h.bf16 %v12550_v31  ;;  %v13636_v6 = vunpack.c.h.bf16 %v12554_v12  ;;  %v7215_v63 = vmul.f32 %v12430_v26, %v6854_v42 }
 0x4af   : > { %v7217_v2 = vmul.f32 %v12439_v59, %v7047_v20  ;;  %8230 = vst [vmem:[%s12752_s20 + $0xb0] sm:$0xff] %v8907_v1  ;;  %v13637_v60 = vunpack.c.l.bf16 %v12560_v34  ;;  %v13638_v39 = vunpack.c.l.bf16 %v12564_v38  ;;  %v7218_v18 = vmul.f32 %v12413_v62, %v6858_v50 }
 0x4b0   : > { %v7617_v52 = vadd.f32 %v13635_v46, %v7361_v40  ;;  %v7619_v56 = vadd.f32 %v13636_v6, %v7363_v33  ;;  %8231 = vst [vmem:[%s12752_s20 + $0xb8] sm:$0xff] %v8908_v16  ;;  %v7220_v31 = vmul.f32 %v12421_v45, %v7051_v22  ;;  %v7365_v12 = vadd.f32 %v12432_v28, %v7215_v63 }
 0x4b1   : > { %v7620_v27 = vadd.f32 %v13637_v60, %v7364_v14  ;;  %v7622_v11 = vadd.f32 %v13638_v39, %v7366_v17  ;;  %v7367_v42 = vadd.f32 %v12441_v15, %v7217_v2  ;;  %v7368_v24 = vadd.f32 %v12415_v61, %v7218_v18 }
 0x4b2   : > { %v7745_v44 = vmax.f32 %v7617_v52, 0.0  ;;  %v7747_v54 = vmax.f32 %v7619_v56, 0.0  ;;  %v7370_v43 = vadd.f32 %v12423_v36, %v7220_v31  ;;  %v13639_v21 = vunpack.c.h.bf16 %v12560_v34 }
 0x4b3   : > { %v7748_v3 = vmax.f32 %v7620_v27, 0.0  ;;  %v7750_v20 = vmax.f32 %v7622_v11, 0.0  ;;  %v13640_v57 = vunpack.c.h.bf16 %v12564_v38  ;;  %v13641_v50 = vunpack.c.l.bf16 %v12570_v19 }
 0x4b4   : > { %v8909_v8 = vpack.c.bf16 %v7745_v44, %v7744_v53  ;;  %v8910_v25 = vpack.c.bf16 %v7747_v54, %v7746_v32  ;;  %v7621_v7 = vadd.f32 %v13639_v21, %v7365_v12  ;;  %v13642_v9 = vunpack.c.l.bf16 %v12574_v10  ;;  %v6870_v53 = vpop.f32.mrb[241].mxu1  ;;  %v7063_v32 = vpop.f32.mrb[241].mxu0 }
 0x4b5   : > { %v7623_v41 = vadd.f32 %v13640_v57, %v7367_v42  ;;  %v7624_v22 = vadd.f32 %v13641_v50, %v7368_v24  ;;  %v7219_v51 = vmul.f32 %v12430_v26, %v6860_v13  ;;  %v7221_v35 = vmul.f32 %v12439_v59, %v7053_v37  ;;  %v6872_v1 = vpop.f32.mrb[242].mxu1  ;;  %v7065_v16 = vpop.f32.mrb[242].mxu0 }
 0x4b6   : > { %v7626_v29 = vadd.f32 %v13642_v9, %v7370_v43  ;;  %8232 = vst [vmem:[%s12752_s20 + $0xc0] sm:$0xff] %v8909_v8  ;;  %8233 = vst [vmem:[%s12752_s20 + $0xc8] sm:$0xff] %v8910_v25  ;;  %v7749_v34 = vmax.f32 %v7621_v7, 0.0  ;;  %v7222_v38 = vmul.f32 %v12413_v62, %v6862_v58  ;;  %v7224_v33 = vmul.f32 %v12421_v45, %v7055_v48  ;;  %v6874_v46 = vpop.f32.mrb[243].mxu1  ;;  %v7067_v52 = vpop.f32.mrb[243].mxu0 }
 0x4b7   : > { %v7751_v40 = vmax.f32 %v7623_v41, 0.0  ;;  %v7752_v14 = vmax.f32 %v7624_v22, 0.0  ;;  %v7369_v13 = vadd.f32 %v12432_v28, %v7219_v51  ;;  %v7371_v37 = vadd.f32 %v12441_v15, %v7221_v35  ;;  %v6878_v8 = vpop.f32.mrb[244].mxu1  ;;  %v7071_v25 = vpop.f32.mrb[244].mxu0 }
 0x4b8   : > { %v7754_v17 = vmax.f32 %v7626_v29, 0.0  ;;  %v8911_v6 = vpack.c.bf16 %v7749_v34, %v7748_v3  ;;  %v7372_v63 = vadd.f32 %v12415_v61, %v7222_v38  ;;  %v7374_v58 = vadd.f32 %v12423_v36, %v7224_v33  ;;  %v6880_v50 = vpop.f32.mrb[245].mxu1  ;;  %v7073_v22 = vpop.f32.mrb[245].mxu0 }
 0x4b9   : > { %v8912_v56 = vpack.c.bf16 %v7751_v40, %v7750_v20  ;;  %v13643_v48 = vunpack.c.h.bf16 %v12570_v19  ;;  %v13644_v60 = vunpack.c.h.bf16 %v12574_v10  ;;  %v7223_v39 = vmul.f32 %v12430_v26, %v6864_v23  ;;  %v6882_v38 = vpop.f32.mrb[246].mxu1  ;;  %v7075_v33 = vpop.f32.mrb[246].mxu0 }
 0x4ba   : > { %v7225_v11 = vmul.f32 %v12439_v59, %v7057_v0  ;;  %8234 = vst [vmem:[%s12752_s20 + $0xd0] sm:$0xff] %v8911_v6  ;;  %v13645_v18 = vunpack.c.l.bf16 %v12580_v47  ;;  %v13646_v44 = vunpack.c.l.bf16 %v12584_v55  ;;  %v7226_v12 = vmul.f32 %v12413_v62, %v6868_v4 }
 0x4bb   : > { %v7625_v2 = vadd.f32 %v13643_v48, %v7369_v13  ;;  %v7627_v27 = vadd.f32 %v13644_v60, %v7371_v37  ;;  %8235 = vst [vmem:[%s12752_s20 + $0xd8] sm:$0xff] %v8912_v56  ;;  %v7228_v19 = vmul.f32 %v12421_v45, %v7061_v30  ;;  %v7373_v10 = vadd.f32 %v12432_v28, %v7223_v39  ;;  %v6884_v13 = vpop.f32.mrb[247].mxu1  ;;  %v7077_v37 = vpop.f32.mrb[247].mxu0 }
 0x4bc   : > { %v7628_v31 = vadd.f32 %v13645_v18, %v7372_v63  ;;  %v7630_v54 = vadd.f32 %v13646_v44, %v7374_v58  ;;  %v7375_v23 = vadd.f32 %v12441_v15, %v7225_v11  ;;  %v7376_v24 = vadd.f32 %v12415_v61, %v7226_v12  ;;  %v13653_v18 = vld [vmem:[#allocation14_spill] sm:$0xff] }
 0x4bd   : > { %v7753_v42 = vmax.f32 %v7625_v2, 0.0  ;;  %v7755_v3 = vmax.f32 %v7627_v27, 0.0  ;;  %v7378_v43 = vadd.f32 %v12423_v36, %v7228_v19  ;;  %v13647_v57 = vunpack.c.h.bf16 %v12580_v47 }
 0x4be   : > { %v7756_v20 = vmax.f32 %v7628_v31, 0.0  ;;  %v7758_v0 = vmax.f32 %v7630_v54, 0.0  ;;  %v13648_v4 = vunpack.c.h.bf16 %v12584_v55  ;;  %v13649_v9 = vunpack.c.l.bf16 %v12590_v5  ;;  %v13655_v54 = vld [vmem:[#allocation16_spill] sm:$0xff] }
 0x4bf   : > { %v8913_v21 = vpack.c.bf16 %v7753_v42, %v7752_v14  ;;  %v8914_v7 = vpack.c.bf16 %v7755_v3, %v7754_v17  ;;  %v7629_v41 = vadd.f32 %v13647_v57, %v7373_v10  ;;  %v13650_v51 = vunpack.c.l.bf16 %v12594_v49 }
 0x4c0   : > { %v7631_v30 = vadd.f32 %v13648_v4, %v7375_v23  ;;  %v7632_v29 = vadd.f32 %v13649_v9, %v7376_v24  ;;  %v7227_v34 = vmul.f32 %v12430_v26, %v6870_v53  ;;  %v7229_v40 = vmul.f32 %v12439_v59, %v7063_v32  ;;  %v6888_v23 = vpop.f32.mrb[248].mxu1 }
 0x4c1   : > { %v7634_v35 = vadd.f32 %v13650_v51, %v7378_v43  ;;  %8236 = vst [vmem:[%s12752_s20 + $0xe0] sm:$0xff] %v8913_v21  ;;  %8237 = vst [vmem:[%s12752_s20 + $0xe8] sm:$0xff] %v8914_v7  ;;  %v7757_v47 = vmax.f32 %v7629_v41, 0.0  ;;  %v7230_v55 = vmul.f32 %v12413_v62, %v6872_v1  ;;  %v7232_v17 = vmul.f32 %v12421_v45, %v7065_v16  ;;  %v6890_v21 = vpop.f32.mrb[249].mxu1  ;;  %v13659_v51 = vld [vmem:[#allocation15_spill] sm:$0xff] }
 0x4c2   : > { %v7759_v14 = vmax.f32 %v7631_v30, 0.0  ;;  %v7760_v6 = vmax.f32 %v7632_v29, 0.0  ;;  %v7377_v53 = vadd.f32 %v12432_v28, %v7227_v34  ;;  %v7379_v32 = vadd.f32 %v12441_v15, %v7229_v40  ;;  %v6892_v9 = vpop.f32.mrb[250].mxu1  ;;  %v13661_v40 = vld [vmem:[#allocation17_spill] sm:$0xff] }
 0x4c3   : > { %v7762_v56 = vmax.f32 %v7634_v35, 0.0  ;;  %v8915_v63 = vpack.c.bf16 %v7757_v47, %v7756_v20  ;;  %v7380_v48 = vadd.f32 %v12415_v61, %v7230_v55  ;;  %v7382_v2 = vadd.f32 %v12423_v36, %v7232_v17 }
 0x4c4   : > { %v8916_v58 = vpack.c.bf16 %v7759_v14, %v7758_v0  ;;  %v13651_v1 = vunpack.c.h.bf16 %v12590_v5  ;;  %v13652_v16 = vunpack.c.h.bf16 %v12594_v49  ;;  %v7231_v39 = vmul.f32 %v12430_v26, %v6874_v46 }
 0x4c5   : > { %v7233_v11 = vmul.f32 %v12439_v59, %v7067_v52  ;;  %8238 = vst [vmem:[%s12752_s20 + $0xf0] sm:$0xff] %v8915_v63  ;;  %v13654_v31 = vunpack.c.l.bf16 %v13653_v18  ;;  %v13656_v12 = vunpack.c.l.bf16 %v13655_v54  ;;  %v7234_v42 = vmul.f32 %v12413_v62, %v6878_v8  ;;  %v7081_v52 = vpop.f32.mrb[248].mxu0 }
 0x4c6   : > { %v7633_v60 = vadd.f32 %v13651_v1, %v7377_v53  ;;  %v7635_v27 = vadd.f32 %v13652_v16, %v7379_v32  ;;  %8239 = vst [vmem:[%s12752_s20 + $0xf8] sm:$0xff] %v8916_v58  ;;  %v7236_v5 = vmul.f32 %v12421_v45, %v7071_v25  ;;  %v7381_v49 = vadd.f32 %v12432_v28, %v7231_v39  ;;  %v7083_v8 = vpop.f32.mrb[249].mxu0 }
 0x4c7   : > { %v7636_v44 = vadd.f32 %v13654_v31, %v7380_v48  ;;  %v7638_v19 = vadd.f32 %v13656_v12, %v7382_v2  ;;  %v7383_v46 = vadd.f32 %v12441_v15, %v7233_v11  ;;  %v7384_v24 = vadd.f32 %v12415_v61, %v7234_v42  ;;  %v7085_v29 = vpop.f32.mrb[250].mxu0 }
 0x4c8   : > { %v7761_v3 = vmax.f32 %v7633_v60, 0.0  ;;  %v7763_v10 = vmax.f32 %v7635_v27, 0.0  ;;  %v7386_v43 = vadd.f32 %v12423_v36, %v7236_v5  ;;  %v13657_v57 = vunpack.c.h.bf16 %v13653_v18 }
 0x4c9   : > { %v7764_v20 = vmax.f32 %v7636_v44, 0.0  ;;  %v7766_v0 = vmax.f32 %v7638_v19, 0.0  ;;  %v13658_v4 = vunpack.c.h.bf16 %v13655_v54  ;;  %v13660_v35 = vunpack.c.l.bf16 %v13659_v51  ;;  %v13665_v44 = vld [vmem:[#allocation18_spill] sm:$0xff]  ;;  %v13667_v19 = vld [vmem:[#allocation9_spill] sm:$0xff] }
 0x4ca   : > { %v8917_v7 = vpack.c.bf16 %v7761_v3, %v7760_v6  ;;  %v8918_v25 = vpack.c.bf16 %v7763_v10, %v7762_v56  ;;  %v7637_v41 = vadd.f32 %v13657_v57, %v7381_v49  ;;  %v13662_v47 = vunpack.c.l.bf16 %v13661_v40  ;;  %v13046_v6 = vpop.f32.mrb[251].mxu1  ;;  %v13048_v56 = vpop.f32.mrb[251].mxu0 }
 0x4cb   : > { %v7639_v30 = vadd.f32 %v13658_v4, %v7383_v46  ;;  %v7640_v34 = vadd.f32 %v13660_v35, %v7384_v24  ;;  %v7235_v55 = vmul.f32 %v12430_v26, %v6880_v50  ;;  %v7237_v17 = vmul.f32 %v12439_v59, %v7073_v22  ;;  %v6898_v49 = vpop.f32.mrb[252].mxu1  ;;  %v7091_v46 = vpop.f32.mrb[252].mxu0 }
 0x4cc   : > { %v7642_v14 = vadd.f32 %v13662_v47, %v7386_v43  ;;  %8240 = vst [vmem:[%s12752_s20 + $0x100] sm:$0xff] %v8917_v7  ;;  %8241 = vst [vmem:[%s12752_s20 + $0x108] sm:$0xff] %v8918_v25  ;;  %v7765_v53 = vmax.f32 %v7637_v41, 0.0  ;;  %v7238_v63 = vmul.f32 %v12413_v62, %v6882_v38  ;;  %v7240_v58 = vmul.f32 %v12421_v45, %v7075_v33  ;;  %v13074_v24 = vpop.f32.mrb[253].mxu1  ;;  %v13076_v43 = vpop.f32.mrb[253].mxu0 }
 0x4cd   : > { %v7767_v32 = vmax.f32 %v7639_v30, 0.0  ;;  %v7768_v48 = vmax.f32 %v7640_v34, 0.0  ;;  %v7385_v50 = vadd.f32 %v12432_v28, %v7235_v55  ;;  %v7387_v22 = vadd.f32 %v12441_v15, %v7237_v17  ;;  %v13080_v57 = vpop.f32.mrb[254].mxu1  ;;  %v13082_v41 = vpop.f32.mrb[254].mxu0  ;;  %v13671_v55 = vld [vmem:[#allocation8_spill] sm:$0xff] }
 0x4ce   : > { %v7770_v2 = vmax.f32 %v7642_v14, 0.0  ;;  %v8919_v1 = vpack.c.bf16 %v7765_v53, %v7764_v20  ;;  %v7388_v16 = vadd.f32 %v12415_v61, %v7238_v63  ;;  %v7390_v27 = vadd.f32 %v12423_v36, %v7240_v58  ;;  %v13088_v47 = vpop.f32.mrb[255].mxu1  ;;  %v13090_v14 = vpop.f32.mrb[255].mxu0 }
 0x4cf   : > { %v8920_v60 = vpack.c.bf16 %v7767_v32, %v7766_v0  ;;  %v13663_v39 = vunpack.c.h.bf16 %v13659_v51  ;;  %v13664_v18 = vunpack.c.h.bf16 %v13661_v40  ;;  %v7239_v33 = vmul.f32 %v12430_v26, %v6884_v13  ;;  %v13673_v32 = vld [vmem:[#allocation11_spill] sm:$0xff] }
 0x4d0   : > { %v7241_v31 = vmul.f32 %v12439_v59, %v7077_v37  ;;  %8242 = vst [vmem:[%s12752_s20 + $0x110] sm:$0xff] %v8919_v1  ;;  %v13666_v54 = vunpack.c.l.bf16 %v13665_v44  ;;  %v13668_v42 = vunpack.c.l.bf16 %v13667_v19  ;;  %v7242_v3 = vmul.f32 %v12413_v62, %v6888_v23 }
 0x4d1   : > { %v7641_v11 = vadd.f32 %v13663_v39, %v7385_v50  ;;  %v7643_v38 = vadd.f32 %v13664_v18, %v7387_v22  ;;  %8243 = vst [vmem:[%s12752_s20 + $0x118] sm:$0xff] %v8920_v60  ;;  %v7244_v10 = vmul.f32 %v12421_v45, %v7081_v52  ;;  %v7389_v13 = vadd.f32 %v12432_v28, %v7239_v33 }
 0x4d2   : > { %v7644_v12 = vadd.f32 %v13666_v54, %v7388_v16  ;;  %v7646_v5 = vadd.f32 %v13668_v42, %v7390_v27  ;;  %v7391_v37 = vadd.f32 %v12441_v15, %v7241_v31  ;;  %v7392_v23 = vadd.f32 %v12415_v61, %v7242_v3  ;;  %v13677_v42 = vld [vmem:[#allocation10_spill] sm:$0xff] }
 0x4d3   : > { %v7769_v20 = vmax.f32 %v7641_v11, 0.0  ;;  %v7771_v0 = vmax.f32 %v7643_v38, 0.0  ;;  %v7394_v52 = vadd.f32 %v12423_v36, %v7244_v10  ;;  %v13669_v51 = vunpack.c.h.bf16 %v13665_v44  ;;  %v13679_v10 = vld [vmem:[#allocation12_spill] sm:$0xff] }
 0x4d4   : > { %v7772_v7 = vmax.f32 %v7644_v12, 0.0  ;;  %v7774_v25 = vmax.f32 %v7646_v5, 0.0  ;;  %v13670_v34 = vunpack.c.h.bf16 %v13667_v19  ;;  %v13672_v17 = vunpack.c.l.bf16 %v13671_v55  ;;  %v6908_v12 = vpop.f32.mrb[0].mxu1  ;;  %v7101_v19 = vpop.f32.mrb[0].mxu0 }
 0x4d5   : > { %v8921_v4 = vpack.c.bf16 %v7769_v20, %v7768_v48  ;;  %v8922_v30 = vpack.c.bf16 %v7771_v0, %v7770_v2  ;;  %v7645_v35 = vadd.f32 %v13669_v51, %v7389_v13  ;;  %v13674_v63 = vunpack.c.l.bf16 %v13673_v32 }
 0x4d6   : > { %v7647_v40 = vadd.f32 %v13670_v34, %v7391_v37  ;;  %v7648_v53 = vadd.f32 %v13672_v17, %v7392_v23  ;;  %v7243_v50 = vmul.f32 %v12430_v26, %v6890_v21  ;;  %v7245_v48 = vmul.f32 %v12439_v59, %v7083_v8 }
 0x4d7   : > { %v7650_v58 = vadd.f32 %v13674_v63, %v7394_v52  ;;  %8244 = vst [vmem:[%s12752_s20 + $0x120] sm:$0xff] %v8921_v4  ;;  %8245 = vst [vmem:[%s12752_s20 + $0x128] sm:$0xff] %v8922_v30  ;;  %v7773_v2 = vmax.f32 %v7645_v35, 0.0  ;;  %v7246_v1 = vmul.f32 %v12413_v62, %v6892_v9  ;;  %v7248_v60 = vmul.f32 %v12421_v45, %v7085_v29 }
 0x4d8   : > { %v7775_v22 = vmax.f32 %v7647_v40, 0.0  ;;  %v7776_v16 = vmax.f32 %v7648_v53, 0.0  ;;  %v7393_v39 = vadd.f32 %v12432_v28, %v7243_v50  ;;  %v7395_v11 = vadd.f32 %v12441_v15, %v7245_v48  ;;  %v13683_v50 = vld [vmem:[#allocation19_spill] sm:$0xff] }
 0x4d9   : > { %v7778_v27 = vmax.f32 %v7650_v58, 0.0  ;;  %v8923_v18 = vpack.c.bf16 %v7773_v2, %v7772_v7  ;;  %v7396_v8 = vadd.f32 %v12415_v61, %v7246_v1  ;;  %v7398_v38 = vadd.f32 %v12423_v36, %v7248_v60  ;;  %v13122_v7 = vpop.f32.mrb[1].mxu1 }
 0x4da   : > { %v8924_v21 = vpack.c.bf16 %v7775_v22, %v7774_v25  ;;  %v13675_v33 = vunpack.c.h.bf16 %v13671_v55  ;;  %v13676_v9 = vunpack.c.h.bf16 %v13673_v32  ;;  %v7247_v29 = vmul.f32 %v12430_v26, %v13046_v6  ;;  %v13124_v6 = vpop.f32.mrb[1].mxu0  ;;  %v13128_v4 = vpop.f32.mrb[2].mxu1  ;;  %v13685_v22 = vld [vmem:[#allocation20_spill] sm:$0xff] }
 0x4db   : > { %v7249_v54 = vmul.f32 %v12439_v59, %v13048_v56  ;;  %8246 = vst [vmem:[%s12752_s20 + $0x130] sm:$0xff] %v8923_v18  ;;  %v13678_v5 = vunpack.c.l.bf16 %v13677_v42  ;;  %v13680_v20 = vunpack.c.l.bf16 %v13679_v10  ;;  %v7250_v13 = vmul.f32 %v12413_v62, %v6898_v49  ;;  %v13130_v30 = vpop.f32.mrb[2].mxu0  ;;  %v13134_v34 = vpop.f32.mrb[3].mxu1 }
 0x4dc   : > { %v7649_v31 = vadd.f32 %v13675_v33, %v7393_v39  ;;  %v7651_v44 = vadd.f32 %v13676_v9, %v7395_v11  ;;  %8247 = vst [vmem:[%s12752_s20 + $0x138] sm:$0xff] %v8924_v21  ;;  %v7252_v37 = vmul.f32 %v12421_v45, %v7091_v46  ;;  %v7397_v23 = vadd.f32 %v12432_v28, %v7247_v29  ;;  %v13136_v40 = vpop.f32.mrb[3].mxu0  ;;  %v6918_v29 = vpop.f32.mrb[4].mxu1 }
 0x4dd   : > { %v7652_v3 = vadd.f32 %v13678_v5, %v7396_v8  ;;  %v7654_v0 = vadd.f32 %v13680_v20, %v7398_v38  ;;  %v7399_v52 = vadd.f32 %v12441_v15, %v7249_v54  ;;  %v7400_v46 = vadd.f32 %v12415_v61, %v7250_v13  ;;  %v7111_v54 = vpop.f32.mrb[4].mxu0  ;;  %v13168_v20 = vpop.f32.mrb[5].mxu1  ;;  %v13689_v13 = vld [vmem:[#allocation21_spill] sm:$0xff] }
 0x4de   : > { %v7777_v25 = vmax.f32 %v7649_v31, 0.0  ;;  %v7779_v56 = vmax.f32 %v7651_v44, 0.0  ;;  %v7402_v35 = vadd.f32 %v12423_v36, %v7252_v37  ;;  %v13681_v53 = vunpack.c.h.bf16 %v13677_v42 }
 0x4df   : > { %v7780_v51 = vmax.f32 %v7652_v3, 0.0  ;;  %v7782_v49 = vmax.f32 %v7654_v0, 0.0  ;;  %v13682_v63 = vunpack.c.h.bf16 %v13679_v10  ;;  %v13684_v48 = vunpack.c.l.bf16 %v13683_v50  ;;  %v13170_v0 = vpop.f32.mrb[5].mxu0 }
 0x4e0   : > { %v8925_v55 = vpack.c.bf16 %v7777_v25, %v7776_v16  ;;  %v8926_v17 = vpack.c.bf16 %v7779_v56, %v7778_v27  ;;  %v7653_v32 = vadd.f32 %v13681_v53, %v7397_v23  ;;  %v13686_v1 = vunpack.c.l.bf16 %v13685_v22  ;;  %v13691_v56 = vld [vmem:[#allocation22_spill] sm:$0xff] }
 0x4e1   : > { %v7655_v58 = vadd.f32 %v13682_v63, %v7399_v52  ;;  %v7656_v2 = vadd.f32 %v13684_v48, %v7400_v46  ;;  %v7251_v39 = vmul.f32 %v12430_v26, %v13074_v24  ;;  %v7253_v11 = vmul.f32 %v12439_v59, %v13076_v43  ;;  %v13182_v46 = vpop.f32.mrb[6].mxu0 }
 0x4e2   : > { %v7658_v60 = vadd.f32 %v13686_v1, %v7402_v35  ;;  %8248 = vst [vmem:[%s12752_s20 + $0x140] sm:$0xff] %v8925_v55  ;;  %8249 = vst [vmem:[%s12752_s20 + $0x148] sm:$0xff] %v8926_v17  ;;  %v7781_v16 = vmax.f32 %v7653_v32, 0.0  ;;  %v7254_v18 = vmul.f32 %v12413_v62, %v13080_v57  ;;  %v7256_v21 = vmul.f32 %v12421_v45, %v13082_v41  ;;  %v13188_v32 = vpop.f32.mrb[7].mxu0 }
 0x4e3   : > { %v7783_v27 = vmax.f32 %v7655_v58, 0.0  ;;  %v7784_v8 = vmax.f32 %v7656_v2, 0.0  ;;  %v7401_v33 = vadd.f32 %v12432_v28, %v7251_v39  ;;  %v7403_v24 = vadd.f32 %v12441_v15, %v7253_v11  ;;  %v13695_v39 = vld [vmem:[#allocation23_spill] sm:$0xff] }
 0x4e4   : > { %v7786_v38 = vmax.f32 %v7658_v60, 0.0  ;;  %v8927_v31 = vpack.c.bf16 %v7781_v16, %v7780_v51  ;;  %v7404_v9 = vadd.f32 %v12415_v61, %v7254_v18  ;;  %v7406_v44 = vadd.f32 %v12423_v36, %v7256_v21 }
 0x4e5   : > { %v8928_v43 = vpack.c.bf16 %v7783_v27, %v7782_v49  ;;  %v13687_v57 = vunpack.c.h.bf16 %v13683_v50  ;;  %v13688_v41 = vunpack.c.h.bf16 %v13685_v22  ;;  %v7255_v3 = vmul.f32 %v12430_v26, %v13088_v47  ;;  %v13180_v47 = vpop.f32.mrb[6].mxu1  ;;  %v13697_v27 = vld [vmem:[#allocation24_spill] sm:$0xff] }
 0x4e6   : > { %v7257_v10 = vmul.f32 %v12439_v59, %v13090_v14  ;;  %8250 = vst [vmem:[%s12752_s20 + $0x150] sm:$0xff] %v8927_v31  ;;  %v13690_v37 = vunpack.c.l.bf16 %v13689_v13  ;;  %v13692_v23 = vunpack.c.l.bf16 %v13691_v56  ;;  %v7258_v51 = vmul.f32 %v12413_v62, %v6908_v12  ;;  %v13186_v53 = vpop.f32.mrb[7].mxu1 }
 0x4e7   : > { %v7657_v42 = vadd.f32 %v13687_v57, %v7401_v33  ;;  %v7659_v5 = vadd.f32 %v13688_v41, %v7403_v24  ;;  %8251 = vst [vmem:[%s12752_s20 + $0x158] sm:$0xff] %v8928_v43  ;;  %v7260_v49 = vmul.f32 %v12421_v45, %v7101_v19  ;;  %v7405_v55 = vadd.f32 %v12432_v28, %v7255_v3 }
 0x4e8   : > { %v7660_v25 = vadd.f32 %v13690_v37, %v7404_v9  ;;  %v7662_v52 = vadd.f32 %v13692_v23, %v7406_v44  ;;  %v7407_v17 = vadd.f32 %v12441_v15, %v7257_v10  ;;  %v7408_v19 = vadd.f32 %v12415_v61, %v7258_v51 }
 0x4e9   : > { %v7785_v14 = vmax.f32 %v7657_v42, 0.0  ;;  %v7787_v35 = vmax.f32 %v7659_v5, 0.0  ;;  %v7410_v58 = vadd.f32 %v12423_v36, %v7260_v49  ;;  %v13693_v2 = vunpack.c.h.bf16 %v13689_v13  ;;  %v13212_v42 = vpop.f32.mrb[8].mxu1 }
 0x4ea   : > { %v7788_v63 = vmax.f32 %v7660_v25, 0.0  ;;  %v7790_v12 = vmax.f32 %v7662_v52, 0.0  ;;  %v13694_v1 = vunpack.c.h.bf16 %v13691_v56  ;;  %v13696_v11 = vunpack.c.l.bf16 %v13695_v39  ;;  %v13218_v10 = vpop.f32.mrb[9].mxu1 }
 0x4eb   : > { %v8929_v50 = vpack.c.bf16 %v7785_v14, %v7784_v8  ;;  %v8930_v48 = vpack.c.bf16 %v7787_v35, %v7786_v38  ;;  %v7661_v22 = vadd.f32 %v13693_v2, %v7405_v55  ;;  %v13698_v18 = vunpack.c.l.bf16 %v13697_v27  ;;  %v13230_v51 = vpop.f32.mrb[10].mxu1  ;;  %v13701_v14 = vld [vmem:[#allocation25_spill] sm:$0xff] }
 0x4ec   : > { %v7663_v60 = vadd.f32 %v13694_v1, %v7407_v17  ;;  %v7664_v16 = vadd.f32 %v13696_v11, %v7408_v19  ;;  %v7259_v33 = vmul.f32 %v12430_v26, %v13122_v7  ;;  %v7261_v24 = vmul.f32 %v12439_v59, %v13124_v6  ;;  %v13214_v6 = vpop.f32.mrb[8].mxu0  ;;  %v13703_v17 = vld [vmem:[#allocation26_spill] sm:$0xff] }
 0x4ed   : > { %v7666_v21 = vadd.f32 %v13698_v18, %v7410_v58  ;;  %8252 = vst [vmem:[%s12752_s20 + $0x160] sm:$0xff] %v8929_v50  ;;  %8253 = vst [vmem:[%s12752_s20 + $0x168] sm:$0xff] %v8930_v48  ;;  %v7789_v8 = vmax.f32 %v7661_v22, 0.0  ;;  %v7262_v31 = vmul.f32 %v12413_v62, %v13128_v4  ;;  %v7264_v43 = vmul.f32 %v12421_v45, %v13130_v30  ;;  %v13220_v30 = vpop.f32.mrb[9].mxu0 }
 0x4ee   : > { %v7791_v38 = vmax.f32 %v7663_v60, 0.0  ;;  %v7792_v9 = vmax.f32 %v7664_v16, 0.0  ;;  %v7409_v57 = vadd.f32 %v12432_v28, %v7259_v33  ;;  %v7411_v7 = vadd.f32 %v12441_v15, %v7261_v24  ;;  %v13232_v49 = vpop.f32.mrb[10].mxu0  ;;  %v13707_v33 = vld [vmem:[#allocation7_spill] sm:$0xff] }
 0x4ef   : > { %v7794_v44 = vmax.f32 %v7666_v21, 0.0  ;;  %v8931_v41 = vpack.c.bf16 %v7789_v8, %v7788_v63  ;;  %v7412_v3 = vadd.f32 %v12415_v61, %v7262_v31  ;;  %v7414_v4 = vadd.f32 %v12423_v36, %v7264_v43  ;;  %v13244_v50 = vpop.f32.mrb[11].mxu0 }
 0x4f0   : > { %v8932_v5 = vpack.c.bf16 %v7791_v38, %v7790_v12  ;;  %v13699_v13 = vunpack.c.h.bf16 %v13695_v39  ;;  %v13700_v25 = vunpack.c.h.bf16 %v13697_v27  ;;  %v7263_v23 = vmul.f32 %v12430_v26, %v13134_v34  ;;  %v13242_v34 = vpop.f32.mrb[11].mxu1  ;;  %v13709_v38 = vld [vmem:[#allocation13_spill] sm:$0xff] }
 0x4f1   : > { %v7265_v52 = vmul.f32 %v12439_v59, %v13136_v40  ;;  %8254 = vst [vmem:[%s12752_s20 + $0x170] sm:$0xff] %v8931_v41  ;;  %v13702_v35 = vunpack.c.l.bf16 %v13701_v14  ;;  %v13704_v63 = vunpack.c.l.bf16 %v13703_v17  ;;  %v7266_v19 = vmul.f32 %v12413_v62, %v6918_v29 }
 0x4f2   : > { %v7665_v37 = vadd.f32 %v13699_v13, %v7409_v57  ;;  %v7667_v56 = vadd.f32 %v13700_v25, %v7411_v7  ;;  %8255 = vst [vmem:[%s12752_s20 + $0x178] sm:$0xff] %v8932_v5  ;;  %v7268_v58 = vmul.f32 %v12421_v45, %v7111_v54  ;;  %v7413_v2 = vadd.f32 %v12432_v28, %v7263_v23 }
 0x4f3   : > { %v7668_v55 = vadd.f32 %v13702_v35, %v7412_v3  ;;  %v7670_v12 = vadd.f32 %v13704_v63, %v7414_v4  ;;  %v7415_v22 = vadd.f32 %v12441_v15, %v7265_v52  ;;  %v7416_v39 = vadd.f32 %v12415_v61, %v7266_v19  ;;  %v13268_v3 = vpop.f32.mrb[12].mxu1  ;;  %v13270_v4 = vpop.f32.mrb[12].mxu0 }
 0x4f4   : > { %v7793_v40 = vmax.f32 %v7665_v37, 0.0  ;;  %v7795_v48 = vmax.f32 %v7667_v56, 0.0  ;;  %v7418_v29 = vadd.f32 %v12423_v36, %v7268_v58  ;;  %v13705_v16 = vunpack.c.h.bf16 %v13701_v14  ;;  %v13274_v25 = vpop.f32.mrb[13].mxu1  ;;  %v13276_v56 = vpop.f32.mrb[13].mxu0 }
 0x4f5   : > { %v7796_v1 = vmax.f32 %v7668_v55, 0.0  ;;  %v7798_v60 = vmax.f32 %v7670_v12, 0.0  ;;  %v13706_v18 = vunpack.c.h.bf16 %v13703_v17  ;;  %v13708_v24 = vunpack.c.l.bf16 %v13707_v33  ;;  %v13280_v14 = vpop.f32.mrb[14].mxu1  ;;  %v13282_v35 = vpop.f32.mrb[14].mxu0 }
 0x4f6   : > { %v8933_v11 = vpack.c.bf16 %v7793_v40, %v7792_v9  ;;  %v8934_v54 = vpack.c.bf16 %v7795_v48, %v7794_v44  ;;  %v7669_v27 = vadd.f32 %v13705_v16, %v7413_v2  ;;  %v13710_v31 = vunpack.c.l.bf16 %v13709_v38  ;;  %v13292_v40 = vpop.f32.mrb[15].mxu1  ;;  %v13294_v48 = vpop.f32.mrb[15].mxu0  ;;  %v13713_v2 = vld [vmem:[#allocation27_spill] sm:$0xff] }
 0x4f7   : > { %v7671_v21 = vadd.f32 %v13706_v18, %v7415_v22  ;;  %v7672_v8 = vadd.f32 %v13708_v24, %v7416_v39  ;;  %v7267_v57 = vmul.f32 %v12430_v26, %v13168_v20  ;;  %v7269_v7 = vmul.f32 %v12439_v59, %v13170_v0 }
 0x4f8   : > { %v7674_v43 = vadd.f32 %v13710_v31, %v7418_v29  ;;  %8256 = vst [vmem:[%s12752_s20 + $0x180] sm:$0xff] %v8933_v11  ;;  %8257 = vst [vmem:[%s12752_s20 + $0x188] sm:$0xff] %v8934_v54  ;;  %v7797_v9 = vmax.f32 %v7669_v27, 0.0  ;;  %v7270_v41 = vmul.f32 %v12413_v62, %v13180_v47  ;;  %v7272_v5 = vmul.f32 %v12421_v45, %v13182_v46  ;;  %v10077_v11 = vld [vmem:[%s10289_s26 + $0x1b8] sm:$0xff] }
 0x4f9   : > { %v7799_v44 = vmax.f32 %v7671_v21, 0.0  ;;  %v7800_v13 = vmax.f32 %v7672_v8, 0.0  ;;  %v7417_v20 = vadd.f32 %v12432_v28, %v7267_v57  ;;  %v7419_v0 = vadd.f32 %v12441_v15, %v7269_v7  ;;  %v10078_v8 = vld [vmem:[%s10289_s26 + $0x1c0] sm:$0xff] }
 0x4fa   : > { %v7802_v37 = vmax.f32 %v7674_v43, 0.0  ;;  %v8935_v47 = vpack.c.bf16 %v7797_v9, %v7796_v1  ;;  %v7420_v46 = vadd.f32 %v12415_v61, %v7270_v41  ;;  %v7422_v52 = vadd.f32 %v12423_v36, %v7272_v5  ;;  %v10079_v41 = vld [vmem:[%s10289_s26 + $0x1c8] sm:$0xff] }
 0x4fb   : > { %v8936_v23 = vpack.c.bf16 %v7799_v44, %v7798_v60  ;;  %v13711_v55 = vunpack.c.h.bf16 %v13707_v33  ;;  %v13712_v63 = vunpack.c.h.bf16 %v13709_v38  ;;  %v7271_v19 = vmul.f32 %v12430_v26, %v13186_v53  ;;  %v13715_v60 = vld [vmem:[#allocation28_spill] sm:$0xff] }
 0x4fc   : > { %v7273_v58 = vmul.f32 %v12439_v59, %v13188_v32  ;;  %8258 = vst [vmem:[%s12752_s20 + $0x190] sm:$0xff] %v8935_v47  ;;  %v13714_v22 = vunpack.c.l.bf16 %v13713_v2  ;;  %v13716_v39 = vunpack.c.l.bf16 %v13715_v60  ;;  %v7551_v54 = vunpack.c.h.bf16 %v10077_v11  ;;  %v10081_v60 = vld [vmem:[%s10289_s26 + $0x1d8] sm:$0xff] }
 0x4fd   : > { %v7673_v17 = vadd.f32 %v13711_v55, %v7417_v20  ;;  %v7675_v12 = vadd.f32 %v13712_v63, %v7419_v0  ;;  %8259 = vst [vmem:[%s12752_s20 + $0x198] sm:$0xff] %v8936_v23  ;;  %v7274_v53 = vmul.f32 %v12413_v62, %v13212_v42  ;;  %v7421_v27 = vadd.f32 %v12432_v28, %v7271_v19 }
 0x4fe   : > { %v7676_v1 = vadd.f32 %v13714_v22, %v7420_v46  ;;  %v7678_v29 = vadd.f32 %v13716_v39, %v7422_v52  ;;  %v7423_v18 = vadd.f32 %v12441_v15, %v7273_v58  ;;  %v7552_v38 = vunpack.c.l.bf16 %v10078_v8  ;;  %v10080_v58 = vld [vmem:[%s10289_s26 + $0x1d0] sm:$0xff] }
 0x4ff   : > { %v7801_v32 = vmax.f32 %v7673_v17, 0.0  ;;  %v7803_v16 = vmax.f32 %v7675_v12, 0.0  ;;  %v7424_v24 = vadd.f32 %v12415_v61, %v7274_v53  ;;  %v13717_v57 = vunpack.c.h.bf16 %v13713_v2 }
 0x500   : > { %v7804_v21 = vmax.f32 %v7676_v1, 0.0  ;;  %v7806_v33 = vmax.f32 %v7678_v29, 0.0  ;;  %v7679_v7 = vadd.f32 %v7551_v54, %v7423_v18  ;;  %v7276_v44 = vmul.f32 %v12421_v45, %v13214_v6 }
 0x501   : > { %v8937_v31 = vpack.c.bf16 %v7801_v32, %v7800_v13  ;;  %v8938_v43 = vpack.c.bf16 %v7803_v16, %v7802_v37  ;;  %v7677_v42 = vadd.f32 %v13717_v57, %v7421_v27  ;;  %v7680_v9 = vadd.f32 %v7552_v38, %v7424_v24 }
 0x502   : > { %v7554_v5 = vunpack.c.l.bf16 %v10079_v41  ;;  %v7275_v20 = vmul.f32 %v12430_v26, %v13218_v10  ;;  %v7807_v47 = vmax.f32 %v7679_v7, 0.0  ;;  %v7553_v13 = vunpack.c.h.bf16 %v10078_v8 }
 0x503   : > { %8260 = vst [vmem:[%s12752_s20 + $0x1a0] sm:$0xff] %v8937_v31  ;;  %8261 = vst [vmem:[%s12752_s20 + $0x1a8] sm:$0xff] %v8938_v43  ;;  %v7805_v0 = vmax.f32 %v7677_v42, 0.0  ;;  %v7277_v37 = vmul.f32 %v12439_v59, %v13220_v30  ;;  %v7808_v23 = vmax.f32 %v7680_v9, 0.0  ;;  %v7426_v46 = vadd.f32 %v12423_v36, %v7276_v44  ;;  %v10082_v42 = vld [vmem:[%s10289_s26 + $0x1e0] sm:$0xff] }
 0x504   : > { %v7425_v6 = vadd.f32 %v12432_v28, %v7275_v20  ;;  %v7555_v52 = vunpack.c.h.bf16 %v10079_v41  ;;  %v8940_v10 = vpack.c.bf16 %v7807_v47, %v7806_v33  ;;  %v7278_v63 = vmul.f32 %v12413_v62, %v13230_v51  ;;  %v10083_v41 = vld [vmem:[%s10289_s26 + $0x1e8] sm:$0xff] }
 0x505   : > { %v8939_v55 = vpack.c.bf16 %v7805_v0, %v7804_v21  ;;  %v7427_v17 = vadd.f32 %v12441_v15, %v7277_v37  ;;  %v7682_v12 = vadd.f32 %v7554_v5, %v7426_v46  ;;  %v7556_v2 = vunpack.c.l.bf16 %v10080_v58 }
 0x506   : > { %v7681_v19 = vadd.f32 %v7553_v13, %v7425_v6  ;;  %v7280_v30 = vmul.f32 %v12421_v45, %v13232_v49  ;;  %8263 = vst [vmem:[%s12752_s20 + $0x1b8] sm:$0xff] %v8940_v10  ;;  %v7428_v1 = vadd.f32 %v12415_v61, %v7278_v63  ;;  %v7558_v39 = vunpack.c.l.bf16 %v10081_v60  ;;  %v10084_v63 = vld [vmem:[%s10289_s26 + $0x1f0] sm:$0xff] }
 0x507   : > { %8262 = vst [vmem:[%s12752_s20 + $0x1b0] sm:$0xff] %v8939_v55  ;;  %v7683_v22 = vadd.f32 %v7555_v52, %v7427_v17  ;;  %v7279_v29 = vmul.f32 %v12430_v26, %v13242_v34  ;;  %v7810_v11 = vmax.f32 %v7682_v12, 0.0  ;;  %v7557_v53 = vunpack.c.h.bf16 %v10080_v58 }
 0x508   : > { %v7809_v51 = vmax.f32 %v7681_v19, 0.0  ;;  %v7430_v54 = vadd.f32 %v12423_v36, %v7280_v30  ;;  %v7684_v16 = vadd.f32 %v7556_v2, %v7428_v1  ;;  %v7281_v27 = vmul.f32 %v12439_v59, %v13244_v50  ;;  %v10085_v30 = vld [vmem:[%s10289_s26 + $0x1f8] sm:$0xff]  ;;  %s8949_s26 = sshll.u32 %s10230_s17, 13  ;;  %s10086_s17 = scalar_lea.vmem %s13380_s25, 8192 }
 0x509   : > { %v7811_v32 = vmax.f32 %v7683_v22, 0.0  ;;  %v7429_v49 = vadd.f32 %v12432_v28, %v7279_v29  ;;  %v7559_v33 = vunpack.c.h.bf16 %v10081_v60  ;;  %v7282_v34 = vmul.f32 %v12413_v62, %v13268_v3  ;;  %s13378_s21 = scalar_lea.hbm %s13437_s10, %s8949_s26  ;;  %p10087_p11 = scmp.ne.s32.totalorder %s13380_s25, %s10086_s17 }
 0x50a   : > { %v8941_v18 = vpack.c.bf16 %v7809_v51, %v7808_v23  ;;  %v7686_v21 = vadd.f32 %v7558_v39, %v7430_v54  ;;  %v7812_v8 = vmax.f32 %v7684_v16, 0.0  ;;  %v7431_v31 = vadd.f32 %v12441_v15, %v7281_v27  ;;  %p10094_p1 = scmp.lt.s32.totalorder %s10092_s18, %s10086_s17 }
 0x50b   : > { %v8942_v24 = vpack.c.bf16 %v7811_v32, %v7810_v11  ;;  %v7685_v38 = vadd.f32 %v7557_v53, %v7429_v49  ;;  %v7432_v57 = vadd.f32 %v12415_v61, %v7282_v34  ;;  %v7560_v7 = vunpack.c.l.bf16 %v10082_v42  ;;  %p10088_p12 = pnand %p10087_p11, %p10247_p5 }
 0x50c   : > { %8264 = vst [vmem:[%s12752_s20 + $0x1c0] sm:$0xff] %v8941_v18  ;;  %v7814_v43 = vmax.f32 %v7686_v21, 0.0  ;;  %v7284_v50 = vmul.f32 %v12421_v45, %v13270_v4  ;;  %v7687_v44 = vadd.f32 %v7559_v33, %v7431_v31  ;;  %v7562_v3 = vunpack.c.l.bf16 %v10083_v41  ;;  %p10095_p2 = por %p10094_p1, %p10093_p0 }
 0x50d   : > { %8265 = vst [vmem:[%s12752_s20 + $0x1c8] sm:$0xff] %v8942_v24  ;;  %v7813_v9 = vmax.f32 %v7685_v38, 0.0  ;;  %v7283_v5 = vmul.f32 %v12430_v26, %v13274_v25  ;;  %v7688_v20 = vadd.f32 %v7560_v7, %v7432_v57  ;;  %v7561_v47 = vunpack.c.h.bf16 %v10082_v42  ;;  %p10089_p13 = pneg %p10088_p12 }
 0x50e   : > { %v7434_v0 = vadd.f32 %v12423_v36, %v7284_v50  ;;  %v7285_v13 = vmul.f32 %v12439_v59, %v13276_v56  ;;  %v7815_v23 = vmax.f32 %v7687_v44, 0.0  ;;  %v7563_v46 = vunpack.c.h.bf16 %v10083_v41 }
 0x50f   : > { %v8943_v37 = vpack.c.bf16 %v7813_v9, %v7812_v8  ;;  %v7433_v4 = vadd.f32 %v12432_v28, %v7283_v5  ;;  %v7816_v6 = vmax.f32 %v7688_v20, 0.0  ;;  %v7286_v25 = vmul.f32 %v12413_v62, %v13280_v14  ;;  %p10096_p3 = pnand %p10095_p2, %p10089_p13 }
 0x510   : > { %v7690_v52 = vadd.f32 %v7562_v3, %v7434_v0  ;;  %v7435_v55 = vadd.f32 %v12441_v15, %v7285_v13  ;;  %v8944_v10 = vpack.c.bf16 %v7815_v23, %v7814_v43  ;;  %v7564_v12 = vunpack.c.l.bf16 %v10084_v63 }
 0x511   : > { %8266 = vst [vmem:[%s12752_s20 + $0x1d0] sm:$0xff] %v8943_v37  ;;  %v7689_v17 = vadd.f32 %v7561_v47, %v7433_v4  ;;  %v7288_v56 = vmul.f32 %v12421_v45, %v13282_v35  ;;  %v7436_v2 = vadd.f32 %v12415_v61, %v7286_v25  ;;  %v7566_v22 = vunpack.c.l.bf16 %v10085_v30 }
 0x512   : > { %v7818_v19 = vmax.f32 %v7690_v52, 0.0  ;;  %v7691_v58 = vadd.f32 %v7563_v46, %v7435_v55  ;;  %8267 = vst [vmem:[%s12752_s20 + $0x1d8] sm:$0xff] %v8944_v10  ;;  %v7287_v14 = vmul.f32 %v12430_v26, %v13292_v40  ;;  %v7565_v60 = vunpack.c.h.bf16 %v10084_v63 }
 0x513   : > { %v7817_v1 = vmax.f32 %v7689_v17, 0.0  ;;  %v7438_v62 = vadd.f32 %v12423_v36, %v7288_v56  ;;  %v7692_v45 = vadd.f32 %v7564_v12, %v7436_v2  ;;  %v7289_v35 = vmul.f32 %v12439_v59, %v13294_v48 }
 0x514   : > { %v7819_v39 = vmax.f32 %v7691_v58, 0.0  ;;  %v7567_v61 = vunpack.c.h.bf16 %v10085_v30  ;;  %v7437_v51 = vadd.f32 %v12432_v28, %v7287_v14 }
 0x515   : > { %v8945_v29 = vpack.c.bf16 %v7817_v1, %v7816_v6  ;;  %v7694_v11 = vadd.f32 %v7566_v22, %v7438_v62  ;;  %v7439_v36 = vadd.f32 %v12441_v15, %v7289_v35  ;;  %v7820_v26 = vmax.f32 %v7692_v45, 0.0 }
 0x516   : > { %v8946_v54 = vpack.c.bf16 %v7819_v39, %v7818_v19  ;;  %v7693_v40 = vadd.f32 %v7565_v60, %v7437_v51 }
 0x517   : > { %8268 = vst [vmem:[%s12752_s20 + $0x1e0] sm:$0xff] %v8945_v29  ;;  %v7822_v53 = vmax.f32 %v7694_v11, 0.0  ;;  %v7695_v32 = vadd.f32 %v7567_v61, %v7439_v36 }
 0x518   : > { %8269 = vst [vmem:[%s12752_s20 + $0x1e8] sm:$0xff] %v8946_v54  ;;  %v7821_v59 = vmax.f32 %v7693_v40, 0.0 }
 0x519   : > { %v7823_v48 = vmax.f32 %v7695_v32, 0.0 }
 0x51a   : > { %v8947_v16 = vpack.c.bf16 %v7821_v59, %v7820_v26 }
 0x51b   : > { %v8948_v28 = vpack.c.bf16 %v7823_v48, %v7822_v53 }
 0x51c   : > { %8270 = vst [vmem:[%s12752_s20 + $0x1f0] sm:$0xff] %v8947_v16 }
 0x51d   : > { %8271 = vst [vmem:[%s12752_s20 + $0x1f8] sm:$0xff] %v8948_v28 }
 0x51e   : > { %10099 = shalt.err (!%p10096_p3)
}
 0x51f   : > { %s10100_s12 = scalar_lea.hbm %s13378_s21, 8192  ;;  %s10104_s27 = scalar_lea.hbm %s13437_s10, 16384 }
 0x520   : > { %p10101_p4 = scmp.ne.s32.totalorder %s13378_s21, %s10100_s12  ;;  %p10105_p9 = scmp.lt.u32.totalorder %s13378_s21, %s13437_s10 }
 0x521   : > { %p10106_p10 = scmp.lt.u32.totalorder %s10104_s27, %s10100_s12  ;;  %p10108_p12 = scmp.lt.u32.totalorder %s10100_s12, %s13378_s21 }
 0x522   : > { %p10102_p7 = pnand %p10101_p4, %p10247_p5 }
 0x523   : > { %p10107_p11 = por %p10106_p10, %p10105_p9 }
 0x524   : > { %p10103_p8 = pneg %p10102_p7 }
 0x525   : > { %p10109_p13 = por %p10108_p12, %p10107_p11 }
 0x527   : > { %p10110_p0 = pnand %p10109_p13, %p10103_p8 }
 0x529   : > { %10113 = shalt.err (!%p10110_p0)
}
 0x52a   : > { %s10152_s17 = smov 256   ;;  %s10153_s11 = smov 16  }
 0x52b   : > { %9710 = dma.vmem_to_hbm [thread:$0]  (%p10247_p5), %s13380_s25, 8192, %s13378_s21, %s13386_s30, %s10152_s17, %s10152_s17, %s10153_s11  }
 0x52c PF: > { %p9716_p1 = scmp.ge.s32.totalorder %s10148_s16, 2  ;;  %s8301_s18 = sand.u32 1, %s10136_s13  }
 0x52d   : > { %s8302_s12 = scalar_lea.sflag [#allocation5], %s8301_s18 }
 0x52e   : > { %p9713_p2 = pnand %p9716_p1, %p10251_p6 }
 0x530   : > { %10131 = dma.done.wait (!%p9713_p2), %s8302_s12, 8192  }
 0x531   : > { %10133 = vsyncadd (!%p9713_p2), %s8302_s12, 4294959104  ;;  %p20_p3 = scmp.ge.s32.totalorder %s10234_s19, 4   ;;  %s13718_s13 = smov %s10140_s14 }
 0x532   : > { %s13719_s14 = smov %s10144_s15  ;;  %s13720_s15 = smov %s10245_s22 }
 0x533   : > { %s13721_s16 = smov %s10234_s19  ;;  %22 = sbr.rel (!%p20_p3) target bundleno = 3 (0x3), region = 98 }
 0x53a   :  { %8307 = vsyncpa [#allocation5], 1 }
 0x53b   :  { %8309 = vsyncpa [#allocation5 + $0x1], 1 }

</bundles_post_ra>
